<compile_context>
chip_gen: v5e
topology: v5e:2x2
jax: 0.10.0
libtpu: 0.0.40
codegen_flags: <defaults>
</compile_context>

<pallas_src>
import jax
import jax.numpy as jnp
from jax.experimental import pallas as pl
from jax.experimental.pallas import tpu as pltpu

H_DIM = 400
IN_DIM = 2
OUT_DIM = 2

H_PAD = 512     # hidden dim padded to a 128-lane multiple for clean MXU tiles
W4_PAD = 128    # layer-4 weight columns padded to one full lane width


def _cdiv(a, b):
    return -(-a // b)


def _round_up(x, m):
    return _cdiv(x, m) * m


def _generator_kernel(z_ref,
                      w1_ref, b1_ref,
                      w2_ref, b2_ref,
                      w3_ref, b3_ref,
                      w4_ref, b4_ref,
                      o_ref):
    z = z_ref[...]                                        # (tb, 2) f32

    # ---- Layer 1 on the VPU: contraction length is only 2, so an MXU pass
    # would waste >98% of the systolic array.  Exact f32 outer-product form.
    h = (z[:, 0:1] * w1_ref[0:1, :]
         + z[:, 1:2] * w1_ref[1:2, :]
         + b1_ref[...])                                   # (tb, 512) f32
    h = jnp.maximum(h, 0.0)

    # ---- Layers 2 & 3: bf16 inputs, f32 accumulation on the MXU.
    h = jnp.dot(h.astype(jnp.bfloat16), w2_ref[...],
                preferred_element_type=jnp.float32) + b2_ref[...]
    h = jnp.maximum(h, 0.0)
    h = jnp.dot(h.astype(jnp.bfloat16), w3_ref[...],
                preferred_element_type=jnp.float32) + b3_ref[...]
    h = jnp.maximum(h, 0.0)

    # ---- Layer 4: (tb,512) @ (512,128) bf16 MXU; store only the 2 real
    # output channels (out block last dim == full array dim == 2).
    out = jnp.dot(h.astype(jnp.bfloat16), w4_ref[...],
                  preferred_element_type=jnp.float32) + b4_ref[...]
    o_ref[...] = out[:, :OUT_DIM].astype(o_ref.dtype)


def prepare_params(params):
    """Transpose PyTorch-convention (out, in) weights to (in, out), zero-pad to
    lane-aligned shapes (exact), and cast the MXU weights to bf16."""
    def pad_to(a, shape):
        return jnp.pad(a, [(0, t - s) for s, t in zip(a.shape, shape)])

    return dict(
        # Layer 1 stays f32 (computed exactly on the VPU).
        w1_t=pad_to(params["w1"].T, (IN_DIM, H_PAD)).astype(jnp.float32),
        b1=pad_to(params["b1"].reshape(1, -1), (1, H_PAD)).astype(jnp.float32),
        # Layers 2-4: bf16 weights (f32 biases / accumulation).
        w2_t=pad_to(params["w2"].T, (H_PAD, H_PAD)).astype(jnp.bfloat16),
        b2=pad_to(params["b2"].reshape(1, -1), (1, H_PAD)).astype(jnp.float32),
        w3_t=pad_to(params["w3"].T, (H_PAD, H_PAD)).astype(jnp.bfloat16),
        b3=pad_to(params["b3"].reshape(1, -1), (1, H_PAD)).astype(jnp.float32),
        w4_t=pad_to(params["w4"].T, (H_PAD, W4_PAD)).astype(jnp.bfloat16),
        b4=pad_to(params["b4"].reshape(1, -1), (1, W4_PAD)).astype(jnp.float32),
    )


def _choose_tiling(batch, max_tb, min_split_batch):
    """Padding-aware batch tiling.  Forces >= 2 grid steps for non-trivial
    batches so the 'parallel' axis spans both TensorCores on megacore parts."""
    n_steps = max(1, _cdiv(batch, max_tb))
    if batch >= min_split_batch:
        n_steps = max(n_steps, 2)
    tb = _round_up(_cdiv(batch, n_steps), 8)
    b_pad = n_steps * tb
    return tb, b_pad


def _build_call(p, tb, b_pad, single_buffer_consts):
    if single_buffer_consts:
        # Constant index_map -> no look-ahead needed; single-buffer to halve
        # the resident weight footprint.
        def const2d(arr):
            return pl.BlockSpec(arr.shape, lambda i: (0, 0),
                                pipeline_mode=pl.Buffered(1))
    else:
        def const2d(arr):
            return pl.BlockSpec(arr.shape, lambda i: (0, 0))

    return pl.pallas_call(
        _generator_kernel,
        out_shape=jax.ShapeDtypeStruct((b_pad, OUT_DIM), jnp.float32),
        grid_spec=pltpu.PrefetchScalarGridSpec(
            num_scalar_prefetch=0,
            grid=(b_pad // tb,),
            in_specs=[
                pl.BlockSpec((tb, IN_DIM), lambda i: (i, 0)),   # z tile
                const2d(p["w1_t"]), const2d(p["b1"]),
                const2d(p["w2_t"]), const2d(p["b2"]),
                const2d(p["w3_t"]), const2d(p["b3"]),
                const2d(p["w4_t"]), const2d(p["b4"]),
            ],
            out_specs=pl.BlockSpec((tb, OUT_DIM), lambda i: (i, 0)),
        ),
        compiler_params=pltpu.CompilerParams(
            dimension_semantics=("parallel",),        # megacore sharding (v7x)
            vmem_limit_bytes=32 * 1024 * 1024),       # covers v5e's 16 MiB default
    )


def generator_forward(z, kernel_params, *, max_tb=1024, min_split_batch=256):
    """z: [B, 2] float32.  kernel_params: output of prepare_params."""
    B, in_dim = z.shape
    assert in_dim == IN_DIM

    tb, b_pad = _choose_tiling(B, max_tb, min_split_batch)
    if b_pad != B:
        z = jnp.pad(z, ((0, b_pad - B), (0, 0)))

    p = kernel_params
    args = (z, p["w1_t"], p["b1"], p["w2_t"], p["b2"],
            p["w3_t"], p["b3"], p["w4_t"], p["b4"])

    try:
        out = _build_call(p, tb, b_pad, single_buffer_consts=True)(*args)
    except Exception:
        # Fallback if this jax build does not accept pipeline_mode=Buffered(1).
        out = _build_call(p, tb, b_pad, single_buffer_consts=False)(*args)

    if b_pad != B:
        out = out[:B]
    return out


def init_params(key):
    """Deterministic synthetic parameters with PyTorch nn.Linear shapes
    (weights stored as (out, in), default U(-1/sqrt(fan_in), 1/sqrt(fan_in)))."""
    ks = jax.random.split(key, 8)

    def linear(kw, kb, fan_in, fan_out):
        bound = 1.0 / jnp.sqrt(fan_in)
        w = jax.random.uniform(kw, (fan_out, fan_in), jnp.float32, -bound, bound)
        b = jax.random.uniform(kb, (fan_out,), jnp.float32, -bound, bound)
        return w, b

    w1, b1 = linear(ks[0], ks[1], IN_DIM, H_DIM)
    w2, b2 = linear(ks[2], ks[3], H_DIM, H_DIM)
    w3, b3 = linear(ks[4], ks[5], H_DIM, H_DIM)
    w4, b4 = linear(ks[6], ks[7], H_DIM, OUT_DIM)

    return {"w1": w1, "b1": b1, "w2": w2, "b2": b2,
            "w3": w3, "b3": b3, "w4": w4, "b4": b4}


def generator_ref(z, params):
    """Pure-JAX f32 reference (un-padded, PyTorch semantics)."""
    hp = jax.lax.Precision.HIGHEST
    h = jnp.maximum(jnp.dot(z, params["w1"].T, precision=hp) + params["b1"], 0.0)
    h = jnp.maximum(jnp.dot(h, params["w2"].T, precision=hp) + params["b2"], 0.0)
    h = jnp.maximum(jnp.dot(h, params["w3"].T, precision=hp) + params["b3"], 0.0)
    return jnp.dot(h, params["w4"].T, precision=hp) + params["b4"]


def _check(out, ref, tag):
    assert out.shape == ref.shape, (out.shape, ref.shape)
    err = float(jnp.max(jnp.abs(out - ref)))
    assert jnp.allclose(out, ref, atol=1e-2, rtol=1e-2), \
        f"{tag}: mismatch vs f32 reference, max abs err {err}"
    return err


if __name__ == "__main__":
    key = jax.random.PRNGKey(0)
    k_param, k_z = jax.random.split(key)

    params = init_params(k_param)
    kernel_params = prepare_params(params)

    # Small batch: single grid step.
    B = 64
    z = jax.random.normal(k_z, (B, IN_DIM), dtype=jnp.float32)
    out = jax.block_until_ready(generator_forward(z, kernel_params))
    _check(out, generator_ref(z, params), "B=64")

    # Non-multiple batch: exercises the padded, >=2-step grid path.
    B2 = 300
    z2 = jax.random.normal(jax.random.fold_in(k_z, 1), (B2, IN_DIM),
                           dtype=jnp.float32)
    out2 = jax.block_until_ready(generator_forward(z2, kernel_params))
    _check(out2, generator_ref(z2, params), "B=300")

    print("KERNEL_OK")
</pallas_src>

<mosaic_0001>
module attributes {stable_mosaic.version = 11 : i64} {
  func.func @_generator_kernel(%arg0: i32, %arg1: memref<64x2xf32, #tpu.memory_space<vmem>>, %arg2: memref<2x512xf32, #tpu.memory_space<vmem>>, %arg3: memref<1x512xf32, #tpu.memory_space<vmem>>, %arg4: memref<512x512xbf16, #tpu.memory_space<vmem>>, %arg5: memref<1x512xf32, #tpu.memory_space<vmem>>, %arg6: memref<512x512xbf16, #tpu.memory_space<vmem>>, %arg7: memref<1x512xf32, #tpu.memory_space<vmem>>, %arg8: memref<512x128xbf16, #tpu.memory_space<vmem>>, %arg9: memref<1x128xf32, #tpu.memory_space<vmem>>, %arg10: memref<64x2xf32, #tpu.memory_space<vmem>>) attributes {dimension_semantics = [#tpu.dimension_semantics<parallel>], iteration_bounds = array<i64: 1>, scalar_prefetch = 0 : i64, scratch_operands = 0 : i64, tpu.core_type = #tpu.core_type<tc>, window_params = [{transform_indices = @transform_0, window_bounds = array<i64: 64, 2>}, {pipeline_mode = #tpu.pipeline_mode<synchronous>, transform_indices = @transform_1, window_bounds = array<i64: 2, 512>}, {pipeline_mode = #tpu.pipeline_mode<synchronous>, transform_indices = @transform_2, window_bounds = array<i64: 1, 512>}, {pipeline_mode = #tpu.pipeline_mode<synchronous>, transform_indices = @transform_3, window_bounds = array<i64: 512, 512>}, {pipeline_mode = #tpu.pipeline_mode<synchronous>, transform_indices = @transform_4, window_bounds = array<i64: 1, 512>}, {pipeline_mode = #tpu.pipeline_mode<synchronous>, transform_indices = @transform_5, window_bounds = array<i64: 512, 512>}, {pipeline_mode = #tpu.pipeline_mode<synchronous>, transform_indices = @transform_6, window_bounds = array<i64: 1, 512>}, {pipeline_mode = #tpu.pipeline_mode<synchronous>, transform_indices = @transform_7, window_bounds = array<i64: 512, 128>}, {pipeline_mode = #tpu.pipeline_mode<synchronous>, transform_indices = @transform_8, window_bounds = array<i64: 1, 128>}, {transform_indices = @transform_9, window_bounds = array<i64: 64, 2>}]} {
    %c0 = arith.constant 0 : index
    %c0_0 = arith.constant 0 : index
    %0 = vector.load %arg1[%c0, %c0_0] : memref<64x2xf32, #tpu.memory_space<vmem>>, vector<64x2xf32>
    %1 = vector.extract_strided_slice %0 {offsets = [0, 0], sizes = [64, 1], strides = [1, 1]} : vector<64x2xf32> to vector<64x1xf32>
    %c0_1 = arith.constant 0 : index
    %c0_2 = arith.constant 0 : index
    %2 = vector.load %arg2[%c0_1, %c0_2] : memref<2x512xf32, #tpu.memory_space<vmem>>, vector<1x512xf32>
    %3 = vector.broadcast %1 : vector<64x1xf32> to vector<64x512xf32>
    %4 = vector.broadcast %2 : vector<1x512xf32> to vector<64x512xf32>
    %5 = arith.mulf %3, %4 : vector<64x512xf32>
    %6 = vector.extract_strided_slice %0 {offsets = [0, 1], sizes = [64, 1], strides = [1, 1]} : vector<64x2xf32> to vector<64x1xf32>
    %c1 = arith.constant 1 : index
    %c0_3 = arith.constant 0 : index
    %7 = vector.load %arg2[%c1, %c0_3] : memref<2x512xf32, #tpu.memory_space<vmem>>, vector<1x512xf32>
    %8 = vector.broadcast %6 : vector<64x1xf32> to vector<64x512xf32>
    %9 = vector.broadcast %7 : vector<1x512xf32> to vector<64x512xf32>
    %10 = arith.mulf %8, %9 : vector<64x512xf32>
    %11 = arith.addf %5, %10 : vector<64x512xf32>
    %c0_4 = arith.constant 0 : index
    %c0_5 = arith.constant 0 : index
    %12 = vector.load %arg3[%c0_4, %c0_5] : memref<1x512xf32, #tpu.memory_space<vmem>>, vector<1x512xf32>
    %13 = vector.broadcast %12 : vector<1x512xf32> to vector<64x512xf32>
    %14 = arith.addf %11, %13 : vector<64x512xf32>
    %cst = arith.constant 0.000000e+00 : f32
    %15 = vector.broadcast %cst : f32 to vector<64x512xf32>
    %16 = arith.maximumf %14, %15 : vector<64x512xf32>
    %17 = arith.truncf %16 : vector<64x512xf32> to vector<64x512xbf16>
    %c0_6 = arith.constant 0 : index
    %c0_7 = arith.constant 0 : index
    %18 = vector.load %arg4[%c0_6, %c0_7] : memref<512x512xbf16, #tpu.memory_space<vmem>>, vector<512x512xbf16>
    %cst_8 = arith.constant dense<0.000000e+00> : vector<64x512xf32>
    %19 = tpu.matmul %17, %18, %cst_8 {dimension_numbers = #tpu.dot_dimension_numbers<[1], [0], [0], [1], [0, 0, 1, 1], [], []>} : vector<64x512xbf16>, vector<512x512xbf16>, vector<64x512xf32> -> vector<64x512xf32>
    %c0_9 = arith.constant 0 : index
    %c0_10 = arith.constant 0 : index
    %20 = vector.load %arg5[%c0_9, %c0_10] : memref<1x512xf32, #tpu.memory_space<vmem>>, vector<1x512xf32>
    %21 = vector.broadcast %20 : vector<1x512xf32> to vector<64x512xf32>
    %22 = arith.addf %19, %21 : vector<64x512xf32>
    %cst_11 = arith.constant 0.000000e+00 : f32
    %23 = vector.broadcast %cst_11 : f32 to vector<64x512xf32>
    %24 = arith.maximumf %22, %23 : vector<64x512xf32>
    %25 = arith.truncf %24 : vector<64x512xf32> to vector<64x512xbf16>
    %c0_12 = arith.constant 0 : index
    %c0_13 = arith.constant 0 : index
    %26 = vector.load %arg6[%c0_12, %c0_13] : memref<512x512xbf16, #tpu.memory_space<vmem>>, vector<512x512xbf16>
    %cst_14 = arith.constant dense<0.000000e+00> : vector<64x512xf32>
    %27 = tpu.matmul %25, %26, %cst_14 {dimension_numbers = #tpu.dot_dimension_numbers<[1], [0], [0], [1], [0, 0, 1, 1], [], []>} : vector<64x512xbf16>, vector<512x512xbf16>, vector<64x512xf32> -> vector<64x512xf32>
    %c0_15 = arith.constant 0 : index
    %c0_16 = arith.constant 0 : index
    %28 = vector.load %arg7[%c0_15, %c0_16] : memref<1x512xf32, #tpu.memory_space<vmem>>, vector<1x512xf32>
    %29 = vector.broadcast %28 : vector<1x512xf32> to vector<64x512xf32>
    %30 = arith.addf %27, %29 : vector<64x512xf32>
    %cst_17 = arith.constant 0.000000e+00 : f32
    %31 = vector.broadcast %cst_17 : f32 to vector<64x512xf32>
    %32 = arith.maximumf %30, %31 : vector<64x512xf32>
    %33 = arith.truncf %32 : vector<64x512xf32> to vector<64x512xbf16>
    %c0_18 = arith.constant 0 : index
    %c0_19 = arith.constant 0 : index
    %34 = vector.load %arg8[%c0_18, %c0_19] : memref<512x128xbf16, #tpu.memory_space<vmem>>, vector<512x128xbf16>
    %cst_20 = arith.constant dense<0.000000e+00> : vector<64x128xf32>
    %35 = tpu.matmul %33, %34, %cst_20 {dimension_numbers = #tpu.dot_dimension_numbers<[1], [0], [0], [1], [0, 0, 1, 1], [], []>} : vector<64x512xbf16>, vector<512x128xbf16>, vector<64x128xf32> -> vector<64x128xf32>
    %c0_21 = arith.constant 0 : index
    %c0_22 = arith.constant 0 : index
    %36 = vector.load %arg9[%c0_21, %c0_22] : memref<1x128xf32, #tpu.memory_space<vmem>>, vector<1x128xf32>
    %37 = vector.broadcast %36 : vector<1x128xf32> to vector<64x128xf32>
    %38 = arith.addf %35, %37 : vector<64x128xf32>
    %39 = vector.extract_strided_slice %38 {offsets = [0, 0], sizes = [64, 2], strides = [1, 1]} : vector<64x128xf32> to vector<64x2xf32>
    %c0_23 = arith.constant 0 : index
    %c0_24 = arith.constant 0 : index
    %40 = vector.load %arg10[%c0_23, %c0_24] : memref<64x2xf32, #tpu.memory_space<vmem>>, vector<64x2xf32>
    tpu.vector_store %arg10[%c0_23, %c0_24], %39 {strides = array<i32>} : memref<64x2xf32, #tpu.memory_space<vmem>>, vector<64x2xf32>,
    return
  }
  func.func @transform_0(%arg0: i32) -> (i32, i32) {
    %c0_i32 = arith.constant 0 : i32
    %c0_i32_0 = arith.constant 0 : i32
    return %arg0, %c0_i32 : i32, i32
  }
  func.func @transform_1(%arg0: i32) -> (i32, i32) {
    %c0_i32 = arith.constant 0 : i32
    %c0_i32_0 = arith.constant 0 : i32
    %c0_i32_1 = arith.constant 0 : i32
    return %c0_i32, %c0_i32_0 : i32, i32
  }
  func.func @transform_2(%arg0: i32) -> (i32, i32) {
    %c0_i32 = arith.constant 0 : i32
    %c0_i32_0 = arith.constant 0 : i32
    %c0_i32_1 = arith.constant 0 : i32
    return %c0_i32, %c0_i32_0 : i32, i32
  }
  func.func @transform_3(%arg0: i32) -> (i32, i32) {
    %c0_i32 = arith.constant 0 : i32
    %c0_i32_0 = arith.constant 0 : i32
    %c0_i32_1 = arith.constant 0 : i32
    return %c0_i32, %c0_i32_0 : i32, i32
  }
  func.func @transform_4(%arg0: i32) -> (i32, i32) {
    %c0_i32 = arith.constant 0 : i32
    %c0_i32_0 = arith.constant 0 : i32
    %c0_i32_1 = arith.constant 0 : i32
    return %c0_i32, %c0_i32_0 : i32, i32
  }
  func.func @transform_5(%arg0: i32) -> (i32, i32) {
    %c0_i32 = arith.constant 0 : i32
    %c0_i32_0 = arith.constant 0 : i32
    %c0_i32_1 = arith.constant 0 : i32
    return %c0_i32, %c0_i32_0 : i32, i32
  }
  func.func @transform_6(%arg0: i32) -> (i32, i32) {
    %c0_i32 = arith.constant 0 : i32
    %c0_i32_0 = arith.constant 0 : i32
    %c0_i32_1 = arith.constant 0 : i32
    return %c0_i32, %c0_i32_0 : i32, i32
  }
  func.func @transform_7(%arg0: i32) -> (i32, i32) {
    %c0_i32 = arith.constant 0 : i32
    %c0_i32_0 = arith.constant 0 : i32
    %c0_i32_1 = arith.constant 0 : i32
    return %c0_i32, %c0_i32_0 : i32, i32
  }
  func.func @transform_8(%arg0: i32) -> (i32, i32) {
    %c0_i32 = arith.constant 0 : i32
    %c0_i32_0 = arith.constant 0 : i32
    %c0_i32_1 = arith.constant 0 : i32
    return %c0_i32, %c0_i32_0 : i32, i32
  }
  func.func @transform_9(%arg0: i32) -> (i32, i32) {
    %c0_i32 = arith.constant 0 : i32
    %c0_i32_0 = arith.constant 0 : i32
    return %arg0, %c0_i32 : i32, i32
  }
}

module attributes {stable_mosaic.version = 11 : i64} {
  func.func @_generator_kernel(%arg0: i32, %arg1: memref<64x2xf32, #tpu.memory_space<vmem>>, %arg2: memref<2x512xf32, #tpu.memory_space<vmem>>, %arg3: memref<1x512xf32, #tpu.memory_space<vmem>>, %arg4: memref<512x512xbf16, #tpu.memory_space<vmem>>, %arg5: memref<1x512xf32, #tpu.memory_space<vmem>>, %arg6: memref<512x512xbf16, #tpu.memory_space<vmem>>, %arg7: memref<1x512xf32, #tpu.memory_space<vmem>>, %arg8: memref<512x128xbf16, #tpu.memory_space<vmem>>, %arg9: memref<1x128xf32, #tpu.memory_space<vmem>>, %arg10: memref<64x2xf32, #tpu.memory_space<vmem>>) attributes {dimension_semantics = [#tpu.dimension_semantics<parallel>], iteration_bounds = array<i64: 1>, scalar_prefetch = 0 : i64, scratch_operands = 0 : i64, tpu.core_type = #tpu.core_type<tc>, window_params = [{transform_indices = @transform_0, window_bounds = array<i64: 64, 2>}, {pipeline_mode = #tpu.pipeline_mode<synchronous>, transform_indices = @transform_1, window_bounds = array<i64: 2, 512>}, {pipeline_mode = #tpu.pipeline_mode<synchronous>, transform_indices = @transform_2, window_bounds = array<i64: 1, 512>}, {pipeline_mode = #tpu.pipeline_mode<synchronous>, transform_indices = @transform_3, window_bounds = array<i64: 512, 512>}, {pipeline_mode = #tpu.pipeline_mode<synchronous>, transform_indices = @transform_4, window_bounds = array<i64: 1, 512>}, {pipeline_mode = #tpu.pipeline_mode<synchronous>, transform_indices = @transform_5, window_bounds = array<i64: 512, 512>}, {pipeline_mode = #tpu.pipeline_mode<synchronous>, transform_indices = @transform_6, window_bounds = array<i64: 1, 512>}, {pipeline_mode = #tpu.pipeline_mode<synchronous>, transform_indices = @transform_7, window_bounds = array<i64: 512, 128>}, {pipeline_mode = #tpu.pipeline_mode<synchronous>, transform_indices = @transform_8, window_bounds = array<i64: 1, 128>}, {transform_indices = @transform_9, window_bounds = array<i64: 64, 2>}]} {
    %c0 = arith.constant 0 : index
    %c0_0 = arith.constant 0 : index
    %0 = vector.load %arg1[%c0, %c0_0] : memref<64x2xf32, #tpu.memory_space<vmem>>, vector<64x2xf32>
    %1 = vector.extract_strided_slice %0 {offsets = [0, 0], sizes = [64, 1], strides = [1, 1]} : vector<64x2xf32> to vector<64x1xf32>
    %c0_1 = arith.constant 0 : index
    %c0_2 = arith.constant 0 : index
    %2 = vector.load %arg2[%c0_1, %c0_2] : memref<2x512xf32, #tpu.memory_space<vmem>>, vector<1x512xf32>
    %3 = vector.broadcast %1 : vector<64x1xf32> to vector<64x512xf32>
    %4 = vector.broadcast %2 : vector<1x512xf32> to vector<64x512xf32>
    %5 = arith.mulf %3, %4 : vector<64x512xf32>
    %6 = vector.extract_strided_slice %0 {offsets = [0, 1], sizes = [64, 1], strides = [1, 1]} : vector<64x2xf32> to vector<64x1xf32>
    %c1 = arith.constant 1 : index
    %c0_3 = arith.constant 0 : index
    %7 = vector.load %arg2[%c1, %c0_3] : memref<2x512xf32, #tpu.memory_space<vmem>>, vector<1x512xf32>
    %8 = vector.broadcast %6 : vector<64x1xf32> to vector<64x512xf32>
    %9 = vector.broadcast %7 : vector<1x512xf32> to vector<64x512xf32>
    %10 = arith.mulf %8, %9 : vector<64x512xf32>
    %11 = arith.addf %5, %10 : vector<64x512xf32>
    %c0_4 = arith.constant 0 : index
    %c0_5 = arith.constant 0 : index
    %12 = vector.load %arg3[%c0_4, %c0_5] : memref<1x512xf32, #tpu.memory_space<vmem>>, vector<1x512xf32>
    %13 = vector.broadcast %12 : vector<1x512xf32> to vector<64x512xf32>
    %14 = arith.addf %11, %13 : vector<64x512xf32>
    %cst = arith.constant 0.000000e+00 : f32
    %15 = vector.broadcast %cst : f32 to vector<64x512xf32>
    %16 = arith.maximumf %14, %15 : vector<64x512xf32>
    %17 = arith.truncf %16 : vector<64x512xf32> to vector<64x512xbf16>
    %c0_6 = arith.constant 0 : index
    %c0_7 = arith.constant 0 : index
    %18 = vector.load %arg4[%c0_6, %c0_7] : memref<512x512xbf16, #tpu.memory_space<vmem>>, vector<512x512xbf16>
    %cst_8 = arith.constant dense<0.000000e+00> : vector<64x512xf32>
    %19 = tpu.matmul %17, %18, %cst_8 {dimension_numbers = #tpu.dot_dimension_numbers<[1], [0], [0], [1], [0, 0, 1, 1], [], []>} : vector<64x512xbf16>, vector<512x512xbf16>, vector<64x512xf32> -> vector<64x512xf32>
    %c0_9 = arith.constant 0 : index
    %c0_10 = arith.constant 0 : index
    %20 = vector.load %arg5[%c0_9, %c0_10] : memref<1x512xf32, #tpu.memory_space<vmem>>, vector<1x512xf32>
    %21 = vector.broadcast %20 : vector<1x512xf32> to vector<64x512xf32>
    %22 = arith.addf %19, %21 : vector<64x512xf32>
    %cst_11 = arith.constant 0.000000e+00 : f32
    %23 = vector.broadcast %cst_11 : f32 to vector<64x512xf32>
    %24 = arith.maximumf %22, %23 : vector<64x512xf32>
    %25 = arith.truncf %24 : vector<64x512xf32> to vector<64x512xbf16>
    %c0_12 = arith.constant 0 : index
    %c0_13 = arith.constant 0 : index
    %26 = vector.load %arg6[%c0_12, %c0_13] : memref<512x512xbf16, #tpu.memory_space<vmem>>, vector<512x512xbf16>
    %cst_14 = arith.constant dense<0.000000e+00> : vector<64x512xf32>
    %27 = tpu.matmul %25, %26, %cst_14 {dimension_numbers = #tpu.dot_dimension_numbers<[1], [0], [0], [1], [0, 0, 1, 1], [], []>} : vector<64x512xbf16>, vector<512x512xbf16>, vector<64x512xf32> -> vector<64x512xf32>
    %c0_15 = arith.constant 0 : index
    %c0_16 = arith.constant 0 : index
    %28 = vector.load %arg7[%c0_15, %c0_16] : memref<1x512xf32, #tpu.memory_space<vmem>>, vector<1x512xf32>
    %29 = vector.broadcast %28 : vector<1x512xf32> to vector<64x512xf32>
    %30 = arith.addf %27, %29 : vector<64x512xf32>
    %cst_17 = arith.constant 0.000000e+00 : f32
    %31 = vector.broadcast %cst_17 : f32 to vector<64x512xf32>
    %32 = arith.maximumf %30, %31 : vector<64x512xf32>
    %33 = arith.truncf %32 : vector<64x512xf32> to vector<64x512xbf16>
    %c0_18 = arith.constant 0 : index
    %c0_19 = arith.constant 0 : index
    %34 = vector.load %arg8[%c0_18, %c0_19] : memref<512x128xbf16, #tpu.memory_space<vmem>>, vector<512x128xbf16>
    %cst_20 = arith.constant dense<0.000000e+00> : vector<64x128xf32>
    %35 = tpu.matmul %33, %34, %cst_20 {dimension_numbers = #tpu.dot_dimension_numbers<[1], [0], [0], [1], [0, 0, 1, 1], [], []>} : vector<64x512xbf16>, vector<512x128xbf16>, vector<64x128xf32> -> vector<64x128xf32>
    %c0_21 = arith.constant 0 : index
    %c0_22 = arith.constant 0 : index
    %36 = vector.load %arg9[%c0_21, %c0_22] : memref<1x128xf32, #tpu.memory_space<vmem>>, vector<1x128xf32>
    %37 = vector.broadcast %36 : vector<1x128xf32> to vector<64x128xf32>
    %38 = arith.addf %35, %37 : vector<64x128xf32>
    %39 = vector.extract_strided_slice %38 {offsets = [0, 0], sizes = [64, 2], strides = [1, 1]} : vector<64x128xf32> to vector<64x2xf32>
    %c0_23 = arith.constant 0 : index
    %c0_24 = arith.constant 0 : index
    %40 = vector.load %arg10[%c0_23, %c0_24] : memref<64x2xf32, #tpu.memory_space<vmem>>, vector<64x2xf32>
    tpu.vector_store %arg10[%c0_23, %c0_24], %39 {strides = array<i32>} : memref<64x2xf32, #tpu.memory_space<vmem>>, vector<64x2xf32>,
    return
  }
  func.func @transform_0(%arg0: i32) -> (i32, i32) {
    %c0_i32 = arith.constant 0 : i32
    %c0_i32_0 = arith.constant 0 : i32
    return %arg0, %c0_i32 : i32, i32
  }
  func.func @transform_1(%arg0: i32) -> (i32, i32) {
    %c0_i32 = arith.constant 0 : i32
    %c0_i32_0 = arith.constant 0 : i32
    %c0_i32_1 = arith.constant 0 : i32
    return %c0_i32, %c0_i32_0 : i32, i32
  }
  func.func @transform_2(%arg0: i32) -> (i32, i32) {
    %c0_i32 = arith.constant 0 : i32
    %c0_i32_0 = arith.constant 0 : i32
    %c0_i32_1 = arith.constant 0 : i32
    return %c0_i32, %c0_i32_0 : i32, i32
  }
  func.func @transform_3(%arg0: i32) -> (i32, i32) {
    %c0_i32 = arith.constant 0 : i32
    %c0_i32_0 = arith.constant 0 : i32
    %c0_i32_1 = arith.constant 0 : i32
    return %c0_i32, %c0_i32_0 : i32, i32
  }
  func.func @transform_4(%arg0: i32) -> (i32, i32) {
    %c0_i32 = arith.constant 0 : i32
    %c0_i32_0 = arith.constant 0 : i32
    %c0_i32_1 = arith.constant 0 : i32
    return %c0_i32, %c0_i32_0 : i32, i32
  }
  func.func @transform_5(%arg0: i32) -> (i32, i32) {
    %c0_i32 = arith.constant 0 : i32
    %c0_i32_0 = arith.constant 0 : i32
    %c0_i32_1 = arith.constant 0 : i32
    return %c0_i32, %c0_i32_0 : i32, i32
  }
  func.func @transform_6(%arg0: i32) -> (i32, i32) {
    %c0_i32 = arith.constant 0 : i32
    %c0_i32_0 = arith.constant 0 : i32
    %c0_i32_1 = arith.constant 0 : i32
    return %c0_i32, %c0_i32_0 : i32, i32
  }
  func.func @transform_7(%arg0: i32) -> (i32, i32) {
    %c0_i32 = arith.constant 0 : i32
    %c0_i32_0 = arith.constant 0 : i32
    %c0_i32_1 = arith.constant 0 : i32
    return %c0_i32, %c0_i32_0 : i32, i32
  }
  func.func @transform_8(%arg0: i32) -> (i32, i32) {
    %c0_i32 = arith.constant 0 : i32
    %c0_i32_0 = arith.constant 0 : i32
    %c0_i32_1 = arith.constant 0 : i32
    return %c0_i32, %c0_i32_0 : i32, i32
  }
  func.func @transform_9(%arg0: i32) -> (i32, i32) {
    %c0_i32 = arith.constant 0 : i32
    %c0_i32_0 = arith.constant 0 : i32
    return %arg0, %c0_i32 : i32, i32
  }
}

</mosaic_0001>

<bundles_post_ra>
// kernel: tpu_custom_call.1
= control target key start
LH: loop header
LB: loop body
LE: loop exit
PB: predicated region body
PF: predicated region fallthrough
CT: control target
= control target key end

     0   :  { %14 = vsyncpa [#allocation3], 0  ;;  %s5688_s0 = inlined_call_operand.vmem [shape: f32[64,2], index: 0, kind: input, shape index: {}]   ;;  %s5689_s1 = inlined_call_operand.vmem [shape: f32[2,512], index: 1, kind: input, shape index: {}]   ;;  %s5690_s2 = inlined_call_operand.vmem [shape: f32[1,512], index: 2, kind: input, shape index: {}]   ;;  %s5691_s3 = inlined_call_operand.hbm [shape: bf16[512,512], index: 3, kind: input, shape index: {}]   ;;  %s5692_s4 = inlined_call_operand.vmem [shape: f32[1,512], index: 4, kind: input, shape index: {}]   ;;  %s5693_s5 = inlined_call_operand.hbm [shape: bf16[512,512], index: 5, kind: input, shape index: {}]   ;;  %s5694_s6 = inlined_call_operand.vmem [shape: f32[1,512], index: 6, kind: input, shape index: {}]   ;;  %s5695_s7 = inlined_call_operand.hbm [shape: bf16[512,128], index: 7, kind: input, shape index: {}]   ;;  %s5696_s8 = inlined_call_operand.vmem [shape: f32[1,128], index: 8, kind: input, shape index: {}]   ;;  %s5697_s9 = inlined_call_operand.vmem [shape: f32[64,2], index: 9, kind: output, shape index: {}]  }
   0x1   :  { %15 = vsyncpa [#allocation5], 0  ;;  %s41_s11 = sshll.u32 %s5693_s5, 4  ;;  %s4873_s12 = smov [#allocation4]   ;;  %s42_s11 = int_to_ptr.hbm [resolvable:$true] %s41_s11 }
   0x2   :  { %s43_s13 = sshll.u32 %s4873_s12, 4  ;;  %s26_s16 = sshll.u32 %s5691_s3, 4  ;;  %s44_s13 = int_to_ptr.vmem [resolvable:$true] %s43_s13  ;;  %s27_s16 = int_to_ptr.hbm [resolvable:$true] %s26_s16 }
   0x3   :  { %s4874_s17 = smov 256   ;;  %s4875_s18 = smov 16  }
   0x4   :  { %49 = dma.hbm_to_vmem [thread:$0]  %s42_s11, 16384, %s44_s13, [#allocation5], %s4874_s17, %s4874_s17, %s4875_s18  }
   0x5   :  { %s4876_s19 = smov [#allocation2]   ;;  %s56_s23 = sshll.u32 %s5695_s7, 4  ;;  %s57_s23 = int_to_ptr.hbm [resolvable:$true] %s56_s23 }
   0x6   :  { %s28_s20 = sshll.u32 %s4876_s19, 4  ;;  %s4877_s5 = smov [#allocation6]   ;;  %s29_s20 = int_to_ptr.vmem [resolvable:$true] %s28_s20 }
   0x7   :  { %34 = dma.hbm_to_vmem [thread:$0]  %s27_s16, 16384, %s29_s20, [#allocation3], %s4874_s17, %s4874_s17, %s4875_s18  }
   0x8   :  { %s58_s24 = sshll.u32 %s4877_s5, 4  ;;  %s4878_s25 = smov 64   ;;  %s59_s24 = int_to_ptr.vmem [resolvable:$true] %s58_s24 }
   0x9   :  { %s4879_s26 = smov 4  }
   0xa   :  { %64 = dma.hbm_to_vmem [thread:$0]  %s57_s23, 4096, %s59_s24, [#allocation5], %s4878_s25, %s4878_s25, %s4879_s26  }
   0xb   :  { %4869 = dma.done.wait [#allocation3], 16384  }
   0xc   :  { %4870 = vsyncadd [#allocation3], 4294950912 }
   0xd   :  { %4871 = dma.done.wait [#allocation5], 20480  }
   0xe   :  { %4872 = vsyncadd [#allocation5], 4294946816  ;;  %v4880_v0 = vmov 1   ;;  %v4881_v1 = vmov 0   ;;  %v79_v2 = vld [vmem:[%s5688_s0] sm:$0xff]  ;;  %v81_v3 = vld [vmem:[%s5688_s0 + $0x10] sm:$0xff] }
   0xf   :  { %4788 = vset.pattern.permute.xlu1 %v4880_v0  ;;  %4787 = vset.pattern.permute.xlu0 %v4881_v1  ;;  %v80_v4 = vld [vmem:[%s5688_s0 + $0x8] sm:$0xff]  ;;  %v82_v5 = vld [vmem:[%s5688_s0 + $0x18] sm:$0xff]  ;;  %v3452_v6 = vld [vmem:[#allocation2 + $0xe0] sm:$0xf]  ;;  %vm3322_vm0 = vcmask 15360  }
  0x10   :  { %4789 = vset.pattern.permute.xlu2 %v4881_v1  ;;  %172 = vperm.xlu1 %4788, %v79_v2   ;;  %v4520_v7 = vld [vmem:[#allocation2 + $0xec] sm:$0xf0]  ;;  %v3580_v8 = vld [vmem:[#allocation2 + $0x1e0] sm:$0xf]  ;;  %v84_v19 = vld [vmem:[%s5688_s0 + $0x28] sm:$0xff] }
  0x11   :  { %90 = vperm.xlu0 %4787, %v79_v2   ;;  %100 = vperm.xlu2 %4789, %v81_v3   ;;  %v3453_v9 = vor.u32 %v4520_v7, %v3452_v6  ;;  %v4552_v10 = vld [vmem:[#allocation2 + $0x1ec] sm:$0xf0]  ;;  %v3708_v11 = vld [vmem:[#allocation2 + $0x2e0] sm:$0xf]  ;;  %v86_v21 = vld [vmem:[%s5688_s0 + $0x38] sm:$0xff] }
  0x12   :  { %v4584_v12 = vld [vmem:[#allocation2 + $0x2ec] sm:$0xf0]  ;;  %v3581_v13 = vor.u32 %v4552_v10, %v3580_v8  ;;  %v3836_v15 = vld [vmem:[#allocation2 + $0x3e0] sm:$0xf] }
  0x13   :  { %v3709_v14 = vor.u32 %v4584_v12, %v3708_v11  ;;  %v4616_v16 = vld [vmem:[#allocation2 + $0x3ec] sm:$0xf0]  ;;  %1144 = vmatpush.bf16.msra.mxu0 %v3453_v9  ;;  %v83_v18 = vld [vmem:[%s5688_s0 + $0x20] sm:$0xff] }
  0x14   :  { %v3837_v17 = vor.u32 %v4616_v16, %v3836_v15  ;;  %1173 = vmatpush.bf16.msra.mxu1 %v3581_v13  ;;  %v85_v20 = vld [vmem:[%s5688_s0 + $0x30] sm:$0xff]  ;;  %v3436_v22 = vld [vmem:[#allocation2 + $0xc0] sm:$0xf] }
  0x15   :  { %1202 = vmatpush.bf16.msra.mxu2 %v3709_v14  ;;  %v4516_v23 = vld [vmem:[#allocation2 + $0xcc] sm:$0xf0]  ;;  %v3564_v24 = vld [vmem:[#allocation2 + $0x1c0] sm:$0xf] }
  0x16   :  { %1231 = vmatpush.bf16.msra.mxu3 %v3837_v17  ;;  %v3437_v25 = vor.u32 %v4516_v23, %v3436_v22  ;;  %v4548_v26 = vld [vmem:[#allocation2 + $0x1cc] sm:$0xf0]  ;;  %v3692_v27 = vld [vmem:[#allocation2 + $0x2c0] sm:$0xf] }
  0x17   :  { %v4580_v28 = vld [vmem:[#allocation2 + $0x2cc] sm:$0xf0]  ;;  %v3565_v29 = vor.u32 %v4548_v26, %v3564_v24  ;;  %v3820_v31 = vld [vmem:[#allocation2 + $0x3c0] sm:$0xf] }
  0x18   :  { %176 = vperm.xlu1 %4788, %v80_v4   ;;  %v3693_v30 = vor.u32 %v4580_v28, %v3692_v27  ;;  %v4612_v32 = vld [vmem:[#allocation2 + $0x3cc] sm:$0xf0]  ;;  %v3420_v33 = vld [vmem:[#allocation2 + $0xa0] sm:$0xf]  ;;  %1145 = vmatpush.bf16.msra.mxu0 %v3437_v25 }
  0x19   :  { %95 = vperm.xlu0 %4787, %v80_v4   ;;  %105 = vperm.xlu2 %4789, %v82_v5   ;;  %v3821_v34 = vor.u32 %v4612_v32, %v3820_v31  ;;  %v4512_v35 = vld [vmem:[#allocation2 + $0xac] sm:$0xf0]  ;;  %v3548_v36 = vld [vmem:[#allocation2 + $0x1a0] sm:$0xf] }
  0x1a   :  { %v4544_v37 = vld [vmem:[#allocation2 + $0x1ac] sm:$0xf0]  ;;  %1174 = vmatpush.bf16.msra.mxu1 %v3565_v29  ;;  %1203 = vmatpush.bf16.msra.mxu2 %v3693_v30  ;;  %v3421_v38 = vor.u32 %v4512_v35, %v3420_v33  ;;  %v3676_v40 = vld [vmem:[#allocation2 + $0x2a0] sm:$0xf] }
  0x1b   :  { %v3549_v39 = vor.u32 %v4544_v37, %v3548_v36  ;;  %v4576_v41 = vld [vmem:[#allocation2 + $0x2ac] sm:$0xf0]  ;;  %v3804_v42 = vld [vmem:[#allocation2 + $0x3a0] sm:$0xf]  ;;  %1232 = vmatpush.bf16.msra.mxu3 %v3821_v34 }
  0x1c   :  { %v3677_v43 = vor.u32 %v4576_v41, %v3676_v40  ;;  %v4608_v44 = vld [vmem:[#allocation2 + $0x3ac] sm:$0xf0]  ;;  %1146 = vmatpush.bf16.msra.mxu0 %v3421_v38  ;;  %v3404_v46 = vld [vmem:[#allocation2 + $0x80] sm:$0xf] }
  0x1d   :  { %v3805_v45 = vor.u32 %v4608_v44, %v3804_v42  ;;  %v4508_v47 = vld [vmem:[#allocation2 + $0x8c] sm:$0xf0]  ;;  %v3532_v48 = vld [vmem:[#allocation2 + $0x180] sm:$0xf]  ;;  %v4582_v44 = vld [vmem:[#allocation2 + $0x2e4] sm:$0xf] }
  0x1e   :  { %1175 = vmatpush.bf16.msra.mxu1 %v3549_v39  ;;  %1204 = vmatpush.bf16.msra.mxu2 %v3677_v43  ;;  %v3405_v49 = vor.u32 %v4508_v47, %v3404_v46  ;;  %v4540_v50 = vld [vmem:[#allocation2 + $0x18c] sm:$0xf0]  ;;  %v3660_v51 = vld [vmem:[#allocation2 + $0x280] sm:$0xf]  ;;  %v4518_v46 = vld [vmem:[#allocation2 + $0xe4] sm:$0xf] }
  0x1f   :  { %1233 = vmatpush.bf16.msra.mxu3 %v3805_v45  ;;  %v4572_v52 = vld [vmem:[#allocation2 + $0x28c] sm:$0xf0]  ;;  %v3533_v53 = vor.u32 %v4540_v50, %v3532_v48  ;;  %v3788_v55 = vld [vmem:[#allocation2 + $0x380] sm:$0xf]  ;;  %v3710_v45 = vld [vmem:[#allocation2 + $0x2f0] sm:$0xf0] }
  0x20   :  { %184 = vperm.xlu1 %4788, %v82_v5   ;;  %v3661_v54 = vor.u32 %v4572_v52, %v3660_v51  ;;  %v4604_v56 = vld [vmem:[#allocation2 + $0x38c] sm:$0xf0]  ;;  %1147 = vmatpush.bf16.msra.mxu0 %v3405_v49  ;;  %v3388_v58 = vld [vmem:[#allocation2 + $0x60] sm:$0xf]  ;;  %v3713_v47 = vor.u32 %v4582_v44, %v3710_v45  ;;  %v3454_v48 = vld [vmem:[#allocation2 + $0xf0] sm:$0xf0] }
  0x21   :  { %4790 = vset.pattern.permute.xlu0 %v4880_v0  ;;  %110 = vperm.xlu2 %4789, %v83_v18   ;;  %v3789_v57 = vor.u32 %v4604_v56, %v3788_v55  ;;  %v4504_v59 = vld [vmem:[#allocation2 + $0x6c] sm:$0xf0]  ;;  %v3516_v60 = vld [vmem:[#allocation2 + $0x160] sm:$0xf]  ;;  %v4614_v49 = vld [vmem:[#allocation2 + $0x3e4] sm:$0xf]  ;;  %v3457_v51 = vor.u32 %v4518_v46, %v3454_v48 }
  0x22   :  { %180 = vperm.xlu0 %4790, %v81_v3   ;;  %1176 = vmatpush.bf16.msra.mxu1 %v3533_v53  ;;  %v4536_v61 = vld [vmem:[#allocation2 + $0x16c] sm:$0xf0]  ;;  %v3389_v62 = vor.u32 %v4504_v59, %v3388_v58  ;;  %v3772_v2 = vld [vmem:[#allocation2 + $0x360] sm:$0xf]  ;;  %v3838_v50 = vld [vmem:[#allocation2 + $0x3f0] sm:$0xf0] }
  0x23   :  { %1205 = vmatpush.bf16.msra.mxu2 %v3661_v54  ;;  %1234 = vmatpush.bf16.msra.mxu3 %v3789_v57  ;;  %v3517_v63 = vor.u32 %v4536_v61, %v3516_v60  ;;  %v4600_v4 = vld [vmem:[#allocation2 + $0x36c] sm:$0xf0]  ;;  %v3372_v6 = vld [vmem:[#allocation2 + $0x40] sm:$0xf]  ;;  %v3841_v52 = vor.u32 %v4614_v49, %v3838_v50  ;;  %v4550_v53 = vld [vmem:[#allocation2 + $0x1e4] sm:$0xf] }
  0x24   :  { %1148 = vmatpush.bf16.msra.mxu0 %v3389_v62  ;;  %v3773_v5 = vor.u32 %v4600_v4, %v3772_v2  ;;  %v4500_v7 = vld [vmem:[#allocation2 + $0x4c] sm:$0xf0]  ;;  %v3500_v8 = vld [vmem:[#allocation2 + $0x140] sm:$0xf]  ;;  %v3582_v54 = vld [vmem:[#allocation2 + $0x1f0] sm:$0xf0] }
  0x25   :  { %v3373_v9 = vor.u32 %v4500_v7, %v3372_v6  ;;  %v4532_v10 = vld [vmem:[#allocation2 + $0x14c] sm:$0xf0]  ;;  %v3628_v11 = vld [vmem:[#allocation2 + $0x240] sm:$0xf]  ;;  %v3585_v55 = vor.u32 %v4550_v53, %v3582_v54  ;;  %v4514_v2 = vld [vmem:[#allocation2 + $0xc4] sm:$0xf] }
  0x26   :  { %1177 = vmatpush.bf16.msra.mxu1 %v3517_v63  ;;  %v4564_v12 = vld [vmem:[#allocation2 + $0x24c] sm:$0xf0]  ;;  %v3501_v13 = vor.u32 %v4532_v10, %v3500_v8  ;;  %v3756_v15 = vld [vmem:[#allocation2 + $0x340] sm:$0xf]  ;;  %v4610_v4 = vld [vmem:[#allocation2 + $0x3c4] sm:$0xf] }
  0x27   :  { %1235 = vmatpush.bf16.msra.mxu3 %v3773_v5  ;;  %v3629_v14 = vor.u32 %v4564_v12, %v3628_v11  ;;  %v4596_v16 = vld [vmem:[#allocation2 + $0x34c] sm:$0xf0]  ;;  %v3612_v23 = vld [vmem:[#allocation2 + $0x220] sm:$0xf]  ;;  %v3822_v5 = vld [vmem:[#allocation2 + $0x3d0] sm:$0xf0] }
  0x28   :  { %4791 = vset.pattern.permute.xlu1 %v4881_v1  ;;  %v3757_v17 = vor.u32 %v4596_v16, %v3756_v15  ;;  %1149 = vmatpush.bf16.msra.mxu0 %v3373_v9  ;;  %v4528_v22 = vld [vmem:[#allocation2 + $0x12c] sm:$0xf0]  ;;  %v3740_v27 = vld [vmem:[#allocation2 + $0x320] sm:$0xf]  ;;  %v4546_v8 = vld [vmem:[#allocation2 + $0x1c4] sm:$0xf]  ;;  %v3825_v15 = vor.u32 %v4610_v4, %v3822_v5 }
  0x29   :  { %115 = vperm.xlu1 %4791, %v84_v19   ;;  %4792 = vset.pattern.permute.xlu2 %v4880_v0  ;;  %v4560_v24 = vld [vmem:[#allocation2 + $0x22c] sm:$0xf0]  ;;  %v3340_v30 = vld [vmem:[#allocation2] sm:$0xf]  ;;  %v3566_v9 = vld [vmem:[#allocation2 + $0x1d0] sm:$0xf0] }
  0x2a   :  { %192 = vperm.xlu0 %4790, %v84_v19   ;;  %188 = vperm.xlu2 %4792, %v83_v18   ;;  %v3356_v18 = vld [vmem:[#allocation2 + $0x20] sm:$0xf]  ;;  %v4496_v19 = vld [vmem:[#allocation2 + $0x2c] sm:$0xf0]  ;;  %v3613_v26 = vor.u32 %v4560_v24, %v3612_v23  ;;  %v3422_v45 = vld [vmem:[#allocation2 + $0xb0] sm:$0xf0] }
  0x2b   :  { %1178 = vmatpush.bf16.msra.mxu1 %v3501_v13  ;;  %1236 = vmatpush.bf16.msra.mxu3 %v3757_v17  ;;  %v4592_v28 = vld [vmem:[#allocation2 + $0x32c] sm:$0xf0]  ;;  %v3468_v32 = vld [vmem:[#allocation2 + $0x100] sm:$0xf]  ;;  %v4606_v46 = vld [vmem:[#allocation2 + $0x3a4] sm:$0xf] }
  0x2c   :  { %v3741_v29 = vor.u32 %v4592_v28, %v3740_v27  ;;  %v4492_v31 = vld [vmem:[#allocation2 + $0xc] sm:$0xf0]  ;;  %v3596_v35 = vld [vmem:[#allocation2 + $0x200] sm:$0xf]  ;;  %v3550_v53 = vld [vmem:[#allocation2 + $0x1b0] sm:$0xf0] }
  0x2d   :  { %v3341_v33 = vor.u32 %v4492_v31, %v3340_v30  ;;  %v4524_v34 = vld [vmem:[#allocation2 + $0x10c] sm:$0xf0]  ;;  %v3724_v39 = vld [vmem:[#allocation2 + $0x300] sm:$0xf] }
  0x2e   :  { %v4556_v36 = vld [vmem:[#allocation2 + $0x20c] sm:$0xf0]  ;;  %v3469_v37 = vor.u32 %v4524_v34, %v3468_v32  ;;  %v87_v42 = vld [vmem:[%s5689_s1] ss:$2 sm:$0xf] }
  0x2f   :  { %1237 = vmatpush.bf16.msra.mxu3 %v3741_v29  ;;  %v3597_v38 = vor.u32 %v4556_v36, %v3596_v35  ;;  %v4588_v40 = vld [vmem:[#allocation2 + $0x30c] sm:$0xf0]  ;;  %v3337_v43 = vld [vmem:[%s5689_s1 + $0x1] ss:$2 sm:$0xf]  ;;  %v4971_v56 = vperm.slane %v87_v42, 0 }
  0x30   :  { %v3725_v41 = vor.u32 %v4588_v40, %v3724_v39  ;;  %v4973_v57 = vperm.slane %v87_v42, 1  ;;  %v4975_v58 = vperm.slane %v87_v42, 2  ;;  %v4977_v59 = vperm.slane %v87_v42, 3  ;;  %v276_v12 = vld [vmem:[%s5690_s2] sm:$0xf] }
  0x31   :  { %120 = vperm.xlu1 %4791, %v85_v20   ;;  %v4979_v60 = vperm.slane %v3337_v43, 0  ;;  %v4981_v61 = vperm.slane %v3337_v43, 1  ;;  %v4983_v6 = vperm.slane %v3337_v43, 2  ;;  %v4985_v7 = vperm.slane %v3337_v43, 3  ;;  %v4574_v40 = vld [vmem:[#allocation2 + $0x2a4] sm:$0xf] }
  0x32   :  { %196 = vperm.xlu0 %4790, %v85_v20   ;;  %4793 = vset.pattern.permute.xlu2 %v4881_v1  ;;  %v4568_v1 = vld [vmem:[#allocation2 + $0x26c] sm:$0xf0]  ;;  %v3484_v20 = vld [vmem:[#allocation2 + $0x120] sm:$0xf]  ;;  %v5006_v27 = vperm.slane %v276_v12, 3 }
  0x33   :  { %125 = vperm.xlu2 %4793, %v86_v21   ;;  %v3485_v25 = vor.u32 %v4528_v22, %v3484_v20  ;;  %1238 = vmatpush.bf16.msra.mxu3 %v3725_v41  ;;  %v4996_v20 = vperm.slane %v276_v12, 0  ;;  %v3678_v41 = vld [vmem:[#allocation2 + $0x2b0] sm:$0xf0]  ;;  %v4510_v42 = vld [vmem:[#allocation2 + $0xa4] sm:$0xf] }
  0x35   :  { %1179 = vmatpush.bf16.msra.mxu1 %v3485_v25 }
  0x37   :  { %1347 = vmatpush.bf16.msrb.mxu3 %v3841_v52  ;;  %v4542_v52 = vld [vmem:[#allocation2 + $0x1a4] sm:$0xf] }
  0x39   :  { %4794 = vset.pattern.permute.xlu1 %v4880_v0  ;;  %v3644_v0 = vld [vmem:[#allocation2 + $0x260] sm:$0xf]  ;;  %1180 = vmatpush.bf16.msra.mxu1 %v3469_v37 }
  0x3a   :  { %200 = vperm.xlu1 %4794, %v86_v21   ;;  %v3645_v3 = vor.u32 %v4568_v1, %v3644_v0  ;;  %v3357_v21 = vor.u32 %v4496_v19, %v3356_v18  ;;  %v4578_v0 = vld [vmem:[#allocation2 + $0x2c4] sm:$0xf]  ;;  %v3694_v1 = vld [vmem:[#allocation2 + $0x2d0] sm:$0xf0]  ;;  %v3569_v19 = vor.u32 %v4546_v8, %v3566_v9 }
  0x3b   :  { %v3697_v13 = vor.u32 %v4578_v0, %v3694_v1  ;;  %1348 = vmatpush.bf16.msrb.mxu3 %v3825_v15  ;;  %v3553_v0 = vor.u32 %v4542_v52, %v3550_v53 }
  0x3c   :  { %1206 = vmatpush.bf16.msra.mxu2 %v3645_v3  ;;  %1150 = vmatpush.bf16.msra.mxu0 %v3357_v21  ;;  %v3438_v3 = vld [vmem:[#allocation2 + $0xd0] sm:$0xf0]  ;;  %v4998_v21 = vperm.slane %v276_v12, 1 }
  0x3d   :  { %1289 = vmatpush.bf16.msrb.mxu1 %v3585_v55  ;;  %v3681_v55 = vor.u32 %v4574_v40, %v3678_v41 }
  0x40   :  { %1207 = vmatpush.bf16.msra.mxu2 %v3629_v14  ;;  %1151 = vmatpush.bf16.msra.mxu0 %v3341_v33  ;;  %v3441_v14 = vor.u32 %v4514_v2, %v3438_v3 }
  0x41   :  { %1290 = vmatpush.bf16.msrb.mxu1 %v3569_v19 }
  0x44   :  { %1208 = vmatpush.bf16.msra.mxu2 %v3613_v26  ;;  %1260 = vmatpush.bf16.msrb.mxu0 %v3457_v51  ;;  %v5004_v26 = vperm.slane %v276_v12, 2 }
  0x45   :  { %1291 = vmatpush.bf16.msrb.mxu1 %v3553_v0 }
  0x48   :  { %1209 = vmatpush.bf16.msra.mxu2 %v3597_v38  ;;  %1261 = vmatpush.bf16.msrb.mxu0 %v3441_v14 }
  0x4c   :  { %1318 = vmatpush.bf16.msrb.mxu2 %v3713_v47  ;;  %v3806_v47 = vld [vmem:[#allocation2 + $0x3b0] sm:$0xf0] }
  0x50   :  { %1319 = vmatpush.bf16.msrb.mxu2 %v3697_v13 }
  0x54   :  { %1320 = vmatpush.bf16.msrb.mxu2 %v3681_v55  ;;  %v4570_v55 = vld [vmem:[#allocation2 + $0x284] sm:$0xf] }
  0x6b   :  { %v4987_v10 = vpop.permute.xlu2 %100 }
  0x73   :  { %v106_v54 = vpop.permute.xlu2 %105 }
  0x74   :  { %v149_v12 = vmul.f32 %v4971_v56, %v106_v54  ;;  %v150_v13 = vmul.f32 %v4973_v57, %v106_v54 }
  0x7b   :  { %v5042_v41 = vpop.permute.xlu2 %110 }
  0x82   :  { %v173_v62 = vpop.permute.xlu1 %172 }
  0x83   :  { %v91_v63 = vpop.permute.xlu0 %90  ;;  %v212_v11 = vmul.f32 %v4979_v60, %v173_v62  ;;  %v213_v16 = vmul.f32 %v4981_v61, %v173_v62  ;;  %v214_v22 = vmul.f32 %v4983_v6, %v173_v62  ;;  %v215_v23 = vmul.f32 %v4985_v7, %v173_v62 }
  0x84   :  { %v137_v17 = vmul.f32 %v4971_v56, %v91_v63  ;;  %v138_v18 = vmul.f32 %v4973_v57, %v91_v63  ;;  %v139_v24 = vmul.f32 %v4975_v58, %v91_v63  ;;  %v140_v25 = vmul.f32 %v4977_v59, %v91_v63 }
  0x85   :  { %v3425_v62 = vor.u32 %v4510_v42, %v3422_v45  ;;  %v3809_v63 = vor.u32 %v4606_v46, %v3806_v47  ;;  %v148_v46 = vmul.f32 %v4977_v59, %v4987_v10 }
  0x86   :  { %v244_v28 = vadd.f32 %v212_v11, %v137_v17  ;;  %v245_v29 = vadd.f32 %v213_v16, %v138_v18  ;;  %v246_v43 = vadd.f32 %v214_v22, %v139_v24  ;;  %v247_v44 = vadd.f32 %v215_v23, %v140_v25 }
  0x87   :  { %1262 = vmatpush.bf16.msrb.mxu0 %v3425_v62  ;;  %1349 = vmatpush.bf16.msrb.mxu3 %v3809_v63  ;;  %v145_v11 = vmul.f32 %v4971_v56, %v4987_v10  ;;  %v151_v17 = vmul.f32 %v4975_v58, %v106_v54  ;;  %v152_v18 = vmul.f32 %v4977_v59, %v106_v54  ;;  %v3662_v62 = vld [vmem:[#allocation2 + $0x290] sm:$0xf0]  ;;  %v4506_v63 = vld [vmem:[#allocation2 + $0x84] sm:$0xf] }
  0x88   :  { %v286_v1 = vadd.f32 %v4996_v20, %v244_v28  ;;  %v287_v2 = vadd.f32 %v4998_v21, %v245_v29  ;;  %v288_v9 = vadd.f32 %v5004_v26, %v246_v43  ;;  %v289_v14 = vadd.f32 %v5006_v27, %v247_v44 }
  0x8a   :  { %v177_v30 = vpop.permute.xlu1 %176  ;;  %v318_v19 = vmax.f32 %v286_v1, 0.0  ;;  %v319_v22 = vmax.f32 %v287_v2, 0.0  ;;  %v4602_v2 = vld [vmem:[#allocation2 + $0x384] sm:$0xf] }
  0x8b   :  { %v96_v31 = vpop.permute.xlu0 %95  ;;  %v216_v32 = vmul.f32 %v4979_v60, %v177_v30  ;;  %v217_v33 = vmul.f32 %v4981_v61, %v177_v30  ;;  %v218_v34 = vmul.f32 %v4983_v6, %v177_v30  ;;  %v219_v35 = vmul.f32 %v4985_v7, %v177_v30 }
  0x8c   :  { %v141_v36 = vmul.f32 %v4971_v56, %v96_v31  ;;  %v142_v37 = vmul.f32 %v4973_v57, %v96_v31  ;;  %v143_v38 = vmul.f32 %v4975_v58, %v96_v31  ;;  %v144_v39 = vmul.f32 %v4977_v59, %v96_v31 }
  0x8e   :  { %v248_v48 = vadd.f32 %v216_v32, %v141_v36  ;;  %v249_v49 = vadd.f32 %v217_v33, %v142_v37  ;;  %v250_v50 = vadd.f32 %v218_v34, %v143_v38  ;;  %v251_v51 = vadd.f32 %v219_v35, %v144_v39 }
  0x8f   :  { %v320_v32 = vmax.f32 %v288_v9, 0.0  ;;  %v321_v36 = vmax.f32 %v289_v14, 0.0  ;;  %v146_v37 = vmul.f32 %v4973_v57, %v4987_v10  ;;  %v147_v38 = vmul.f32 %v4975_v58, %v4987_v10  ;;  %v3406_v10 = vld [vmem:[#allocation2 + $0x90] sm:$0xf0] }
  0x90   :  { %v290_v3 = vadd.f32 %v4996_v20, %v248_v48  ;;  %v291_v4 = vadd.f32 %v4998_v21, %v249_v49  ;;  %v292_v5 = vadd.f32 %v5004_v26, %v250_v50  ;;  %v293_v8 = vadd.f32 %v5006_v27, %v251_v51 }
  0x92   :  { %v185_v15 = vpop.permute.xlu1 %184  ;;  %v322_v23 = vmax.f32 %v290_v3, 0.0  ;;  %v323_v24 = vmax.f32 %v291_v4, 0.0  ;;  %v324_v25 = vmax.f32 %v292_v5, 0.0  ;;  %v325_v28 = vmax.f32 %v293_v8, 0.0  ;;  %v3790_v3 = vld [vmem:[#allocation2 + $0x390] sm:$0xf0] }
  0x93   :  { %v224_v29 = vmul.f32 %v4979_v60, %v185_v15  ;;  %v225_v30 = vmul.f32 %v4981_v61, %v185_v15  ;;  %v226_v33 = vmul.f32 %v4983_v6, %v185_v15  ;;  %v227_v34 = vmul.f32 %v4985_v7, %v185_v15 }
  0x94   :  { %v181_v16 = vpop.permute.xlu0 %180  ;;  %v5044_v42 = vpack.c.bf16 %v322_v23, %v318_v19  ;;  %v5046_v43 = vpack.c.bf16 %v323_v24, %v319_v22  ;;  %v5048_v44 = vpack.c.bf16 %v324_v25, %v320_v32  ;;  %v5050_v45 = vpack.c.bf16 %v325_v28, %v321_v36  ;;  %v189_v25 = vpop.permute.xlu2 %188 }
  0x95   :  { %v220_v31 = vmul.f32 %v4979_v60, %v181_v16  ;;  %v221_v35 = vmul.f32 %v4981_v61, %v181_v16  ;;  %v222_v39 = vmul.f32 %v4983_v6, %v181_v16  ;;  %v223_v40 = vmul.f32 %v4985_v7, %v181_v16 }
  0x96   :  { %v256_v47 = vadd.f32 %v224_v29, %v149_v12  ;;  %v257_v48 = vadd.f32 %v225_v30, %v150_v13  ;;  %v258_v50 = vadd.f32 %v226_v33, %v151_v17  ;;  %v259_v51 = vadd.f32 %v227_v34, %v152_v18  ;;  %1152 = vmatmul.bf16.vlgmr.msra.gmra.mxu0 %v5044_v42  ;;  %v3534_v12 = vld [vmem:[#allocation2 + $0x190] sm:$0xf0]  ;;  %v4566_v17 = vld [vmem:[#allocation2 + $0x264] sm:$0xf] }
  0x97   :  { %v252_v49 = vadd.f32 %v220_v31, %v145_v11  ;;  %v253_v52 = vadd.f32 %v221_v35, %v146_v37  ;;  %1181 = vmatmul.bf16.vlgmr.msra.gmra.mxu1 %v5046_v43  ;;  %v254_v53 = vadd.f32 %v222_v39, %v147_v38  ;;  %v255_v54 = vadd.f32 %v223_v40, %v148_v46  ;;  %v4538_v11 = vld [vmem:[#allocation2 + $0x184] sm:$0xf]  ;;  %v3646_v18 = vld [vmem:[#allocation2 + $0x270] sm:$0xf0] }
  0x98   :  { %1210 = vmatmul.bf16.vlgmr.msra.gmra.mxu2 %v5048_v44  ;;  %1239 = vmatmul.bf16.vlgmr.msra.gmra.mxu3 %v5050_v45  ;;  %v298_v0 = vadd.f32 %v4996_v20, %v256_v47  ;;  %v299_v4 = vadd.f32 %v4998_v21, %v257_v48  ;;  %v300_v5 = vadd.f32 %v5004_v26, %v258_v50  ;;  %v4502_v37 = vld [vmem:[#allocation2 + $0x64] sm:$0xf]  ;;  %v3390_v40 = vld [vmem:[#allocation2 + $0x70] sm:$0xf0] }
  0x99   :  { %v294_v1 = vadd.f32 %v4996_v20, %v252_v49  ;;  %v301_v8 = vadd.f32 %v5006_v27, %v259_v51  ;;  %v295_v9 = vadd.f32 %v4998_v21, %v253_v52  ;;  %v296_v13 = vadd.f32 %v5004_v26, %v254_v53  ;;  %v4598_v46 = vld [vmem:[#allocation2 + $0x364] sm:$0xf]  ;;  %v3774_v47 = vld [vmem:[#allocation2 + $0x370] sm:$0xf0] }
  0x9a   :  { %v297_v14 = vadd.f32 %v5006_v27, %v255_v54  ;;  %v3665_v15 = vor.u32 %v4570_v55, %v3662_v62  ;;  %v3409_v16 = vor.u32 %v4506_v63, %v3406_v10  ;;  %v3793_v19 = vor.u32 %v4602_v2, %v3790_v3  ;;  %v4534_v52 = vld [vmem:[#allocation2 + $0x164] sm:$0xf]  ;;  %v3518_v53 = vld [vmem:[#allocation2 + $0x170] sm:$0xf0] }
  0x9b   :  { %v116_v22 = vpop.permute.xlu1 %115  ;;  %v326_v23 = vmax.f32 %v294_v1, 0.0  ;;  %v3537_v24 = vor.u32 %v4538_v11, %v3534_v12  ;;  %v330_v28 = vmax.f32 %v298_v0, 0.0  ;;  %v327_v29 = vmax.f32 %v295_v9, 0.0  ;;  %v4562_v54 = vld [vmem:[#allocation2 + $0x244] sm:$0xf] }
  0x9c   :  { %1321 = vmatpush.bf16.msrb.mxu2 %v3665_v15  ;;  %1263 = vmatpush.bf16.msrb.mxu0 %v3409_v16  ;;  %v331_v30 = vmax.f32 %v299_v4, 0.0  ;;  %v3649_v31 = vor.u32 %v4566_v17, %v3646_v18  ;;  %v193_v32 = vpop.permute.xlu0 %192  ;;  %v328_v33 = vmax.f32 %v296_v13, 0.0  ;;  %v332_v34 = vmax.f32 %v300_v5, 0.0  ;;  %v3630_v0 = vld [vmem:[#allocation2 + $0x250] sm:$0xf0] }
  0x9d   :  { %1350 = vmatpush.bf16.msrb.mxu3 %v3793_v19  ;;  %v329_v35 = vmax.f32 %v297_v14, 0.0  ;;  %v333_v36 = vmax.f32 %v301_v8, 0.0  ;;  %1292 = vmatpush.bf16.msrb.mxu1 %v3537_v24  ;;  %v5068_v38 = vmul.f32 %v4971_v56, %v5042_v41  ;;  %v5072_v39 = vmul.f32 %v4973_v57, %v5042_v41  ;;  %v4498_v1 = vld [vmem:[#allocation2 + $0x44] sm:$0xf]  ;;  %v3374_v2 = vld [vmem:[#allocation2 + $0x50] sm:$0xf0] }
  0x9e   :  { %v5076_v48 = vmul.f32 %v4975_v58, %v5042_v41  ;;  %v228_v49 = vmul.f32 %v4979_v60, %v189_v25  ;;  %v157_v50 = vmul.f32 %v4971_v56, %v116_v22  ;;  %v158_v51 = vmul.f32 %v4973_v57, %v116_v22  ;;  %v4594_v9 = vld [vmem:[#allocation2 + $0x344] sm:$0xf]  ;;  %v3758_v11 = vld [vmem:[#allocation2 + $0x350] sm:$0xf0] }
  0x9f   :  { %v159_v55 = vmul.f32 %v4975_v58, %v116_v22  ;;  %v160_v62 = vmul.f32 %v4977_v59, %v116_v22  ;;  %v232_v63 = vmul.f32 %v4979_v60, %v193_v32  ;;  %v233_v10 = vmul.f32 %v4981_v61, %v193_v32  ;;  %v4530_v19 = vld [vmem:[#allocation2 + $0x144] sm:$0xf]  ;;  %v3502_v22 = vld [vmem:[#allocation2 + $0x150] sm:$0xf0] }
  0xa0   :  { %1322 = vmatpush.bf16.msrb.mxu2 %v3649_v31  ;;  %v234_v3 = vmul.f32 %v4983_v6, %v193_v32  ;;  %v235_v4 = vmul.f32 %v4985_v7, %v193_v32  ;;  %v3393_v5 = vor.u32 %v4502_v37, %v3390_v40  ;;  %v3777_v8 = vor.u32 %v4598_v46, %v3774_v47  ;;  %v4558_v32 = vld [vmem:[#allocation2 + $0x224] sm:$0xf]  ;;  %v3358_v46 = vld [vmem:[#allocation2 + $0x30] sm:$0xf0] }
  0xa1   :  { %v5087_v12 = vpack.c.bf16 %v330_v28, %v326_v23  ;;  %v5089_v13 = vpack.c.bf16 %v331_v30, %v327_v29  ;;  %v5091_v14 = vpack.c.bf16 %v332_v34, %v328_v33  ;;  %v3521_v15 = vor.u32 %v4534_v52, %v3518_v53  ;;  %v3614_v33 = vld [vmem:[#allocation2 + $0x230] sm:$0xf0]  ;;  %v4494_v34 = vld [vmem:[#allocation2 + $0x24] sm:$0xf] }
  0xa2   :  { %v5093_v16 = vpack.c.bf16 %v333_v36, %v329_v35  ;;  %1264 = vmatpush.bf16.msrb.mxu0 %v3393_v5  ;;  %1351 = vmatpush.bf16.msrb.mxu3 %v3777_v8  ;;  %v3633_v17 = vor.u32 %v4562_v54, %v3630_v0  ;;  %v3377_v18 = vor.u32 %v4498_v1, %v3374_v2  ;;  %v4590_v47 = vld [vmem:[#allocation2 + $0x324] sm:$0xf]  ;;  %v3742_v52 = vld [vmem:[#allocation2 + $0x330] sm:$0xf0] }
  0xa3   :  { %v229_v24 = vmul.f32 %v4981_v61, %v189_v25  ;;  %v230_v31 = vmul.f32 %v4983_v6, %v189_v25  ;;  %v3761_v23 = vor.u32 %v4594_v9, %v3758_v11  ;;  %v156_v28 = vmul.f32 %v4977_v59, %v5042_v41  ;;  %v5102_v30 = vpop.permute.xlu1 %120  ;;  %1293 = vmatpush.bf16.msrb.mxu1 %v3521_v15  ;;  %v4526_v54 = vld [vmem:[#allocation2 + $0x124] sm:$0xf]  ;;  %v3486_v0 = vld [vmem:[#allocation2 + $0x130] sm:$0xf0] }
  0xa4   :  { %v231_v29 = vmul.f32 %v4985_v7, %v189_v25  ;;  %v264_v35 = vadd.f32 %v232_v63, %v157_v50  ;;  %v265_v36 = vadd.f32 %v233_v10, %v158_v51  ;;  %v266_v37 = vadd.f32 %v234_v3, %v159_v55  ;;  %1323 = vmatpush.bf16.msrb.mxu2 %v3633_v17  ;;  %v4554_v1 = vld [vmem:[#allocation2 + $0x204] sm:$0xf]  ;;  %v3598_v55 = vld [vmem:[#allocation2 + $0x210] sm:$0xf0] }
  0xa5   :  { %v3505_v40 = vor.u32 %v4530_v19, %v3502_v22  ;;  %v267_v41 = vadd.f32 %v235_v4, %v160_v62  ;;  %v3617_v25 = vor.u32 %v4558_v32, %v3614_v33  ;;  %v3361_v53 = vor.u32 %v4494_v34, %v3358_v46  ;;  %v4490_v63 = vld [vmem:[#allocation2 + $0x4] sm:$0xf]  ;;  %v3342_v10 = vld [vmem:[#allocation2 + $0x10] sm:$0xf0] }
  0xa6   :  { %1157 = vmatmul.bf16.gmra.mxu0 %v5087_v12  ;;  %v260_v2 = vadd.f32 %v228_v49, %v5068_v38  ;;  %v261_v5 = vadd.f32 %v229_v24, %v5072_v39  ;;  %v262_v50 = vadd.f32 %v230_v31, %v5076_v48  ;;  %1352 = vmatpush.bf16.msrb.mxu3 %v3761_v23  ;;  %v4586_v62 = vld [vmem:[#allocation2 + $0x304] sm:$0xf]  ;;  %v3726_v4 = vld [vmem:[#allocation2 + $0x310] sm:$0xf0]  ;;  %v126_v49 = vpop.permute.xlu2 %125 }
  0xa7   :  { %1186 = vmatmul.bf16.gmra.mxu1 %v5089_v13  ;;  %1265 = vmatpush.bf16.msrb.mxu0 %v3377_v18  ;;  %v3745_v51 = vor.u32 %v4590_v47, %v3742_v52  ;;  %v263_v3 = vadd.f32 %v231_v29, %v156_v28  ;;  %v306_v8 = vadd.f32 %v4996_v20, %v264_v35  ;;  %v4522_v17 = vld [vmem:[#allocation2 + $0x104] sm:$0xf]  ;;  %v3470_v18 = vld [vmem:[#allocation2 + $0x110] sm:$0xf0] }
  0xa8   :  { %1215 = vmatmul.bf16.gmra.mxu2 %v5091_v14  ;;  %1244 = vmatmul.bf16.gmra.mxu3 %v5093_v16  ;;  %v307_v9 = vadd.f32 %v4998_v21, %v265_v36  ;;  %v308_v11 = vadd.f32 %v5004_v26, %v266_v37  ;;  %v3489_v38 = vor.u32 %v4526_v54, %v3486_v0  ;;  %v197_v0 = vpop.permute.xlu0 %196 }
  0xa9   :  { %1294 = vmatpush.bf16.msrb.mxu1 %v3505_v40  ;;  %v309_v39 = vadd.f32 %v5006_v27, %v267_v41  ;;  %1324 = vmatpush.bf16.msrb.mxu2 %v3617_v25  ;;  %v3601_v48 = vor.u32 %v4554_v1, %v3598_v55  ;;  %v3345_v15 = vor.u32 %v4490_v63, %v3342_v10  ;;  %v338_v29 = vmax.f32 %v306_v8, 0.0  ;;  %v3716_v8 = vld [vmem:[#allocation2 + $0x2e8] sm:$0xf] }
  0xaa   :  { %v302_v19 = vadd.f32 %v4996_v20, %v260_v2  ;;  %v303_v22 = vadd.f32 %v4998_v21, %v261_v5  ;;  %v304_v24 = vadd.f32 %v5004_v26, %v262_v50  ;;  %1353 = vmatpush.bf16.msrb.mxu3 %v3745_v51  ;;  %v3729_v31 = vor.u32 %v4586_v62, %v3726_v4 }
  0xab   :  { %1266 = vmatpush.bf16.msrb.mxu0 %v3361_v53  ;;  %v305_v23 = vadd.f32 %v5006_v27, %v263_v3  ;;  %v165_v28 = vmul.f32 %v4971_v56, %v126_v49  ;;  %v339_v32 = vmax.f32 %v307_v9, 0.0  ;;  %v3473_v33 = vor.u32 %v4522_v17, %v3470_v18  ;;  %v4585_v9 = vld [vmem:[#allocation2 + $0x2f4] sm:$0xf0] }
  0xac   :  { %v166_v34 = vmul.f32 %v4973_v57, %v126_v49  ;;  %v167_v35 = vmul.f32 %v4975_v58, %v126_v49  ;;  %v201_v36 = vpop.permute.xlu1 %200  ;;  %v340_v37 = vmax.f32 %v308_v11, 0.0  ;;  %v341_v40 = vmax.f32 %v309_v39, 0.0  ;;  %v3844_v39 = vld [vmem:[#allocation2 + $0x3e8] sm:$0xf] }
  0xad   :  { %1295 = vmatpush.bf16.msrb.mxu1 %v3489_v38  ;;  %1325 = vmatpush.bf16.msrb.mxu2 %v3601_v48  ;;  %v168_v46 = vmul.f32 %v4977_v59, %v126_v49  ;;  %v334_v47 = vmax.f32 %v302_v19, 0.0  ;;  %v335_v52 = vmax.f32 %v303_v22, 0.0  ;;  %v336_v41 = vmax.f32 %v304_v24, 0.0  ;;  %v4617_v49 = vld [vmem:[#allocation2 + $0x3f4] sm:$0xf0] }
  0xae   :  { %1354 = vmatpush.bf16.msrb.mxu3 %v3729_v31  ;;  %v161_v25 = vmul.f32 %v4971_v56, %v5102_v30  ;;  %v162_v53 = vmul.f32 %v4973_v57, %v5102_v30  ;;  %v163_v54 = vmul.f32 %v4975_v58, %v5102_v30  ;;  %v337_v1 = vmax.f32 %v305_v23, 0.0  ;;  %v4581_v23 = vld [vmem:[#allocation2 + $0x2d4] sm:$0xf0] }
  0xaf   :  { %1267 = vmatpush.bf16.msrb.mxu0 %v3345_v15  ;;  %v240_v2 = vmul.f32 %v4979_v60, %v201_v36  ;;  %v241_v5 = vmul.f32 %v4981_v61, %v201_v36  ;;  %v5129_v50 = vpack.c.bf16 %v338_v29, %v334_v47  ;;  %v5131_v51 = vpack.c.bf16 %v339_v32, %v335_v52  ;;  %v3444_v29 = vld [vmem:[#allocation2 + $0xc8] sm:$0xf]  ;;  %v4549_v52 = vld [vmem:[#allocation2 + $0x1d4] sm:$0xf0] }
  0xb0   :  { %v242_v55 = vmul.f32 %v4983_v6, %v201_v36  ;;  %v243_v56 = vmul.f32 %v4985_v7, %v201_v36  ;;  %v5135_v63 = vpack.c.bf16 %v340_v37, %v336_v41  ;;  %v5137_v57 = vpack.c.bf16 %v341_v40, %v337_v1  ;;  %v4613_v36 = vld [vmem:[#allocation2 + $0x3d4] sm:$0xf0]  ;;  %v3572_v37 = vld [vmem:[#allocation2 + $0x1c8] sm:$0xf] }
  0xb1   :  { %1296 = vmatpush.bf16.msrb.mxu1 %v3473_v33  ;;  %v236_v58 = vmul.f32 %v4979_v60, %v197_v0  ;;  %v237_v10 = vmul.f32 %v4981_v61, %v197_v0  ;;  %v238_v3 = vmul.f32 %v4983_v6, %v197_v0  ;;  %v164_v62 = vmul.f32 %v4977_v59, %v5102_v30  ;;  %v3460_v60 = vld [vmem:[#allocation2 + $0xe8] sm:$0xf]  ;;  %v4521_v6 = vld [vmem:[#allocation2 + $0xf4] sm:$0xf0] }
  0xb2   :  { %v239_v4 = vmul.f32 %v4985_v7, %v197_v0  ;;  %v272_v11 = vadd.f32 %v240_v2, %v165_v28  ;;  %v273_v61 = vadd.f32 %v241_v5, %v166_v34  ;;  %v3717_v38 = vor.u32 %v4585_v9, %v3716_v8  ;;  %v3588_v59 = vld [vmem:[#allocation2 + $0x1e8] sm:$0xf]  ;;  %v4553_v30 = vld [vmem:[#allocation2 + $0x1f4] sm:$0xf0] }
  0xb3   :  { %v274_v48 = vadd.f32 %v242_v55, %v167_v35  ;;  %v275_v15 = vadd.f32 %v243_v56, %v168_v46  ;;  %v3461_v17 = vor.u32 %v4521_v6, %v3460_v60  ;;  %v3845_v18 = vor.u32 %v4617_v49, %v3844_v39  ;;  %v3700_v7 = vld [vmem:[#allocation2 + $0x2c8] sm:$0xf]  ;;  %v4517_v28 = vld [vmem:[#allocation2 + $0xd4] sm:$0xf0] }
  0xb4   :  { %v268_v19 = vadd.f32 %v236_v58, %v161_v25  ;;  %v269_v22 = vadd.f32 %v237_v10, %v162_v53  ;;  %v270_v24 = vadd.f32 %v238_v3, %v163_v54  ;;  %1434 = vmatpush.bf16.msra.mxu2 %v3717_v38  ;;  %v3589_v31 = vor.u32 %v4553_v30, %v3588_v59  ;;  %v3828_v35 = vld [vmem:[#allocation2 + $0x3c8] sm:$0xf]  ;;  %v4577_v9 = vld [vmem:[#allocation2 + $0x2b4] sm:$0xf0] }
  0xb5   :  { %v271_v32 = vadd.f32 %v239_v4, %v164_v62  ;;  %1376 = vmatpush.bf16.msra.mxu0 %v3461_v17  ;;  %1463 = vmatpush.bf16.msra.mxu3 %v3845_v18  ;;  %v3701_v33 = vor.u32 %v4581_v23, %v3700_v7  ;;  %v3445_v34 = vor.u32 %v4517_v28, %v3444_v29  ;;  %v3428_v60 = vld [vmem:[#allocation2 + $0xa8] sm:$0xf]  ;;  %v4609_v6 = vld [vmem:[#allocation2 + $0x3b4] sm:$0xf0] }
  0xb6   :  { %1162 = vmatmul.bf16.gmra.mxu0 %v5129_v50  ;;  %v314_v40 = vadd.f32 %v4996_v20, %v272_v11  ;;  %v315_v46 = vadd.f32 %v4998_v21, %v273_v61  ;;  %1405 = vmatpush.bf16.msra.mxu1 %v3589_v31  ;;  %v3829_v47 = vor.u32 %v4613_v36, %v3828_v35  ;;  %v4513_v61 = vld [vmem:[#allocation2 + $0xb4] sm:$0xf0]  ;;  %v3812_v38 = vld [vmem:[#allocation2 + $0x3a8] sm:$0xf] }
  0xb7   :  { %1191 = vmatmul.bf16.gmra.mxu1 %v5131_v51  ;;  %v316_v41 = vadd.f32 %v5004_v26, %v274_v48  ;;  %v317_v25 = vadd.f32 %v5006_v27, %v275_v15  ;;  %v3573_v53 = vor.u32 %v4549_v52, %v3572_v37  ;;  %v310_v54 = vadd.f32 %v4996_v20, %v268_v19  ;;  %v3556_v48 = vld [vmem:[#allocation2 + $0x1a8] sm:$0xf]  ;;  %v4545_v15 = vld [vmem:[#allocation2 + $0x1b4] sm:$0xf0] }
  0xb8   :  { %1220 = vmatmul.bf16.gmra.mxu2 %v5135_v63  ;;  %1249 = vmatmul.bf16.gmra.mxu3 %v5137_v57  ;;  %v311_v0 = vadd.f32 %v4998_v21, %v269_v22  ;;  %v312_v1 = vadd.f32 %v5004_v26, %v270_v24  ;;  %v313_v2 = vadd.f32 %v5006_v27, %v271_v32  ;;  %v346_v5 = vmax.f32 %v314_v40, 0.0  ;;  %v3684_v27 = vld [vmem:[#allocation2 + $0x2a8] sm:$0xf]  ;;  %v4573_v59 = vld [vmem:[#allocation2 + $0x294] sm:$0xf0] }
  0xb9   :  { %1435 = vmatpush.bf16.msra.mxu2 %v3701_v33  ;;  %1377 = vmatpush.bf16.msra.mxu0 %v3445_v34  ;;  %v347_v55 = vmax.f32 %v315_v46, 0.0  ;;  %v348_v56 = vmax.f32 %v316_v41, 0.0  ;;  %v349_v58 = vmax.f32 %v317_v25, 0.0  ;;  %v342_v10 = vmax.f32 %v310_v54, 0.0  ;;  %v3668_v17 = vld [vmem:[#allocation2 + $0x288] sm:$0xf] }
  0xba   :  { %1464 = vmatpush.bf16.msra.mxu3 %v3829_v47  ;;  %1406 = vmatpush.bf16.msra.mxu1 %v3573_v53  ;;  %v343_v3 = vmax.f32 %v311_v0, 0.0  ;;  %v344_v62 = vmax.f32 %v312_v1, 0.0  ;;  %v345_v4 = vmax.f32 %v313_v2, 0.0  ;;  %v3685_v11 = vor.u32 %v4577_v9, %v3684_v27  ;;  %v3412_v30 = vld [vmem:[#allocation2 + $0x88] sm:$0xf] }
  0xbb   :  { %v5157_v8 = vpack.c.bf16 %v346_v5, %v342_v10  ;;  %v3429_v39 = vor.u32 %v4513_v61, %v3428_v60  ;;  %v3813_v49 = vor.u32 %v4609_v6, %v3812_v38  ;;  %v3557_v18 = vor.u32 %v4545_v15, %v3556_v48  ;;  %v4509_v7 = vld [vmem:[#allocation2 + $0x94] sm:$0xf0]  ;;  %v3796_v24 = vld [vmem:[#allocation2 + $0x388] sm:$0xf] }
  0xbc   :  { %v5159_v20 = vpack.c.bf16 %v347_v55, %v343_v3  ;;  %v5161_v21 = vpack.c.bf16 %v348_v56, %v344_v62  ;;  %v5163_v26 = vpack.c.bf16 %v349_v58, %v345_v4  ;;  %v3669_v19 = vor.u32 %v4573_v59, %v3668_v17  ;;  %v4605_v31 = vld [vmem:[#allocation2 + $0x394] sm:$0xf0]  ;;  %v3540_v23 = vld [vmem:[#allocation2 + $0x188] sm:$0xf] }
  0xbd   :  { %1436 = vmatpush.bf16.msra.mxu2 %v3685_v11  ;;  %1378 = vmatpush.bf16.msra.mxu0 %v3429_v39  ;;  %v3413_v22 = vor.u32 %v4509_v7, %v3412_v30  ;;  %v3797_v29 = vor.u32 %v4605_v31, %v3796_v24  ;;  %v4541_v28 = vld [vmem:[#allocation2 + $0x194] sm:$0xf0]  ;;  %v3652_v33 = vld [vmem:[#allocation2 + $0x268] sm:$0xf] }
  0xbe   :  { %1465 = vmatpush.bf16.msra.mxu3 %v3813_v49  ;;  %1407 = vmatpush.bf16.msra.mxu1 %v3557_v18  ;;  %v3541_v32 = vor.u32 %v4541_v28, %v3540_v23  ;;  %v4569_v34 = vld [vmem:[#allocation2 + $0x274] sm:$0xf0]  ;;  %v3396_v35 = vld [vmem:[#allocation2 + $0x68] sm:$0xf] }
  0xbf   :  { %v3653_v36 = vor.u32 %v4569_v34, %v3652_v33  ;;  %v4505_v37 = vld [vmem:[#allocation2 + $0x74] sm:$0xf0]  ;;  %v3780_v40 = vld [vmem:[#allocation2 + $0x368] sm:$0xf]  ;;  %v4583_v33 = vld [vmem:[#allocation2 + $0x2ec] sm:$0xf] }
  0xc0   :  { %v4601_v46 = vld [vmem:[#allocation2 + $0x374] sm:$0xf0]  ;;  %v3397_v47 = vor.u32 %v4505_v37, %v3396_v35  ;;  %v3524_v41 = vld [vmem:[#allocation2 + $0x168] sm:$0xf]  ;;  %v3718_v34 = vld [vmem:[#allocation2 + $0x2f8] sm:$0xf0] }
  0xc1   :  { %1437 = vmatpush.bf16.msra.mxu2 %v3669_v19  ;;  %1379 = vmatpush.bf16.msra.mxu0 %v3413_v22  ;;  %v3781_v52 = vor.u32 %v4601_v46, %v3780_v40  ;;  %v4537_v25 = vld [vmem:[#allocation2 + $0x174] sm:$0xf0]  ;;  %v3636_v53 = vld [vmem:[#allocation2 + $0x248] sm:$0xf]  ;;  %v4519_v35 = vld [vmem:[#allocation2 + $0xec] sm:$0xf] }
  0xc2   :  { %1466 = vmatpush.bf16.msra.mxu3 %v3797_v29  ;;  %1408 = vmatpush.bf16.msra.mxu1 %v3541_v32  ;;  %v3525_v54 = vor.u32 %v4537_v25, %v3524_v41  ;;  %v4565_v0 = vld [vmem:[#allocation2 + $0x254] sm:$0xf0]  ;;  %v3380_v1 = vld [vmem:[#allocation2 + $0x48] sm:$0xf]  ;;  %v3462_v37 = vld [vmem:[#allocation2 + $0xf8] sm:$0xf0] }
  0xc3   :  { %v4501_v2 = vld [vmem:[#allocation2 + $0x54] sm:$0xf0]  ;;  %v3637_v5 = vor.u32 %v4565_v0, %v3636_v53  ;;  %v3764_v56 = vld [vmem:[#allocation2 + $0x348] sm:$0xf]  ;;  %v4615_v40 = vld [vmem:[#allocation2 + $0x3ec] sm:$0xf] }
  0xc4   :  { %v3381_v55 = vor.u32 %v4501_v2, %v3380_v1  ;;  %v4597_v58 = vld [vmem:[#allocation2 + $0x354] sm:$0xf0]  ;;  %v3508_v10 = vld [vmem:[#allocation2 + $0x148] sm:$0xf]  ;;  %v3846_v46 = vld [vmem:[#allocation2 + $0x3f8] sm:$0xf0] }
  0xc5   :  { %1438 = vmatpush.bf16.msra.mxu2 %v3653_v36  ;;  %1380 = vmatpush.bf16.msra.mxu0 %v3397_v47  ;;  %v3765_v3 = vor.u32 %v4597_v58, %v3764_v56  ;;  %v4533_v62 = vld [vmem:[#allocation2 + $0x154] sm:$0xf0]  ;;  %v3620_v27 = vld [vmem:[#allocation2 + $0x228] sm:$0xf]  ;;  %v3721_v36 = vor.u32 %v4583_v33, %v3718_v34  ;;  %v3465_v47 = vor.u32 %v4519_v35, %v3462_v37  ;;  %v4551_v41 = vld [vmem:[#allocation2 + $0x1ec] sm:$0xf] }
  0xc6   :  { %1167 = vmatmul.bf16.gmra.mxu0 %v5157_v8  ;;  %1467 = vmatpush.bf16.msra.mxu3 %v3781_v52  ;;  %v3509_v4 = vor.u32 %v4533_v62, %v3508_v10  ;;  %v4561_v9 = vld [vmem:[#allocation2 + $0x234] sm:$0xf0]  ;;  %v3364_v60 = vld [vmem:[#allocation2 + $0x28] sm:$0xf]  ;;  %v3849_v52 = vor.u32 %v4615_v40, %v3846_v46  ;;  %v3590_v25 = vld [vmem:[#allocation2 + $0x1f8] sm:$0xf0] }
  0xc7   :  { %1196 = vmatmul.bf16.gmra.mxu1 %v5159_v20  ;;  %v3621_v11 = vor.u32 %v4561_v9, %v3620_v27  ;;  %v4497_v61 = vld [vmem:[#allocation2 + $0x34] sm:$0xf0]  ;;  %v3748_v38 = vld [vmem:[#allocation2 + $0x328] sm:$0xf]  ;;  %v4579_v53 = vld [vmem:[#allocation2 + $0x2cc] sm:$0xf] }
  0xc8   :  { %1225 = vmatmul.bf16.gmra.mxu2 %v5161_v21  ;;  %1254 = vmatmul.bf16.gmra.mxu3 %v5163_v26  ;;  %v4593_v6 = vld [vmem:[#allocation2 + $0x334] sm:$0xf0]  ;;  %v3365_v39 = vor.u32 %v4497_v61, %v3364_v60  ;;  %v3492_v48 = vld [vmem:[#allocation2 + $0x128] sm:$0xf]  ;;  %v3702_v0 = vld [vmem:[#allocation2 + $0x2d8] sm:$0xf0] }
  0xc9   :  { %1409 = vmatpush.bf16.msra.mxu1 %v3525_v54  ;;  %1439 = vmatpush.bf16.msra.mxu2 %v3637_v5  ;;  %v3749_v49 = vor.u32 %v4593_v6, %v3748_v38  ;;  %v4529_v15 = vld [vmem:[#allocation2 + $0x134] sm:$0xf0]  ;;  %v3604_v17 = vld [vmem:[#allocation2 + $0x208] sm:$0xf]  ;;  %v3593_v54 = vor.u32 %v4551_v41, %v3590_v25  ;;  %v4515_v1 = vld [vmem:[#allocation2 + $0xcc] sm:$0xf]  ;;  %v3705_v5 = vor.u32 %v4579_v53, %v3702_v0 }
  0xca   :  { %1381 = vmatpush.bf16.msra.mxu0 %v3381_v55  ;;  %1468 = vmatpush.bf16.msra.mxu3 %v3765_v3  ;;  %v3493_v18 = vor.u32 %v4529_v15, %v3492_v48  ;;  %v4557_v59 = vld [vmem:[#allocation2 + $0x214] sm:$0xf0]  ;;  %v3348_v30 = vld [vmem:[#allocation2 + $0x8] sm:$0xf]  ;;  %v3446_v2 = vld [vmem:[#allocation2 + $0xd8] sm:$0xf0] }
  0xcb   :  { %v4493_v7 = vld [vmem:[#allocation2 + $0x14] sm:$0xf0]  ;;  %v3605_v19 = vor.u32 %v4557_v59, %v3604_v17  ;;  %v3732_v24 = vld [vmem:[#allocation2 + $0x308] sm:$0xf]  ;;  %v3449_v55 = vor.u32 %v4515_v1, %v3446_v2  ;;  %v4611_v56 = vld [vmem:[#allocation2 + $0x3cc] sm:$0xf] }
  0xcc   :  { %v3349_v22 = vor.u32 %v4493_v7, %v3348_v30  ;;  %v4589_v31 = vld [vmem:[#allocation2 + $0x314] sm:$0xf0]  ;;  %v3476_v23 = vld [vmem:[#allocation2 + $0x108] sm:$0xf]  ;;  %v3830_v58 = vld [vmem:[#allocation2 + $0x3d8] sm:$0xf0] }
  0xcd   :  { %1410 = vmatpush.bf16.msra.mxu1 %v3509_v4  ;;  %1440 = vmatpush.bf16.msra.mxu2 %v3621_v11  ;;  %v3733_v29 = vor.u32 %v4589_v31, %v3732_v24  ;;  %v4525_v28 = vld [vmem:[#allocation2 + $0x114] sm:$0xf0]  ;;  %v3833_v10 = vor.u32 %v4611_v56, %v3830_v58  ;;  %v4547_v3 = vld [vmem:[#allocation2 + $0x1cc] sm:$0xf]  ;;  %v3574_v62 = vld [vmem:[#allocation2 + $0x1d8] sm:$0xf0] }
  0xce   :  { %1382 = vmatpush.bf16.msra.mxu0 %v3365_v39  ;;  %1469 = vmatpush.bf16.msra.mxu3 %v3749_v49  ;;  %v3477_v32 = vor.u32 %v4525_v28, %v3476_v23  ;;  %v4575_v4 = vld [vmem:[#allocation2 + $0x2ac] sm:$0xf]  ;;  %v3577_v27 = vor.u32 %v4547_v3, %v3574_v62  ;;  %v3686_v9 = vld [vmem:[#allocation2 + $0x2b8] sm:$0xf0]  ;;  %v5188_v61 = vld [vmem:[%s5692_s4] sm:$0xf] }
  0xcf   :  { %v4511_v60 = vld [vmem:[#allocation2 + $0xac] sm:$0xf]  ;;  %v3430_v11 = vld [vmem:[#allocation2 + $0xb8] sm:$0xf0]  ;;  %v3689_v38 = vor.u32 %v4575_v4, %v3686_v9  ;;  %v5191_v15 = vperm.slane %v5188_v61, 0 }
  0xd0   :  { %v3433_v6 = vor.u32 %v4511_v60, %v3430_v11  ;;  %v4607_v39 = vld [vmem:[#allocation2 + $0x3ac] sm:$0xf]  ;;  %v3814_v49 = vld [vmem:[#allocation2 + $0x3b8] sm:$0xf0] }
  0xd1   :  { %1411 = vmatpush.bf16.msra.mxu1 %v3493_v18  ;;  %1441 = vmatpush.bf16.msra.mxu2 %v3605_v19  ;;  %v3817_v48 = vor.u32 %v4607_v39, %v3814_v49  ;;  %v4543_v17 = vld [vmem:[#allocation2 + $0x1ac] sm:$0xf]  ;;  %v3558_v18 = vld [vmem:[#allocation2 + $0x1b8] sm:$0xf0] }
  0xd2   :  { %1383 = vmatpush.bf16.msra.mxu0 %v3349_v22  ;;  %1470 = vmatpush.bf16.msra.mxu3 %v3733_v29  ;;  %v4571_v59 = vld [vmem:[#allocation2 + $0x28c] sm:$0xf]  ;;  %v3561_v30 = vor.u32 %v4543_v17, %v3558_v18  ;;  %v3670_v7 = vld [vmem:[#allocation2 + $0x298] sm:$0xf0] }
  0xd3   :  { %v4507_v19 = vld [vmem:[#allocation2 + $0x8c] sm:$0xf]  ;;  %v3414_v22 = vld [vmem:[#allocation2 + $0x98] sm:$0xf0]  ;;  %v3673_v24 = vor.u32 %v4571_v59, %v3670_v7 }
  0xd4   :  { %v3417_v31 = vor.u32 %v4507_v19, %v3414_v22  ;;  %v4603_v23 = vld [vmem:[#allocation2 + $0x38c] sm:$0xf]  ;;  %v3798_v29 = vld [vmem:[#allocation2 + $0x398] sm:$0xf0] }
  0xd5   :  { %1412 = vmatpush.bf16.msra.mxu1 %v3477_v32  ;;  %v3801_v28 = vor.u32 %v4603_v23, %v3798_v29  ;;  %v3542_v37 = vld [vmem:[#allocation2 + $0x198] sm:$0xf0]  ;;  %v4567_v40 = vld [vmem:[#allocation2 + $0x26c] sm:$0xf] }
  0xd6   :  { %1268 = vmatmul.bf16.vlgmr.msrb.gmra.mxu0 %v5044_v42  ;;  %v3654_v41 = vld [vmem:[#allocation2 + $0x278] sm:$0xf0]  ;;  %v4503_v25 = vld [vmem:[#allocation2 + $0x6c] sm:$0xf] }
  0xd7   :  { %1297 = vmatmul.bf16.vlgmr.msrb.gmra.mxu1 %v5046_v43  ;;  %1492 = vmatpush.bf16.msrb.mxu0 %v3465_v47  ;;  %v3398_v53 = vld [vmem:[#allocation2 + $0x78] sm:$0xf0]  ;;  %v3657_v2 = vor.u32 %v4567_v40, %v3654_v41  ;;  %v4535_v4 = vld [vmem:[#allocation2 + $0x16c] sm:$0xf] }
  0xd8   :  { %1326 = vmatmul.bf16.vlgmr.msrb.gmra.mxu2 %v5048_v44  ;;  %1355 = vmatmul.bf16.vlgmr.msrb.gmra.mxu3 %v5050_v45  ;;  %v3782_v56 = vld [vmem:[#allocation2 + $0x378] sm:$0xf0]  ;;  %v4563_v60 = vld [vmem:[#allocation2 + $0x24c] sm:$0xf] }
  0xd9   :  { %1550 = vmatpush.bf16.msrb.mxu2 %v3721_v36  ;;  %1579 = vmatpush.bf16.msrb.mxu3 %v3849_v52  ;;  %v4539_v36 = vld [vmem:[#allocation2 + $0x18c] sm:$0xf]  ;;  %v3638_v11 = vld [vmem:[#allocation2 + $0x258] sm:$0xf0] }
  0xda   :  { %1521 = vmatpush.bf16.msrb.mxu1 %v3593_v54  ;;  %v3545_v52 = vor.u32 %v4539_v36, %v3542_v37  ;;  %v3382_v39 = vld [vmem:[#allocation2 + $0x58] sm:$0xf0]  ;;  %v4595_v49 = vld [vmem:[#allocation2 + $0x34c] sm:$0xf] }
  0xdb   :  { %1493 = vmatpush.bf16.msrb.mxu0 %v3449_v55  ;;  %v4599_v55 = vld [vmem:[#allocation2 + $0x36c] sm:$0xf] }
  0xdd   :  { %1551 = vmatpush.bf16.msrb.mxu2 %v3705_v5  ;;  %1580 = vmatpush.bf16.msrb.mxu3 %v3833_v10  ;;  %v3401_v5 = vor.u32 %v4503_v25, %v3398_v53  ;;  %v3785_v10 = vor.u32 %v4599_v55, %v3782_v56 }
  0xde   :  { %1522 = vmatpush.bf16.msrb.mxu1 %v3577_v27  ;;  %v3526_v27 = vld [vmem:[#allocation2 + $0x178] sm:$0xf0] }
  0xdf   :  { %1494 = vmatpush.bf16.msrb.mxu0 %v3433_v6  ;;  %v3529_v9 = vor.u32 %v4535_v4, %v3526_v27  ;;  %v3641_v6 = vor.u32 %v4563_v60, %v3638_v11  ;;  %v4555_v4 = vld [vmem:[#allocation2 + $0x20c] sm:$0xf]  ;;  %v3606_v27 = vld [vmem:[#allocation2 + $0x218] sm:$0xf0] }
  0xe0   :  { %v3609_v60 = vor.u32 %v4555_v4, %v3606_v27  ;;  %v3350_v11 = vld [vmem:[#allocation2 + $0x18] sm:$0xf0] }
  0xe1   :  { %1552 = vmatpush.bf16.msrb.mxu2 %v3689_v38  ;;  %1581 = vmatpush.bf16.msrb.mxu3 %v3817_v48  ;;  %v4499_v38 = vld [vmem:[#allocation2 + $0x4c] sm:$0xf]  ;;  %v3766_v48 = vld [vmem:[#allocation2 + $0x358] sm:$0xf0] }
  0xe2   :  { %1523 = vmatpush.bf16.msrb.mxu1 %v3561_v30  ;;  %v3385_v59 = vor.u32 %v4499_v38, %v3382_v39  ;;  %v3769_v30 = vor.u32 %v4595_v49, %v3766_v48  ;;  %v4587_v38 = vld [vmem:[#allocation2 + $0x30c] sm:$0xf] }
  0xe3   :  { %1495 = vmatpush.bf16.msrb.mxu0 %v3417_v31 }
  0xe5   :  { %1553 = vmatpush.bf16.msrb.mxu2 %v3673_v24  ;;  %1582 = vmatpush.bf16.msrb.mxu3 %v3801_v28 }
  0xe6   :  { %1273 = vmatmul.bf16.gmra.mxu0 %v5087_v12  ;;  %1524 = vmatpush.bf16.msrb.mxu1 %v3545_v52  ;;  %v3366_v52 = vld [vmem:[#allocation2 + $0x38] sm:$0xf0] }
  0xe7   :  { %1302 = vmatmul.bf16.gmra.mxu1 %v5089_v13  ;;  %1496 = vmatpush.bf16.msrb.mxu0 %v3401_v5 }
  0xe8   :  { %1331 = vmatmul.bf16.gmra.mxu2 %v5091_v14  ;;  %1360 = vmatmul.bf16.gmra.mxu3 %v5093_v16 }
  0xe9   :  { %1554 = vmatpush.bf16.msrb.mxu2 %v3657_v2  ;;  %1583 = vmatpush.bf16.msrb.mxu3 %v3785_v10  ;;  %v3750_v2 = vld [vmem:[#allocation2 + $0x338] sm:$0xf0]  ;;  %v4527_v10 = vld [vmem:[#allocation2 + $0x12c] sm:$0xf] }
  0xea   :  { %1525 = vmatpush.bf16.msrb.mxu1 %v3529_v9  ;;  %v4491_v9 = vld [vmem:[#allocation2 + $0xc] sm:$0xf] }
  0xeb   :  { %1497 = vmatpush.bf16.msrb.mxu0 %v3385_v59  ;;  %v3353_v48 = vor.u32 %v4491_v9, %v3350_v11 }
  0xed   :  { %1555 = vmatpush.bf16.msrb.mxu2 %v3641_v6  ;;  %1584 = vmatpush.bf16.msrb.mxu3 %v3769_v30  ;;  %v3734_v6 = vld [vmem:[#allocation2 + $0x318] sm:$0xf0] }
  0xf6   :  { %1278 = vmatmul.bf16.gmra.mxu0 %v5129_v50 }
  0xf7   :  { %1307 = vmatmul.bf16.gmra.mxu1 %v5131_v51 }
  0xf8   :  { %1336 = vmatmul.bf16.gmra.mxu2 %v5135_v63  ;;  %1365 = vmatmul.bf16.gmra.mxu3 %v5137_v57 }
 0x106   :  { %1283 = vmatmul.bf16.gmra.mxu0 %v5157_v8 }
 0x107   :  { %1312 = vmatmul.bf16.gmra.mxu1 %v5159_v20 }
 0x108   :  { %1341 = vmatmul.bf16.gmra.mxu2 %v5161_v21  ;;  %1370 = vmatmul.bf16.gmra.mxu3 %v5163_v26 }
 0x113   :  { %v1153_v32 = vpop.f32.mrf.mxu0 }
 0x114   :  { %v1182_v33 = vpop.f32.mrf.mxu1  ;;  %v1154_v34 = vadd.f32 %v1153_v32, %v5191_v15 }
 0x116   :  { %v1183_v35 = vadd.f32 %v1182_v33, %v1154_v34  ;;  %1384 = vmatmul.bf16.vlgmr.msra.gmra.mxu0 %v5044_v42  ;;  %v4531_v33 = vld [vmem:[#allocation2 + $0x14c] sm:$0xf]  ;;  %v3510_v34 = vld [vmem:[#allocation2 + $0x158] sm:$0xf0] }
 0x117   :  { %1413 = vmatmul.bf16.vlgmr.msra.gmra.mxu1 %v5046_v43  ;;  %v3513_v40 = vor.u32 %v4531_v33, %v3510_v34 }
 0x118   :  { %1442 = vmatmul.bf16.vlgmr.msra.gmra.mxu2 %v5048_v44  ;;  %1471 = vmatmul.bf16.vlgmr.msra.gmra.mxu3 %v5050_v45 }
 0x119   :  { %1526 = vmatpush.bf16.msrb.mxu1 %v3513_v40 }
 0x11b   :  { %v1211_v46 = vpop.f32.mrf.mxu2  ;;  %v1240_v47 = vpop.f32.mrf.mxu3 }
 0x11c   :  { %v1212_v54 = vadd.f32 %v1211_v46, %v1183_v35  ;;  %v1155_v0 = vpop.f32.mrf.mxu0  ;;  %v1184_v1 = vpop.f32.mrf.mxu1  ;;  %v4559_v35 = vld [vmem:[#allocation2 + $0x22c] sm:$0xf]  ;;  %v3622_v46 = vld [vmem:[#allocation2 + $0x238] sm:$0xf0] }
 0x11d   :  { %v1156_v58 = vadd.f32 %v1155_v0, %v5191_v15 }
 0x11e   :  { %v1241_v3 = vadd.f32 %v1240_v47, %v1212_v54  ;;  %v4495_v47 = vld [vmem:[#allocation2 + $0x2c] sm:$0xf]  ;;  %v3625_v54 = vor.u32 %v4559_v35, %v3622_v46 }
 0x11f   :  { %v1185_v62 = vadd.f32 %v1184_v1, %v1156_v58  ;;  %v3369_v0 = vor.u32 %v4495_v47, %v3366_v52  ;;  %v4591_v1 = vld [vmem:[#allocation2 + $0x32c] sm:$0xf] }
 0x120   :  { %v1608_v29 = vmax.f32 %v1241_v3, 0.0  ;;  %v3753_v55 = vor.u32 %v4591_v1, %v3750_v2  ;;  %1556 = vmatpush.bf16.msrb.mxu2 %v3625_v54  ;;  %v3494_v3 = vld [vmem:[#allocation2 + $0x138] sm:$0xf0] }
 0x121   :  { %1498 = vmatpush.bf16.msrb.mxu0 %v3369_v0 }
 0x122   :  { %1585 = vmatpush.bf16.msrb.mxu3 %v3753_v55 }
 0x123   :  { %v1213_v17 = vpop.f32.mrf.mxu2  ;;  %v1242_v18 = vpop.f32.mrf.mxu3 }
 0x124   :  { %v1214_v7 = vadd.f32 %v1213_v17, %v1185_v62  ;;  %v1158_v19 = vpop.f32.mrf.mxu0  ;;  %v1187_v22 = vpop.f32.mrf.mxu1  ;;  %v3497_v62 = vor.u32 %v4527_v10, %v3494_v3  ;;  %v3737_v17 = vor.u32 %v4587_v38, %v3734_v6  ;;  %1557 = vmatpush.bf16.msrb.mxu2 %v3609_v60 }
 0x125   :  { %v1159_v24 = vadd.f32 %v1158_v19, %v5191_v15  ;;  %1499 = vmatpush.bf16.msrb.mxu0 %v3353_v48  ;;  %v4523_v19 = vld [vmem:[#allocation2 + $0x10c] sm:$0xf] }
 0x126   :  { %v1243_v31 = vadd.f32 %v1242_v18, %v1214_v7  ;;  %1389 = vmatmul.bf16.gmra.mxu0 %v5087_v12  ;;  %1527 = vmatpush.bf16.msrb.mxu1 %v3497_v62 }
 0x127   :  { %v1188_v23 = vadd.f32 %v1187_v22, %v1159_v24  ;;  %1418 = vmatmul.bf16.gmra.mxu1 %v5089_v13  ;;  %1586 = vmatpush.bf16.msrb.mxu3 %v3737_v17  ;;  %v3478_v22 = vld [vmem:[#allocation2 + $0x118] sm:$0xf0] }
 0x128   :  { %v1612_v28 = vmax.f32 %v1243_v31, 0.0  ;;  %1447 = vmatmul.bf16.gmra.mxu2 %v5091_v14  ;;  %1476 = vmatmul.bf16.gmra.mxu3 %v5093_v16  ;;  %v3481_v31 = vor.u32 %v4523_v19, %v3478_v22 }
 0x12a   :  { %v5204_v32 = vpack.c.bf16 %v1612_v28, %v1608_v29  ;;  %1528 = vmatpush.bf16.msrb.mxu1 %v3481_v31 }
 0x12b   :  { %v1216_v36 = vpop.f32.mrf.mxu2  ;;  %v1245_v37 = vpop.f32.mrf.mxu3 }
 0x12c   :  { %v1217_v41 = vadd.f32 %v1216_v36, %v1188_v23  ;;  %v1160_v25 = vpop.f32.mrf.mxu0  ;;  %v1189_v53 = vpop.f32.mrf.mxu1 }
 0x12d   :  { %v1161_v5 = vadd.f32 %v1160_v25, %v5191_v15 }
 0x12e   :  { %v1246_v56 = vadd.f32 %v1245_v37, %v1217_v41 }
 0x12f   :  { %v1190_v58 = vadd.f32 %v1189_v53, %v1161_v5 }
 0x130   :  { %v1616_v29 = vmax.f32 %v1246_v56, 0.0 }
 0x133   :  { %v1218_v39 = vpop.f32.mrf.mxu2  ;;  %v1247_v49 = vpop.f32.mrf.mxu3 }
 0x134   :  { %v1219_v18 = vadd.f32 %v1218_v39, %v1190_v58  ;;  %v1163_v59 = vpop.f32.mrf.mxu0  ;;  %v1192_v30 = vpop.f32.mrf.mxu1 }
 0x135   :  { %v1164_v7 = vadd.f32 %v1163_v59, %v5191_v15 }
 0x136   :  { %v1248_v24 = vadd.f32 %v1247_v49, %v1219_v18  ;;  %1394 = vmatmul.bf16.gmra.mxu0 %v5129_v50 }
 0x137   :  { %v1193_v23 = vadd.f32 %v1192_v30, %v1164_v7  ;;  %1423 = vmatmul.bf16.gmra.mxu1 %v5131_v51  ;;  %v4648_v30 = vld [vmem:[#allocation4 + $0xec] sm:$0xf0]  ;;  %v4092_v7 = vld [vmem:[#allocation4 + $0x1e0] sm:$0xf] }
 0x138   :  { %v1620_v28 = vmax.f32 %v1248_v24, 0.0  ;;  %1452 = vmatmul.bf16.gmra.mxu2 %v5135_v63  ;;  %1481 = vmatmul.bf16.gmra.mxu3 %v5137_v57  ;;  %v4680_v24 = vld [vmem:[#allocation4 + $0x1ec] sm:$0xf0] }
 0x13a   :  { %v5212_v33 = vpack.c.bf16 %v1620_v28, %v1616_v29  ;;  %v4076_v28 = vld [vmem:[#allocation4 + $0x1c0] sm:$0xf] }
 0x13b   :  { %v1221_v34 = vpop.f32.mrf.mxu2  ;;  %v1250_v35 = vpop.f32.mrf.mxu3 }
 0x13c   :  { %v1222_v36 = vadd.f32 %v1221_v34, %v1193_v23  ;;  %v1165_v37 = vpop.f32.mrf.mxu0  ;;  %v1194_v40 = vpop.f32.mrf.mxu1 }
 0x13d   :  { %v1166_v46 = vadd.f32 %v1165_v37, %v5191_v15  ;;  %v3932_v37 = vld [vmem:[#allocation4 + $0xa0] sm:$0xf] }
 0x13e   :  { %v1251_v47 = vadd.f32 %v1250_v35, %v1222_v36  ;;  %v4676_v35 = vld [vmem:[#allocation4 + $0x1cc] sm:$0xf0] }
 0x13f   :  { %v1195_v52 = vadd.f32 %v1194_v40, %v1166_v46  ;;  %v4077_v36 = vor.u32 %v4676_v35, %v4076_v28  ;;  %v4640_v40 = vld [vmem:[#allocation4 + $0xac] sm:$0xf0] }
 0x140   :  { %v1624_v55 = vmax.f32 %v1251_v47, 0.0  ;;  %v3933_v46 = vor.u32 %v4640_v40, %v3932_v37  ;;  %v4060_v47 = vld [vmem:[#allocation4 + $0x1a0] sm:$0xf] }
 0x143   :  { %v1223_v41 = vpop.f32.mrf.mxu2  ;;  %v1252_v25 = vpop.f32.mrf.mxu3 }
 0x144   :  { %v1224_v53 = vadd.f32 %v1223_v41, %v1195_v52  ;;  %v1168_v54 = vpop.f32.mrf.mxu0  ;;  %v1197_v0 = vpop.f32.mrf.mxu1  ;;  %v4672_v52 = vld [vmem:[#allocation4 + $0x1ac] sm:$0xf0] }
 0x145   :  { %v1169_v1 = vadd.f32 %v1168_v54, %v5191_v15  ;;  %v4061_v41 = vor.u32 %v4672_v52, %v4060_v47  ;;  %v3852_v47 = vld [vmem:[#allocation4] sm:$0xf]  ;;  %v4620_v52 = vld [vmem:[#allocation4 + $0xc] sm:$0xf0] }
 0x146   :  { %v1253_v2 = vadd.f32 %v1252_v25, %v1224_v53  ;;  %1399 = vmatmul.bf16.gmra.mxu0 %v5157_v8 }
 0x147   :  { %v1198_v5 = vadd.f32 %v1197_v0, %v1169_v1  ;;  %1428 = vmatmul.bf16.gmra.mxu1 %v5159_v20  ;;  %v3916_v1 = vld [vmem:[#allocation4 + $0x80] sm:$0xf] }
 0x148   :  { %v1628_v56 = vmax.f32 %v1253_v2, 0.0  ;;  %1457 = vmatmul.bf16.gmra.mxu2 %v5161_v21  ;;  %1486 = vmatmul.bf16.gmra.mxu3 %v5163_v26  ;;  %v4636_v2 = vld [vmem:[#allocation4 + $0x8c] sm:$0xf0] }
 0x14a   :  { %v5220_v58 = vpack.c.bf16 %v1628_v56, %v1624_v55  ;;  %v3917_v55 = vor.u32 %v4636_v2, %v3916_v1  ;;  %v4668_v56 = vld [vmem:[#allocation4 + $0x18c] sm:$0xf0]  ;;  %v3853_v1 = vor.u32 %v4620_v52, %v3852_v47 }
 0x14b   :  { %v1226_v10 = vpop.f32.mrf.mxu2  ;;  %v1255_v3 = vpop.f32.mrf.mxu3  ;;  %v4652_v2 = vld [vmem:[#allocation4 + $0x10c] sm:$0xf0] }
 0x14c   :  { %v1227_v62 = vadd.f32 %v1226_v10, %v1198_v5  ;;  %v1170_v4 = vpop.f32.mrf.mxu0  ;;  %v1199_v27 = vpop.f32.mrf.mxu1  ;;  %v4044_v5 = vld [vmem:[#allocation4 + $0x180] sm:$0xf] }
 0x14d   :  { %v1171_v9 = vadd.f32 %v1170_v4, %v5191_v15  ;;  %v3964_v15 = vld [vmem:[#allocation4 + $0xe0] sm:$0xf]  ;;  %v4045_v10 = vor.u32 %v4668_v56, %v4044_v5 }
 0x14e   :  { %v1256_v60 = vadd.f32 %v1255_v3, %v1227_v62  ;;  %v3965_v22 = vor.u32 %v4648_v30, %v3964_v15  ;;  %v3900_v3 = vld [vmem:[#allocation4 + $0x60] sm:$0xf]  ;;  %v4632_v62 = vld [vmem:[#allocation4 + $0x6c] sm:$0xf0] }
 0x14f   :  { %v1200_v11 = vadd.f32 %v1199_v27, %v1171_v9  ;;  %v4028_v4 = vld [vmem:[#allocation4 + $0x160] sm:$0xf]  ;;  %v3901_v27 = vor.u32 %v4632_v62, %v3900_v3  ;;  %v4664_v9 = vld [vmem:[#allocation4 + $0x16c] sm:$0xf0] }
 0x150   :  { %v1632_v18 = vmax.f32 %v1256_v60, 0.0  ;;  %2434 = vmatpush.bf16.msra.mxu0 %v3965_v22  ;;  %v4624_v22 = vld [vmem:[#allocation4 + $0x2c] sm:$0xf0]  ;;  %v4188_v5 = vld [vmem:[#allocation4 + $0x2a0] sm:$0xf] }
 0x151   :  { %v4172_v3 = vld [vmem:[#allocation4 + $0x280] sm:$0xf]  ;;  %v4700_v62 = vld [vmem:[#allocation4 + $0x28c] sm:$0xf0] }
 0x153   :  { %v1228_v38 = vpop.f32.mrf.mxu2  ;;  %v1257_v6 = vpop.f32.mrf.mxu3 }
 0x154   :  { %v1229_v39 = vadd.f32 %v1228_v38, %v1200_v11  ;;  %v5223_v49 = vpop.f32.mrf.mxu0  ;;  %v5225_v48 = vpop.f32.mrf.mxu1  ;;  %v4029_v38 = vor.u32 %v4664_v9, %v4028_v4  ;;  %v4173_v4 = vor.u32 %v4700_v62, %v4172_v3  ;;  %v5326_v3 = vperm.slane %v5188_v61, 2 }
 0x156   :  { %v1258_v17 = vadd.f32 %v1257_v6, %v1229_v39  ;;  %1500 = vmatmul.bf16.vlgmr.msrb.gmra.mxu0 %v5044_v42  ;;  %v4093_v42 = vor.u32 %v4680_v24, %v4092_v7  ;;  %v4012_v6 = vld [vmem:[#allocation4 + $0x140] sm:$0xf] }
 0x157   :  { %1529 = vmatmul.bf16.vlgmr.msrb.gmra.mxu1 %v5046_v43  ;;  %v3868_v7 = vld [vmem:[#allocation4 + $0x20] sm:$0xf] }
 0x158   :  { %v1636_v59 = vmax.f32 %v1258_v17, 0.0  ;;  %1558 = vmatmul.bf16.vlgmr.msrb.gmra.mxu2 %v5048_v44  ;;  %1587 = vmatmul.bf16.vlgmr.msrb.gmra.mxu3 %v5050_v45  ;;  %v3948_v44 = vld [vmem:[#allocation4 + $0xc0] sm:$0xf]  ;;  %v4644_v45 = vld [vmem:[#allocation4 + $0xcc] sm:$0xf0]  ;;  %v3869_v24 = vor.u32 %v4624_v22, %v3868_v7 }
 0x159   :  { %2463 = vmatpush.bf16.msra.mxu1 %v4093_v42  ;;  %v3949_v34 = vor.u32 %v4644_v45, %v3948_v44  ;;  %v4660_v17 = vld [vmem:[#allocation4 + $0x14c] sm:$0xf0]  ;;  %v3996_v42 = vld [vmem:[#allocation4 + $0x120] sm:$0xf] }
 0x15a   :  { %v5231_v19 = vpack.c.bf16 %v1636_v59, %v1632_v18  ;;  %v4220_v18 = vld [vmem:[#allocation4 + $0x2e0] sm:$0xf]  ;;  %v4712_v59 = vld [vmem:[#allocation4 + $0x2ec] sm:$0xf0]  ;;  %v4013_v15 = vor.u32 %v4660_v17, %v4012_v6  ;;  %v5282_v6 = vperm.slane %v5188_v61, 1 }
 0x15b   :  { %v5233_v31 = vpop.f32.mrf.mxu2  ;;  %v5235_v23 = vpop.f32.mrf.mxu3  ;;  %2435 = vmatpush.bf16.msra.mxu0 %v3949_v34  ;;  %v4221_v30 = vor.u32 %v4712_v59, %v4220_v18  ;;  %v4656_v44 = vld [vmem:[#allocation4 + $0x12c] sm:$0xf0]  ;;  %v4204_v45 = vld [vmem:[#allocation4 + $0x2c0] sm:$0xf] }
 0x15c   :  { %v5237_v29 = vpop.f32.mrf.mxu0  ;;  %v5239_v43 = vpop.f32.mrf.mxu1  ;;  %v3997_v28 = vor.u32 %v4656_v44, %v3996_v42  ;;  %v4708_v34 = vld [vmem:[#allocation4 + $0x2cc] sm:$0xf0]  ;;  %v1270_v7 = vadd.f32 %v5223_v49, %v5282_v6  ;;  %v4124_v22 = vld [vmem:[#allocation4 + $0x220] sm:$0xf] }
 0x15d   :  { %2464 = vmatpush.bf16.msra.mxu1 %v4077_v36  ;;  %2492 = vmatpush.bf16.msra.mxu2 %v4221_v30  ;;  %v4205_v37 = vor.u32 %v4708_v34, %v4204_v45  ;;  %v1272_v17 = vadd.f32 %v5237_v29, %v5282_v6  ;;  %v4684_v49 = vld [vmem:[#allocation4 + $0x20c] sm:$0xf0] }
 0x15e   :  { %v1299_v29 = vadd.f32 %v5225_v48, %v1270_v7  ;;  %v4348_v48 = vld [vmem:[#allocation4 + $0x3e0] sm:$0xf] }
 0x15f   :  { %2436 = vmatpush.bf16.msra.mxu0 %v3933_v46  ;;  %v1301_v44 = vadd.f32 %v5239_v43, %v1272_v17 }
 0x161   :  { %2465 = vmatpush.bf16.msra.mxu1 %v4061_v41  ;;  %v3980_v41 = vld [vmem:[#allocation4 + $0x100] sm:$0xf]  ;;  %2493 = vmatpush.bf16.msra.mxu2 %v4205_v37  ;;  %v1328_v37 = vadd.f32 %v5233_v31, %v1299_v29  ;;  %v4674_v29 = vld [vmem:[#allocation4 + $0x1c4] sm:$0xf] }
 0x162   :  { %v3981_v56 = vor.u32 %v4652_v2, %v3980_v41 }
 0x163   :  { %v5241_v25 = vpop.f32.mrf.mxu2  ;;  %v5243_v53 = vpop.f32.mrf.mxu3  ;;  %2437 = vmatpush.bf16.msra.mxu0 %v3917_v55  ;;  %v4704_v55 = vld [vmem:[#allocation4 + $0x2ac] sm:$0xf0] }
 0x164   :  { %v5245_v54 = vpop.f32.mrf.mxu0  ;;  %v5247_v0 = vpop.f32.mrf.mxu1  ;;  %v1330_v45 = vadd.f32 %v5241_v25, %v1301_v44  ;;  %v4744_v25 = vld [vmem:[#allocation4 + $0x3ec] sm:$0xf0]  ;;  %v3950_v44 = vld [vmem:[#allocation4 + $0xd0] sm:$0xf0] }
 0x165   :  { %2466 = vmatpush.bf16.msra.mxu1 %v4045_v10  ;;  %v4189_v10 = vor.u32 %v4704_v55, %v4188_v5  ;;  %v4349_v41 = vor.u32 %v4744_v25, %v4348_v48  ;;  %v4316_v48 = vld [vmem:[#allocation4 + $0x3a0] sm:$0xf] }
 0x166   :  { %1505 = vmatmul.bf16.gmra.mxu0 %v5087_v12 }
 0x167   :  { %1534 = vmatmul.bf16.gmra.mxu1 %v5089_v13  ;;  %2438 = vmatpush.bf16.msra.mxu0 %v3901_v27 }
 0x168   :  { %1563 = vmatmul.bf16.gmra.mxu2 %v5091_v14  ;;  %1592 = vmatmul.bf16.gmra.mxu3 %v5093_v16  ;;  %v3884_v14 = vld [vmem:[#allocation4 + $0x40] sm:$0xf]  ;;  %v4628_v16 = vld [vmem:[#allocation4 + $0x4c] sm:$0xf0] }
 0x169   :  { %2467 = vmatpush.bf16.msra.mxu1 %v4029_v38  ;;  %v3885_v39 = vor.u32 %v4628_v16, %v3884_v14  ;;  %2494 = vmatpush.bf16.msra.mxu2 %v4189_v10  ;;  %v4696_v14 = vld [vmem:[#allocation4 + $0x26c] sm:$0xf0]  ;;  %v4140_v16 = vld [vmem:[#allocation4 + $0x240] sm:$0xf] }
 0x16a   :  { %2521 = vmatpush.bf16.msra.mxu3 %v4349_v41  ;;  %v3934_v41 = vld [vmem:[#allocation4 + $0xb0] sm:$0xf0] }
 0x16b   :  { %v5253_v60 = vpop.f32.mrf.mxu2  ;;  %v5255_v11 = vpop.f32.mrf.mxu3  ;;  %2439 = vmatpush.bf16.msra.mxu0 %v3885_v39 }
 0x16c   :  { %v5257_v12 = vpop.f32.mrf.mxu0  ;;  %v5259_v13 = vpop.f32.mrf.mxu1 }
 0x16d   :  { %2468 = vmatpush.bf16.msra.mxu1 %v4013_v15  ;;  %2495 = vmatpush.bf16.msra.mxu2 %v4173_v4  ;;  %v1277_v31 = vadd.f32 %v5257_v12, %v5282_v6  ;;  %v4646_v4 = vld [vmem:[#allocation4 + $0xe4] sm:$0xf] }
 0x16f   :  { %2440 = vmatpush.bf16.msra.mxu0 %v3869_v24  ;;  %v4688_v24 = vld [vmem:[#allocation4 + $0x22c] sm:$0xf0] }
 0x170   :  { %v4125_v42 = vor.u32 %v4688_v24, %v4124_v22 }
 0x171   :  { %2469 = vmatpush.bf16.msra.mxu1 %v3997_v28  ;;  %v4108_v28 = vld [vmem:[#allocation4 + $0x200] sm:$0xf] }
 0x172   :  { %v4109_v34 = vor.u32 %v4684_v49, %v4108_v28 }
 0x173   :  { %v5261_v35 = vpop.f32.mrf.mxu2  ;;  %v5263_v36 = vpop.f32.mrf.mxu3  ;;  %2441 = vmatpush.bf16.msra.mxu0 %v3853_v1 }
 0x174   :  { %v5265_v40 = vpop.f32.mrf.mxu0  ;;  %v5267_v46 = vpop.f32.mrf.mxu1 }
 0x175   :  { %2470 = vmatpush.bf16.msra.mxu1 %v3981_v56 }
 0x176   :  { %1510 = vmatmul.bf16.gmra.mxu0 %v5129_v50 }
 0x177   :  { %1539 = vmatmul.bf16.gmra.mxu1 %v5131_v51  ;;  %v4156_v51 = vld [vmem:[#allocation4 + $0x260] sm:$0xf] }
 0x178   :  { %1568 = vmatmul.bf16.gmra.mxu2 %v5135_v63  ;;  %1597 = vmatmul.bf16.gmra.mxu3 %v5137_v57  ;;  %v4157_v63 = vor.u32 %v4696_v14, %v4156_v51  ;;  %v4692_v57 = vld [vmem:[#allocation4 + $0x24c] sm:$0xf0]  ;;  %v3966_v51 = vld [vmem:[#allocation4 + $0xf0] sm:$0xf0]  ;;  %v4678_v14 = vld [vmem:[#allocation4 + $0x1e4] sm:$0xf] }
 0x179   :  { %v4141_v39 = vor.u32 %v4692_v57, %v4140_v16  ;;  %v4332_v16 = vld [vmem:[#allocation4 + $0x3c0] sm:$0xf]  ;;  %v3969_v57 = vor.u32 %v4646_v4, %v3966_v51 }
 0x17a   :  { %2496 = vmatpush.bf16.msra.mxu2 %v4157_v63 }
 0x17b   :  { %v5273_v27 = vpop.f32.mrf.mxu2  ;;  %v5275_v9 = vpop.f32.mrf.mxu3  ;;  %2550 = vmatpush.bf16.msrb.mxu0 %v3969_v57  ;;  %v3918_v57 = vld [vmem:[#allocation4 + $0x90] sm:$0xf0] }
 0x17c   :  { %v5277_v38 = vpop.f32.mrf.mxu0  ;;  %v5279_v50 = vpop.f32.mrf.mxu1 }
 0x17e   :  { %2497 = vmatpush.bf16.msra.mxu2 %v4141_v39 }
 0x182   :  { %2498 = vmatpush.bf16.msra.mxu2 %v4125_v42 }
 0x183   :  { %v5286_v18 = vpop.f32.mrf.mxu2  ;;  %v5288_v59 = vpop.f32.mrf.mxu3 }
 0x184   :  { %v5290_v15 = vpop.f32.mrf.mxu0  ;;  %v5292_v30 = vpop.f32.mrf.mxu1 }
 0x186   :  { %1515 = vmatmul.bf16.gmra.mxu0 %v5157_v8  ;;  %2499 = vmatpush.bf16.msra.mxu2 %v4109_v34  ;;  %v4078_v34 = vld [vmem:[#allocation4 + $0x1d0] sm:$0xf0] }
 0x187   :  { %1544 = vmatmul.bf16.gmra.mxu1 %v5159_v20 }
 0x188   :  { %1573 = vmatmul.bf16.gmra.mxu2 %v5161_v21  ;;  %1602 = vmatmul.bf16.gmra.mxu3 %v5163_v26  ;;  %v1359_v21 = vadd.f32 %v5243_v53, %v1330_v45  ;;  %v1357_v26 = vadd.f32 %v5235_v23, %v1328_v37  ;;  %v1275_v23 = vadd.f32 %v5245_v54, %v5282_v6  ;;  %v4740_v54 = vld [vmem:[#allocation4 + $0x3cc] sm:$0xf0] }
 0x189   :  { %v1306_v53 = vadd.f32 %v5259_v13, %v1277_v31  ;;  %v4094_v13 = vld [vmem:[#allocation4 + $0x1f0] sm:$0xf0]  ;;  %v4333_v7 = vor.u32 %v4740_v54, %v4332_v16  ;;  %v4081_v37 = vor.u32 %v4674_v29, %v4078_v34  ;;  %v4670_v31 = vld [vmem:[#allocation4 + $0x1a4] sm:$0xf]  ;;  %v1280_v54 = vadd.f32 %v5265_v40, %v5282_v6 }
 0x18a   :  { %v1613_v52 = vmax.f32 %v1359_v21, 0.0  ;;  %v1609_v1 = vmax.f32 %v1357_v26, 0.0  ;;  %v1304_v62 = vadd.f32 %v5247_v0, %v1275_v23  ;;  %v4097_v22 = vor.u32 %v4678_v14, %v4094_v13  ;;  %v4642_v0 = vld [vmem:[#allocation4 + $0xc4] sm:$0xf]  ;;  %v4062_v23 = vld [vmem:[#allocation4 + $0x1b0] sm:$0xf0] }
 0x18b   :  { %v5304_v47 = vpop.f32.mrf.mxu2  ;;  %v5306_v43 = vpop.f32.mrf.mxu3  ;;  %v1335_v12 = vadd.f32 %v5261_v35, %v1306_v53  ;;  %2522 = vmatpush.bf16.msra.mxu3 %v4333_v7  ;;  %v3953_v49 = vor.u32 %v4642_v0, %v3950_v44  ;;  %v4666_v13 = vld [vmem:[#allocation4 + $0x184] sm:$0xf]  ;;  %v1309_v40 = vadd.f32 %v5267_v46, %v1280_v54  ;;  %v3902_v44 = vld [vmem:[#allocation4 + $0x70] sm:$0xf0] }
 0x18c   :  { %v5308_v8 = vpop.f32.mrf.mxu0  ;;  %v5310_v20 = vpop.f32.mrf.mxu1  ;;  %v5320_v10 = vpack.c.bf16 %v1613_v52, %v1609_v1  ;;  %v1333_v61 = vadd.f32 %v5253_v60, %v1304_v62  ;;  %2579 = vmatpush.bf16.msrb.mxu1 %v4097_v22  ;;  %v4638_v52 = vld [vmem:[#allocation4 + $0xa4] sm:$0xf]  ;;  %v1282_v1 = vadd.f32 %v5277_v38, %v5282_v6  ;;  %v4065_v62 = vor.u32 %v4670_v31, %v4062_v23  ;;  %v4046_v22 = vld [vmem:[#allocation4 + $0x190] sm:$0xf0] }
 0x18d   :  { %v1364_v24 = vadd.f32 %v5263_v36, %v1335_v12  ;;  %v4736_v36 = vld [vmem:[#allocation4 + $0x3ac] sm:$0xf0]  ;;  %2551 = vmatpush.bf16.msrb.mxu0 %v3953_v49  ;;  %v4634_v38 = vld [vmem:[#allocation4 + $0x84] sm:$0xf] }
 0x18e   :  { %v1362_v60 = vadd.f32 %v5255_v11, %v1333_v61  ;;  %v4317_v25 = vor.u32 %v4736_v36, %v4316_v48  ;;  %v1311_v61 = vadd.f32 %v5279_v50, %v1282_v1  ;;  %v3921_v7 = vor.u32 %v4634_v38, %v3918_v57  ;;  %v4630_v0 = vld [vmem:[#allocation4 + $0x64] sm:$0xf]  ;;  %v4732_v49 = vld [vmem:[#allocation4 + $0x38c] sm:$0xf0] }
 0x18f   :  { %v1621_v21 = vmax.f32 %v1364_v24, 0.0  ;;  %v4662_v29 = vld [vmem:[#allocation4 + $0x164] sm:$0xf]  ;;  %v3905_v34 = vor.u32 %v4630_v0, %v3902_v44 }
 0x190   :  { %2580 = vmatpush.bf16.msrb.mxu1 %v4081_v37  ;;  %v1617_v53 = vmax.f32 %v1362_v60, 0.0  ;;  %2523 = vmatpush.bf16.msra.mxu3 %v4317_v25  ;;  %v1340_v24 = vadd.f32 %v5286_v18, %v1311_v61  ;;  %v4030_v60 = vld [vmem:[#allocation4 + $0x170] sm:$0xf0]  ;;  %v1338_v37 = vadd.f32 %v5273_v27, %v1309_v40  ;;  %v4658_v31 = vld [vmem:[#allocation4 + $0x144] sm:$0xf] }
 0x191   :  { %v4033_v48 = vor.u32 %v4662_v29, %v4030_v60  ;;  %v4710_v23 = vld [vmem:[#allocation4 + $0x2e4] sm:$0xf]  ;;  %v3854_v60 = vld [vmem:[#allocation4 + $0x10] sm:$0xf0] }
 0x192   :  { %v5339_v16 = vpack.c.bf16 %v1621_v21, %v1617_v53  ;;  %v1369_v46 = vadd.f32 %v5288_v59, %v1340_v24  ;;  %v4222_v53 = vld [vmem:[#allocation4 + $0x2f0] sm:$0xf0]  ;;  %v4622_v38 = vld [vmem:[#allocation4 + $0x24] sm:$0xf] }
 0x193   :  { %v5316_v2 = vpop.f32.mrf.mxu2  ;;  %v5318_v5 = vpop.f32.mrf.mxu3  ;;  %v4654_v57 = vld [vmem:[#allocation4 + $0x124] sm:$0xf] }
 0x194   :  { %v1385_v55 = vpop.f32.mrf.mxu0  ;;  %v1414_v56 = vpop.f32.mrf.mxu1  ;;  %2581 = vmatpush.bf16.msrb.mxu1 %v4065_v62  ;;  %v1629_v62 = vmax.f32 %v1369_v46, 0.0  ;;  %v4190_v46 = vld [vmem:[#allocation4 + $0x2b0] sm:$0xf0] }
 0x195   :  { %v1386_v63 = vadd.f32 %v1385_v55, %v5326_v3 }
 0x196   :  { %2442 = vmatmul.bf16.vlgmr.msra.gmra.mxu0 %v5204_v32 }
 0x197   :  { %2471 = vmatmul.bf16.vlgmr.msra.gmra.mxu1 %v5320_v10  ;;  %v1415_v45 = vadd.f32 %v1414_v56, %v1386_v63  ;;  %v3937_v56 = vor.u32 %v4638_v52, %v3934_v41  ;;  %v4626_v52 = vld [vmem:[#allocation4 + $0x44] sm:$0xf]  ;;  %v3886_v41 = vld [vmem:[#allocation4 + $0x50] sm:$0xf0] }
 0x198   :  { %v3889_v27 = vor.u32 %v4626_v52, %v3886_v41 }
 0x199   :  { %2552 = vmatpush.bf16.msrb.mxu0 %v3937_v56  ;;  %v4014_v56 = vld [vmem:[#allocation4 + $0x150] sm:$0xf0] }
 0x19a   :  { %v4017_v59 = vor.u32 %v4658_v31, %v4014_v56  ;;  %v4698_v31 = vld [vmem:[#allocation4 + $0x284] sm:$0xf]  ;;  %v4724_v56 = vld [vmem:[#allocation4 + $0x34c] sm:$0xf0] }
 0x19b   :  { %v1443_v39 = vpop.f32.mrf.mxu2  ;;  %v1472_v17 = vpop.f32.mrf.mxu3 }
 0x19c   :  { %v1387_v35 = vpop.f32.mrf.mxu0  ;;  %v1416_v42 = vpop.f32.mrf.mxu1  ;;  %v1444_v26 = vadd.f32 %v1443_v39, %v1415_v45 }
 0x19d   :  { %v1388_v28 = vadd.f32 %v1387_v35, %v5326_v3  ;;  %2553 = vmatpush.bf16.msrb.mxu0 %v3921_v7  ;;  %v4706_v7 = vld [vmem:[#allocation4 + $0x2c4] sm:$0xf] }
 0x19e   :  { %v1473_v4 = vadd.f32 %v1472_v17, %v1444_v26  ;;  %v4049_v17 = vor.u32 %v4666_v13, %v4046_v22  ;;  %v4206_v22 = vld [vmem:[#allocation4 + $0x2d0] sm:$0xf0] }
 0x19f   :  { %v1417_v55 = vadd.f32 %v1416_v42, %v1388_v28  ;;  %v4300_v28 = vld [vmem:[#allocation4 + $0x380] sm:$0xf]  ;;  %v4209_v40 = vor.u32 %v4706_v7, %v4206_v22  ;;  %v4690_v7 = vld [vmem:[#allocation4 + $0x244] sm:$0xf]  ;;  %v4142_v22 = vld [vmem:[#allocation4 + $0x250] sm:$0xf0] }
 0x1a0   :  { %v1610_v35 = vmax.f32 %v1473_v4, 0.0  ;;  %2582 = vmatpush.bf16.msrb.mxu1 %v4049_v17  ;;  %v4301_v26 = vor.u32 %v4732_v49, %v4300_v28  ;;  %v1285_v49 = vadd.f32 %v5290_v15, %v5282_v6 }
 0x1a1   :  { %2554 = vmatpush.bf16.msrb.mxu0 %v3905_v34  ;;  %v4618_v34 = vld [vmem:[#allocation4 + $0x4] sm:$0xf] }
 0x1a2   :  { %2524 = vmatpush.bf16.msra.mxu3 %v4301_v26  ;;  %v3982_v26 = vld [vmem:[#allocation4 + $0x110] sm:$0xf0]  ;;  %v1314_v15 = vadd.f32 %v5292_v30, %v1285_v49 }
 0x1a3   :  { %v1445_v12 = vpop.f32.mrf.mxu2  ;;  %v1474_v11 = vpop.f32.mrf.mxu3 }
 0x1a4   :  { %v1446_v51 = vadd.f32 %v1445_v12, %v1417_v55  ;;  %v1390_v14 = vpop.f32.mrf.mxu0  ;;  %v1419_v63 = vpop.f32.mrf.mxu1  ;;  %2583 = vmatpush.bf16.msrb.mxu1 %v4033_v48  ;;  %v1367_v12 = vadd.f32 %v5275_v9, %v1338_v37  ;;  %v1287_v9 = vadd.f32 %v5308_v8, %v5282_v6  ;;  %v4650_v8 = vld [vmem:[#allocation4 + $0x104] sm:$0xf] }
 0x1a5   :  { %v1391_v45 = vadd.f32 %v1390_v14, %v5326_v3  ;;  %v4728_v14 = vld [vmem:[#allocation4 + $0x36c] sm:$0xf0]  ;;  %2555 = vmatpush.bf16.msrb.mxu0 %v3889_v27  ;;  %v4702_v48 = vld [vmem:[#allocation4 + $0x2a4] sm:$0xf]  ;;  %v4268_v27 = vld [vmem:[#allocation4 + $0x340] sm:$0xf] }
 0x1a6   :  { %v1475_v39 = vadd.f32 %v1474_v11, %v1446_v51  ;;  %2447 = vmatmul.bf16.gmra.mxu0 %v5212_v33  ;;  %v4225_v11 = vor.u32 %v4710_v23, %v4222_v53  ;;  %v4284_v51 = vld [vmem:[#allocation4 + $0x360] sm:$0xf]  ;;  %v1625_v17 = vmax.f32 %v1367_v12, 0.0  ;;  %v1343_v53 = vadd.f32 %v5304_v47, %v1314_v15 }
 0x1a7   :  { %2476 = vmatmul.bf16.gmra.mxu1 %v5339_v16  ;;  %v1420_v1 = vadd.f32 %v1419_v63, %v1391_v45  ;;  %v4285_v54 = vor.u32 %v4728_v14, %v4284_v51  ;;  %v3870_v63 = vld [vmem:[#allocation4 + $0x30] sm:$0xf0] }
 0x1a8   :  { %v1614_v42 = vmax.f32 %v1475_v39, 0.0  ;;  %2584 = vmatpush.bf16.msrb.mxu1 %v4017_v59  ;;  %2608 = vmatpush.bf16.msrb.mxu2 %v4225_v11  ;;  %v3873_v61 = vor.u32 %v4622_v38, %v3870_v63  ;;  %v3998_v39 = vld [vmem:[#allocation4 + $0x130] sm:$0xf0]  ;;  %v5358_v28 = vpack.c.bf16 %v1629_v62, %v1625_v17  ;;  %v4269_v11 = vor.u32 %v4724_v56, %v4268_v27  ;;  %v4742_v27 = vld [vmem:[#allocation4 + $0x3e4] sm:$0xf] }
 0x1a9   :  { %2525 = vmatpush.bf16.msra.mxu3 %v4285_v54  ;;  %v4158_v51 = vld [vmem:[#allocation4 + $0x270] sm:$0xf0]  ;;  %v1372_v63 = vadd.f32 %v5306_v43, %v1343_v53  ;;  %v4686_v43 = vld [vmem:[#allocation4 + $0x224] sm:$0xf] }
 0x1aa   :  { %v5348_v50 = vpack.c.bf16 %v1614_v42, %v1610_v35  ;;  %v4001_v42 = vor.u32 %v4654_v57, %v3998_v39  ;;  %2556 = vmatpush.bf16.msrb.mxu0 %v3873_v61  ;;  %v4252_v57 = vld [vmem:[#allocation4 + $0x320] sm:$0xf]  ;;  %v4350_v56 = vld [vmem:[#allocation4 + $0x3f0] sm:$0xf0] }
 0x1ab   :  { %v1448_v18 = vpop.f32.mrf.mxu2  ;;  %v1477_v21 = vpop.f32.mrf.mxu3 }
 0x1ac   :  { %2500 = vmatmul.bf16.vlgmr.msra.gmra.mxu2 %v5348_v50  ;;  %v1392_v36 = vpop.f32.mrf.mxu0  ;;  %v1421_v25 = vpop.f32.mrf.mxu1  ;;  %v1449_v4 = vadd.f32 %v1448_v18, %v1420_v1  ;;  %2585 = vmatpush.bf16.msrb.mxu1 %v4001_v42  ;;  %v3857_v18 = vor.u32 %v4618_v34, %v3854_v60  ;;  %v4174_v1 = vld [vmem:[#allocation4 + $0x290] sm:$0xf0] }
 0x1ad   :  { %v1393_v55 = vadd.f32 %v1392_v36, %v5326_v3  ;;  %2609 = vmatpush.bf16.msrb.mxu2 %v4209_v40  ;;  %v3985_v36 = vor.u32 %v4650_v8, %v3982_v26  ;;  %v4177_v23 = vor.u32 %v4698_v31, %v4174_v1  ;;  %2526 = vmatpush.bf16.msra.mxu3 %v4269_v11  ;;  %v4682_v26 = vld [vmem:[#allocation4 + $0x204] sm:$0xf] }
 0x1ae   :  { %v1478_v0 = vadd.f32 %v1477_v21, %v1449_v4  ;;  %v1316_v21 = vadd.f32 %v5310_v20, %v1287_v9  ;;  %2557 = vmatpush.bf16.msrb.mxu0 %v3857_v18  ;;  %v4694_v4 = vld [vmem:[#allocation4 + $0x264] sm:$0xf]  ;;  %v1633_v9 = vmax.f32 %v1372_v63, 0.0  ;;  %v4716_v18 = vld [vmem:[#allocation4 + $0x30c] sm:$0xf0] }
 0x1af   :  { %v1422_v13 = vadd.f32 %v1421_v25, %v1393_v55  ;;  %v4193_v25 = vor.u32 %v4702_v48, %v4190_v46  ;;  %v4161_v38 = vor.u32 %v4694_v4, %v4158_v51  ;;  %v4796_v51 = vld [vmem:[%s5692_s4] sm:$0xf]  ;;  %v4649_v63 = vld [vmem:[#allocation4 + $0xf4] sm:$0xf0] }
 0x1b0   :  { %v1618_v52 = vmax.f32 %v1478_v0, 0.0  ;;  %v1345_v41 = vadd.f32 %v5316_v2, %v1316_v21  ;;  %2586 = vmatpush.bf16.msrb.mxu1 %v3985_v36  ;;  %v4110_v36 = vld [vmem:[#allocation4 + $0x210] sm:$0xf0] }
 0x1b1   :  { %2610 = vmatpush.bf16.msrb.mxu2 %v4193_v25 }
 0x1b2   :  { %v1374_v62 = vadd.f32 %v5318_v5, %v1345_v41  ;;  %v4145_v5 = vor.u32 %v4690_v7, %v4142_v22  ;;  %v4681_v22 = vld [vmem:[#allocation4 + $0x1f4] sm:$0xf0] }
 0x1b3   :  { %v1450_v24 = vpop.f32.mrf.mxu2  ;;  %v1479_v35 = vpop.f32.mrf.mxu3 }
 0x1b4   :  { %v1451_v44 = vadd.f32 %v1450_v24, %v1422_v13  ;;  %v1395_v29 = vpop.f32.mrf.mxu0  ;;  %v1424_v45 = vpop.f32.mrf.mxu1  ;;  %v4720_v13 = vld [vmem:[#allocation4 + $0x32c] sm:$0xf0]  ;;  %v1637_v61 = vmax.f32 %v1374_v62, 0.0 }
 0x1b5   :  { %v1396_v20 = vadd.f32 %v1395_v29, %v5326_v3  ;;  %2611 = vmatpush.bf16.msrb.mxu2 %v4177_v23  ;;  %v4253_v39 = vor.u32 %v4720_v13, %v4252_v57  ;;  %v4353_v23 = vor.u32 %v4742_v27, %v4350_v56 }
 0x1b6   :  { %v1480_v37 = vadd.f32 %v1479_v35, %v1451_v44  ;;  %2452 = vmatmul.bf16.gmra.mxu0 %v5220_v58  ;;  %v5375_v29 = vpack.c.bf16 %v1637_v61, %v1633_v9  ;;  %v4738_v61 = vld [vmem:[#allocation4 + $0x3c4] sm:$0xf] }
 0x1b7   :  { %2481 = vmatmul.bf16.gmra.mxu1 %v5358_v28  ;;  %v1425_v14 = vadd.f32 %v1424_v45, %v1396_v20  ;;  %2527 = vmatpush.bf16.msra.mxu3 %v4253_v39  ;;  %v4126_v45 = vld [vmem:[#allocation4 + $0x230] sm:$0xf0] }
 0x1b8   :  { %v1622_v6 = vmax.f32 %v1480_v37, 0.0  ;;  %v4129_v34 = vor.u32 %v4686_v43, %v4126_v45  ;;  %v4236_v37 = vld [vmem:[#allocation4 + $0x300] sm:$0xf]  ;;  %v4334_v39 = vld [vmem:[#allocation4 + $0x3d0] sm:$0xf0] }
 0x1b9   :  { %2612 = vmatpush.bf16.msrb.mxu2 %v4161_v38  ;;  %v4237_v21 = vor.u32 %v4716_v18, %v4236_v37  ;;  %v3972_v38 = vld [vmem:[#allocation4 + $0xe8] sm:$0xf]  ;;  %v4337_v9 = vor.u32 %v4738_v61, %v4334_v39  ;;  %v4734_v37 = vld [vmem:[#allocation4 + $0x3a4] sm:$0xf]  ;;  %v4318_v18 = vld [vmem:[#allocation4 + $0x3b0] sm:$0xf0] }
 0x1ba   :  { %v5367_v55 = vpack.c.bf16 %v1622_v6, %v1618_v52  ;;  %v4113_v6 = vor.u32 %v4682_v26, %v4110_v36  ;;  %v3973_v7 = vor.u32 %v4649_v63, %v3972_v38  ;;  %v4321_v26 = vor.u32 %v4734_v37, %v4318_v18  ;;  %v4068_v36 = vld [vmem:[#allocation4 + $0x1a8] sm:$0xf]  ;;  %v4665_v39 = vld [vmem:[#allocation4 + $0x174] sm:$0xf0]  ;;  %v4726_v18 = vld [vmem:[#allocation4 + $0x364] sm:$0xf] }
 0x1bb   :  { %v1453_v12 = vpop.f32.mrf.mxu2  ;;  %v1482_v59 = vpop.f32.mrf.mxu3  ;;  %2528 = vmatpush.bf16.msra.mxu3 %v4237_v21  ;;  %v4641_v21 = vld [vmem:[#allocation4 + $0xb4] sm:$0xf0] }
 0x1bc   :  { %2505 = vmatmul.bf16.gmra.mxu2 %v5367_v55  ;;  %v1397_v30 = vpop.f32.mrf.mxu0  ;;  %v1426_v2 = vpop.f32.mrf.mxu1  ;;  %v1454_v47 = vadd.f32 %v1453_v12, %v1425_v14  ;;  %v5387_v14 = vperm.slane %v4796_v51, 3  ;;  %2666 = vmatpush.bf16.msra.mxu0 %v3973_v7  ;;  %v3908_v51 = vld [vmem:[#allocation4 + $0x68] sm:$0xf] }
 0x1bd   :  { %v1398_v54 = vadd.f32 %v1397_v30, %v5326_v3  ;;  %2613 = vmatpush.bf16.msrb.mxu2 %v4145_v5 }
 0x1be   :  { %v1483_v42 = vadd.f32 %v1482_v59, %v1454_v47  ;;  %v4100_v47 = vld [vmem:[#allocation4 + $0x1e8] sm:$0xf] }
 0x1bf   :  { %v1427_v17 = vadd.f32 %v1426_v2, %v1398_v54  ;;  %2637 = vmatpush.bf16.msrb.mxu3 %v4353_v23  ;;  %v3924_v23 = vld [vmem:[#allocation4 + $0x88] sm:$0xf] }
 0x1c0   :  { %v1626_v60 = vmax.f32 %v1483_v42, 0.0 }
 0x1c1   :  { %2614 = vmatpush.bf16.msrb.mxu2 %v4129_v34  ;;  %v4677_v34 = vld [vmem:[#allocation4 + $0x1d4] sm:$0xf0] }
 0x1c3   :  { %v1455_v24 = vpop.f32.mrf.mxu2  ;;  %v1484_v35 = vpop.f32.mrf.mxu3  ;;  %2638 = vmatpush.bf16.msrb.mxu3 %v4337_v9 }
 0x1c4   :  { %v1456_v40 = vadd.f32 %v1455_v24, %v1427_v17  ;;  %v1400_v0 = vpop.f32.mrf.mxu0  ;;  %v1429_v44 = vpop.f32.mrf.mxu1  ;;  %v4101_v24 = vor.u32 %v4681_v22, %v4100_v47  ;;  %v4730_v47 = vld [vmem:[#allocation4 + $0x384] sm:$0xf] }
 0x1c5   :  { %v1401_v46 = vadd.f32 %v1400_v0, %v5326_v3  ;;  %2615 = vmatpush.bf16.msrb.mxu2 %v4113_v6  ;;  %v4645_v0 = vld [vmem:[#allocation4 + $0xd4] sm:$0xf0] }
 0x1c6   :  { %v1485_v49 = vadd.f32 %v1484_v35, %v1456_v40  ;;  %2457 = vmatmul.bf16.gmra.mxu0 %v5231_v19  ;;  %2695 = vmatpush.bf16.msra.mxu1 %v4101_v24  ;;  %v3956_v40 = vld [vmem:[#allocation4 + $0xc8] sm:$0xf]  ;;  %v4673_v6 = vld [vmem:[#allocation4 + $0x1b4] sm:$0xf0] }
 0x1c7   :  { %2486 = vmatmul.bf16.gmra.mxu1 %v5375_v29  ;;  %v1430_v31 = vadd.f32 %v1429_v44, %v1401_v46  ;;  %v4084_v44 = vld [vmem:[#allocation4 + $0x1c8] sm:$0xf]  ;;  %2639 = vmatpush.bf16.msrb.mxu3 %v4321_v26  ;;  %v4286_v26 = vld [vmem:[#allocation4 + $0x370] sm:$0xf0] }
 0x1c8   :  { %v1630_v8 = vmax.f32 %v1485_v49, 0.0  ;;  %v3957_v49 = vor.u32 %v4645_v0, %v3956_v40  ;;  %v3940_v46 = vld [vmem:[#allocation4 + $0xa8] sm:$0xf] }
 0x1c9   :  { %v4020_v40 = vld [vmem:[#allocation4 + $0x148] sm:$0xf] }
 0x1ca   :  { %v5379_v48 = vpack.c.bf16 %v1630_v8, %v1626_v60  ;;  %v4085_v60 = vor.u32 %v4677_v34, %v4084_v44  ;;  %2667 = vmatpush.bf16.msra.mxu0 %v3957_v49  ;;  %v4228_v49 = vld [vmem:[#allocation4 + $0x2e8] sm:$0xf]  ;;  %v4713_v34 = vld [vmem:[#allocation4 + $0x2f4] sm:$0xf0] }
 0x1cb   :  { %v1458_v25 = vpop.f32.mrf.mxu2  ;;  %v1487_v52 = vpop.f32.mrf.mxu3 }
 0x1cc   :  { %2510 = vmatmul.bf16.gmra.mxu2 %v5379_v48  ;;  %v1402_v15 = vpop.f32.mrf.mxu0  ;;  %v1431_v41 = vpop.f32.mrf.mxu1  ;;  %v1459_v20 = vadd.f32 %v1458_v25, %v1430_v31  ;;  %2696 = vmatpush.bf16.msra.mxu1 %v4085_v60  ;;  %v4069_v31 = vor.u32 %v4673_v6, %v4068_v36  ;;  %v4625_v36 = vld [vmem:[#allocation4 + $0x34] sm:$0xf0] }
 0x1cd   :  { %v1403_v1 = vadd.f32 %v1402_v15, %v5326_v3 }
 0x1ce   :  { %v1488_v11 = vadd.f32 %v1487_v52, %v1459_v20  ;;  %v3941_v52 = vor.u32 %v4641_v21, %v3940_v46  ;;  %v4289_v46 = vor.u32 %v4726_v18, %v4286_v26  ;;  %v3876_v21 = vld [vmem:[#allocation4 + $0x28] sm:$0xf] }
 0x1cf   :  { %v1432_v53 = vadd.f32 %v1431_v41, %v1403_v1  ;;  %v3877_v6 = vor.u32 %v4625_v36, %v3876_v21  ;;  %v4148_v26 = vld [vmem:[#allocation4 + $0x248] sm:$0xf]  ;;  %v4714_v21 = vld [vmem:[#allocation4 + $0x304] sm:$0xf] }
 0x1d0   :  { %v1634_v3 = vmax.f32 %v1488_v11, 0.0  ;;  %2668 = vmatpush.bf16.msra.mxu0 %v3941_v52  ;;  %2697 = vmatpush.bf16.msra.mxu1 %v4069_v31  ;;  %v4709_v31 = vld [vmem:[#allocation4 + $0x2d4] sm:$0xf0] }
 0x1d3   :  { %v1460_v12 = vpop.f32.mrf.mxu2  ;;  %v1489_v59 = vpop.f32.mrf.mxu3 }
 0x1d4   :  { %v1461_v30 = vadd.f32 %v1460_v12, %v1432_v53  ;;  %v1501_v2 = vpop.f32.mrf.mxu0  ;;  %v1530_v62 = vpop.f32.mrf.mxu1  ;;  %v4637_v53 = vld [vmem:[#allocation4 + $0x94] sm:$0xf0]  ;;  %v4052_v12 = vld [vmem:[#allocation4 + $0x188] sm:$0xf] }
 0x1d5   :  { %v1502_v13 = vadd.f32 %v1501_v2, %v5387_v14  ;;  %v3925_v11 = vor.u32 %v4637_v53, %v3924_v23 }
 0x1d6   :  { %v1490_v4 = vadd.f32 %v1489_v59, %v1461_v30  ;;  %2558 = vmatmul.bf16.vlgmr.msrb.gmra.mxu0 %v5204_v32  ;;  %v4669_v30 = vld [vmem:[#allocation4 + $0x194] sm:$0xf0] }
 0x1d7   :  { %2587 = vmatmul.bf16.vlgmr.msrb.gmra.mxu1 %v5320_v10  ;;  %v1531_v43 = vadd.f32 %v1530_v62, %v1502_v13  ;;  %v4053_v2 = vor.u32 %v4669_v30, %v4052_v12  ;;  %2669 = vmatpush.bf16.msra.mxu0 %v3925_v11  ;;  %v4302_v13 = vld [vmem:[#allocation4 + $0x390] sm:$0xf0]  ;;  %v3860_v11 = vld [vmem:[#allocation4 + $0x8] sm:$0xf]  ;;  %v4621_v30 = vld [vmem:[#allocation4 + $0x14] sm:$0xf0] }
 0x1d8   :  { %v1638_v54 = vmax.f32 %v1490_v4, 0.0 }
 0x1d9   :  { %2698 = vmatpush.bf16.msra.mxu1 %v4053_v2  ;;  %v3988_v2 = vld [vmem:[#allocation4 + $0x108] sm:$0xf] }
 0x1da   :  { %v5391_v57 = vpack.c.bf16 %v1638_v54, %v1634_v3  ;;  %v4633_v3 = vld [vmem:[#allocation4 + $0x74] sm:$0xf0]  ;;  %v4036_v54 = vld [vmem:[#allocation4 + $0x168] sm:$0xf] }
 0x1db   :  { %v1559_v17 = vpop.f32.mrf.mxu2  ;;  %v1588_v5 = vpop.f32.mrf.mxu3  ;;  %v3909_v61 = vor.u32 %v4633_v3, %v3908_v51  ;;  %v4653_v51 = vld [vmem:[#allocation4 + $0x114] sm:$0xf0]  ;;  %v4196_v3 = vld [vmem:[#allocation4 + $0x2a8] sm:$0xf] }
 0x1dc   :  { %2515 = vmatmul.bf16.gmra.mxu2 %v5391_v57  ;;  %v1503_v35 = vpop.f32.mrf.mxu0  ;;  %v1532_v42 = vpop.f32.mrf.mxu1  ;;  %v1560_v8 = vadd.f32 %v1559_v17, %v1531_v43  ;;  %v4305_v17 = vor.u32 %v4730_v47, %v4302_v13 }
 0x1dd   :  { %v1504_v45 = vadd.f32 %v1503_v35, %v5387_v14  ;;  %2670 = vmatpush.bf16.msra.mxu0 %v3909_v61  ;;  %v3892_v35 = vld [vmem:[#allocation4 + $0x48] sm:$0xf] }
 0x1de   :  { %v1589_v1 = vadd.f32 %v1588_v5, %v1560_v8  ;;  %v4037_v5 = vor.u32 %v4665_v39, %v4036_v54  ;;  %2640 = vmatpush.bf16.msrb.mxu3 %v4305_v17  ;;  %v4229_v8 = vor.u32 %v4713_v34, %v4228_v49  ;;  %v3989_v54 = vor.u32 %v4653_v51, %v3988_v2  ;;  %v4180_v39 = vld [vmem:[#allocation4 + $0x288] sm:$0xf] }
 0x1df   :  { %v1533_v25 = vadd.f32 %v1532_v42, %v1504_v45  ;;  %v4629_v42 = vld [vmem:[#allocation4 + $0x54] sm:$0xf0]  ;;  %v4164_v34 = vld [vmem:[#allocation4 + $0x268] sm:$0xf] }
 0x1e0   :  { %v1611_v62 = vmax.f32 %v1589_v1, 0.0  ;;  %2699 = vmatpush.bf16.msra.mxu1 %v4037_v5  ;;  %v3893_v43 = vor.u32 %v4629_v42, %v3892_v35  ;;  %v4661_v45 = vld [vmem:[#allocation4 + $0x154] sm:$0xf0]  ;;  %2724 = vmatpush.bf16.msra.mxu2 %v4229_v8  ;;  %v4722_v5 = vld [vmem:[#allocation4 + $0x344] sm:$0xf] }
 0x1e1   :  { %v4021_v60 = vor.u32 %v4661_v45, %v4020_v40 }
 0x1e2   :  { %2671 = vmatpush.bf16.msra.mxu0 %v3893_v43  ;;  %2641 = vmatpush.bf16.msrb.mxu3 %v4289_v46  ;;  %v4254_v43 = vld [vmem:[#allocation4 + $0x330] sm:$0xf0]  ;;  %v4693_v46 = vld [vmem:[#allocation4 + $0x254] sm:$0xf0] }
 0x1e3   :  { %v1561_v15 = vpop.f32.mrf.mxu2  ;;  %v1590_v41 = vpop.f32.mrf.mxu3 }
 0x1e4   :  { %v1562_v20 = vadd.f32 %v1561_v15, %v1533_v25  ;;  %v1506_v27 = vpop.f32.mrf.mxu0  ;;  %v1535_v56 = vpop.f32.mrf.mxu1  ;;  %v4004_v25 = vld [vmem:[#allocation4 + $0x128] sm:$0xf]  ;;  %2700 = vmatpush.bf16.msra.mxu1 %v4021_v60  ;;  %v4657_v15 = vld [vmem:[#allocation4 + $0x134] sm:$0xf0] }
 0x1e5   :  { %v1507_v63 = vadd.f32 %v1506_v27, %v5387_v14  ;;  %v4005_v27 = vor.u32 %v4657_v15, %v4004_v25  ;;  %v4697_v60 = vld [vmem:[#allocation4 + $0x274] sm:$0xf0]  ;;  %v4238_v25 = vld [vmem:[#allocation4 + $0x310] sm:$0xf0]  ;;  %v4149_v15 = vor.u32 %v4693_v46, %v4148_v26  ;;  %v4102_v26 = vld [vmem:[#allocation4 + $0x1f8] sm:$0xf0] }
 0x1e6   :  { %v1591_v59 = vadd.f32 %v1590_v41, %v1562_v20  ;;  %2563 = vmatmul.bf16.gmra.mxu0 %v5212_v33  ;;  %v4212_v41 = vld [vmem:[#allocation4 + $0x2c8] sm:$0xf]  ;;  %v4165_v18 = vor.u32 %v4697_v60, %v4164_v34  ;;  %v4647_v60 = vld [vmem:[#allocation4 + $0xec] sm:$0xf] }
 0x1e7   :  { %2592 = vmatmul.bf16.gmra.mxu1 %v5339_v16  ;;  %v1536_v0 = vadd.f32 %v1535_v56, %v1507_v63  ;;  %v4213_v56 = vor.u32 %v4709_v31, %v4212_v41  ;;  %2672 = vmatpush.bf16.msra.mxu0 %v3877_v6  ;;  %v4705_v63 = vld [vmem:[#allocation4 + $0x2b4] sm:$0xf0] }
 0x1e8   :  { %v1615_v4 = vmax.f32 %v1591_v59, 0.0  ;;  %2701 = vmatpush.bf16.msra.mxu1 %v4005_v27  ;;  %v4197_v61 = vor.u32 %v4705_v63, %v4196_v3 }
 0x1e9   :  { %2725 = vmatpush.bf16.msra.mxu2 %v4213_v56  ;;  %v4132_v56 = vld [vmem:[#allocation4 + $0x228] sm:$0xf] }
 0x1ea   :  { %v5398_v38 = vpack.c.bf16 %v1615_v4, %v1611_v62  ;;  %v3861_v4 = vor.u32 %v4621_v30, %v3860_v11  ;;  %v4116_v11 = vld [vmem:[#allocation4 + $0x208] sm:$0xf]  ;;  %v4685_v30 = vld [vmem:[#allocation4 + $0x214] sm:$0xf0] }
 0x1eb   :  { %v1564_v7 = vpop.f32.mrf.mxu2  ;;  %v1593_v22 = vpop.f32.mrf.mxu3  ;;  %v4117_v3 = vor.u32 %v4685_v30, %v4116_v11  ;;  %v4733_v11 = vld [vmem:[#allocation4 + $0x394] sm:$0xf0] }
 0x1ec   :  { %2529 = vmatmul.bf16.vlgmr.msra.gmra.mxu3 %v5398_v38  ;;  %2616 = vmatmul.bf16.vlgmr.msrb.gmra.mxu2 %v5348_v50  ;;  %v1508_v9 = vpop.f32.mrf.mxu0  ;;  %v1537_v24 = vpop.f32.mrf.mxu1  ;;  %v1565_v37 = vadd.f32 %v1564_v7, %v1536_v0  ;;  %v4701_v7 = vld [vmem:[#allocation4 + $0x294] sm:$0xf0] }
 0x1ed   :  { %v1509_v44 = vadd.f32 %v1508_v9, %v5387_v14  ;;  %2673 = vmatpush.bf16.msra.mxu0 %v3861_v4  ;;  %v4270_v9 = vld [vmem:[#allocation4 + $0x350] sm:$0xf0]  ;;  %2702 = vmatpush.bf16.msra.mxu1 %v3989_v54 }
 0x1ee   :  { %v1594_v23 = vadd.f32 %v1593_v22, %v1565_v37  ;;  %2726 = vmatpush.bf16.msra.mxu2 %v4197_v61  ;;  %v4273_v40 = vor.u32 %v4722_v5, %v4270_v9  ;;  %v4745_v61 = vld [vmem:[#allocation4 + $0x3f4] sm:$0xf0]  ;;  %v4340_v9 = vld [vmem:[#allocation4 + $0x3c8] sm:$0xf] }
 0x1ef   :  { %v1538_v52 = vadd.f32 %v1537_v24, %v1509_v44  ;;  %v4181_v24 = vor.u32 %v4701_v7, %v4180_v39  ;;  %v4718_v44 = vld [vmem:[#allocation4 + $0x324] sm:$0xf] }
 0x1f0   :  { %v1619_v47 = vmax.f32 %v1594_v23, 0.0  ;;  %2642 = vmatpush.bf16.msrb.mxu3 %v4273_v40  ;;  %v4257_v49 = vor.u32 %v4718_v44, %v4254_v43  ;;  %v4689_v23 = vld [vmem:[#allocation4 + $0x234] sm:$0xf0] }
 0x1f2   :  { %2727 = vmatpush.bf16.msra.mxu2 %v4181_v24  ;;  %v4741_v24 = vld [vmem:[#allocation4 + $0x3d4] sm:$0xf0] }
 0x1f3   :  { %v1566_v1 = vpop.f32.mrf.mxu2  ;;  %v1595_v20 = vpop.f32.mrf.mxu3 }
 0x1f4   :  { %v1567_v53 = vadd.f32 %v1566_v1, %v1538_v52  ;;  %v1511_v12 = vpop.f32.mrf.mxu0  ;;  %v1540_v59 = vpop.f32.mrf.mxu1  ;;  %2643 = vmatpush.bf16.msrb.mxu3 %v4257_v49  ;;  %v4241_v52 = vor.u32 %v4714_v21, %v4238_v25  ;;  %v4737_v25 = vld [vmem:[#allocation4 + $0x3b4] sm:$0xf0] }
 0x1f5   :  { %v1512_v17 = vadd.f32 %v1511_v12, %v5387_v14  ;;  %v4133_v12 = vor.u32 %v4689_v23, %v4132_v56  ;;  %v3942_v56 = vld [vmem:[#allocation4 + $0xb8] sm:$0xf0]  ;;  %v4671_v23 = vld [vmem:[#allocation4 + $0x1ac] sm:$0xf] }
 0x1f6   :  { %v1596_v62 = vadd.f32 %v1595_v20, %v1567_v53  ;;  %2568 = vmatmul.bf16.gmra.mxu0 %v5220_v58  ;;  %2728 = vmatpush.bf16.msra.mxu2 %v4165_v18  ;;  %v4679_v18 = vld [vmem:[#allocation4 + $0x1ec] sm:$0xf] }
 0x1f7   :  { %2597 = vmatmul.bf16.gmra.mxu1 %v5358_v28  ;;  %v1541_v8 = vadd.f32 %v1540_v59, %v1512_v17  ;;  %v4105_v21 = vor.u32 %v4679_v18, %v4102_v26  ;;  %v4623_v18 = vld [vmem:[#allocation4 + $0x2c] sm:$0xf]  ;;  %v3878_v26 = vld [vmem:[#allocation4 + $0x38] sm:$0xf0] }
 0x1f8   :  { %v1623_v13 = vmax.f32 %v1596_v62, 0.0  ;;  %2644 = vmatpush.bf16.msrb.mxu3 %v4241_v52 }
 0x1f9   :  { %2811 = vmatpush.bf16.msrb.mxu1 %v4105_v21  ;;  %v4655_v21 = vld [vmem:[#allocation4 + $0x12c] sm:$0xf] }
 0x1fa   :  { %v5406_v22 = vpack.c.bf16 %v1623_v13, %v1619_v47  ;;  %2729 = vmatpush.bf16.msra.mxu2 %v4149_v15  ;;  %v4356_v13 = vld [vmem:[#allocation4 + $0x3e8] sm:$0xf]  ;;  %v3958_v15 = vld [vmem:[#allocation4 + $0xd8] sm:$0xf0] }
 0x1fb   :  { %v1569_v35 = vpop.f32.mrf.mxu2  ;;  %v1598_v42 = vpop.f32.mrf.mxu3  ;;  %v4357_v39 = vor.u32 %v4745_v61, %v4356_v13  ;;  %v4631_v61 = vld [vmem:[#allocation4 + $0x6c] sm:$0xf] }
 0x1fc   :  { %2534 = vmatmul.bf16.gmra.mxu3 %v5406_v22  ;;  %2621 = vmatmul.bf16.gmra.mxu2 %v5367_v55  ;;  %v1513_v0 = vpop.f32.mrf.mxu0  ;;  %v1542_v45 = vpop.f32.mrf.mxu1  ;;  %v1570_v36 = vadd.f32 %v1569_v35, %v1541_v8  ;;  %v3974_v8 = vld [vmem:[#allocation4 + $0xf8] sm:$0xf0] }
 0x1fd   :  { %v1514_v37 = vadd.f32 %v1513_v0, %v5387_v14  ;;  %2753 = vmatpush.bf16.msra.mxu3 %v4357_v39  ;;  %v3910_v39 = vld [vmem:[#allocation4 + $0x78] sm:$0xf0] }
 0x1fe   :  { %v1599_v1 = vadd.f32 %v1598_v42, %v1570_v36  ;;  %2730 = vmatpush.bf16.msra.mxu2 %v4133_v12  ;;  %v4341_v42 = vor.u32 %v4741_v24, %v4340_v9  ;;  %v4324_v36 = vld [vmem:[#allocation4 + $0x3a8] sm:$0xf]  ;;  %v4070_v12 = vld [vmem:[#allocation4 + $0x1b8] sm:$0xf0] }
 0x1ff   :  { %v1543_v6 = vadd.f32 %v1542_v45, %v1514_v37  ;;  %v3977_v37 = vor.u32 %v4647_v60, %v3974_v8  ;;  %v4325_v52 = vor.u32 %v4737_v25, %v4324_v36  ;;  %v4073_v30 = vor.u32 %v4671_v23, %v4070_v12  ;;  %v3862_v23 = vld [vmem:[#allocation4 + $0x18] sm:$0xf0] }
 0x200   :  { %v1627_v2 = vmax.f32 %v1599_v1, 0.0  ;;  %v4086_v1 = vld [vmem:[#allocation4 + $0x1d8] sm:$0xf0]  ;;  %v3881_v25 = vor.u32 %v4623_v18, %v3878_v26  ;;  %v4683_v26 = vld [vmem:[#allocation4 + $0x20c] sm:$0xf] }
 0x201   :  { %2754 = vmatpush.bf16.msra.mxu3 %v4341_v42  ;;  %2782 = vmatpush.bf16.msrb.mxu0 %v3977_v37  ;;  %v4729_v42 = vld [vmem:[#allocation4 + $0x374] sm:$0xf0] }
 0x202   :  { %2731 = vmatpush.bf16.msra.mxu2 %v4117_v3  ;;  %v4667_v3 = vld [vmem:[#allocation4 + $0x18c] sm:$0xf] }
 0x203   :  { %v1571_v41 = vpop.f32.mrf.mxu2  ;;  %v1600_v31 = vpop.f32.mrf.mxu3 }
 0x204   :  { %v1572_v20 = vadd.f32 %v1571_v41, %v1543_v6  ;;  %v1516_v27 = vpop.f32.mrf.mxu0  ;;  %v1545_v59 = vpop.f32.mrf.mxu1  ;;  %v4643_v6 = vld [vmem:[#allocation4 + $0xcc] sm:$0xf] }
 0x205   :  { %v1517_v51 = vadd.f32 %v1516_v27, %v5387_v14  ;;  %v4675_v41 = vld [vmem:[#allocation4 + $0x1cc] sm:$0xf]  ;;  %2755 = vmatpush.bf16.msra.mxu3 %v4325_v52  ;;  %v4006_v52 = vld [vmem:[#allocation4 + $0x138] sm:$0xf0] }
 0x206   :  { %v1601_v53 = vadd.f32 %v1600_v31, %v1572_v20  ;;  %2573 = vmatmul.bf16.gmra.mxu0 %v5231_v19  ;;  %v3961_v31 = vor.u32 %v4643_v6, %v3958_v15  ;;  %v4089_v20 = vor.u32 %v4675_v41, %v4086_v1  ;;  %v4639_v27 = vld [vmem:[#allocation4 + $0xac] sm:$0xf]  ;;  %v4214_v15 = vld [vmem:[#allocation4 + $0x2d8] sm:$0xf0]  ;;  %v4009_v41 = vor.u32 %v4655_v21, %v4006_v52  ;;  %v4276_v1 = vld [vmem:[#allocation4 + $0x348] sm:$0xf] }
 0x207   :  { %2602 = vmatmul.bf16.gmra.mxu1 %v5375_v29  ;;  %v1546_v7 = vadd.f32 %v1545_v59, %v1517_v51  ;;  %v4308_v59 = vld [vmem:[#allocation4 + $0x388] sm:$0xf]  ;;  %v3926_v51 = vld [vmem:[#allocation4 + $0x98] sm:$0xf0]  ;;  %v4707_v6 = vld [vmem:[#allocation4 + $0x2cc] sm:$0xf] }
 0x208   :  { %v1631_v62 = vmax.f32 %v1601_v53, 0.0  ;;  %2783 = vmatpush.bf16.msrb.mxu0 %v3961_v31  ;;  %2812 = vmatpush.bf16.msrb.mxu1 %v4089_v20  ;;  %v3945_v53 = vor.u32 %v4639_v27, %v3942_v56  ;;  %v4217_v31 = vor.u32 %v4707_v6, %v4214_v15  ;;  %v4725_v20 = vld [vmem:[#allocation4 + $0x354] sm:$0xf0]  ;;  %v4619_v56 = vld [vmem:[#allocation4 + $0xc] sm:$0xf] }
 0x209   :  { %v4277_v27 = vor.u32 %v4725_v20, %v4276_v1  ;;  %v4118_v21 = vld [vmem:[#allocation4 + $0x218] sm:$0xf0]  ;;  %v4743_v15 = vld [vmem:[#allocation4 + $0x3ec] sm:$0xf] }
 0x20a   :  { %v5414_v4 = vpack.c.bf16 %v1631_v62, %v1627_v2  ;;  %v4309_v2 = vor.u32 %v4733_v11, %v4308_v59  ;;  %v4635_v62 = vld [vmem:[#allocation4 + $0x8c] sm:$0xf]  ;;  %v3865_v59 = vor.u32 %v4619_v56, %v3862_v23  ;;  %v3990_v11 = vld [vmem:[#allocation4 + $0x118] sm:$0xf0]  ;;  %v4121_v52 = vor.u32 %v4683_v26, %v4118_v21 }
 0x20b   :  { %v1574_v54 = vpop.f32.mrf.mxu2  ;;  %v1603_v63 = vpop.f32.mrf.mxu3  ;;  %v4739_v20 = vld [vmem:[#allocation4 + $0x3cc] sm:$0xf] }
 0x20c   :  { %2539 = vmatmul.bf16.gmra.mxu3 %v5414_v4  ;;  %2626 = vmatmul.bf16.gmra.mxu2 %v5379_v48  ;;  %v1518_v47 = vpop.f32.mrf.mxu0  ;;  %v1575_v5 = vadd.f32 %v1574_v54, %v1546_v7  ;;  %v1547_v35 = vpop.f32.mrf.mxu1  ;;  %v3929_v54 = vor.u32 %v4635_v62, %v3926_v51  ;;  %v4663_v7 = vld [vmem:[#allocation4 + $0x16c] sm:$0xf] }
 0x20d   :  { %v1519_v17 = vadd.f32 %v1518_v47, %v5387_v14  ;;  %2784 = vmatpush.bf16.msrb.mxu0 %v3945_v53  ;;  %2756 = vmatpush.bf16.msra.mxu3 %v4309_v2  ;;  %v4651_v53 = vld [vmem:[#allocation4 + $0x10c] sm:$0xf]  ;;  %v4198_v2 = vld [vmem:[#allocation4 + $0x2b8] sm:$0xf0] }
 0x20e   :  { %v1604_v44 = vadd.f32 %v1603_v63, %v1575_v5  ;;  %2813 = vmatpush.bf16.msrb.mxu1 %v4073_v30  ;;  %v4054_v63 = vld [vmem:[#allocation4 + $0x198] sm:$0xf0]  ;;  %v4703_v30 = vld [vmem:[#allocation4 + $0x2ac] sm:$0xf]  ;;  %v3993_v51 = vor.u32 %v4651_v53, %v3990_v11 }
 0x20f   :  { %v1548_v40 = vadd.f32 %v1547_v35, %v1519_v17  ;;  %v4057_v13 = vor.u32 %v4667_v3, %v4054_v63  ;;  %v3913_v17 = vor.u32 %v4631_v61, %v3910_v39  ;;  %v4038_v5 = vld [vmem:[#allocation4 + $0x178] sm:$0xf0]  ;;  %v4292_v35 = vld [vmem:[#allocation4 + $0x368] sm:$0xf]  ;;  %v4201_v3 = vor.u32 %v4703_v30, %v4198_v2  ;;  %v4735_v30 = vld [vmem:[#allocation4 + $0x3ac] sm:$0xf] }
 0x210   :  { %v1635_v34 = vmax.f32 %v1604_v44, 0.0  ;;  %v4041_v9 = vor.u32 %v4663_v7, %v4038_v5  ;;  %v3894_v44 = vld [vmem:[#allocation4 + $0x58] sm:$0xf0]  ;;  %v4260_v39 = vld [vmem:[#allocation4 + $0x328] sm:$0xf] }
 0x211   :  { %2785 = vmatpush.bf16.msrb.mxu0 %v3929_v54  ;;  %v4699_v54 = vld [vmem:[#allocation4 + $0x28c] sm:$0xf]  ;;  %v4182_v63 = vld [vmem:[#allocation4 + $0x298] sm:$0xf0]  ;;  %v4721_v7 = vld [vmem:[#allocation4 + $0x334] sm:$0xf0] }
 0x212   :  { %2814 = vmatpush.bf16.msrb.mxu1 %v4057_v13  ;;  %v4185_v13 = vor.u32 %v4699_v54, %v4182_v63  ;;  %v4695_v5 = vld [vmem:[#allocation4 + $0x26c] sm:$0xf]  ;;  %v4753_v11 = vld [vmem:[#allocation6 + $0x38] sm:$0xff]  ;;  %v4752_v54 = vld [vmem:[#allocation6 + $0x30] sm:$0xff] }
 0x213   :  { %v1576_v0 = vpop.f32.mrf.mxu2  ;;  %v1605_v45 = vpop.f32.mrf.mxu3  ;;  %v4326_v2 = vld [vmem:[#allocation4 + $0x3b8] sm:$0xf0] }
 0x214   :  { %v1577_v43 = vadd.f32 %v1576_v0, %v1548_v40  ;;  %v5426_v47 = vpop.f32.mrf.mxu0  ;;  %v5430_v24 = vpop.f32.mrf.mxu1  ;;  %v4293_v40 = vor.u32 %v4729_v42, %v4292_v35  ;;  %v4627_v0 = vld [vmem:[#allocation4 + $0x4c] sm:$0xf] }
 0x215   :  { %2786 = vmatpush.bf16.msrb.mxu0 %v3913_v17  ;;  %v4261_v17 = vor.u32 %v4721_v7, %v4260_v39 }
 0x216   :  { %v1606_v49 = vadd.f32 %v1605_v45, %v1577_v43  ;;  %2674 = vmatmul.bf16.vlgmr.msra.gmra.mxu0 %v5204_v32  ;;  %2815 = vmatpush.bf16.msrb.mxu1 %v4041_v9  ;;  %v4659_v43 = vld [vmem:[#allocation4 + $0x14c] sm:$0xf]  ;;  %v3897_v45 = vor.u32 %v4627_v0, %v3894_v44  ;;  %v4166_v9 = vld [vmem:[#allocation4 + $0x278] sm:$0xf0]  ;;  %v4244_v44 = vld [vmem:[#allocation4 + $0x308] sm:$0xf] }
 0x217   :  { %2703 = vmatmul.bf16.vlgmr.msra.gmra.mxu1 %v5320_v10  ;;  %2757 = vmatpush.bf16.msra.mxu3 %v4293_v40  ;;  %v4169_v35 = vor.u32 %v4695_v5, %v4166_v9  ;;  %v4691_v40 = vld [vmem:[#allocation4 + $0x24c] sm:$0xf]  ;;  %v4150_v0 = vld [vmem:[#allocation4 + $0x258] sm:$0xf0] }
 0x218   :  { %v1639_v14 = vmax.f32 %v1606_v49, 0.0  ;;  %v4022_v49 = vld [vmem:[#allocation4 + $0x158] sm:$0xf0] }
 0x219   :  { %v4025_v8 = vor.u32 %v4659_v43, %v4022_v49  ;;  %2787 = vmatpush.bf16.msrb.mxu0 %v3897_v45  ;;  %v4717_v45 = vld [vmem:[#allocation4 + $0x314] sm:$0xf0]  ;;  %v4153_v49 = vor.u32 %v4691_v40, %v4150_v0  ;;  %v4727_v40 = vld [vmem:[#allocation4 + $0x36c] sm:$0xf]  ;;  %v4294_v0 = vld [vmem:[#allocation4 + $0x378] sm:$0xf0] }
 0x21a   :  { %v5422_v46 = vpack.c.bf16 %v1639_v14, %v1635_v34  ;;  %v4711_v34 = vld [vmem:[#allocation4 + $0x2ec] sm:$0xf]  ;;  %v4230_v14 = vld [vmem:[#allocation4 + $0x2f8] sm:$0xf0] }
 0x21b   :  { %v4233_v37 = vor.u32 %v4711_v34, %v4230_v14  ;;  %2816 = vmatpush.bf16.msrb.mxu1 %v4025_v8  ;;  %2758 = vmatpush.bf16.msra.mxu3 %v4277_v27  ;;  %v4245_v34 = vor.u32 %v4717_v45, %v4244_v44  ;;  %v4687_v8 = vld [vmem:[#allocation4 + $0x22c] sm:$0xf]  ;;  %v4342_v27 = vld [vmem:[#allocation4 + $0x3d8] sm:$0xf0]  ;;  %v4297_v45 = vor.u32 %v4727_v40, %v4294_v0  ;;  %v4758_v0 = vld [vmem:[#allocation6 + $0x60] sm:$0xff] }
 0x21c   :  { %2544 = vmatmul.bf16.gmra.mxu3 %v5422_v46  ;;  %2631 = vmatmul.bf16.gmra.mxu2 %v5391_v57  ;;  %v5436_v36 = vpop.f32.mrf.mxu0  ;;  %v5438_v12 = vpop.f32.mrf.mxu1  ;;  %v4345_v56 = vor.u32 %v4739_v20, %v4342_v27 }
 0x21d   :  { %2840 = vmatpush.bf16.msrb.mxu2 %v4233_v37  ;;  %2788 = vmatpush.bf16.msrb.mxu0 %v3881_v25  ;;  %v4134_v37 = vld [vmem:[#allocation4 + $0x238] sm:$0xf0] }
 0x21e   :  { %v4137_v18 = vor.u32 %v4687_v8, %v4134_v37  ;;  %v4723_v8 = vld [vmem:[#allocation4 + $0x34c] sm:$0xf]  ;;  %v4278_v37 = vld [vmem:[#allocation4 + $0x358] sm:$0xf0] }
 0x21f   :  { %2817 = vmatpush.bf16.msrb.mxu1 %v4009_v41  ;;  %2759 = vmatpush.bf16.msra.mxu3 %v4261_v17  ;;  %v4358_v41 = vld [vmem:[#allocation4 + $0x3f8] sm:$0xf0]  ;;  %v4750_v17 = vld [vmem:[#allocation6 + $0x20] sm:$0xff]  ;;  %v4281_v26 = vor.u32 %v4723_v8, %v4278_v37 }
 0x221   :  { %2841 = vmatpush.bf16.msrb.mxu2 %v4217_v31  ;;  %2789 = vmatpush.bf16.msrb.mxu0 %v3865_v59  ;;  %v4361_v31 = vor.u32 %v4743_v15, %v4358_v41  ;;  %v4719_v41 = vld [vmem:[#allocation4 + $0x32c] sm:$0xf] }
 0x223   :  { %2818 = vmatpush.bf16.msrb.mxu1 %v3993_v51  ;;  %2760 = vmatpush.bf16.msra.mxu3 %v4245_v34  ;;  %v4329_v51 = vor.u32 %v4735_v30, %v4326_v2  ;;  %v4747_v34 = vld [vmem:[#allocation6 + $0x8] sm:$0xff]  ;;  %v4760_v30 = vld [vmem:[#allocation6 + $0x70] sm:$0xff] }
 0x224   :  { %v5444_v61 = vpop.f32.mrf.mxu0  ;;  %v5448_v42 = vpop.f32.mrf.mxu1  ;;  %v4715_v2 = vld [vmem:[#allocation4 + $0x30c] sm:$0xf] }
 0x225   :  { %2842 = vmatpush.bf16.msrb.mxu2 %v4201_v3  ;;  %3206 = vmatpush.bf16.msra.mxu0 %v4753_v11 }
 0x226   :  { %2679 = vmatmul.bf16.gmra.mxu0 %v5212_v33 }
 0x227   :  { %2708 = vmatmul.bf16.gmra.mxu1 %v5339_v16 }
 0x229   :  { %2843 = vmatpush.bf16.msrb.mxu2 %v4185_v13  ;;  %3207 = vmatpush.bf16.msra.mxu0 %v4752_v54  ;;  %v4310_v13 = vld [vmem:[#allocation4 + $0x398] sm:$0xf0] }
 0x22c   :  { %2645 = vmatmul.bf16.vlgmr.msrb.gmra.mxu3 %v5398_v38  ;;  %2732 = vmatmul.bf16.vlgmr.msra.gmra.mxu2 %v5348_v50  ;;  %v5452_v14 = vpop.f32.mrf.mxu0  ;;  %v5456_v25 = vpop.f32.mrf.mxu1 }
 0x22d   :  { %2844 = vmatpush.bf16.msrb.mxu2 %v4169_v35  ;;  %2869 = vmatpush.bf16.msrb.mxu3 %v4361_v31  ;;  %v4749_v35 = vld [vmem:[#allocation6 + $0x18] sm:$0xff] }
 0x22e   :  { %v4262_v31 = vld [vmem:[#allocation4 + $0x338] sm:$0xf0] }
 0x22f   :  { %v5434_v60 = vpop.f32.mrf.mxu2  ;;  %v4265_v27 = vor.u32 %v4719_v41, %v4262_v31 }
 0x231   :  { %2845 = vmatpush.bf16.msrb.mxu2 %v4153_v49  ;;  %2870 = vmatpush.bf16.msrb.mxu3 %v4345_v56  ;;  %v4748_v49 = vld [vmem:[#allocation6 + $0x10] sm:$0xff] }
 0x234   :  { %v5462_v1 = vpop.f32.mrf.mxu0  ;;  %v5464_v23 = vpop.f32.mrf.mxu1 }
 0x235   :  { %2846 = vmatpush.bf16.msrb.mxu2 %v4137_v18  ;;  %2871 = vmatpush.bf16.msrb.mxu3 %v4329_v51  ;;  %v4246_v51 = vld [vmem:[#allocation4 + $0x318] sm:$0xf0] }
 0x236   :  { %2684 = vmatmul.bf16.gmra.mxu0 %v5220_v58  ;;  %v4249_v54 = vor.u32 %v4715_v2, %v4246_v51  ;;  %v4754_v2 = vld [vmem:[#allocation6 + $0x40] sm:$0xff] }
 0x237   :  { %v5440_v62 = vpop.f32.mrf.mxu2  ;;  %2713 = vmatmul.bf16.gmra.mxu1 %v5358_v28 }
 0x239   :  { %2847 = vmatpush.bf16.msrb.mxu2 %v4121_v52 }
 0x23c   :  { %2650 = vmatmul.bf16.gmra.mxu3 %v5406_v22  ;;  %2737 = vmatmul.bf16.gmra.mxu2 %v5367_v55  ;;  %v5470_v59 = vpop.f32.mrf.mxu0  ;;  %v5474_v3 = vpop.f32.mrf.mxu1 }
 0x23f   :  { %v5450_v43 = vpop.f32.mrf.mxu2 }
 0x244   :  { %v5478_v39 = vpop.f32.mrf.mxu0  ;;  %v5482_v5 = vpop.f32.mrf.mxu1 }
 0x246   :  { %2689 = vmatmul.bf16.gmra.mxu0 %v5231_v19 }
 0x247   :  { %2718 = vmatmul.bf16.gmra.mxu1 %v5375_v29  ;;  %v5458_v6 = vpop.f32.mrf.mxu2 }
 0x24c   :  { %2655 = vmatmul.bf16.gmra.mxu3 %v5414_v4  ;;  %2742 = vmatmul.bf16.gmra.mxu2 %v5379_v48  ;;  %v5488_v44 = vpop.f32.mrf.mxu0 }
 0x24f   :  { %v5466_v53 = vpop.f32.mrf.mxu2 }
 0x254   :  { %v5494_v21 = vpop.f32.mrf.mxu0 }
 0x256   :  { %2790 = vmatmul.bf16.vlgmr.msrb.gmra.mxu0 %v5204_v32  ;;  %v4751_v32 = vld [vmem:[#allocation6 + $0x28] sm:$0xff] }
 0x257   :  { %2819 = vmatmul.bf16.vlgmr.msrb.gmra.mxu1 %v5320_v10  ;;  %v5476_v63 = vpop.f32.mrf.mxu2  ;;  %v4731_v10 = vld [vmem:[#allocation4 + $0x38c] sm:$0xf]  ;;  %3208 = vmatpush.bf16.msra.mxu0 %v4751_v32 }
 0x258   :  { %v4313_v7 = vor.u32 %v4731_v10, %v4310_v13 }
 0x25a   :  { %2872 = vmatpush.bf16.msrb.mxu3 %v4313_v7 }
 0x25b   :  { %3209 = vmatpush.bf16.msra.mxu0 %v4750_v17 }
 0x25c   :  { %2660 = vmatmul.bf16.gmra.mxu3 %v5422_v46  ;;  %2747 = vmatmul.bf16.gmra.mxu2 %v5391_v57  ;;  %v5509_v11 = vpop.f32.mrf.mxu0 }
 0x25e   :  { %2873 = vmatpush.bf16.msrb.mxu3 %v4297_v45 }
 0x25f   :  { %v5484_v9 = vpop.f32.mrf.mxu2  ;;  %3210 = vmatpush.bf16.msra.mxu0 %v4749_v35  ;;  %v4759_v35 = vld [vmem:[#allocation6 + $0x68] sm:$0xff] }
 0x262   :  { %2874 = vmatpush.bf16.msrb.mxu3 %v4281_v26 }
 0x263   :  { %3211 = vmatpush.bf16.msra.mxu0 %v4748_v49 }
 0x264   :  { %v5527_v49 = vpop.f32.mrf.mxu0 }
 0x266   :  { %2795 = vmatmul.bf16.gmra.mxu0 %v5212_v33  ;;  %2875 = vmatpush.bf16.msrb.mxu3 %v4265_v27 }
 0x267   :  { %2824 = vmatmul.bf16.gmra.mxu1 %v5339_v16  ;;  %v5490_v16 = vpop.f32.mrf.mxu1  ;;  %v5492_v18 = vpop.f32.mrf.mxu2  ;;  %3212 = vmatpush.bf16.msra.mxu0 %v4747_v34 }
 0x26a   :  { %2876 = vmatpush.bf16.msrb.mxu3 %v4249_v54 }
 0x26c   :  { %2761 = vmatmul.bf16.vlgmr.msra.gmra.mxu3 %v5398_v38  ;;  %2848 = vmatmul.bf16.vlgmr.msrb.gmra.mxu2 %v5348_v50  ;;  %v4746_v50 = vld [vmem:[#allocation6] sm:$0xff]  ;;  %v5538_v41 = vpop.f32.mrf.mxu0 }
 0x26d   :  { %3213 = vmatpush.bf16.msra.mxu0 %v4746_v50 }
 0x26f   :  { %v2530_v33 = vpop.f32.mrf.mxu3  ;;  %v5498_v15 = vpop.f32.mrf.mxu1 }
 0x270   :  { %v5502_v20 = vpop.f32.mrf.mxu2 }
 0x274   :  { %v5552_v54 = vpop.f32.mrf.mxu0 }
 0x276   :  { %2800 = vmatmul.bf16.gmra.mxu0 %v5220_v58  ;;  %v5507_v58 = vld [vmem:[%s5694_s6] sm:$0xf] }
 0x277   :  { %v2532_v52 = vpop.f32.mrf.mxu3  ;;  %2829 = vmatmul.bf16.gmra.mxu1 %v5358_v28  ;;  %v4761_v28 = vld [vmem:[#allocation6 + $0x78] sm:$0xff]  ;;  %v5516_v10 = vpop.f32.mrf.mxu1 }
 0x278   :  { %3235 = vmatpush.bf16.msra.mxu1 %v4761_v28  ;;  %v5520_v7 = vpop.f32.mrf.mxu2 }
 0x27c   :  { %2766 = vmatmul.bf16.gmra.mxu3 %v5406_v22  ;;  %2853 = vmatmul.bf16.gmra.mxu2 %v5367_v55  ;;  %v5512_v55 = vperm.slane %v5507_v58, 0 }
 0x27d   :  { %3236 = vmatpush.bf16.msra.mxu1 %v4760_v30 }
 0x27e   :  { %v2446_v32 = vadd.f32 %v5436_v36, %v5512_v55  ;;  %v2444_v13 = vadd.f32 %v5426_v47, %v5512_v55  ;;  %v2451_v50 = vadd.f32 %v5452_v14, %v5512_v55 }
 0x27f   :  { %v2535_v56 = vpop.f32.mrf.mxu3  ;;  %v5532_v8 = vpop.f32.mrf.mxu1 }
 0x280   :  { %v2475_v40 = vadd.f32 %v5438_v12, %v2446_v32  ;;  %v2473_v36 = vadd.f32 %v5430_v24, %v2444_v13  ;;  %v4757_v12 = vld [vmem:[#allocation6 + $0x58] sm:$0xff]  ;;  %v5534_v26 = vpop.f32.mrf.mxu2  ;;  %v4756_v24 = vld [vmem:[#allocation6 + $0x50] sm:$0xff]  ;;  %v2480_v31 = vadd.f32 %v5456_v25, %v2451_v50 }
 0x281   :  { %3237 = vmatpush.bf16.msra.mxu1 %v4759_v35 }
 0x282   :  { %v2504_v45 = vadd.f32 %v5440_v62, %v2475_v40  ;;  %v2502_v47 = vadd.f32 %v5434_v60, %v2473_v36  ;;  %v2449_v60 = vadd.f32 %v5444_v61, %v5512_v55  ;;  %v2509_v30 = vadd.f32 %v5458_v6, %v2480_v31  ;;  %v5563_v36 = vpop.f32.mrf.mxu0 }
 0x283   :  { %v2456_v6 = vadd.f32 %v5470_v59, %v5512_v55 }
 0x284   :  { %v2478_v28 = vadd.f32 %v5448_v42, %v2449_v60 }
 0x285   :  { %3238 = vmatpush.bf16.msra.mxu1 %v4758_v0 }
 0x286   :  { %2805 = vmatmul.bf16.gmra.mxu0 %v5231_v19  ;;  %v2533_v19 = vadd.f32 %v2532_v52, %v2504_v45  ;;  %v4755_v52 = vld [vmem:[#allocation6 + $0x48] sm:$0xff]  ;;  %v2507_v61 = vadd.f32 %v5450_v43, %v2478_v28 }
 0x287   :  { %v2537_v17 = vpop.f32.mrf.mxu3  ;;  %2834 = vmatmul.bf16.gmra.mxu1 %v5375_v29  ;;  %v2531_v29 = vadd.f32 %v2530_v33, %v2502_v47  ;;  %v5543_v27 = vpop.f32.mrf.mxu1 }
 0x288   :  { %v2902_v37 = vmax.f32 %v2533_v19, 0.0  ;;  %v5547_v14 = vpop.f32.mrf.mxu2  ;;  %v2538_v51 = vadd.f32 %v2537_v17, %v2509_v30  ;;  %v2536_v25 = vadd.f32 %v2535_v56, %v2507_v61  ;;  %v2485_v17 = vadd.f32 %v5474_v3, %v2456_v6 }
 0x289   :  { %3239 = vmatpush.bf16.msra.mxu1 %v4757_v12  ;;  %v2898_v62 = vmax.f32 %v2531_v29, 0.0  ;;  %v5566_v56 = vperm.slane %v5507_v58, 1 }
 0x28a   :  { %v2910_v13 = vmax.f32 %v2538_v51, 0.0  ;;  %v2906_v35 = vmax.f32 %v2536_v25, 0.0  ;;  %v2514_v47 = vadd.f32 %v5476_v63, %v2485_v17 }
 0x28b   :  { %v2565_v61 = vadd.f32 %v5527_v49, %v5566_v56  ;;  %v2567_v25 = vadd.f32 %v5538_v41, %v5566_v56 }
 0x28c   :  { %2771 = vmatmul.bf16.gmra.mxu3 %v5414_v4  ;;  %2858 = vmatmul.bf16.gmra.mxu2 %v5379_v48  ;;  %v2930_v48 = vpack.c.bf16 %v2902_v37, %v2898_v62  ;;  %v2934_v0 = vpack.c.bf16 %v2910_v13, %v2906_v35  ;;  %v5581_v62 = vpop.f32.mrf.mxu0 }
 0x28d   :  { %3240 = vmatpush.bf16.msra.mxu1 %v4756_v24  ;;  %v2562_v24 = vadd.f32 %v5509_v11, %v5566_v56  ;;  %v2459_v11 = vadd.f32 %v5478_v39, %v5512_v55 }
 0x28f   :  { %v2540_v34 = vpop.f32.mrf.mxu3  ;;  %v5554_v42 = vpop.f32.mrf.mxu1 }
 0x290   :  { %v5558_v40 = vpop.f32.mrf.mxu2 }
 0x291   :  { %3241 = vmatpush.bf16.msra.mxu1 %v4755_v52 }
 0x295   :  { %3242 = vmatpush.bf16.msra.mxu1 %v4754_v2 }
 0x296   :  { %3214 = vmatmul.bf16.vlgmr.msra.gmra.mxu0 %v2930_v48 }
 0x297   :  { %v2542_v33 = vpop.f32.mrf.mxu3  ;;  %v5574_v29 = vpop.f32.mrf.mxu1 }
 0x298   :  { %v2543_v19 = vadd.f32 %v2542_v33, %v2514_v47  ;;  %v5576_v12 = vpop.f32.mrf.mxu2 }
 0x29c   :  { %2776 = vmatmul.bf16.gmra.mxu3 %v5422_v46  ;;  %2863 = vmatmul.bf16.gmra.mxu2 %v5391_v57  ;;  %v2454_v57 = vadd.f32 %v5462_v1, %v5512_v55  ;;  %v2560_v1 = vadd.f32 %v5494_v21, %v5566_v56  ;;  %v2461_v21 = vadd.f32 %v5488_v44, %v5512_v55  ;;  %v5599_v55 = vpop.f32.mrf.mxu0 }
 0x29d   :  { %v2488_v44 = vadd.f32 %v5482_v5, %v2459_v11  ;;  %v4769_v5 = vld [vmem:[#allocation6 + $0xb8] sm:$0xff]  ;;  %v4763_v11 = vld [vmem:[#allocation6 + $0x88] sm:$0xff] }
 0x29e   :  { %v2483_v45 = vadd.f32 %v5464_v23, %v2454_v57  ;;  %v2918_v23 = vmax.f32 %v2543_v19, 0.0  ;;  %v2589_v63 = vadd.f32 %v5498_v15, %v2560_v1  ;;  %v2490_v31 = vadd.f32 %v5490_v16, %v2461_v21  ;;  %3264 = vmatpush.bf16.msra.mxu2 %v4769_v5  ;;  %v4766_v19 = vld [vmem:[#allocation6 + $0xa0] sm:$0xff] }
 0x29f   :  { %v2545_v32 = vpop.f32.mrf.mxu3  ;;  %v5590_v15 = vpop.f32.mrf.mxu1  ;;  %v2517_v39 = vadd.f32 %v5484_v9, %v2488_v44 }
 0x2a0   :  { %v2512_v59 = vadd.f32 %v5466_v53, %v2483_v45  ;;  %v2591_v53 = vadd.f32 %v5516_v10, %v2562_v24  ;;  %v2618_v50 = vadd.f32 %v5502_v20, %v2589_v63  ;;  %v5593_v10 = vpop.f32.mrf.mxu2  ;;  %v2519_v30 = vadd.f32 %v5492_v18, %v2490_v31  ;;  %v4765_v24 = vld [vmem:[#allocation6 + $0x98] sm:$0xff]  ;;  %v4762_v31 = vld [vmem:[#allocation6 + $0x80] sm:$0xff] }
 0x2a1   :  { %v2546_v16 = vadd.f32 %v2545_v32, %v2517_v39  ;;  %v2594_v18 = vadd.f32 %v5532_v8, %v2565_v61  ;;  %v4767_v8 = vld [vmem:[#allocation6 + $0xa8] sm:$0xff] }
 0x2a2   :  { %v2541_v3 = vadd.f32 %v2540_v34, %v2512_v59  ;;  %v2620_v48 = vadd.f32 %v5520_v7, %v2591_v53 }
 0x2a3   :  { %v2922_v9 = vmax.f32 %v2546_v16, 0.0  ;;  %v2623_v57 = vadd.f32 %v5534_v26, %v2594_v18 }
 0x2a4   :  { %v5609_v17 = vpop.f32.mrf.mxu0 }
 0x2a6   :  { %3219 = vmatmul.bf16.gmra.mxu0 %v2934_v0  ;;  %v2596_v0 = vadd.f32 %v5543_v27, %v2567_v25  ;;  %v5630_v25 = vperm.slane %v5507_v58, 2 }
 0x2a7   :  { %v2547_v43 = vpop.f32.mrf.mxu3  ;;  %v2605_v35 = vpop.f32.mrf.mxu1 }
 0x2a8   :  { %v2548_v2 = vadd.f32 %v2547_v43, %v2519_v30  ;;  %v2634_v6 = vpop.f32.mrf.mxu2  ;;  %v2625_v32 = vadd.f32 %v5547_v14, %v2596_v0  ;;  %v2570_v14 = vadd.f32 %v5552_v54, %v5566_v56 }
 0x2aa   :  { %v2926_v13 = vmax.f32 %v2548_v2, 0.0  ;;  %v2599_v63 = vadd.f32 %v5554_v42, %v2570_v14 }
 0x2ac   :  { %2877 = vmatmul.bf16.vlgmr.msrb.gmra.mxu3 %v5398_v38  ;;  %v2914_v38 = vmax.f32 %v2541_v3, 0.0  ;;  %v2942_v49 = vpack.c.bf16 %v2926_v13, %v2922_v9 }
 0x2ae   :  { %v2938_v34 = vpack.c.bf16 %v2918_v23, %v2914_v38  ;;  %v2677_v23 = vpop.f32.mrf.mxu0  ;;  %v4764_v38 = vld [vmem:[#allocation6 + $0x90] sm:$0xff] }
 0x2af   :  { %v2646_v37 = vpop.f32.mrf.mxu3  ;;  %v5611_v1 = vpop.f32.mrf.mxu1  ;;  %v2678_v9 = vadd.f32 %v2677_v23, %v5630_v25 }
 0x2b0   :  { %v2647_v60 = vadd.f32 %v2646_v37, %v2618_v50  ;;  %v2733_v27 = vpop.f32.mrf.mxu2  ;;  %v2572_v37 = vadd.f32 %v5563_v36, %v5566_v56 }
 0x2b2   :  { %v2899_v20 = vmax.f32 %v2647_v60, 0.0  ;;  %v2601_v53 = vadd.f32 %v5574_v29, %v2572_v37  ;;  %v4773_v37 = vld [vmem:[#allocation6 + $0xd8] sm:$0xff] }
 0x2b4   :  { %v2630_v50 = vadd.f32 %v5576_v12, %v2601_v53  ;;  %v4777_v12 = vld [vmem:[#allocation6 + $0xf8] sm:$0xff] }
 0x2b5   :  { %3293 = vmatpush.bf16.msra.mxu3 %v4777_v12 }
 0x2b6   :  { %3224 = vmatmul.bf16.gmra.mxu0 %v2938_v34 }
 0x2b7   :  { %v2648_v33 = vpop.f32.mrf.mxu3  ;;  %v2706_v21 = vpop.f32.mrf.mxu1 }
 0x2b8   :  { %v2649_v52 = vadd.f32 %v2648_v33, %v2620_v48  ;;  %v2735_v34 = vpop.f32.mrf.mxu2  ;;  %v2707_v0 = vadd.f32 %v2706_v21, %v2678_v9 }
 0x2ba   :  { %v2903_v28 = vmax.f32 %v2649_v52, 0.0  ;;  %v2680_v52 = vpop.f32.mrf.mxu0 }
 0x2bb   :  { %v2681_v14 = vadd.f32 %v2680_v52, %v5630_v25 }
 0x2bc   :  { %v2931_v7 = vpack.c.bf16 %v2903_v28, %v2899_v20  ;;  %2882 = vmatmul.bf16.gmra.mxu3 %v5406_v22  ;;  %v4768_v22 = vld [vmem:[#allocation6 + $0xb0] sm:$0xff]  ;;  %v2577_v20 = vadd.f32 %v5599_v55, %v5566_v56 }
 0x2bd   :  { %3265 = vmatpush.bf16.msra.mxu2 %v4768_v22  ;;  %v4775_v22 = vld [vmem:[#allocation6 + $0xe8] sm:$0xff] }
 0x2be   :  { %3243 = vmatmul.bf16.vlgmr.msra.gmra.mxu1 %v2931_v7  ;;  %v2606_v7 = vadd.f32 %v2605_v35, %v2577_v20 }
 0x2bf   :  { %v2651_v51 = vpop.f32.mrf.mxu3  ;;  %v2709_v28 = vpop.f32.mrf.mxu1 }
 0x2c0   :  { %v2652_v43 = vadd.f32 %v2651_v51, %v2623_v57  ;;  %v2738_v44 = vpop.f32.mrf.mxu2  ;;  %v2635_v2 = vadd.f32 %v2634_v6, %v2606_v7  ;;  %v2710_v23 = vadd.f32 %v2709_v28, %v2681_v14  ;;  %v4770_v7 = vld [vmem:[#allocation6 + $0xc0] sm:$0xff] }
 0x2c1   :  { %3266 = vmatpush.bf16.msra.mxu2 %v4767_v8 }
 0x2c2   :  { %v2907_v47 = vmax.f32 %v2652_v43, 0.0  ;;  %v2682_v39 = vpop.f32.mrf.mxu0  ;;  %v4774_v43 = vld [vmem:[#allocation6 + $0xe0] sm:$0xff]  ;;  %v2739_v53 = vadd.f32 %v2738_v44, %v2710_v23 }
 0x2c5   :  { %3267 = vmatpush.bf16.msra.mxu2 %v4766_v19 }
 0x2c6   :  { %3229 = vmatmul.bf16.gmra.mxu0 %v2942_v49 }
 0x2c7   :  { %v2653_v41 = vpop.f32.mrf.mxu3  ;;  %v2711_v5 = vpop.f32.mrf.mxu1 }
 0x2c8   :  { %v2654_v45 = vadd.f32 %v2653_v41, %v2625_v32  ;;  %v2740_v13 = vpop.f32.mrf.mxu2  ;;  %v2736_v41 = vadd.f32 %v2735_v34, %v2707_v0 }
 0x2c9   :  { %3268 = vmatpush.bf16.msra.mxu2 %v4765_v24 }
 0x2ca   :  { %v2911_v59 = vmax.f32 %v2654_v45, 0.0 }
 0x2cc   :  { %2887 = vmatmul.bf16.gmra.mxu3 %v5414_v4  ;;  %v2935_v26 = vpack.c.bf16 %v2911_v59, %v2907_v47  ;;  %v2628_v4 = vadd.f32 %v5558_v40, %v2599_v63  ;;  %v2575_v40 = vadd.f32 %v5581_v62, %v5566_v56  ;;  %v4776_v62 = vld [vmem:[#allocation6 + $0xf0] sm:$0xff] }
 0x2cd   :  { %3269 = vmatpush.bf16.msra.mxu2 %v4764_v38  ;;  %3294 = vmatpush.bf16.msra.mxu3 %v4776_v62 }
 0x2ce   :  { %3248 = vmatmul.bf16.gmra.mxu1 %v2935_v26  ;;  %v2604_v30 = vadd.f32 %v5590_v15, %v2575_v40  ;;  %v2676_v15 = vadd.f32 %v5609_v17, %v5630_v25 }
 0x2cf   :  { %v2656_v3 = vpop.f32.mrf.mxu3  ;;  %v2714_v49 = vpop.f32.mrf.mxu1 }
 0x2d0   :  { %v2657_v54 = vadd.f32 %v2656_v3, %v2628_v4  ;;  %v2705_v6 = vadd.f32 %v5611_v1, %v2676_v15  ;;  %v2743_v32 = vpop.f32.mrf.mxu2  ;;  %v4772_v4 = vld [vmem:[#allocation6 + $0xd0] sm:$0xff] }
 0x2d1   :  { %3270 = vmatpush.bf16.msra.mxu2 %v4763_v11  ;;  %3295 = vmatpush.bf16.msra.mxu3 %v4775_v22 }
 0x2d2   :  { %v2915_v36 = vmax.f32 %v2657_v54, 0.0  ;;  %v2734_v57 = vadd.f32 %v2733_v27, %v2705_v6  ;;  %v2683_v27 = vadd.f32 %v2682_v39, %v5630_v25 }
 0x2d4   :  { %v2712_v38 = vadd.f32 %v2711_v5, %v2683_v27 }
 0x2d5   :  { %3271 = vmatpush.bf16.msra.mxu2 %v4762_v31  ;;  %3296 = vmatpush.bf16.msra.mxu3 %v4774_v43  ;;  %v4771_v31 = vld [vmem:[#allocation6 + $0xc8] sm:$0xff] }
 0x2d7   :  { %v2658_v48 = vpop.f32.mrf.mxu3  ;;  %v2716_v3 = vpop.f32.mrf.mxu1 }
 0x2d8   :  { %v2659_v60 = vadd.f32 %v2658_v48, %v2630_v50  ;;  %v2745_v1 = vpop.f32.mrf.mxu2  ;;  %v2741_v50 = vadd.f32 %v2740_v13, %v2712_v38 }
 0x2d9   :  { %3297 = vmatpush.bf16.msra.mxu3 %v4773_v37 }
 0x2da   :  { %v2919_v33 = vmax.f32 %v2659_v60, 0.0 }
 0x2dc   :  { %2892 = vmatmul.bf16.gmra.mxu3 %v5422_v46  ;;  %v2939_v42 = vpack.c.bf16 %v2919_v33, %v2915_v36  ;;  %v2633_v46 = vadd.f32 %v5593_v10, %v2604_v30  ;;  %v2685_v10 = vpop.f32.mrf.mxu0 }
 0x2dd   :  { %3298 = vmatpush.bf16.msra.mxu3 %v4772_v4 }
 0x2de   :  { %3253 = vmatmul.bf16.gmra.mxu1 %v2939_v42  ;;  %v2686_v42 = vadd.f32 %v2685_v10, %v5630_v25 }
 0x2df   :  { %v2661_v29 = vpop.f32.mrf.mxu3  ;;  %v2719_v34 = vpop.f32.mrf.mxu1 }
 0x2e0   :  { %v2662_v61 = vadd.f32 %v2661_v29, %v2633_v46  ;;  %v2748_v60 = vpop.f32.mrf.mxu2  ;;  %v2715_v12 = vadd.f32 %v2714_v49, %v2686_v42 }
 0x2e1   :  { %3299 = vmatpush.bf16.msra.mxu3 %v4771_v31 }
 0x2e2   :  { %v2923_v56 = vmax.f32 %v2662_v61, 0.0  ;;  %v2744_v30 = vadd.f32 %v2743_v32, %v2715_v12 }
 0x2e4   :  { %v2687_v17 = vpop.f32.mrf.mxu0 }
 0x2e5   :  { %v2688_v29 = vadd.f32 %v2687_v17, %v5630_v25  ;;  %3300 = vmatpush.bf16.msra.mxu3 %v4770_v7 }
 0x2e7   :  { %v2663_v16 = vpop.f32.mrf.mxu3  ;;  %v2721_v20 = vpop.f32.mrf.mxu1  ;;  %v2717_v44 = vadd.f32 %v2716_v3, %v2688_v29 }
 0x2e8   :  { %v2664_v51 = vadd.f32 %v2663_v16, %v2635_v2  ;;  %v2750_v28 = vpop.f32.mrf.mxu2 }
 0x2e9   :  { %v2746_v46 = vadd.f32 %v2745_v1, %v2717_v44 }
 0x2ea   :  { %v2927_v55 = vmax.f32 %v2664_v51, 0.0 }
 0x2ec   :  { %v2943_v18 = vpack.c.bf16 %v2927_v55, %v2923_v56  ;;  %v2690_v63 = vpop.f32.mrf.mxu0 }
 0x2ed   :  { %v2691_v13 = vadd.f32 %v2690_v63, %v5630_v25 }
 0x2ee   :  { %3258 = vmatmul.bf16.gmra.mxu1 %v2943_v18 }
 0x2ef   :  { %v2762_v35 = vpop.f32.mrf.mxu3  ;;  %v2820_v5 = vpop.f32.mrf.mxu1 }
 0x2f0   :  { %v2763_v45 = vadd.f32 %v2762_v35, %v2734_v57  ;;  %v2849_v55 = vpop.f32.mrf.mxu2  ;;  %v2720_v35 = vadd.f32 %v2719_v34, %v2691_v13 }
 0x2f2   :  { %v2900_v59 = vmax.f32 %v2763_v45, 0.0  ;;  %v2749_v9 = vadd.f32 %v2748_v60, %v2720_v35 }
 0x2f4   :  { %v2692_v52 = vpop.f32.mrf.mxu0 }
 0x2f5   :  { %v2693_v15 = vadd.f32 %v2692_v52, %v5630_v25 }
 0x2f7   :  { %v2764_v8 = vpop.f32.mrf.mxu3  ;;  %v2722_v22 = vadd.f32 %v2721_v20, %v2693_v15  ;;  %v2822_v6 = vpop.f32.mrf.mxu1 }
 0x2f8   :  { %v2765_v47 = vadd.f32 %v2764_v8, %v2736_v41  ;;  %v2851_v49 = vpop.f32.mrf.mxu2  ;;  %v5643_v41 = vperm.slane %v5507_v58, 3 }
 0x2f9   :  { %v2751_v0 = vadd.f32 %v2750_v28, %v2722_v22 }
 0x2fa   :  { %v2904_v19 = vmax.f32 %v2765_v47, 0.0 }
 0x2fc   :  { %v2932_v26 = vpack.c.bf16 %v2904_v19, %v2900_v59  ;;  %v2791_v2 = vpop.f32.mrf.mxu0 }
 0x2fd   :  { %v2792_v59 = vadd.f32 %v2791_v2, %v5643_v41 }
 0x2fe   :  { %3272 = vmatmul.bf16.vlgmr.msra.gmra.mxu2 %v2932_v26 }
 0x2ff   :  { %v2767_v24 = vpop.f32.mrf.mxu3  ;;  %v2825_v26 = vpop.f32.mrf.mxu1  ;;  %v2821_v3 = vadd.f32 %v2820_v5, %v2792_v59 }
 0x300   :  { %v2768_v21 = vadd.f32 %v2767_v24, %v2739_v53  ;;  %v2854_v14 = vpop.f32.mrf.mxu2 }
 0x301   :  { %v2850_v1 = vadd.f32 %v2849_v55, %v2821_v3 }
 0x302   :  { %v2908_v11 = vmax.f32 %v2768_v21, 0.0 }
 0x304   :  { %v2793_v10 = vpop.f32.mrf.mxu0 }
 0x305   :  { %v2794_v19 = vadd.f32 %v2793_v10, %v5643_v41 }
 0x307   :  { %v2769_v54 = vpop.f32.mrf.mxu3  ;;  %v2823_v37 = vadd.f32 %v2822_v6, %v2794_v19  ;;  %v2827_v38 = vpop.f32.mrf.mxu1 }
 0x308   :  { %v2770_v48 = vadd.f32 %v2769_v54, %v2741_v50  ;;  %v2856_v50 = vpop.f32.mrf.mxu2 }
 0x309   :  { %v2852_v27 = vadd.f32 %v2851_v49, %v2823_v37 }
 0x30a   :  { %v2912_v36 = vmax.f32 %v2770_v48, 0.0 }
 0x30c   :  { %v2936_v33 = vpack.c.bf16 %v2912_v36, %v2908_v11  ;;  %v2796_v47 = vpop.f32.mrf.mxu0 }
 0x30d   :  { %v2797_v54 = vadd.f32 %v2796_v47, %v5643_v41 }
 0x30e   :  { %3277 = vmatmul.bf16.gmra.mxu2 %v2936_v33 }
 0x30f   :  { %v2772_v40 = vpop.f32.mrf.mxu3  ;;  %v2826_v11 = vadd.f32 %v2825_v26, %v2797_v54  ;;  %v2830_v33 = vpop.f32.mrf.mxu1 }
 0x310   :  { %v2773_v39 = vadd.f32 %v2772_v40, %v2744_v30  ;;  %v2859_v42 = vpop.f32.mrf.mxu2 }
 0x311   :  { %v2855_v52 = vadd.f32 %v2854_v14, %v2826_v11 }
 0x312   :  { %v2916_v62 = vmax.f32 %v2773_v39, 0.0 }
 0x314   :  { %v2798_v24 = vpop.f32.mrf.mxu0 }
 0x315   :  { %v2799_v60 = vadd.f32 %v2798_v24, %v5643_v41 }
 0x317   :  { %v2774_v61 = vpop.f32.mrf.mxu3  ;;  %v2828_v36 = vadd.f32 %v2827_v38, %v2799_v60 }
 0x318   :  { %v2775_v16 = vadd.f32 %v2774_v61, %v2746_v46  ;;  %v2832_v46 = vpop.f32.mrf.mxu1  ;;  %v2861_v39 = vpop.f32.mrf.mxu2 }
 0x319   :  { %v2857_v31 = vadd.f32 %v2856_v50, %v2828_v36 }
 0x31a   :  { %v2920_v51 = vmax.f32 %v2775_v16, 0.0 }
 0x31c   :  { %v2940_v56 = vpack.c.bf16 %v2920_v51, %v2916_v62  ;;  %v2801_v34 = vpop.f32.mrf.mxu0 }
 0x31d   :  { %v2802_v7 = vadd.f32 %v2801_v34, %v5643_v41 }
 0x31e   :  { %3282 = vmatmul.bf16.gmra.mxu2 %v2940_v56 }
 0x31f   :  { %v2777_v18 = vpop.f32.mrf.mxu3  ;;  %v2831_v16 = vadd.f32 %v2830_v33, %v2802_v7 }
 0x320   :  { %v2778_v57 = vadd.f32 %v2777_v18, %v2749_v9  ;;  %v2835_v15 = vpop.f32.mrf.mxu1  ;;  %v2864_v10 = vpop.f32.mrf.mxu2 }
 0x321   :  { %v2860_v5 = vadd.f32 %v2859_v42, %v2831_v16 }
 0x322   :  { %v2924_v45 = vmax.f32 %v2778_v57, 0.0 }
 0x324   :  { %v2803_v20 = vpop.f32.mrf.mxu0 }
 0x325   :  { %v2804_v61 = vadd.f32 %v2803_v20, %v5643_v41 }
 0x327   :  { %v2779_v32 = vpop.f32.mrf.mxu3  ;;  %v2833_v51 = vadd.f32 %v2832_v46, %v2804_v61 }
 0x328   :  { %v2780_v43 = vadd.f32 %v2779_v32, %v2751_v0 }
 0x329   :  { %v2862_v56 = vadd.f32 %v2861_v39, %v2833_v51 }
 0x32a   :  { %v2928_v8 = vmax.f32 %v2780_v43, 0.0  ;;  %v2837_v43 = vpop.f32.mrf.mxu1 }
 0x32c   :  { %v2944_v17 = vpack.c.bf16 %v2928_v8, %v2924_v45  ;;  %v2806_v62 = vpop.f32.mrf.mxu0  ;;  %v2866_v45 = vpop.f32.mrf.mxu2 }
 0x32d   :  { %v2807_v0 = vadd.f32 %v2806_v62, %v5643_v41 }
 0x32e   :  { %3287 = vmatmul.bf16.gmra.mxu2 %v2944_v17 }
 0x32f   :  { %v2878_v25 = vpop.f32.mrf.mxu3  ;;  %v2836_v32 = vadd.f32 %v2835_v15, %v2807_v0 }
 0x330   :  { %v2879_v23 = vadd.f32 %v2878_v25, %v2850_v1 }
 0x331   :  { %v2865_v47 = vadd.f32 %v2864_v10, %v2836_v32 }
 0x332   :  { %v2901_v53 = vmax.f32 %v2879_v23, 0.0 }
 0x334   :  { %v2808_v6 = vpop.f32.mrf.mxu0 }
 0x335   :  { %v2809_v49 = vadd.f32 %v2808_v6, %v5643_v41  ;;  %v4795_v41 = vld [vmem:[%s5696_s8] ss:$0 sm:$0xff] }
 0x337   :  { %v2880_v58 = vpop.f32.mrf.mxu3  ;;  %v2838_v8 = vadd.f32 %v2837_v43, %v2809_v49 }
 0x338   :  { %v2881_v63 = vadd.f32 %v2880_v58, %v2852_v27 }
 0x339   :  { %v2867_v17 = vadd.f32 %v2866_v45, %v2838_v8 }
 0x33a   :  { %v2905_v4 = vmax.f32 %v2881_v63, 0.0 }
 0x33b   :  { %v3244_v1 = vpop.f32.mrf.mxu1 }
 0x33c   :  { %v2933_v21 = vpack.c.bf16 %v2905_v4, %v2901_v53  ;;  %v3215_v37 = vpop.f32.mrf.mxu0 }
 0x33d   :  { %v3216_v63 = vadd.f32 %v4795_v41, %v3215_v37 }
 0x33e   :  { %3301 = vmatmul.bf16.vlgmr.msra.gmra.mxu3 %v2933_v21 }
 0x33f   :  { %v2883_v48 = vpop.f32.mrf.mxu3  ;;  %v3245_v38 = vadd.f32 %v3244_v1, %v3216_v63 }
 0x340   :  { %v2884_v40 = vadd.f32 %v2883_v48, %v2855_v52 }
 0x342   :  { %v2909_v28 = vmax.f32 %v2884_v40, 0.0 }
 0x343   :  { %v3246_v23 = vpop.f32.mrf.mxu1 }
 0x344   :  { %v3217_v27 = vpop.f32.mrf.mxu0 }
 0x345   :  { %v3218_v48 = vadd.f32 %v4795_v41, %v3217_v27 }
 0x347   :  { %v2885_v29 = vpop.f32.mrf.mxu3  ;;  %v3247_v60 = vadd.f32 %v3246_v23, %v3218_v48 }
 0x348   :  { %v2886_v12 = vadd.f32 %v2885_v29, %v2857_v31 }
 0x34a   :  { %v2913_v44 = vmax.f32 %v2886_v12, 0.0 }
 0x34b   :  { %v3249_v50 = vpop.f32.mrf.mxu1 }
 0x34c   :  { %v2937_v30 = vpack.c.bf16 %v2913_v44, %v2909_v28  ;;  %v3220_v53 = vpop.f32.mrf.mxu0 }
 0x34d   :  { %v3221_v31 = vadd.f32 %v4795_v41, %v3220_v53 }
 0x34e   :  { %3306 = vmatmul.bf16.gmra.mxu3 %v2937_v30 }
 0x34f   :  { %v2888_v2 = vpop.f32.mrf.mxu3  ;;  %v3250_v29 = vadd.f32 %v3249_v50, %v3221_v31 }
 0x350   :  { %v2889_v55 = vadd.f32 %v2888_v2, %v2860_v5 }
 0x352   :  { %v2917_v35 = vmax.f32 %v2889_v55, 0.0 }
 0x353   :  { %v3251_v42 = vpop.f32.mrf.mxu1 }
 0x354   :  { %v3222_v36 = vpop.f32.mrf.mxu0 }
 0x355   :  { %v3223_v30 = vadd.f32 %v4795_v41, %v3222_v36 }
 0x357   :  { %v2890_v13 = vpop.f32.mrf.mxu3  ;;  %v3252_v46 = vadd.f32 %v3251_v42, %v3223_v30 }
 0x358   :  { %v2891_v18 = vadd.f32 %v2890_v13, %v2862_v56 }
 0x35a   :  { %v2921_v22 = vmax.f32 %v2891_v18, 0.0 }
 0x35b   :  { %v3254_v7 = vpop.f32.mrf.mxu1 }
 0x35c   :  { %v2941_v9 = vpack.c.bf16 %v2921_v22, %v2917_v35  ;;  %v3225_v44 = vpop.f32.mrf.mxu0 }
 0x35d   :  { %v3226_v62 = vadd.f32 %v4795_v41, %v3225_v44 }
 0x35e   :  { %3311 = vmatmul.bf16.gmra.mxu3 %v2941_v9 }
 0x35f   :  { %v2893_v57 = vpop.f32.mrf.mxu3  ;;  %v3255_v5 = vadd.f32 %v3254_v7, %v3226_v62 }
 0x360   :  { %v2894_v59 = vadd.f32 %v2893_v57, %v2865_v47 }
 0x362   :  { %v2925_v26 = vmax.f32 %v2894_v59, 0.0 }
 0x363   :  { %v3256_v56 = vpop.f32.mrf.mxu1 }
 0x364   :  { %v3227_v51 = vpop.f32.mrf.mxu0 }
 0x365   :  { %v3228_v10 = vadd.f32 %v4795_v41, %v3227_v51 }
 0x367   :  { %v2895_v25 = vpop.f32.mrf.mxu3  ;;  %v3257_v35 = vadd.f32 %v3256_v56, %v3228_v10 }
 0x368   :  { %v2896_v19 = vadd.f32 %v2895_v25, %v2867_v17 }
 0x36a   :  { %v2929_v14 = vmax.f32 %v2896_v19, 0.0 }
 0x36b   :  { %v3259_v6 = vpop.f32.mrf.mxu1 }
 0x36c   :  { %v2945_v3 = vpack.c.bf16 %v2929_v14, %v2925_v26  ;;  %v3230_v22 = vpop.f32.mrf.mxu0 }
 0x36d   :  { %v3231_v32 = vadd.f32 %v4795_v41, %v3230_v22 }
 0x36e   :  { %3316 = vmatmul.bf16.gmra.mxu3 %v2945_v3 }
 0x36f   :  { %v3260_v43 = vadd.f32 %v3259_v6, %v3231_v32 }
 0x373   :  { %v3261_v59 = vpop.f32.mrf.mxu1 }
 0x374   :  { %v3232_v8 = vpop.f32.mrf.mxu0 }
 0x375   :  { %v3233_v25 = vadd.f32 %v4795_v41, %v3232_v8 }
 0x377   :  { %v3262_v26 = vadd.f32 %v3261_v59, %v3233_v25 }
 0x381   :  { %v3273_v24 = vpop.f32.mrf.mxu2 }
 0x382   :  { %v3274_v4 = vadd.f32 %v3273_v24, %v3245_v38 }
 0x389   :  { %v3275_v58 = vpop.f32.mrf.mxu2 }
 0x38a   :  { %v3276_v11 = vadd.f32 %v3275_v58, %v3247_v60 }
 0x391   :  { %v3278_v34 = vpop.f32.mrf.mxu2 }
 0x392   :  { %v3279_v12 = vadd.f32 %v3278_v34, %v3250_v29 }
 0x399   :  { %v3280_v40 = vpop.f32.mrf.mxu2 }
 0x39a   :  { %v3281_v2 = vadd.f32 %v3280_v40, %v3252_v46 }
 0x3a1   :  { %v3283_v39 = vpop.f32.mrf.mxu2 }
 0x3a2   :  { %v3284_v55 = vadd.f32 %v3283_v39, %v3255_v5 }
 0x3a9   :  { %v3285_v13 = vpop.f32.mrf.mxu2 }
 0x3aa   :  { %v3286_v9 = vadd.f32 %v3285_v13, %v3257_v35 }
 0x3b1   :  { %v3288_v49 = vpop.f32.mrf.mxu2 }
 0x3b2   :  { %v3289_v45 = vadd.f32 %v3288_v49, %v3260_v43 }
 0x3b9   :  { %v3290_v19 = vpop.f32.mrf.mxu2 }
 0x3ba   :  { %v3291_v14 = vadd.f32 %v3290_v19, %v3262_v26 }
 0x3c1   :  { %v3302_v21 = vpop.f32.mrf.mxu3 }
 0x3c2   :  { %v3303_v54 = vadd.f32 %v3302_v21, %v3274_v4 }
 0x3c4   :  { %3323 = vst.msk [vmem:[%s5697_s9] sm:$0xff] %vm3322_vm0, %v3303_v54 }
 0x3c9   :  { %v3304_v33 = vpop.f32.mrf.mxu3 }
 0x3ca   :  { %v3305_v52 = vadd.f32 %v3304_v33, %v3276_v11 }
 0x3cc   :  { %3324 = vst.msk [vmem:[%s5697_s9 + $0x8] sm:$0xff] %vm3322_vm0, %v3305_v52 }
 0x3d1   :  { %v3307_v20 = vpop.f32.mrf.mxu3 }
 0x3d2   :  { %v3308_v28 = vadd.f32 %v3307_v20, %v3279_v12 }
 0x3d4   :  { %3325 = vst.msk [vmem:[%s5697_s9 + $0x10] sm:$0xff] %vm3322_vm0, %v3308_v28 }
 0x3d9   :  { %v3309_v61 = vpop.f32.mrf.mxu3 }
 0x3da   :  { %v3310_v16 = vadd.f32 %v3309_v61, %v3281_v2 }
 0x3dc   :  { %3326 = vst.msk [vmem:[%s5697_s9 + $0x18] sm:$0xff] %vm3322_vm0, %v3310_v16 }
 0x3e1   :  { %v3312_v18 = vpop.f32.mrf.mxu3 }
 0x3e2   :  { %v3313_v15 = vadd.f32 %v3312_v18, %v3284_v55 }
 0x3e4   :  { %3327 = vst.msk [vmem:[%s5697_s9 + $0x20] sm:$0xff] %vm3322_vm0, %v3313_v15 }
 0x3e9   :  { %v3314_v0 = vpop.f32.mrf.mxu3 }
 0x3ea   :  { %v3315_v57 = vadd.f32 %v3314_v0, %v3286_v9 }
 0x3ec   :  { %3328 = vst.msk [vmem:[%s5697_s9 + $0x28] sm:$0xff] %vm3322_vm0, %v3315_v57 }
 0x3f1   :  { %v3317_v47 = vpop.f32.mrf.mxu3 }
 0x3f2   :  { %v3318_v17 = vadd.f32 %v3317_v47, %v3289_v45 }
 0x3f4   :  { %3329 = vst.msk [vmem:[%s5697_s9 + $0x30] sm:$0xff] %vm3322_vm0, %v3318_v17 }
 0x3f9   :  { %v3319_v3 = vpop.f32.mrf.mxu3 }
 0x3fa   :  { %v3320_v37 = vadd.f32 %v3319_v3, %v3291_v14 }
 0x3fc   :  { %3330 = vst.msk [vmem:[%s5697_s9 + $0x38] sm:$0xff] %vm3322_vm0, %v3320_v37 }
 0x3fd   :  { %3335 = vsyncpa [#allocation3], 1 }
 0x3fe   :  { %3336 = vsyncpa [#allocation5], 1 }

// kernel: tpu_custom_call.1
= control target key start
LH: loop header
LB: loop body
LE: loop exit
PB: predicated region body
PF: predicated region fallthrough
CT: control target
= control target key end

     0   :  { %14 = vsyncpa [#allocation3], 0  ;;  %s5688_s0 = inlined_call_operand.vmem [shape: f32[64,2], index: 0, kind: input, shape index: {}]   ;;  %s5689_s1 = inlined_call_operand.vmem [shape: f32[2,512], index: 1, kind: input, shape index: {}]   ;;  %s5690_s2 = inlined_call_operand.vmem [shape: f32[1,512], index: 2, kind: input, shape index: {}]   ;;  %s5691_s3 = inlined_call_operand.hbm [shape: bf16[512,512], index: 3, kind: input, shape index: {}]   ;;  %s5692_s4 = inlined_call_operand.vmem [shape: f32[1,512], index: 4, kind: input, shape index: {}]   ;;  %s5693_s5 = inlined_call_operand.hbm [shape: bf16[512,512], index: 5, kind: input, shape index: {}]   ;;  %s5694_s6 = inlined_call_operand.vmem [shape: f32[1,512], index: 6, kind: input, shape index: {}]   ;;  %s5695_s7 = inlined_call_operand.hbm [shape: bf16[512,128], index: 7, kind: input, shape index: {}]   ;;  %s5696_s8 = inlined_call_operand.vmem [shape: f32[1,128], index: 8, kind: input, shape index: {}]   ;;  %s5697_s9 = inlined_call_operand.vmem [shape: f32[64,2], index: 9, kind: output, shape index: {}]  }
   0x1   :  { %15 = vsyncpa [#allocation5], 0  ;;  %s41_s11 = sshll.u32 %s5693_s5, 4  ;;  %s4873_s12 = smov [#allocation4]   ;;  %s42_s11 = int_to_ptr.hbm [resolvable:$true] %s41_s11 }
   0x2   :  { %s43_s13 = sshll.u32 %s4873_s12, 4  ;;  %s26_s16 = sshll.u32 %s5691_s3, 4  ;;  %s44_s13 = int_to_ptr.vmem [resolvable:$true] %s43_s13  ;;  %s27_s16 = int_to_ptr.hbm [resolvable:$true] %s26_s16 }
   0x3   :  { %s4874_s17 = smov 256   ;;  %s4875_s18 = smov 16  }
   0x4   :  { %49 = dma.hbm_to_vmem [thread:$0]  %s42_s11, 16384, %s44_s13, [#allocation5], %s4874_s17, %s4874_s17, %s4875_s18  }
   0x5   :  { %s4876_s19 = smov [#allocation2]   ;;  %s56_s23 = sshll.u32 %s5695_s7, 4  ;;  %s57_s23 = int_to_ptr.hbm [resolvable:$true] %s56_s23 }
   0x6   :  { %s28_s20 = sshll.u32 %s4876_s19, 4  ;;  %s4877_s5 = smov [#allocation6]   ;;  %s29_s20 = int_to_ptr.vmem [resolvable:$true] %s28_s20 }
   0x7   :  { %34 = dma.hbm_to_vmem [thread:$0]  %s27_s16, 16384, %s29_s20, [#allocation3], %s4874_s17, %s4874_s17, %s4875_s18  }
   0x8   :  { %s58_s24 = sshll.u32 %s4877_s5, 4  ;;  %s4878_s25 = smov 64   ;;  %s59_s24 = int_to_ptr.vmem [resolvable:$true] %s58_s24 }
   0x9   :  { %s4879_s26 = smov 4  }
   0xa   :  { %64 = dma.hbm_to_vmem [thread:$0]  %s57_s23, 4096, %s59_s24, [#allocation5], %s4878_s25, %s4878_s25, %s4879_s26  }
   0xb   :  { %4869 = dma.done.wait [#allocation3], 16384  }
   0xc   :  { %4870 = vsyncadd [#allocation3], 4294950912 }
   0xd   :  { %4871 = dma.done.wait [#allocation5], 20480  }
   0xe   :  { %4872 = vsyncadd [#allocation5], 4294946816  ;;  %v4880_v0 = vmov 1   ;;  %v4881_v1 = vmov 0   ;;  %v79_v2 = vld [vmem:[%s5688_s0] sm:$0xff]  ;;  %v81_v3 = vld [vmem:[%s5688_s0 + $0x10] sm:$0xff] }
   0xf   :  { %4788 = vset.pattern.permute.xlu1 %v4880_v0  ;;  %4787 = vset.pattern.permute.xlu0 %v4881_v1  ;;  %v80_v4 = vld [vmem:[%s5688_s0 + $0x8] sm:$0xff]  ;;  %v82_v5 = vld [vmem:[%s5688_s0 + $0x18] sm:$0xff]  ;;  %v3452_v6 = vld [vmem:[#allocation2 + $0xe0] sm:$0xf]  ;;  %vm3322_vm0 = vcmask 15360  }
  0x10   :  { %4789 = vset.pattern.permute.xlu2 %v4881_v1  ;;  %172 = vperm.xlu1 %4788, %v79_v2   ;;  %v4520_v7 = vld [vmem:[#allocation2 + $0xec] sm:$0xf0]  ;;  %v3580_v8 = vld [vmem:[#allocation2 + $0x1e0] sm:$0xf]  ;;  %v84_v19 = vld [vmem:[%s5688_s0 + $0x28] sm:$0xff] }
  0x11   :  { %90 = vperm.xlu0 %4787, %v79_v2   ;;  %100 = vperm.xlu2 %4789, %v81_v3   ;;  %v3453_v9 = vor.u32 %v4520_v7, %v3452_v6  ;;  %v4552_v10 = vld [vmem:[#allocation2 + $0x1ec] sm:$0xf0]  ;;  %v3708_v11 = vld [vmem:[#allocation2 + $0x2e0] sm:$0xf]  ;;  %v86_v21 = vld [vmem:[%s5688_s0 + $0x38] sm:$0xff] }
  0x12   :  { %v4584_v12 = vld [vmem:[#allocation2 + $0x2ec] sm:$0xf0]  ;;  %v3581_v13 = vor.u32 %v4552_v10, %v3580_v8  ;;  %v3836_v15 = vld [vmem:[#allocation2 + $0x3e0] sm:$0xf] }
  0x13   :  { %v3709_v14 = vor.u32 %v4584_v12, %v3708_v11  ;;  %v4616_v16 = vld [vmem:[#allocation2 + $0x3ec] sm:$0xf0]  ;;  %1144 = vmatpush.bf16.msra.mxu0 %v3453_v9  ;;  %v83_v18 = vld [vmem:[%s5688_s0 + $0x20] sm:$0xff] }
  0x14   :  { %v3837_v17 = vor.u32 %v4616_v16, %v3836_v15  ;;  %1173 = vmatpush.bf16.msra.mxu1 %v3581_v13  ;;  %v85_v20 = vld [vmem:[%s5688_s0 + $0x30] sm:$0xff]  ;;  %v3436_v22 = vld [vmem:[#allocation2 + $0xc0] sm:$0xf] }
  0x15   :  { %1202 = vmatpush.bf16.msra.mxu2 %v3709_v14  ;;  %v4516_v23 = vld [vmem:[#allocation2 + $0xcc] sm:$0xf0]  ;;  %v3564_v24 = vld [vmem:[#allocation2 + $0x1c0] sm:$0xf] }
  0x16   :  { %1231 = vmatpush.bf16.msra.mxu3 %v3837_v17  ;;  %v3437_v25 = vor.u32 %v4516_v23, %v3436_v22  ;;  %v4548_v26 = vld [vmem:[#allocation2 + $0x1cc] sm:$0xf0]  ;;  %v3692_v27 = vld [vmem:[#allocation2 + $0x2c0] sm:$0xf] }
  0x17   :  { %v4580_v28 = vld [vmem:[#allocation2 + $0x2cc] sm:$0xf0]  ;;  %v3565_v29 = vor.u32 %v4548_v26, %v3564_v24  ;;  %v3820_v31 = vld [vmem:[#allocation2 + $0x3c0] sm:$0xf] }
  0x18   :  { %176 = vperm.xlu1 %4788, %v80_v4   ;;  %v3693_v30 = vor.u32 %v4580_v28, %v3692_v27  ;;  %v4612_v32 = vld [vmem:[#allocation2 + $0x3cc] sm:$0xf0]  ;;  %v3420_v33 = vld [vmem:[#allocation2 + $0xa0] sm:$0xf]  ;;  %1145 = vmatpush.bf16.msra.mxu0 %v3437_v25 }
  0x19   :  { %95 = vperm.xlu0 %4787, %v80_v4   ;;  %105 = vperm.xlu2 %4789, %v82_v5   ;;  %v3821_v34 = vor.u32 %v4612_v32, %v3820_v31  ;;  %v4512_v35 = vld [vmem:[#allocation2 + $0xac] sm:$0xf0]  ;;  %v3548_v36 = vld [vmem:[#allocation2 + $0x1a0] sm:$0xf] }
  0x1a   :  { %v4544_v37 = vld [vmem:[#allocation2 + $0x1ac] sm:$0xf0]  ;;  %1174 = vmatpush.bf16.msra.mxu1 %v3565_v29  ;;  %1203 = vmatpush.bf16.msra.mxu2 %v3693_v30  ;;  %v3421_v38 = vor.u32 %v4512_v35, %v3420_v33  ;;  %v3676_v40 = vld [vmem:[#allocation2 + $0x2a0] sm:$0xf] }
  0x1b   :  { %v3549_v39 = vor.u32 %v4544_v37, %v3548_v36  ;;  %v4576_v41 = vld [vmem:[#allocation2 + $0x2ac] sm:$0xf0]  ;;  %v3804_v42 = vld [vmem:[#allocation2 + $0x3a0] sm:$0xf]  ;;  %1232 = vmatpush.bf16.msra.mxu3 %v3821_v34 }
  0x1c   :  { %v3677_v43 = vor.u32 %v4576_v41, %v3676_v40  ;;  %v4608_v44 = vld [vmem:[#allocation2 + $0x3ac] sm:$0xf0]  ;;  %1146 = vmatpush.bf16.msra.mxu0 %v3421_v38  ;;  %v3404_v46 = vld [vmem:[#allocation2 + $0x80] sm:$0xf] }
  0x1d   :  { %v3805_v45 = vor.u32 %v4608_v44, %v3804_v42  ;;  %v4508_v47 = vld [vmem:[#allocation2 + $0x8c] sm:$0xf0]  ;;  %v3532_v48 = vld [vmem:[#allocation2 + $0x180] sm:$0xf]  ;;  %v4582_v44 = vld [vmem:[#allocation2 + $0x2e4] sm:$0xf] }
  0x1e   :  { %1175 = vmatpush.bf16.msra.mxu1 %v3549_v39  ;;  %1204 = vmatpush.bf16.msra.mxu2 %v3677_v43  ;;  %v3405_v49 = vor.u32 %v4508_v47, %v3404_v46  ;;  %v4540_v50 = vld [vmem:[#allocation2 + $0x18c] sm:$0xf0]  ;;  %v3660_v51 = vld [vmem:[#allocation2 + $0x280] sm:$0xf]  ;;  %v4518_v46 = vld [vmem:[#allocation2 + $0xe4] sm:$0xf] }
  0x1f   :  { %1233 = vmatpush.bf16.msra.mxu3 %v3805_v45  ;;  %v4572_v52 = vld [vmem:[#allocation2 + $0x28c] sm:$0xf0]  ;;  %v3533_v53 = vor.u32 %v4540_v50, %v3532_v48  ;;  %v3788_v55 = vld [vmem:[#allocation2 + $0x380] sm:$0xf]  ;;  %v3710_v45 = vld [vmem:[#allocation2 + $0x2f0] sm:$0xf0] }
  0x20   :  { %184 = vperm.xlu1 %4788, %v82_v5   ;;  %v3661_v54 = vor.u32 %v4572_v52, %v3660_v51  ;;  %v4604_v56 = vld [vmem:[#allocation2 + $0x38c] sm:$0xf0]  ;;  %1147 = vmatpush.bf16.msra.mxu0 %v3405_v49  ;;  %v3388_v58 = vld [vmem:[#allocation2 + $0x60] sm:$0xf]  ;;  %v3713_v47 = vor.u32 %v4582_v44, %v3710_v45  ;;  %v3454_v48 = vld [vmem:[#allocation2 + $0xf0] sm:$0xf0] }
  0x21   :  { %4790 = vset.pattern.permute.xlu0 %v4880_v0  ;;  %110 = vperm.xlu2 %4789, %v83_v18   ;;  %v3789_v57 = vor.u32 %v4604_v56, %v3788_v55  ;;  %v4504_v59 = vld [vmem:[#allocation2 + $0x6c] sm:$0xf0]  ;;  %v3516_v60 = vld [vmem:[#allocation2 + $0x160] sm:$0xf]  ;;  %v4614_v49 = vld [vmem:[#allocation2 + $0x3e4] sm:$0xf]  ;;  %v3457_v51 = vor.u32 %v4518_v46, %v3454_v48 }
  0x22   :  { %180 = vperm.xlu0 %4790, %v81_v3   ;;  %1176 = vmatpush.bf16.msra.mxu1 %v3533_v53  ;;  %v4536_v61 = vld [vmem:[#allocation2 + $0x16c] sm:$0xf0]  ;;  %v3389_v62 = vor.u32 %v4504_v59, %v3388_v58  ;;  %v3772_v2 = vld [vmem:[#allocation2 + $0x360] sm:$0xf]  ;;  %v3838_v50 = vld [vmem:[#allocation2 + $0x3f0] sm:$0xf0] }
  0x23   :  { %1205 = vmatpush.bf16.msra.mxu2 %v3661_v54  ;;  %1234 = vmatpush.bf16.msra.mxu3 %v3789_v57  ;;  %v3517_v63 = vor.u32 %v4536_v61, %v3516_v60  ;;  %v4600_v4 = vld [vmem:[#allocation2 + $0x36c] sm:$0xf0]  ;;  %v3372_v6 = vld [vmem:[#allocation2 + $0x40] sm:$0xf]  ;;  %v3841_v52 = vor.u32 %v4614_v49, %v3838_v50  ;;  %v4550_v53 = vld [vmem:[#allocation2 + $0x1e4] sm:$0xf] }
  0x24   :  { %1148 = vmatpush.bf16.msra.mxu0 %v3389_v62  ;;  %v3773_v5 = vor.u32 %v4600_v4, %v3772_v2  ;;  %v4500_v7 = vld [vmem:[#allocation2 + $0x4c] sm:$0xf0]  ;;  %v3500_v8 = vld [vmem:[#allocation2 + $0x140] sm:$0xf]  ;;  %v3582_v54 = vld [vmem:[#allocation2 + $0x1f0] sm:$0xf0] }
  0x25   :  { %v3373_v9 = vor.u32 %v4500_v7, %v3372_v6  ;;  %v4532_v10 = vld [vmem:[#allocation2 + $0x14c] sm:$0xf0]  ;;  %v3628_v11 = vld [vmem:[#allocation2 + $0x240] sm:$0xf]  ;;  %v3585_v55 = vor.u32 %v4550_v53, %v3582_v54  ;;  %v4514_v2 = vld [vmem:[#allocation2 + $0xc4] sm:$0xf] }
  0x26   :  { %1177 = vmatpush.bf16.msra.mxu1 %v3517_v63  ;;  %v4564_v12 = vld [vmem:[#allocation2 + $0x24c] sm:$0xf0]  ;;  %v3501_v13 = vor.u32 %v4532_v10, %v3500_v8  ;;  %v3756_v15 = vld [vmem:[#allocation2 + $0x340] sm:$0xf]  ;;  %v4610_v4 = vld [vmem:[#allocation2 + $0x3c4] sm:$0xf] }
  0x27   :  { %1235 = vmatpush.bf16.msra.mxu3 %v3773_v5  ;;  %v3629_v14 = vor.u32 %v4564_v12, %v3628_v11  ;;  %v4596_v16 = vld [vmem:[#allocation2 + $0x34c] sm:$0xf0]  ;;  %v3612_v23 = vld [vmem:[#allocation2 + $0x220] sm:$0xf]  ;;  %v3822_v5 = vld [vmem:[#allocation2 + $0x3d0] sm:$0xf0] }
  0x28   :  { %4791 = vset.pattern.permute.xlu1 %v4881_v1  ;;  %v3757_v17 = vor.u32 %v4596_v16, %v3756_v15  ;;  %1149 = vmatpush.bf16.msra.mxu0 %v3373_v9  ;;  %v4528_v22 = vld [vmem:[#allocation2 + $0x12c] sm:$0xf0]  ;;  %v3740_v27 = vld [vmem:[#allocation2 + $0x320] sm:$0xf]  ;;  %v4546_v8 = vld [vmem:[#allocation2 + $0x1c4] sm:$0xf]  ;;  %v3825_v15 = vor.u32 %v4610_v4, %v3822_v5 }
  0x29   :  { %115 = vperm.xlu1 %4791, %v84_v19   ;;  %4792 = vset.pattern.permute.xlu2 %v4880_v0  ;;  %v4560_v24 = vld [vmem:[#allocation2 + $0x22c] sm:$0xf0]  ;;  %v3340_v30 = vld [vmem:[#allocation2] sm:$0xf]  ;;  %v3566_v9 = vld [vmem:[#allocation2 + $0x1d0] sm:$0xf0] }
  0x2a   :  { %192 = vperm.xlu0 %4790, %v84_v19   ;;  %188 = vperm.xlu2 %4792, %v83_v18   ;;  %v3356_v18 = vld [vmem:[#allocation2 + $0x20] sm:$0xf]  ;;  %v4496_v19 = vld [vmem:[#allocation2 + $0x2c] sm:$0xf0]  ;;  %v3613_v26 = vor.u32 %v4560_v24, %v3612_v23  ;;  %v3422_v45 = vld [vmem:[#allocation2 + $0xb0] sm:$0xf0] }
  0x2b   :  { %1178 = vmatpush.bf16.msra.mxu1 %v3501_v13  ;;  %1236 = vmatpush.bf16.msra.mxu3 %v3757_v17  ;;  %v4592_v28 = vld [vmem:[#allocation2 + $0x32c] sm:$0xf0]  ;;  %v3468_v32 = vld [vmem:[#allocation2 + $0x100] sm:$0xf]  ;;  %v4606_v46 = vld [vmem:[#allocation2 + $0x3a4] sm:$0xf] }
  0x2c   :  { %v3741_v29 = vor.u32 %v4592_v28, %v3740_v27  ;;  %v4492_v31 = vld [vmem:[#allocation2 + $0xc] sm:$0xf0]  ;;  %v3596_v35 = vld [vmem:[#allocation2 + $0x200] sm:$0xf]  ;;  %v3550_v53 = vld [vmem:[#allocation2 + $0x1b0] sm:$0xf0] }
  0x2d   :  { %v3341_v33 = vor.u32 %v4492_v31, %v3340_v30  ;;  %v4524_v34 = vld [vmem:[#allocation2 + $0x10c] sm:$0xf0]  ;;  %v3724_v39 = vld [vmem:[#allocation2 + $0x300] sm:$0xf] }
  0x2e   :  { %v4556_v36 = vld [vmem:[#allocation2 + $0x20c] sm:$0xf0]  ;;  %v3469_v37 = vor.u32 %v4524_v34, %v3468_v32  ;;  %v87_v42 = vld [vmem:[%s5689_s1] ss:$2 sm:$0xf] }
  0x2f   :  { %1237 = vmatpush.bf16.msra.mxu3 %v3741_v29  ;;  %v3597_v38 = vor.u32 %v4556_v36, %v3596_v35  ;;  %v4588_v40 = vld [vmem:[#allocation2 + $0x30c] sm:$0xf0]  ;;  %v3337_v43 = vld [vmem:[%s5689_s1 + $0x1] ss:$2 sm:$0xf]  ;;  %v4971_v56 = vperm.slane %v87_v42, 0 }
  0x30   :  { %v3725_v41 = vor.u32 %v4588_v40, %v3724_v39  ;;  %v4973_v57 = vperm.slane %v87_v42, 1  ;;  %v4975_v58 = vperm.slane %v87_v42, 2  ;;  %v4977_v59 = vperm.slane %v87_v42, 3  ;;  %v276_v12 = vld [vmem:[%s5690_s2] sm:$0xf] }
  0x31   :  { %120 = vperm.xlu1 %4791, %v85_v20   ;;  %v4979_v60 = vperm.slane %v3337_v43, 0  ;;  %v4981_v61 = vperm.slane %v3337_v43, 1  ;;  %v4983_v6 = vperm.slane %v3337_v43, 2  ;;  %v4985_v7 = vperm.slane %v3337_v43, 3  ;;  %v4574_v40 = vld [vmem:[#allocation2 + $0x2a4] sm:$0xf] }
  0x32   :  { %196 = vperm.xlu0 %4790, %v85_v20   ;;  %4793 = vset.pattern.permute.xlu2 %v4881_v1  ;;  %v4568_v1 = vld [vmem:[#allocation2 + $0x26c] sm:$0xf0]  ;;  %v3484_v20 = vld [vmem:[#allocation2 + $0x120] sm:$0xf]  ;;  %v5006_v27 = vperm.slane %v276_v12, 3 }
  0x33   :  { %125 = vperm.xlu2 %4793, %v86_v21   ;;  %v3485_v25 = vor.u32 %v4528_v22, %v3484_v20  ;;  %1238 = vmatpush.bf16.msra.mxu3 %v3725_v41  ;;  %v4996_v20 = vperm.slane %v276_v12, 0  ;;  %v3678_v41 = vld [vmem:[#allocation2 + $0x2b0] sm:$0xf0]  ;;  %v4510_v42 = vld [vmem:[#allocation2 + $0xa4] sm:$0xf] }
  0x35   :  { %1179 = vmatpush.bf16.msra.mxu1 %v3485_v25 }
  0x37   :  { %1347 = vmatpush.bf16.msrb.mxu3 %v3841_v52  ;;  %v4542_v52 = vld [vmem:[#allocation2 + $0x1a4] sm:$0xf] }
  0x39   :  { %4794 = vset.pattern.permute.xlu1 %v4880_v0  ;;  %v3644_v0 = vld [vmem:[#allocation2 + $0x260] sm:$0xf]  ;;  %1180 = vmatpush.bf16.msra.mxu1 %v3469_v37 }
  0x3a   :  { %200 = vperm.xlu1 %4794, %v86_v21   ;;  %v3645_v3 = vor.u32 %v4568_v1, %v3644_v0  ;;  %v3357_v21 = vor.u32 %v4496_v19, %v3356_v18  ;;  %v4578_v0 = vld [vmem:[#allocation2 + $0x2c4] sm:$0xf]  ;;  %v3694_v1 = vld [vmem:[#allocation2 + $0x2d0] sm:$0xf0]  ;;  %v3569_v19 = vor.u32 %v4546_v8, %v3566_v9 }
  0x3b   :  { %v3697_v13 = vor.u32 %v4578_v0, %v3694_v1  ;;  %1348 = vmatpush.bf16.msrb.mxu3 %v3825_v15  ;;  %v3553_v0 = vor.u32 %v4542_v52, %v3550_v53 }
  0x3c   :  { %1206 = vmatpush.bf16.msra.mxu2 %v3645_v3  ;;  %1150 = vmatpush.bf16.msra.mxu0 %v3357_v21  ;;  %v3438_v3 = vld [vmem:[#allocation2 + $0xd0] sm:$0xf0]  ;;  %v4998_v21 = vperm.slane %v276_v12, 1 }
  0x3d   :  { %1289 = vmatpush.bf16.msrb.mxu1 %v3585_v55  ;;  %v3681_v55 = vor.u32 %v4574_v40, %v3678_v41 }
  0x40   :  { %1207 = vmatpush.bf16.msra.mxu2 %v3629_v14  ;;  %1151 = vmatpush.bf16.msra.mxu0 %v3341_v33  ;;  %v3441_v14 = vor.u32 %v4514_v2, %v3438_v3 }
  0x41   :  { %1290 = vmatpush.bf16.msrb.mxu1 %v3569_v19 }
  0x44   :  { %1208 = vmatpush.bf16.msra.mxu2 %v3613_v26  ;;  %1260 = vmatpush.bf16.msrb.mxu0 %v3457_v51  ;;  %v5004_v26 = vperm.slane %v276_v12, 2 }
  0x45   :  { %1291 = vmatpush.bf16.msrb.mxu1 %v3553_v0 }
  0x48   :  { %1209 = vmatpush.bf16.msra.mxu2 %v3597_v38  ;;  %1261 = vmatpush.bf16.msrb.mxu0 %v3441_v14 }
  0x4c   :  { %1318 = vmatpush.bf16.msrb.mxu2 %v3713_v47  ;;  %v3806_v47 = vld [vmem:[#allocation2 + $0x3b0] sm:$0xf0] }
  0x50   :  { %1319 = vmatpush.bf16.msrb.mxu2 %v3697_v13 }
  0x54   :  { %1320 = vmatpush.bf16.msrb.mxu2 %v3681_v55  ;;  %v4570_v55 = vld [vmem:[#allocation2 + $0x284] sm:$0xf] }
  0x6b   :  { %v4987_v10 = vpop.permute.xlu2 %100 }
  0x73   :  { %v106_v54 = vpop.permute.xlu2 %105 }
  0x74   :  { %v149_v12 = vmul.f32 %v4971_v56, %v106_v54  ;;  %v150_v13 = vmul.f32 %v4973_v57, %v106_v54 }
  0x7b   :  { %v5042_v41 = vpop.permute.xlu2 %110 }
  0x82   :  { %v173_v62 = vpop.permute.xlu1 %172 }
  0x83   :  { %v91_v63 = vpop.permute.xlu0 %90  ;;  %v212_v11 = vmul.f32 %v4979_v60, %v173_v62  ;;  %v213_v16 = vmul.f32 %v4981_v61, %v173_v62  ;;  %v214_v22 = vmul.f32 %v4983_v6, %v173_v62  ;;  %v215_v23 = vmul.f32 %v4985_v7, %v173_v62 }
  0x84   :  { %v137_v17 = vmul.f32 %v4971_v56, %v91_v63  ;;  %v138_v18 = vmul.f32 %v4973_v57, %v91_v63  ;;  %v139_v24 = vmul.f32 %v4975_v58, %v91_v63  ;;  %v140_v25 = vmul.f32 %v4977_v59, %v91_v63 }
  0x85   :  { %v3425_v62 = vor.u32 %v4510_v42, %v3422_v45  ;;  %v3809_v63 = vor.u32 %v4606_v46, %v3806_v47  ;;  %v148_v46 = vmul.f32 %v4977_v59, %v4987_v10 }
  0x86   :  { %v244_v28 = vadd.f32 %v212_v11, %v137_v17  ;;  %v245_v29 = vadd.f32 %v213_v16, %v138_v18  ;;  %v246_v43 = vadd.f32 %v214_v22, %v139_v24  ;;  %v247_v44 = vadd.f32 %v215_v23, %v140_v25 }
  0x87   :  { %1262 = vmatpush.bf16.msrb.mxu0 %v3425_v62  ;;  %1349 = vmatpush.bf16.msrb.mxu3 %v3809_v63  ;;  %v145_v11 = vmul.f32 %v4971_v56, %v4987_v10  ;;  %v151_v17 = vmul.f32 %v4975_v58, %v106_v54  ;;  %v152_v18 = vmul.f32 %v4977_v59, %v106_v54  ;;  %v3662_v62 = vld [vmem:[#allocation2 + $0x290] sm:$0xf0]  ;;  %v4506_v63 = vld [vmem:[#allocation2 + $0x84] sm:$0xf] }
  0x88   :  { %v286_v1 = vadd.f32 %v4996_v20, %v244_v28  ;;  %v287_v2 = vadd.f32 %v4998_v21, %v245_v29  ;;  %v288_v9 = vadd.f32 %v5004_v26, %v246_v43  ;;  %v289_v14 = vadd.f32 %v5006_v27, %v247_v44 }
  0x8a   :  { %v177_v30 = vpop.permute.xlu1 %176  ;;  %v318_v19 = vmax.f32 %v286_v1, 0.0  ;;  %v319_v22 = vmax.f32 %v287_v2, 0.0  ;;  %v4602_v2 = vld [vmem:[#allocation2 + $0x384] sm:$0xf] }
  0x8b   :  { %v96_v31 = vpop.permute.xlu0 %95  ;;  %v216_v32 = vmul.f32 %v4979_v60, %v177_v30  ;;  %v217_v33 = vmul.f32 %v4981_v61, %v177_v30  ;;  %v218_v34 = vmul.f32 %v4983_v6, %v177_v30  ;;  %v219_v35 = vmul.f32 %v4985_v7, %v177_v30 }
  0x8c   :  { %v141_v36 = vmul.f32 %v4971_v56, %v96_v31  ;;  %v142_v37 = vmul.f32 %v4973_v57, %v96_v31  ;;  %v143_v38 = vmul.f32 %v4975_v58, %v96_v31  ;;  %v144_v39 = vmul.f32 %v4977_v59, %v96_v31 }
  0x8e   :  { %v248_v48 = vadd.f32 %v216_v32, %v141_v36  ;;  %v249_v49 = vadd.f32 %v217_v33, %v142_v37  ;;  %v250_v50 = vadd.f32 %v218_v34, %v143_v38  ;;  %v251_v51 = vadd.f32 %v219_v35, %v144_v39 }
  0x8f   :  { %v320_v32 = vmax.f32 %v288_v9, 0.0  ;;  %v321_v36 = vmax.f32 %v289_v14, 0.0  ;;  %v146_v37 = vmul.f32 %v4973_v57, %v4987_v10  ;;  %v147_v38 = vmul.f32 %v4975_v58, %v4987_v10  ;;  %v3406_v10 = vld [vmem:[#allocation2 + $0x90] sm:$0xf0] }
  0x90   :  { %v290_v3 = vadd.f32 %v4996_v20, %v248_v48  ;;  %v291_v4 = vadd.f32 %v4998_v21, %v249_v49  ;;  %v292_v5 = vadd.f32 %v5004_v26, %v250_v50  ;;  %v293_v8 = vadd.f32 %v5006_v27, %v251_v51 }
  0x92   :  { %v185_v15 = vpop.permute.xlu1 %184  ;;  %v322_v23 = vmax.f32 %v290_v3, 0.0  ;;  %v323_v24 = vmax.f32 %v291_v4, 0.0  ;;  %v324_v25 = vmax.f32 %v292_v5, 0.0  ;;  %v325_v28 = vmax.f32 %v293_v8, 0.0  ;;  %v3790_v3 = vld [vmem:[#allocation2 + $0x390] sm:$0xf0] }
  0x93   :  { %v224_v29 = vmul.f32 %v4979_v60, %v185_v15  ;;  %v225_v30 = vmul.f32 %v4981_v61, %v185_v15  ;;  %v226_v33 = vmul.f32 %v4983_v6, %v185_v15  ;;  %v227_v34 = vmul.f32 %v4985_v7, %v185_v15 }
  0x94   :  { %v181_v16 = vpop.permute.xlu0 %180  ;;  %v5044_v42 = vpack.c.bf16 %v322_v23, %v318_v19  ;;  %v5046_v43 = vpack.c.bf16 %v323_v24, %v319_v22  ;;  %v5048_v44 = vpack.c.bf16 %v324_v25, %v320_v32  ;;  %v5050_v45 = vpack.c.bf16 %v325_v28, %v321_v36  ;;  %v189_v25 = vpop.permute.xlu2 %188 }
  0x95   :  { %v220_v31 = vmul.f32 %v4979_v60, %v181_v16  ;;  %v221_v35 = vmul.f32 %v4981_v61, %v181_v16  ;;  %v222_v39 = vmul.f32 %v4983_v6, %v181_v16  ;;  %v223_v40 = vmul.f32 %v4985_v7, %v181_v16 }
  0x96   :  { %v256_v47 = vadd.f32 %v224_v29, %v149_v12  ;;  %v257_v48 = vadd.f32 %v225_v30, %v150_v13  ;;  %v258_v50 = vadd.f32 %v226_v33, %v151_v17  ;;  %v259_v51 = vadd.f32 %v227_v34, %v152_v18  ;;  %1152 = vmatmul.bf16.vlgmr.msra.gmra.mxu0 %v5044_v42  ;;  %v3534_v12 = vld [vmem:[#allocation2 + $0x190] sm:$0xf0]  ;;  %v4566_v17 = vld [vmem:[#allocation2 + $0x264] sm:$0xf] }
  0x97   :  { %v252_v49 = vadd.f32 %v220_v31, %v145_v11  ;;  %v253_v52 = vadd.f32 %v221_v35, %v146_v37  ;;  %1181 = vmatmul.bf16.vlgmr.msra.gmra.mxu1 %v5046_v43  ;;  %v254_v53 = vadd.f32 %v222_v39, %v147_v38  ;;  %v255_v54 = vadd.f32 %v223_v40, %v148_v46  ;;  %v4538_v11 = vld [vmem:[#allocation2 + $0x184] sm:$0xf]  ;;  %v3646_v18 = vld [vmem:[#allocation2 + $0x270] sm:$0xf0] }
  0x98   :  { %1210 = vmatmul.bf16.vlgmr.msra.gmra.mxu2 %v5048_v44  ;;  %1239 = vmatmul.bf16.vlgmr.msra.gmra.mxu3 %v5050_v45  ;;  %v298_v0 = vadd.f32 %v4996_v20, %v256_v47  ;;  %v299_v4 = vadd.f32 %v4998_v21, %v257_v48  ;;  %v300_v5 = vadd.f32 %v5004_v26, %v258_v50  ;;  %v4502_v37 = vld [vmem:[#allocation2 + $0x64] sm:$0xf]  ;;  %v3390_v40 = vld [vmem:[#allocation2 + $0x70] sm:$0xf0] }
  0x99   :  { %v294_v1 = vadd.f32 %v4996_v20, %v252_v49  ;;  %v301_v8 = vadd.f32 %v5006_v27, %v259_v51  ;;  %v295_v9 = vadd.f32 %v4998_v21, %v253_v52  ;;  %v296_v13 = vadd.f32 %v5004_v26, %v254_v53  ;;  %v4598_v46 = vld [vmem:[#allocation2 + $0x364] sm:$0xf]  ;;  %v3774_v47 = vld [vmem:[#allocation2 + $0x370] sm:$0xf0] }
  0x9a   :  { %v297_v14 = vadd.f32 %v5006_v27, %v255_v54  ;;  %v3665_v15 = vor.u32 %v4570_v55, %v3662_v62  ;;  %v3409_v16 = vor.u32 %v4506_v63, %v3406_v10  ;;  %v3793_v19 = vor.u32 %v4602_v2, %v3790_v3  ;;  %v4534_v52 = vld [vmem:[#allocation2 + $0x164] sm:$0xf]  ;;  %v3518_v53 = vld [vmem:[#allocation2 + $0x170] sm:$0xf0] }
  0x9b   :  { %v116_v22 = vpop.permute.xlu1 %115  ;;  %v326_v23 = vmax.f32 %v294_v1, 0.0  ;;  %v3537_v24 = vor.u32 %v4538_v11, %v3534_v12  ;;  %v330_v28 = vmax.f32 %v298_v0, 0.0  ;;  %v327_v29 = vmax.f32 %v295_v9, 0.0  ;;  %v4562_v54 = vld [vmem:[#allocation2 + $0x244] sm:$0xf] }
  0x9c   :  { %1321 = vmatpush.bf16.msrb.mxu2 %v3665_v15  ;;  %1263 = vmatpush.bf16.msrb.mxu0 %v3409_v16  ;;  %v331_v30 = vmax.f32 %v299_v4, 0.0  ;;  %v3649_v31 = vor.u32 %v4566_v17, %v3646_v18  ;;  %v193_v32 = vpop.permute.xlu0 %192  ;;  %v328_v33 = vmax.f32 %v296_v13, 0.0  ;;  %v332_v34 = vmax.f32 %v300_v5, 0.0  ;;  %v3630_v0 = vld [vmem:[#allocation2 + $0x250] sm:$0xf0] }
  0x9d   :  { %1350 = vmatpush.bf16.msrb.mxu3 %v3793_v19  ;;  %v329_v35 = vmax.f32 %v297_v14, 0.0  ;;  %v333_v36 = vmax.f32 %v301_v8, 0.0  ;;  %1292 = vmatpush.bf16.msrb.mxu1 %v3537_v24  ;;  %v5068_v38 = vmul.f32 %v4971_v56, %v5042_v41  ;;  %v5072_v39 = vmul.f32 %v4973_v57, %v5042_v41  ;;  %v4498_v1 = vld [vmem:[#allocation2 + $0x44] sm:$0xf]  ;;  %v3374_v2 = vld [vmem:[#allocation2 + $0x50] sm:$0xf0] }
  0x9e   :  { %v5076_v48 = vmul.f32 %v4975_v58, %v5042_v41  ;;  %v228_v49 = vmul.f32 %v4979_v60, %v189_v25  ;;  %v157_v50 = vmul.f32 %v4971_v56, %v116_v22  ;;  %v158_v51 = vmul.f32 %v4973_v57, %v116_v22  ;;  %v4594_v9 = vld [vmem:[#allocation2 + $0x344] sm:$0xf]  ;;  %v3758_v11 = vld [vmem:[#allocation2 + $0x350] sm:$0xf0] }
  0x9f   :  { %v159_v55 = vmul.f32 %v4975_v58, %v116_v22  ;;  %v160_v62 = vmul.f32 %v4977_v59, %v116_v22  ;;  %v232_v63 = vmul.f32 %v4979_v60, %v193_v32  ;;  %v233_v10 = vmul.f32 %v4981_v61, %v193_v32  ;;  %v4530_v19 = vld [vmem:[#allocation2 + $0x144] sm:$0xf]  ;;  %v3502_v22 = vld [vmem:[#allocation2 + $0x150] sm:$0xf0] }
  0xa0   :  { %1322 = vmatpush.bf16.msrb.mxu2 %v3649_v31  ;;  %v234_v3 = vmul.f32 %v4983_v6, %v193_v32  ;;  %v235_v4 = vmul.f32 %v4985_v7, %v193_v32  ;;  %v3393_v5 = vor.u32 %v4502_v37, %v3390_v40  ;;  %v3777_v8 = vor.u32 %v4598_v46, %v3774_v47  ;;  %v4558_v32 = vld [vmem:[#allocation2 + $0x224] sm:$0xf]  ;;  %v3358_v46 = vld [vmem:[#allocation2 + $0x30] sm:$0xf0] }
  0xa1   :  { %v5087_v12 = vpack.c.bf16 %v330_v28, %v326_v23  ;;  %v5089_v13 = vpack.c.bf16 %v331_v30, %v327_v29  ;;  %v5091_v14 = vpack.c.bf16 %v332_v34, %v328_v33  ;;  %v3521_v15 = vor.u32 %v4534_v52, %v3518_v53  ;;  %v3614_v33 = vld [vmem:[#allocation2 + $0x230] sm:$0xf0]  ;;  %v4494_v34 = vld [vmem:[#allocation2 + $0x24] sm:$0xf] }
  0xa2   :  { %v5093_v16 = vpack.c.bf16 %v333_v36, %v329_v35  ;;  %1264 = vmatpush.bf16.msrb.mxu0 %v3393_v5  ;;  %1351 = vmatpush.bf16.msrb.mxu3 %v3777_v8  ;;  %v3633_v17 = vor.u32 %v4562_v54, %v3630_v0  ;;  %v3377_v18 = vor.u32 %v4498_v1, %v3374_v2  ;;  %v4590_v47 = vld [vmem:[#allocation2 + $0x324] sm:$0xf]  ;;  %v3742_v52 = vld [vmem:[#allocation2 + $0x330] sm:$0xf0] }
  0xa3   :  { %v229_v24 = vmul.f32 %v4981_v61, %v189_v25  ;;  %v230_v31 = vmul.f32 %v4983_v6, %v189_v25  ;;  %v3761_v23 = vor.u32 %v4594_v9, %v3758_v11  ;;  %v156_v28 = vmul.f32 %v4977_v59, %v5042_v41  ;;  %v5102_v30 = vpop.permute.xlu1 %120  ;;  %1293 = vmatpush.bf16.msrb.mxu1 %v3521_v15  ;;  %v4526_v54 = vld [vmem:[#allocation2 + $0x124] sm:$0xf]  ;;  %v3486_v0 = vld [vmem:[#allocation2 + $0x130] sm:$0xf0] }
  0xa4   :  { %v231_v29 = vmul.f32 %v4985_v7, %v189_v25  ;;  %v264_v35 = vadd.f32 %v232_v63, %v157_v50  ;;  %v265_v36 = vadd.f32 %v233_v10, %v158_v51  ;;  %v266_v37 = vadd.f32 %v234_v3, %v159_v55  ;;  %1323 = vmatpush.bf16.msrb.mxu2 %v3633_v17  ;;  %v4554_v1 = vld [vmem:[#allocation2 + $0x204] sm:$0xf]  ;;  %v3598_v55 = vld [vmem:[#allocation2 + $0x210] sm:$0xf0] }
  0xa5   :  { %v3505_v40 = vor.u32 %v4530_v19, %v3502_v22  ;;  %v267_v41 = vadd.f32 %v235_v4, %v160_v62  ;;  %v3617_v25 = vor.u32 %v4558_v32, %v3614_v33  ;;  %v3361_v53 = vor.u32 %v4494_v34, %v3358_v46  ;;  %v4490_v63 = vld [vmem:[#allocation2 + $0x4] sm:$0xf]  ;;  %v3342_v10 = vld [vmem:[#allocation2 + $0x10] sm:$0xf0] }
  0xa6   :  { %1157 = vmatmul.bf16.gmra.mxu0 %v5087_v12  ;;  %v260_v2 = vadd.f32 %v228_v49, %v5068_v38  ;;  %v261_v5 = vadd.f32 %v229_v24, %v5072_v39  ;;  %v262_v50 = vadd.f32 %v230_v31, %v5076_v48  ;;  %1352 = vmatpush.bf16.msrb.mxu3 %v3761_v23  ;;  %v4586_v62 = vld [vmem:[#allocation2 + $0x304] sm:$0xf]  ;;  %v3726_v4 = vld [vmem:[#allocation2 + $0x310] sm:$0xf0]  ;;  %v126_v49 = vpop.permute.xlu2 %125 }
  0xa7   :  { %1186 = vmatmul.bf16.gmra.mxu1 %v5089_v13  ;;  %1265 = vmatpush.bf16.msrb.mxu0 %v3377_v18  ;;  %v3745_v51 = vor.u32 %v4590_v47, %v3742_v52  ;;  %v263_v3 = vadd.f32 %v231_v29, %v156_v28  ;;  %v306_v8 = vadd.f32 %v4996_v20, %v264_v35  ;;  %v4522_v17 = vld [vmem:[#allocation2 + $0x104] sm:$0xf]  ;;  %v3470_v18 = vld [vmem:[#allocation2 + $0x110] sm:$0xf0] }
  0xa8   :  { %1215 = vmatmul.bf16.gmra.mxu2 %v5091_v14  ;;  %1244 = vmatmul.bf16.gmra.mxu3 %v5093_v16  ;;  %v307_v9 = vadd.f32 %v4998_v21, %v265_v36  ;;  %v308_v11 = vadd.f32 %v5004_v26, %v266_v37  ;;  %v3489_v38 = vor.u32 %v4526_v54, %v3486_v0  ;;  %v197_v0 = vpop.permute.xlu0 %196 }
  0xa9   :  { %1294 = vmatpush.bf16.msrb.mxu1 %v3505_v40  ;;  %v309_v39 = vadd.f32 %v5006_v27, %v267_v41  ;;  %1324 = vmatpush.bf16.msrb.mxu2 %v3617_v25  ;;  %v3601_v48 = vor.u32 %v4554_v1, %v3598_v55  ;;  %v3345_v15 = vor.u32 %v4490_v63, %v3342_v10  ;;  %v338_v29 = vmax.f32 %v306_v8, 0.0  ;;  %v3716_v8 = vld [vmem:[#allocation2 + $0x2e8] sm:$0xf] }
  0xaa   :  { %v302_v19 = vadd.f32 %v4996_v20, %v260_v2  ;;  %v303_v22 = vadd.f32 %v4998_v21, %v261_v5  ;;  %v304_v24 = vadd.f32 %v5004_v26, %v262_v50  ;;  %1353 = vmatpush.bf16.msrb.mxu3 %v3745_v51  ;;  %v3729_v31 = vor.u32 %v4586_v62, %v3726_v4 }
  0xab   :  { %1266 = vmatpush.bf16.msrb.mxu0 %v3361_v53  ;;  %v305_v23 = vadd.f32 %v5006_v27, %v263_v3  ;;  %v165_v28 = vmul.f32 %v4971_v56, %v126_v49  ;;  %v339_v32 = vmax.f32 %v307_v9, 0.0  ;;  %v3473_v33 = vor.u32 %v4522_v17, %v3470_v18  ;;  %v4585_v9 = vld [vmem:[#allocation2 + $0x2f4] sm:$0xf0] }
  0xac   :  { %v166_v34 = vmul.f32 %v4973_v57, %v126_v49  ;;  %v167_v35 = vmul.f32 %v4975_v58, %v126_v49  ;;  %v201_v36 = vpop.permute.xlu1 %200  ;;  %v340_v37 = vmax.f32 %v308_v11, 0.0  ;;  %v341_v40 = vmax.f32 %v309_v39, 0.0  ;;  %v3844_v39 = vld [vmem:[#allocation2 + $0x3e8] sm:$0xf] }
  0xad   :  { %1295 = vmatpush.bf16.msrb.mxu1 %v3489_v38  ;;  %1325 = vmatpush.bf16.msrb.mxu2 %v3601_v48  ;;  %v168_v46 = vmul.f32 %v4977_v59, %v126_v49  ;;  %v334_v47 = vmax.f32 %v302_v19, 0.0  ;;  %v335_v52 = vmax.f32 %v303_v22, 0.0  ;;  %v336_v41 = vmax.f32 %v304_v24, 0.0  ;;  %v4617_v49 = vld [vmem:[#allocation2 + $0x3f4] sm:$0xf0] }
  0xae   :  { %1354 = vmatpush.bf16.msrb.mxu3 %v3729_v31  ;;  %v161_v25 = vmul.f32 %v4971_v56, %v5102_v30  ;;  %v162_v53 = vmul.f32 %v4973_v57, %v5102_v30  ;;  %v163_v54 = vmul.f32 %v4975_v58, %v5102_v30  ;;  %v337_v1 = vmax.f32 %v305_v23, 0.0  ;;  %v4581_v23 = vld [vmem:[#allocation2 + $0x2d4] sm:$0xf0] }
  0xaf   :  { %1267 = vmatpush.bf16.msrb.mxu0 %v3345_v15  ;;  %v240_v2 = vmul.f32 %v4979_v60, %v201_v36  ;;  %v241_v5 = vmul.f32 %v4981_v61, %v201_v36  ;;  %v5129_v50 = vpack.c.bf16 %v338_v29, %v334_v47  ;;  %v5131_v51 = vpack.c.bf16 %v339_v32, %v335_v52  ;;  %v3444_v29 = vld [vmem:[#allocation2 + $0xc8] sm:$0xf]  ;;  %v4549_v52 = vld [vmem:[#allocation2 + $0x1d4] sm:$0xf0] }
  0xb0   :  { %v242_v55 = vmul.f32 %v4983_v6, %v201_v36  ;;  %v243_v56 = vmul.f32 %v4985_v7, %v201_v36  ;;  %v5135_v63 = vpack.c.bf16 %v340_v37, %v336_v41  ;;  %v5137_v57 = vpack.c.bf16 %v341_v40, %v337_v1  ;;  %v4613_v36 = vld [vmem:[#allocation2 + $0x3d4] sm:$0xf0]  ;;  %v3572_v37 = vld [vmem:[#allocation2 + $0x1c8] sm:$0xf] }
  0xb1   :  { %1296 = vmatpush.bf16.msrb.mxu1 %v3473_v33  ;;  %v236_v58 = vmul.f32 %v4979_v60, %v197_v0  ;;  %v237_v10 = vmul.f32 %v4981_v61, %v197_v0  ;;  %v238_v3 = vmul.f32 %v4983_v6, %v197_v0  ;;  %v164_v62 = vmul.f32 %v4977_v59, %v5102_v30  ;;  %v3460_v60 = vld [vmem:[#allocation2 + $0xe8] sm:$0xf]  ;;  %v4521_v6 = vld [vmem:[#allocation2 + $0xf4] sm:$0xf0] }
  0xb2   :  { %v239_v4 = vmul.f32 %v4985_v7, %v197_v0  ;;  %v272_v11 = vadd.f32 %v240_v2, %v165_v28  ;;  %v273_v61 = vadd.f32 %v241_v5, %v166_v34  ;;  %v3717_v38 = vor.u32 %v4585_v9, %v3716_v8  ;;  %v3588_v59 = vld [vmem:[#allocation2 + $0x1e8] sm:$0xf]  ;;  %v4553_v30 = vld [vmem:[#allocation2 + $0x1f4] sm:$0xf0] }
  0xb3   :  { %v274_v48 = vadd.f32 %v242_v55, %v167_v35  ;;  %v275_v15 = vadd.f32 %v243_v56, %v168_v46  ;;  %v3461_v17 = vor.u32 %v4521_v6, %v3460_v60  ;;  %v3845_v18 = vor.u32 %v4617_v49, %v3844_v39  ;;  %v3700_v7 = vld [vmem:[#allocation2 + $0x2c8] sm:$0xf]  ;;  %v4517_v28 = vld [vmem:[#allocation2 + $0xd4] sm:$0xf0] }
  0xb4   :  { %v268_v19 = vadd.f32 %v236_v58, %v161_v25  ;;  %v269_v22 = vadd.f32 %v237_v10, %v162_v53  ;;  %v270_v24 = vadd.f32 %v238_v3, %v163_v54  ;;  %1434 = vmatpush.bf16.msra.mxu2 %v3717_v38  ;;  %v3589_v31 = vor.u32 %v4553_v30, %v3588_v59  ;;  %v3828_v35 = vld [vmem:[#allocation2 + $0x3c8] sm:$0xf]  ;;  %v4577_v9 = vld [vmem:[#allocation2 + $0x2b4] sm:$0xf0] }
  0xb5   :  { %v271_v32 = vadd.f32 %v239_v4, %v164_v62  ;;  %1376 = vmatpush.bf16.msra.mxu0 %v3461_v17  ;;  %1463 = vmatpush.bf16.msra.mxu3 %v3845_v18  ;;  %v3701_v33 = vor.u32 %v4581_v23, %v3700_v7  ;;  %v3445_v34 = vor.u32 %v4517_v28, %v3444_v29  ;;  %v3428_v60 = vld [vmem:[#allocation2 + $0xa8] sm:$0xf]  ;;  %v4609_v6 = vld [vmem:[#allocation2 + $0x3b4] sm:$0xf0] }
  0xb6   :  { %1162 = vmatmul.bf16.gmra.mxu0 %v5129_v50  ;;  %v314_v40 = vadd.f32 %v4996_v20, %v272_v11  ;;  %v315_v46 = vadd.f32 %v4998_v21, %v273_v61  ;;  %1405 = vmatpush.bf16.msra.mxu1 %v3589_v31  ;;  %v3829_v47 = vor.u32 %v4613_v36, %v3828_v35  ;;  %v4513_v61 = vld [vmem:[#allocation2 + $0xb4] sm:$0xf0]  ;;  %v3812_v38 = vld [vmem:[#allocation2 + $0x3a8] sm:$0xf] }
  0xb7   :  { %1191 = vmatmul.bf16.gmra.mxu1 %v5131_v51  ;;  %v316_v41 = vadd.f32 %v5004_v26, %v274_v48  ;;  %v317_v25 = vadd.f32 %v5006_v27, %v275_v15  ;;  %v3573_v53 = vor.u32 %v4549_v52, %v3572_v37  ;;  %v310_v54 = vadd.f32 %v4996_v20, %v268_v19  ;;  %v3556_v48 = vld [vmem:[#allocation2 + $0x1a8] sm:$0xf]  ;;  %v4545_v15 = vld [vmem:[#allocation2 + $0x1b4] sm:$0xf0] }
  0xb8   :  { %1220 = vmatmul.bf16.gmra.mxu2 %v5135_v63  ;;  %1249 = vmatmul.bf16.gmra.mxu3 %v5137_v57  ;;  %v311_v0 = vadd.f32 %v4998_v21, %v269_v22  ;;  %v312_v1 = vadd.f32 %v5004_v26, %v270_v24  ;;  %v313_v2 = vadd.f32 %v5006_v27, %v271_v32  ;;  %v346_v5 = vmax.f32 %v314_v40, 0.0  ;;  %v3684_v27 = vld [vmem:[#allocation2 + $0x2a8] sm:$0xf]  ;;  %v4573_v59 = vld [vmem:[#allocation2 + $0x294] sm:$0xf0] }
  0xb9   :  { %1435 = vmatpush.bf16.msra.mxu2 %v3701_v33  ;;  %1377 = vmatpush.bf16.msra.mxu0 %v3445_v34  ;;  %v347_v55 = vmax.f32 %v315_v46, 0.0  ;;  %v348_v56 = vmax.f32 %v316_v41, 0.0  ;;  %v349_v58 = vmax.f32 %v317_v25, 0.0  ;;  %v342_v10 = vmax.f32 %v310_v54, 0.0  ;;  %v3668_v17 = vld [vmem:[#allocation2 + $0x288] sm:$0xf] }
  0xba   :  { %1464 = vmatpush.bf16.msra.mxu3 %v3829_v47  ;;  %1406 = vmatpush.bf16.msra.mxu1 %v3573_v53  ;;  %v343_v3 = vmax.f32 %v311_v0, 0.0  ;;  %v344_v62 = vmax.f32 %v312_v1, 0.0  ;;  %v345_v4 = vmax.f32 %v313_v2, 0.0  ;;  %v3685_v11 = vor.u32 %v4577_v9, %v3684_v27  ;;  %v3412_v30 = vld [vmem:[#allocation2 + $0x88] sm:$0xf] }
  0xbb   :  { %v5157_v8 = vpack.c.bf16 %v346_v5, %v342_v10  ;;  %v3429_v39 = vor.u32 %v4513_v61, %v3428_v60  ;;  %v3813_v49 = vor.u32 %v4609_v6, %v3812_v38  ;;  %v3557_v18 = vor.u32 %v4545_v15, %v3556_v48  ;;  %v4509_v7 = vld [vmem:[#allocation2 + $0x94] sm:$0xf0]  ;;  %v3796_v24 = vld [vmem:[#allocation2 + $0x388] sm:$0xf] }
  0xbc   :  { %v5159_v20 = vpack.c.bf16 %v347_v55, %v343_v3  ;;  %v5161_v21 = vpack.c.bf16 %v348_v56, %v344_v62  ;;  %v5163_v26 = vpack.c.bf16 %v349_v58, %v345_v4  ;;  %v3669_v19 = vor.u32 %v4573_v59, %v3668_v17  ;;  %v4605_v31 = vld [vmem:[#allocation2 + $0x394] sm:$0xf0]  ;;  %v3540_v23 = vld [vmem:[#allocation2 + $0x188] sm:$0xf] }
  0xbd   :  { %1436 = vmatpush.bf16.msra.mxu2 %v3685_v11  ;;  %1378 = vmatpush.bf16.msra.mxu0 %v3429_v39  ;;  %v3413_v22 = vor.u32 %v4509_v7, %v3412_v30  ;;  %v3797_v29 = vor.u32 %v4605_v31, %v3796_v24  ;;  %v4541_v28 = vld [vmem:[#allocation2 + $0x194] sm:$0xf0]  ;;  %v3652_v33 = vld [vmem:[#allocation2 + $0x268] sm:$0xf] }
  0xbe   :  { %1465 = vmatpush.bf16.msra.mxu3 %v3813_v49  ;;  %1407 = vmatpush.bf16.msra.mxu1 %v3557_v18  ;;  %v3541_v32 = vor.u32 %v4541_v28, %v3540_v23  ;;  %v4569_v34 = vld [vmem:[#allocation2 + $0x274] sm:$0xf0]  ;;  %v3396_v35 = vld [vmem:[#allocation2 + $0x68] sm:$0xf] }
  0xbf   :  { %v3653_v36 = vor.u32 %v4569_v34, %v3652_v33  ;;  %v4505_v37 = vld [vmem:[#allocation2 + $0x74] sm:$0xf0]  ;;  %v3780_v40 = vld [vmem:[#allocation2 + $0x368] sm:$0xf]  ;;  %v4583_v33 = vld [vmem:[#allocation2 + $0x2ec] sm:$0xf] }
  0xc0   :  { %v4601_v46 = vld [vmem:[#allocation2 + $0x374] sm:$0xf0]  ;;  %v3397_v47 = vor.u32 %v4505_v37, %v3396_v35  ;;  %v3524_v41 = vld [vmem:[#allocation2 + $0x168] sm:$0xf]  ;;  %v3718_v34 = vld [vmem:[#allocation2 + $0x2f8] sm:$0xf0] }
  0xc1   :  { %1437 = vmatpush.bf16.msra.mxu2 %v3669_v19  ;;  %1379 = vmatpush.bf16.msra.mxu0 %v3413_v22  ;;  %v3781_v52 = vor.u32 %v4601_v46, %v3780_v40  ;;  %v4537_v25 = vld [vmem:[#allocation2 + $0x174] sm:$0xf0]  ;;  %v3636_v53 = vld [vmem:[#allocation2 + $0x248] sm:$0xf]  ;;  %v4519_v35 = vld [vmem:[#allocation2 + $0xec] sm:$0xf] }
  0xc2   :  { %1466 = vmatpush.bf16.msra.mxu3 %v3797_v29  ;;  %1408 = vmatpush.bf16.msra.mxu1 %v3541_v32  ;;  %v3525_v54 = vor.u32 %v4537_v25, %v3524_v41  ;;  %v4565_v0 = vld [vmem:[#allocation2 + $0x254] sm:$0xf0]  ;;  %v3380_v1 = vld [vmem:[#allocation2 + $0x48] sm:$0xf]  ;;  %v3462_v37 = vld [vmem:[#allocation2 + $0xf8] sm:$0xf0] }
  0xc3   :  { %v4501_v2 = vld [vmem:[#allocation2 + $0x54] sm:$0xf0]  ;;  %v3637_v5 = vor.u32 %v4565_v0, %v3636_v53  ;;  %v3764_v56 = vld [vmem:[#allocation2 + $0x348] sm:$0xf]  ;;  %v4615_v40 = vld [vmem:[#allocation2 + $0x3ec] sm:$0xf] }
  0xc4   :  { %v3381_v55 = vor.u32 %v4501_v2, %v3380_v1  ;;  %v4597_v58 = vld [vmem:[#allocation2 + $0x354] sm:$0xf0]  ;;  %v3508_v10 = vld [vmem:[#allocation2 + $0x148] sm:$0xf]  ;;  %v3846_v46 = vld [vmem:[#allocation2 + $0x3f8] sm:$0xf0] }
  0xc5   :  { %1438 = vmatpush.bf16.msra.mxu2 %v3653_v36  ;;  %1380 = vmatpush.bf16.msra.mxu0 %v3397_v47  ;;  %v3765_v3 = vor.u32 %v4597_v58, %v3764_v56  ;;  %v4533_v62 = vld [vmem:[#allocation2 + $0x154] sm:$0xf0]  ;;  %v3620_v27 = vld [vmem:[#allocation2 + $0x228] sm:$0xf]  ;;  %v3721_v36 = vor.u32 %v4583_v33, %v3718_v34  ;;  %v3465_v47 = vor.u32 %v4519_v35, %v3462_v37  ;;  %v4551_v41 = vld [vmem:[#allocation2 + $0x1ec] sm:$0xf] }
  0xc6   :  { %1167 = vmatmul.bf16.gmra.mxu0 %v5157_v8  ;;  %1467 = vmatpush.bf16.msra.mxu3 %v3781_v52  ;;  %v3509_v4 = vor.u32 %v4533_v62, %v3508_v10  ;;  %v4561_v9 = vld [vmem:[#allocation2 + $0x234] sm:$0xf0]  ;;  %v3364_v60 = vld [vmem:[#allocation2 + $0x28] sm:$0xf]  ;;  %v3849_v52 = vor.u32 %v4615_v40, %v3846_v46  ;;  %v3590_v25 = vld [vmem:[#allocation2 + $0x1f8] sm:$0xf0] }
  0xc7   :  { %1196 = vmatmul.bf16.gmra.mxu1 %v5159_v20  ;;  %v3621_v11 = vor.u32 %v4561_v9, %v3620_v27  ;;  %v4497_v61 = vld [vmem:[#allocation2 + $0x34] sm:$0xf0]  ;;  %v3748_v38 = vld [vmem:[#allocation2 + $0x328] sm:$0xf]  ;;  %v4579_v53 = vld [vmem:[#allocation2 + $0x2cc] sm:$0xf] }
  0xc8   :  { %1225 = vmatmul.bf16.gmra.mxu2 %v5161_v21  ;;  %1254 = vmatmul.bf16.gmra.mxu3 %v5163_v26  ;;  %v4593_v6 = vld [vmem:[#allocation2 + $0x334] sm:$0xf0]  ;;  %v3365_v39 = vor.u32 %v4497_v61, %v3364_v60  ;;  %v3492_v48 = vld [vmem:[#allocation2 + $0x128] sm:$0xf]  ;;  %v3702_v0 = vld [vmem:[#allocation2 + $0x2d8] sm:$0xf0] }
  0xc9   :  { %1409 = vmatpush.bf16.msra.mxu1 %v3525_v54  ;;  %1439 = vmatpush.bf16.msra.mxu2 %v3637_v5  ;;  %v3749_v49 = vor.u32 %v4593_v6, %v3748_v38  ;;  %v4529_v15 = vld [vmem:[#allocation2 + $0x134] sm:$0xf0]  ;;  %v3604_v17 = vld [vmem:[#allocation2 + $0x208] sm:$0xf]  ;;  %v3593_v54 = vor.u32 %v4551_v41, %v3590_v25  ;;  %v4515_v1 = vld [vmem:[#allocation2 + $0xcc] sm:$0xf]  ;;  %v3705_v5 = vor.u32 %v4579_v53, %v3702_v0 }
  0xca   :  { %1381 = vmatpush.bf16.msra.mxu0 %v3381_v55  ;;  %1468 = vmatpush.bf16.msra.mxu3 %v3765_v3  ;;  %v3493_v18 = vor.u32 %v4529_v15, %v3492_v48  ;;  %v4557_v59 = vld [vmem:[#allocation2 + $0x214] sm:$0xf0]  ;;  %v3348_v30 = vld [vmem:[#allocation2 + $0x8] sm:$0xf]  ;;  %v3446_v2 = vld [vmem:[#allocation2 + $0xd8] sm:$0xf0] }
  0xcb   :  { %v4493_v7 = vld [vmem:[#allocation2 + $0x14] sm:$0xf0]  ;;  %v3605_v19 = vor.u32 %v4557_v59, %v3604_v17  ;;  %v3732_v24 = vld [vmem:[#allocation2 + $0x308] sm:$0xf]  ;;  %v3449_v55 = vor.u32 %v4515_v1, %v3446_v2  ;;  %v4611_v56 = vld [vmem:[#allocation2 + $0x3cc] sm:$0xf] }
  0xcc   :  { %v3349_v22 = vor.u32 %v4493_v7, %v3348_v30  ;;  %v4589_v31 = vld [vmem:[#allocation2 + $0x314] sm:$0xf0]  ;;  %v3476_v23 = vld [vmem:[#allocation2 + $0x108] sm:$0xf]  ;;  %v3830_v58 = vld [vmem:[#allocation2 + $0x3d8] sm:$0xf0] }
  0xcd   :  { %1410 = vmatpush.bf16.msra.mxu1 %v3509_v4  ;;  %1440 = vmatpush.bf16.msra.mxu2 %v3621_v11  ;;  %v3733_v29 = vor.u32 %v4589_v31, %v3732_v24  ;;  %v4525_v28 = vld [vmem:[#allocation2 + $0x114] sm:$0xf0]  ;;  %v3833_v10 = vor.u32 %v4611_v56, %v3830_v58  ;;  %v4547_v3 = vld [vmem:[#allocation2 + $0x1cc] sm:$0xf]  ;;  %v3574_v62 = vld [vmem:[#allocation2 + $0x1d8] sm:$0xf0] }
  0xce   :  { %1382 = vmatpush.bf16.msra.mxu0 %v3365_v39  ;;  %1469 = vmatpush.bf16.msra.mxu3 %v3749_v49  ;;  %v3477_v32 = vor.u32 %v4525_v28, %v3476_v23  ;;  %v4575_v4 = vld [vmem:[#allocation2 + $0x2ac] sm:$0xf]  ;;  %v3577_v27 = vor.u32 %v4547_v3, %v3574_v62  ;;  %v3686_v9 = vld [vmem:[#allocation2 + $0x2b8] sm:$0xf0]  ;;  %v5188_v61 = vld [vmem:[%s5692_s4] sm:$0xf] }
  0xcf   :  { %v4511_v60 = vld [vmem:[#allocation2 + $0xac] sm:$0xf]  ;;  %v3430_v11 = vld [vmem:[#allocation2 + $0xb8] sm:$0xf0]  ;;  %v3689_v38 = vor.u32 %v4575_v4, %v3686_v9  ;;  %v5191_v15 = vperm.slane %v5188_v61, 0 }
  0xd0   :  { %v3433_v6 = vor.u32 %v4511_v60, %v3430_v11  ;;  %v4607_v39 = vld [vmem:[#allocation2 + $0x3ac] sm:$0xf]  ;;  %v3814_v49 = vld [vmem:[#allocation2 + $0x3b8] sm:$0xf0] }
  0xd1   :  { %1411 = vmatpush.bf16.msra.mxu1 %v3493_v18  ;;  %1441 = vmatpush.bf16.msra.mxu2 %v3605_v19  ;;  %v3817_v48 = vor.u32 %v4607_v39, %v3814_v49  ;;  %v4543_v17 = vld [vmem:[#allocation2 + $0x1ac] sm:$0xf]  ;;  %v3558_v18 = vld [vmem:[#allocation2 + $0x1b8] sm:$0xf0] }
  0xd2   :  { %1383 = vmatpush.bf16.msra.mxu0 %v3349_v22  ;;  %1470 = vmatpush.bf16.msra.mxu3 %v3733_v29  ;;  %v4571_v59 = vld [vmem:[#allocation2 + $0x28c] sm:$0xf]  ;;  %v3561_v30 = vor.u32 %v4543_v17, %v3558_v18  ;;  %v3670_v7 = vld [vmem:[#allocation2 + $0x298] sm:$0xf0] }
  0xd3   :  { %v4507_v19 = vld [vmem:[#allocation2 + $0x8c] sm:$0xf]  ;;  %v3414_v22 = vld [vmem:[#allocation2 + $0x98] sm:$0xf0]  ;;  %v3673_v24 = vor.u32 %v4571_v59, %v3670_v7 }
  0xd4   :  { %v3417_v31 = vor.u32 %v4507_v19, %v3414_v22  ;;  %v4603_v23 = vld [vmem:[#allocation2 + $0x38c] sm:$0xf]  ;;  %v3798_v29 = vld [vmem:[#allocation2 + $0x398] sm:$0xf0] }
  0xd5   :  { %1412 = vmatpush.bf16.msra.mxu1 %v3477_v32  ;;  %v3801_v28 = vor.u32 %v4603_v23, %v3798_v29  ;;  %v3542_v37 = vld [vmem:[#allocation2 + $0x198] sm:$0xf0]  ;;  %v4567_v40 = vld [vmem:[#allocation2 + $0x26c] sm:$0xf] }
  0xd6   :  { %1268 = vmatmul.bf16.vlgmr.msrb.gmra.mxu0 %v5044_v42  ;;  %v3654_v41 = vld [vmem:[#allocation2 + $0x278] sm:$0xf0]  ;;  %v4503_v25 = vld [vmem:[#allocation2 + $0x6c] sm:$0xf] }
  0xd7   :  { %1297 = vmatmul.bf16.vlgmr.msrb.gmra.mxu1 %v5046_v43  ;;  %1492 = vmatpush.bf16.msrb.mxu0 %v3465_v47  ;;  %v3398_v53 = vld [vmem:[#allocation2 + $0x78] sm:$0xf0]  ;;  %v3657_v2 = vor.u32 %v4567_v40, %v3654_v41  ;;  %v4535_v4 = vld [vmem:[#allocation2 + $0x16c] sm:$0xf] }
  0xd8   :  { %1326 = vmatmul.bf16.vlgmr.msrb.gmra.mxu2 %v5048_v44  ;;  %1355 = vmatmul.bf16.vlgmr.msrb.gmra.mxu3 %v5050_v45  ;;  %v3782_v56 = vld [vmem:[#allocation2 + $0x378] sm:$0xf0]  ;;  %v4563_v60 = vld [vmem:[#allocation2 + $0x24c] sm:$0xf] }
  0xd9   :  { %1550 = vmatpush.bf16.msrb.mxu2 %v3721_v36  ;;  %1579 = vmatpush.bf16.msrb.mxu3 %v3849_v52  ;;  %v4539_v36 = vld [vmem:[#allocation2 + $0x18c] sm:$0xf]  ;;  %v3638_v11 = vld [vmem:[#allocation2 + $0x258] sm:$0xf0] }
  0xda   :  { %1521 = vmatpush.bf16.msrb.mxu1 %v3593_v54  ;;  %v3545_v52 = vor.u32 %v4539_v36, %v3542_v37  ;;  %v3382_v39 = vld [vmem:[#allocation2 + $0x58] sm:$0xf0]  ;;  %v4595_v49 = vld [vmem:[#allocation2 + $0x34c] sm:$0xf] }
  0xdb   :  { %1493 = vmatpush.bf16.msrb.mxu0 %v3449_v55  ;;  %v4599_v55 = vld [vmem:[#allocation2 + $0x36c] sm:$0xf] }
  0xdd   :  { %1551 = vmatpush.bf16.msrb.mxu2 %v3705_v5  ;;  %1580 = vmatpush.bf16.msrb.mxu3 %v3833_v10  ;;  %v3401_v5 = vor.u32 %v4503_v25, %v3398_v53  ;;  %v3785_v10 = vor.u32 %v4599_v55, %v3782_v56 }
  0xde   :  { %1522 = vmatpush.bf16.msrb.mxu1 %v3577_v27  ;;  %v3526_v27 = vld [vmem:[#allocation2 + $0x178] sm:$0xf0] }
  0xdf   :  { %1494 = vmatpush.bf16.msrb.mxu0 %v3433_v6  ;;  %v3529_v9 = vor.u32 %v4535_v4, %v3526_v27  ;;  %v3641_v6 = vor.u32 %v4563_v60, %v3638_v11  ;;  %v4555_v4 = vld [vmem:[#allocation2 + $0x20c] sm:$0xf]  ;;  %v3606_v27 = vld [vmem:[#allocation2 + $0x218] sm:$0xf0] }
  0xe0   :  { %v3609_v60 = vor.u32 %v4555_v4, %v3606_v27  ;;  %v3350_v11 = vld [vmem:[#allocation2 + $0x18] sm:$0xf0] }
  0xe1   :  { %1552 = vmatpush.bf16.msrb.mxu2 %v3689_v38  ;;  %1581 = vmatpush.bf16.msrb.mxu3 %v3817_v48  ;;  %v4499_v38 = vld [vmem:[#allocation2 + $0x4c] sm:$0xf]  ;;  %v3766_v48 = vld [vmem:[#allocation2 + $0x358] sm:$0xf0] }
  0xe2   :  { %1523 = vmatpush.bf16.msrb.mxu1 %v3561_v30  ;;  %v3385_v59 = vor.u32 %v4499_v38, %v3382_v39  ;;  %v3769_v30 = vor.u32 %v4595_v49, %v3766_v48  ;;  %v4587_v38 = vld [vmem:[#allocation2 + $0x30c] sm:$0xf] }
  0xe3   :  { %1495 = vmatpush.bf16.msrb.mxu0 %v3417_v31 }
  0xe5   :  { %1553 = vmatpush.bf16.msrb.mxu2 %v3673_v24  ;;  %1582 = vmatpush.bf16.msrb.mxu3 %v3801_v28 }
  0xe6   :  { %1273 = vmatmul.bf16.gmra.mxu0 %v5087_v12  ;;  %1524 = vmatpush.bf16.msrb.mxu1 %v3545_v52  ;;  %v3366_v52 = vld [vmem:[#allocation2 + $0x38] sm:$0xf0] }
  0xe7   :  { %1302 = vmatmul.bf16.gmra.mxu1 %v5089_v13  ;;  %1496 = vmatpush.bf16.msrb.mxu0 %v3401_v5 }
  0xe8   :  { %1331 = vmatmul.bf16.gmra.mxu2 %v5091_v14  ;;  %1360 = vmatmul.bf16.gmra.mxu3 %v5093_v16 }
  0xe9   :  { %1554 = vmatpush.bf16.msrb.mxu2 %v3657_v2  ;;  %1583 = vmatpush.bf16.msrb.mxu3 %v3785_v10  ;;  %v3750_v2 = vld [vmem:[#allocation2 + $0x338] sm:$0xf0]  ;;  %v4527_v10 = vld [vmem:[#allocation2 + $0x12c] sm:$0xf] }
  0xea   :  { %1525 = vmatpush.bf16.msrb.mxu1 %v3529_v9  ;;  %v4491_v9 = vld [vmem:[#allocation2 + $0xc] sm:$0xf] }
  0xeb   :  { %1497 = vmatpush.bf16.msrb.mxu0 %v3385_v59  ;;  %v3353_v48 = vor.u32 %v4491_v9, %v3350_v11 }
  0xed   :  { %1555 = vmatpush.bf16.msrb.mxu2 %v3641_v6  ;;  %1584 = vmatpush.bf16.msrb.mxu3 %v3769_v30  ;;  %v3734_v6 = vld [vmem:[#allocation2 + $0x318] sm:$0xf0] }
  0xf6   :  { %1278 = vmatmul.bf16.gmra.mxu0 %v5129_v50 }
  0xf7   :  { %1307 = vmatmul.bf16.gmra.mxu1 %v5131_v51 }
  0xf8   :  { %1336 = vmatmul.bf16.gmra.mxu2 %v5135_v63  ;;  %1365 = vmatmul.bf16.gmra.mxu3 %v5137_v57 }
 0x106   :  { %1283 = vmatmul.bf16.gmra.mxu0 %v5157_v8 }
 0x107   :  { %1312 = vmatmul.bf16.gmra.mxu1 %v5159_v20 }
 0x108   :  { %1341 = vmatmul.bf16.gmra.mxu2 %v5161_v21  ;;  %1370 = vmatmul.bf16.gmra.mxu3 %v5163_v26 }
 0x113   :  { %v1153_v32 = vpop.f32.mrf.mxu0 }
 0x114   :  { %v1182_v33 = vpop.f32.mrf.mxu1  ;;  %v1154_v34 = vadd.f32 %v1153_v32, %v5191_v15 }
 0x116   :  { %v1183_v35 = vadd.f32 %v1182_v33, %v1154_v34  ;;  %1384 = vmatmul.bf16.vlgmr.msra.gmra.mxu0 %v5044_v42  ;;  %v4531_v33 = vld [vmem:[#allocation2 + $0x14c] sm:$0xf]  ;;  %v3510_v34 = vld [vmem:[#allocation2 + $0x158] sm:$0xf0] }
 0x117   :  { %1413 = vmatmul.bf16.vlgmr.msra.gmra.mxu1 %v5046_v43  ;;  %v3513_v40 = vor.u32 %v4531_v33, %v3510_v34 }
 0x118   :  { %1442 = vmatmul.bf16.vlgmr.msra.gmra.mxu2 %v5048_v44  ;;  %1471 = vmatmul.bf16.vlgmr.msra.gmra.mxu3 %v5050_v45 }
 0x119   :  { %1526 = vmatpush.bf16.msrb.mxu1 %v3513_v40 }
 0x11b   :  { %v1211_v46 = vpop.f32.mrf.mxu2  ;;  %v1240_v47 = vpop.f32.mrf.mxu3 }
 0x11c   :  { %v1212_v54 = vadd.f32 %v1211_v46, %v1183_v35  ;;  %v1155_v0 = vpop.f32.mrf.mxu0  ;;  %v1184_v1 = vpop.f32.mrf.mxu1  ;;  %v4559_v35 = vld [vmem:[#allocation2 + $0x22c] sm:$0xf]  ;;  %v3622_v46 = vld [vmem:[#allocation2 + $0x238] sm:$0xf0] }
 0x11d   :  { %v1156_v58 = vadd.f32 %v1155_v0, %v5191_v15 }
 0x11e   :  { %v1241_v3 = vadd.f32 %v1240_v47, %v1212_v54  ;;  %v4495_v47 = vld [vmem:[#allocation2 + $0x2c] sm:$0xf]  ;;  %v3625_v54 = vor.u32 %v4559_v35, %v3622_v46 }
 0x11f   :  { %v1185_v62 = vadd.f32 %v1184_v1, %v1156_v58  ;;  %v3369_v0 = vor.u32 %v4495_v47, %v3366_v52  ;;  %v4591_v1 = vld [vmem:[#allocation2 + $0x32c] sm:$0xf] }
 0x120   :  { %v1608_v29 = vmax.f32 %v1241_v3, 0.0  ;;  %v3753_v55 = vor.u32 %v4591_v1, %v3750_v2  ;;  %1556 = vmatpush.bf16.msrb.mxu2 %v3625_v54  ;;  %v3494_v3 = vld [vmem:[#allocation2 + $0x138] sm:$0xf0] }
 0x121   :  { %1498 = vmatpush.bf16.msrb.mxu0 %v3369_v0 }
 0x122   :  { %1585 = vmatpush.bf16.msrb.mxu3 %v3753_v55 }
 0x123   :  { %v1213_v17 = vpop.f32.mrf.mxu2  ;;  %v1242_v18 = vpop.f32.mrf.mxu3 }
 0x124   :  { %v1214_v7 = vadd.f32 %v1213_v17, %v1185_v62  ;;  %v1158_v19 = vpop.f32.mrf.mxu0  ;;  %v1187_v22 = vpop.f32.mrf.mxu1  ;;  %v3497_v62 = vor.u32 %v4527_v10, %v3494_v3  ;;  %v3737_v17 = vor.u32 %v4587_v38, %v3734_v6  ;;  %1557 = vmatpush.bf16.msrb.mxu2 %v3609_v60 }
 0x125   :  { %v1159_v24 = vadd.f32 %v1158_v19, %v5191_v15  ;;  %1499 = vmatpush.bf16.msrb.mxu0 %v3353_v48  ;;  %v4523_v19 = vld [vmem:[#allocation2 + $0x10c] sm:$0xf] }
 0x126   :  { %v1243_v31 = vadd.f32 %v1242_v18, %v1214_v7  ;;  %1389 = vmatmul.bf16.gmra.mxu0 %v5087_v12  ;;  %1527 = vmatpush.bf16.msrb.mxu1 %v3497_v62 }
 0x127   :  { %v1188_v23 = vadd.f32 %v1187_v22, %v1159_v24  ;;  %1418 = vmatmul.bf16.gmra.mxu1 %v5089_v13  ;;  %1586 = vmatpush.bf16.msrb.mxu3 %v3737_v17  ;;  %v3478_v22 = vld [vmem:[#allocation2 + $0x118] sm:$0xf0] }
 0x128   :  { %v1612_v28 = vmax.f32 %v1243_v31, 0.0  ;;  %1447 = vmatmul.bf16.gmra.mxu2 %v5091_v14  ;;  %1476 = vmatmul.bf16.gmra.mxu3 %v5093_v16  ;;  %v3481_v31 = vor.u32 %v4523_v19, %v3478_v22 }
 0x12a   :  { %v5204_v32 = vpack.c.bf16 %v1612_v28, %v1608_v29  ;;  %1528 = vmatpush.bf16.msrb.mxu1 %v3481_v31 }
 0x12b   :  { %v1216_v36 = vpop.f32.mrf.mxu2  ;;  %v1245_v37 = vpop.f32.mrf.mxu3 }
 0x12c   :  { %v1217_v41 = vadd.f32 %v1216_v36, %v1188_v23  ;;  %v1160_v25 = vpop.f32.mrf.mxu0  ;;  %v1189_v53 = vpop.f32.mrf.mxu1 }
 0x12d   :  { %v1161_v5 = vadd.f32 %v1160_v25, %v5191_v15 }
 0x12e   :  { %v1246_v56 = vadd.f32 %v1245_v37, %v1217_v41 }
 0x12f   :  { %v1190_v58 = vadd.f32 %v1189_v53, %v1161_v5 }
 0x130   :  { %v1616_v29 = vmax.f32 %v1246_v56, 0.0 }
 0x133   :  { %v1218_v39 = vpop.f32.mrf.mxu2  ;;  %v1247_v49 = vpop.f32.mrf.mxu3 }
 0x134   :  { %v1219_v18 = vadd.f32 %v1218_v39, %v1190_v58  ;;  %v1163_v59 = vpop.f32.mrf.mxu0  ;;  %v1192_v30 = vpop.f32.mrf.mxu1 }
 0x135   :  { %v1164_v7 = vadd.f32 %v1163_v59, %v5191_v15 }
 0x136   :  { %v1248_v24 = vadd.f32 %v1247_v49, %v1219_v18  ;;  %1394 = vmatmul.bf16.gmra.mxu0 %v5129_v50 }
 0x137   :  { %v1193_v23 = vadd.f32 %v1192_v30, %v1164_v7  ;;  %1423 = vmatmul.bf16.gmra.mxu1 %v5131_v51  ;;  %v4648_v30 = vld [vmem:[#allocation4 + $0xec] sm:$0xf0]  ;;  %v4092_v7 = vld [vmem:[#allocation4 + $0x1e0] sm:$0xf] }
 0x138   :  { %v1620_v28 = vmax.f32 %v1248_v24, 0.0  ;;  %1452 = vmatmul.bf16.gmra.mxu2 %v5135_v63  ;;  %1481 = vmatmul.bf16.gmra.mxu3 %v5137_v57  ;;  %v4680_v24 = vld [vmem:[#allocation4 + $0x1ec] sm:$0xf0] }
 0x13a   :  { %v5212_v33 = vpack.c.bf16 %v1620_v28, %v1616_v29  ;;  %v4076_v28 = vld [vmem:[#allocation4 + $0x1c0] sm:$0xf] }
 0x13b   :  { %v1221_v34 = vpop.f32.mrf.mxu2  ;;  %v1250_v35 = vpop.f32.mrf.mxu3 }
 0x13c   :  { %v1222_v36 = vadd.f32 %v1221_v34, %v1193_v23  ;;  %v1165_v37 = vpop.f32.mrf.mxu0  ;;  %v1194_v40 = vpop.f32.mrf.mxu1 }
 0x13d   :  { %v1166_v46 = vadd.f32 %v1165_v37, %v5191_v15  ;;  %v3932_v37 = vld [vmem:[#allocation4 + $0xa0] sm:$0xf] }
 0x13e   :  { %v1251_v47 = vadd.f32 %v1250_v35, %v1222_v36  ;;  %v4676_v35 = vld [vmem:[#allocation4 + $0x1cc] sm:$0xf0] }
 0x13f   :  { %v1195_v52 = vadd.f32 %v1194_v40, %v1166_v46  ;;  %v4077_v36 = vor.u32 %v4676_v35, %v4076_v28  ;;  %v4640_v40 = vld [vmem:[#allocation4 + $0xac] sm:$0xf0] }
 0x140   :  { %v1624_v55 = vmax.f32 %v1251_v47, 0.0  ;;  %v3933_v46 = vor.u32 %v4640_v40, %v3932_v37  ;;  %v4060_v47 = vld [vmem:[#allocation4 + $0x1a0] sm:$0xf] }
 0x143   :  { %v1223_v41 = vpop.f32.mrf.mxu2  ;;  %v1252_v25 = vpop.f32.mrf.mxu3 }
 0x144   :  { %v1224_v53 = vadd.f32 %v1223_v41, %v1195_v52  ;;  %v1168_v54 = vpop.f32.mrf.mxu0  ;;  %v1197_v0 = vpop.f32.mrf.mxu1  ;;  %v4672_v52 = vld [vmem:[#allocation4 + $0x1ac] sm:$0xf0] }
 0x145   :  { %v1169_v1 = vadd.f32 %v1168_v54, %v5191_v15  ;;  %v4061_v41 = vor.u32 %v4672_v52, %v4060_v47  ;;  %v3852_v47 = vld [vmem:[#allocation4] sm:$0xf]  ;;  %v4620_v52 = vld [vmem:[#allocation4 + $0xc] sm:$0xf0] }
 0x146   :  { %v1253_v2 = vadd.f32 %v1252_v25, %v1224_v53  ;;  %1399 = vmatmul.bf16.gmra.mxu0 %v5157_v8 }
 0x147   :  { %v1198_v5 = vadd.f32 %v1197_v0, %v1169_v1  ;;  %1428 = vmatmul.bf16.gmra.mxu1 %v5159_v20  ;;  %v3916_v1 = vld [vmem:[#allocation4 + $0x80] sm:$0xf] }
 0x148   :  { %v1628_v56 = vmax.f32 %v1253_v2, 0.0  ;;  %1457 = vmatmul.bf16.gmra.mxu2 %v5161_v21  ;;  %1486 = vmatmul.bf16.gmra.mxu3 %v5163_v26  ;;  %v4636_v2 = vld [vmem:[#allocation4 + $0x8c] sm:$0xf0] }
 0x14a   :  { %v5220_v58 = vpack.c.bf16 %v1628_v56, %v1624_v55  ;;  %v3917_v55 = vor.u32 %v4636_v2, %v3916_v1  ;;  %v4668_v56 = vld [vmem:[#allocation4 + $0x18c] sm:$0xf0]  ;;  %v3853_v1 = vor.u32 %v4620_v52, %v3852_v47 }
 0x14b   :  { %v1226_v10 = vpop.f32.mrf.mxu2  ;;  %v1255_v3 = vpop.f32.mrf.mxu3  ;;  %v4652_v2 = vld [vmem:[#allocation4 + $0x10c] sm:$0xf0] }
 0x14c   :  { %v1227_v62 = vadd.f32 %v1226_v10, %v1198_v5  ;;  %v1170_v4 = vpop.f32.mrf.mxu0  ;;  %v1199_v27 = vpop.f32.mrf.mxu1  ;;  %v4044_v5 = vld [vmem:[#allocation4 + $0x180] sm:$0xf] }
 0x14d   :  { %v1171_v9 = vadd.f32 %v1170_v4, %v5191_v15  ;;  %v3964_v15 = vld [vmem:[#allocation4 + $0xe0] sm:$0xf]  ;;  %v4045_v10 = vor.u32 %v4668_v56, %v4044_v5 }
 0x14e   :  { %v1256_v60 = vadd.f32 %v1255_v3, %v1227_v62  ;;  %v3965_v22 = vor.u32 %v4648_v30, %v3964_v15  ;;  %v3900_v3 = vld [vmem:[#allocation4 + $0x60] sm:$0xf]  ;;  %v4632_v62 = vld [vmem:[#allocation4 + $0x6c] sm:$0xf0] }
 0x14f   :  { %v1200_v11 = vadd.f32 %v1199_v27, %v1171_v9  ;;  %v4028_v4 = vld [vmem:[#allocation4 + $0x160] sm:$0xf]  ;;  %v3901_v27 = vor.u32 %v4632_v62, %v3900_v3  ;;  %v4664_v9 = vld [vmem:[#allocation4 + $0x16c] sm:$0xf0] }
 0x150   :  { %v1632_v18 = vmax.f32 %v1256_v60, 0.0  ;;  %2434 = vmatpush.bf16.msra.mxu0 %v3965_v22  ;;  %v4624_v22 = vld [vmem:[#allocation4 + $0x2c] sm:$0xf0]  ;;  %v4188_v5 = vld [vmem:[#allocation4 + $0x2a0] sm:$0xf] }
 0x151   :  { %v4172_v3 = vld [vmem:[#allocation4 + $0x280] sm:$0xf]  ;;  %v4700_v62 = vld [vmem:[#allocation4 + $0x28c] sm:$0xf0] }
 0x153   :  { %v1228_v38 = vpop.f32.mrf.mxu2  ;;  %v1257_v6 = vpop.f32.mrf.mxu3 }
 0x154   :  { %v1229_v39 = vadd.f32 %v1228_v38, %v1200_v11  ;;  %v5223_v49 = vpop.f32.mrf.mxu0  ;;  %v5225_v48 = vpop.f32.mrf.mxu1  ;;  %v4029_v38 = vor.u32 %v4664_v9, %v4028_v4  ;;  %v4173_v4 = vor.u32 %v4700_v62, %v4172_v3  ;;  %v5326_v3 = vperm.slane %v5188_v61, 2 }
 0x156   :  { %v1258_v17 = vadd.f32 %v1257_v6, %v1229_v39  ;;  %1500 = vmatmul.bf16.vlgmr.msrb.gmra.mxu0 %v5044_v42  ;;  %v4093_v42 = vor.u32 %v4680_v24, %v4092_v7  ;;  %v4012_v6 = vld [vmem:[#allocation4 + $0x140] sm:$0xf] }
 0x157   :  { %1529 = vmatmul.bf16.vlgmr.msrb.gmra.mxu1 %v5046_v43  ;;  %v3868_v7 = vld [vmem:[#allocation4 + $0x20] sm:$0xf] }
 0x158   :  { %v1636_v59 = vmax.f32 %v1258_v17, 0.0  ;;  %1558 = vmatmul.bf16.vlgmr.msrb.gmra.mxu2 %v5048_v44  ;;  %1587 = vmatmul.bf16.vlgmr.msrb.gmra.mxu3 %v5050_v45  ;;  %v3948_v44 = vld [vmem:[#allocation4 + $0xc0] sm:$0xf]  ;;  %v4644_v45 = vld [vmem:[#allocation4 + $0xcc] sm:$0xf0]  ;;  %v3869_v24 = vor.u32 %v4624_v22, %v3868_v7 }
 0x159   :  { %2463 = vmatpush.bf16.msra.mxu1 %v4093_v42  ;;  %v3949_v34 = vor.u32 %v4644_v45, %v3948_v44  ;;  %v4660_v17 = vld [vmem:[#allocation4 + $0x14c] sm:$0xf0]  ;;  %v3996_v42 = vld [vmem:[#allocation4 + $0x120] sm:$0xf] }
 0x15a   :  { %v5231_v19 = vpack.c.bf16 %v1636_v59, %v1632_v18  ;;  %v4220_v18 = vld [vmem:[#allocation4 + $0x2e0] sm:$0xf]  ;;  %v4712_v59 = vld [vmem:[#allocation4 + $0x2ec] sm:$0xf0]  ;;  %v4013_v15 = vor.u32 %v4660_v17, %v4012_v6  ;;  %v5282_v6 = vperm.slane %v5188_v61, 1 }
 0x15b   :  { %v5233_v31 = vpop.f32.mrf.mxu2  ;;  %v5235_v23 = vpop.f32.mrf.mxu3  ;;  %2435 = vmatpush.bf16.msra.mxu0 %v3949_v34  ;;  %v4221_v30 = vor.u32 %v4712_v59, %v4220_v18  ;;  %v4656_v44 = vld [vmem:[#allocation4 + $0x12c] sm:$0xf0]  ;;  %v4204_v45 = vld [vmem:[#allocation4 + $0x2c0] sm:$0xf] }
 0x15c   :  { %v5237_v29 = vpop.f32.mrf.mxu0  ;;  %v5239_v43 = vpop.f32.mrf.mxu1  ;;  %v3997_v28 = vor.u32 %v4656_v44, %v3996_v42  ;;  %v4708_v34 = vld [vmem:[#allocation4 + $0x2cc] sm:$0xf0]  ;;  %v1270_v7 = vadd.f32 %v5223_v49, %v5282_v6  ;;  %v4124_v22 = vld [vmem:[#allocation4 + $0x220] sm:$0xf] }
 0x15d   :  { %2464 = vmatpush.bf16.msra.mxu1 %v4077_v36  ;;  %2492 = vmatpush.bf16.msra.mxu2 %v4221_v30  ;;  %v4205_v37 = vor.u32 %v4708_v34, %v4204_v45  ;;  %v1272_v17 = vadd.f32 %v5237_v29, %v5282_v6  ;;  %v4684_v49 = vld [vmem:[#allocation4 + $0x20c] sm:$0xf0] }
 0x15e   :  { %v1299_v29 = vadd.f32 %v5225_v48, %v1270_v7  ;;  %v4348_v48 = vld [vmem:[#allocation4 + $0x3e0] sm:$0xf] }
 0x15f   :  { %2436 = vmatpush.bf16.msra.mxu0 %v3933_v46  ;;  %v1301_v44 = vadd.f32 %v5239_v43, %v1272_v17 }
 0x161   :  { %2465 = vmatpush.bf16.msra.mxu1 %v4061_v41  ;;  %v3980_v41 = vld [vmem:[#allocation4 + $0x100] sm:$0xf]  ;;  %2493 = vmatpush.bf16.msra.mxu2 %v4205_v37  ;;  %v1328_v37 = vadd.f32 %v5233_v31, %v1299_v29  ;;  %v4674_v29 = vld [vmem:[#allocation4 + $0x1c4] sm:$0xf] }
 0x162   :  { %v3981_v56 = vor.u32 %v4652_v2, %v3980_v41 }
 0x163   :  { %v5241_v25 = vpop.f32.mrf.mxu2  ;;  %v5243_v53 = vpop.f32.mrf.mxu3  ;;  %2437 = vmatpush.bf16.msra.mxu0 %v3917_v55  ;;  %v4704_v55 = vld [vmem:[#allocation4 + $0x2ac] sm:$0xf0] }
 0x164   :  { %v5245_v54 = vpop.f32.mrf.mxu0  ;;  %v5247_v0 = vpop.f32.mrf.mxu1  ;;  %v1330_v45 = vadd.f32 %v5241_v25, %v1301_v44  ;;  %v4744_v25 = vld [vmem:[#allocation4 + $0x3ec] sm:$0xf0]  ;;  %v3950_v44 = vld [vmem:[#allocation4 + $0xd0] sm:$0xf0] }
 0x165   :  { %2466 = vmatpush.bf16.msra.mxu1 %v4045_v10  ;;  %v4189_v10 = vor.u32 %v4704_v55, %v4188_v5  ;;  %v4349_v41 = vor.u32 %v4744_v25, %v4348_v48  ;;  %v4316_v48 = vld [vmem:[#allocation4 + $0x3a0] sm:$0xf] }
 0x166   :  { %1505 = vmatmul.bf16.gmra.mxu0 %v5087_v12 }
 0x167   :  { %1534 = vmatmul.bf16.gmra.mxu1 %v5089_v13  ;;  %2438 = vmatpush.bf16.msra.mxu0 %v3901_v27 }
 0x168   :  { %1563 = vmatmul.bf16.gmra.mxu2 %v5091_v14  ;;  %1592 = vmatmul.bf16.gmra.mxu3 %v5093_v16  ;;  %v3884_v14 = vld [vmem:[#allocation4 + $0x40] sm:$0xf]  ;;  %v4628_v16 = vld [vmem:[#allocation4 + $0x4c] sm:$0xf0] }
 0x169   :  { %2467 = vmatpush.bf16.msra.mxu1 %v4029_v38  ;;  %v3885_v39 = vor.u32 %v4628_v16, %v3884_v14  ;;  %2494 = vmatpush.bf16.msra.mxu2 %v4189_v10  ;;  %v4696_v14 = vld [vmem:[#allocation4 + $0x26c] sm:$0xf0]  ;;  %v4140_v16 = vld [vmem:[#allocation4 + $0x240] sm:$0xf] }
 0x16a   :  { %2521 = vmatpush.bf16.msra.mxu3 %v4349_v41  ;;  %v3934_v41 = vld [vmem:[#allocation4 + $0xb0] sm:$0xf0] }
 0x16b   :  { %v5253_v60 = vpop.f32.mrf.mxu2  ;;  %v5255_v11 = vpop.f32.mrf.mxu3  ;;  %2439 = vmatpush.bf16.msra.mxu0 %v3885_v39 }
 0x16c   :  { %v5257_v12 = vpop.f32.mrf.mxu0  ;;  %v5259_v13 = vpop.f32.mrf.mxu1 }
 0x16d   :  { %2468 = vmatpush.bf16.msra.mxu1 %v4013_v15  ;;  %2495 = vmatpush.bf16.msra.mxu2 %v4173_v4  ;;  %v1277_v31 = vadd.f32 %v5257_v12, %v5282_v6  ;;  %v4646_v4 = vld [vmem:[#allocation4 + $0xe4] sm:$0xf] }
 0x16f   :  { %2440 = vmatpush.bf16.msra.mxu0 %v3869_v24  ;;  %v4688_v24 = vld [vmem:[#allocation4 + $0x22c] sm:$0xf0] }
 0x170   :  { %v4125_v42 = vor.u32 %v4688_v24, %v4124_v22 }
 0x171   :  { %2469 = vmatpush.bf16.msra.mxu1 %v3997_v28  ;;  %v4108_v28 = vld [vmem:[#allocation4 + $0x200] sm:$0xf] }
 0x172   :  { %v4109_v34 = vor.u32 %v4684_v49, %v4108_v28 }
 0x173   :  { %v5261_v35 = vpop.f32.mrf.mxu2  ;;  %v5263_v36 = vpop.f32.mrf.mxu3  ;;  %2441 = vmatpush.bf16.msra.mxu0 %v3853_v1 }
 0x174   :  { %v5265_v40 = vpop.f32.mrf.mxu0  ;;  %v5267_v46 = vpop.f32.mrf.mxu1 }
 0x175   :  { %2470 = vmatpush.bf16.msra.mxu1 %v3981_v56 }
 0x176   :  { %1510 = vmatmul.bf16.gmra.mxu0 %v5129_v50 }
 0x177   :  { %1539 = vmatmul.bf16.gmra.mxu1 %v5131_v51  ;;  %v4156_v51 = vld [vmem:[#allocation4 + $0x260] sm:$0xf] }
 0x178   :  { %1568 = vmatmul.bf16.gmra.mxu2 %v5135_v63  ;;  %1597 = vmatmul.bf16.gmra.mxu3 %v5137_v57  ;;  %v4157_v63 = vor.u32 %v4696_v14, %v4156_v51  ;;  %v4692_v57 = vld [vmem:[#allocation4 + $0x24c] sm:$0xf0]  ;;  %v3966_v51 = vld [vmem:[#allocation4 + $0xf0] sm:$0xf0]  ;;  %v4678_v14 = vld [vmem:[#allocation4 + $0x1e4] sm:$0xf] }
 0x179   :  { %v4141_v39 = vor.u32 %v4692_v57, %v4140_v16  ;;  %v4332_v16 = vld [vmem:[#allocation4 + $0x3c0] sm:$0xf]  ;;  %v3969_v57 = vor.u32 %v4646_v4, %v3966_v51 }
 0x17a   :  { %2496 = vmatpush.bf16.msra.mxu2 %v4157_v63 }
 0x17b   :  { %v5273_v27 = vpop.f32.mrf.mxu2  ;;  %v5275_v9 = vpop.f32.mrf.mxu3  ;;  %2550 = vmatpush.bf16.msrb.mxu0 %v3969_v57  ;;  %v3918_v57 = vld [vmem:[#allocation4 + $0x90] sm:$0xf0] }
 0x17c   :  { %v5277_v38 = vpop.f32.mrf.mxu0  ;;  %v5279_v50 = vpop.f32.mrf.mxu1 }
 0x17e   :  { %2497 = vmatpush.bf16.msra.mxu2 %v4141_v39 }
 0x182   :  { %2498 = vmatpush.bf16.msra.mxu2 %v4125_v42 }
 0x183   :  { %v5286_v18 = vpop.f32.mrf.mxu2  ;;  %v5288_v59 = vpop.f32.mrf.mxu3 }
 0x184   :  { %v5290_v15 = vpop.f32.mrf.mxu0  ;;  %v5292_v30 = vpop.f32.mrf.mxu1 }
 0x186   :  { %1515 = vmatmul.bf16.gmra.mxu0 %v5157_v8  ;;  %2499 = vmatpush.bf16.msra.mxu2 %v4109_v34  ;;  %v4078_v34 = vld [vmem:[#allocation4 + $0x1d0] sm:$0xf0] }
 0x187   :  { %1544 = vmatmul.bf16.gmra.mxu1 %v5159_v20 }
 0x188   :  { %1573 = vmatmul.bf16.gmra.mxu2 %v5161_v21  ;;  %1602 = vmatmul.bf16.gmra.mxu3 %v5163_v26  ;;  %v1359_v21 = vadd.f32 %v5243_v53, %v1330_v45  ;;  %v1357_v26 = vadd.f32 %v5235_v23, %v1328_v37  ;;  %v1275_v23 = vadd.f32 %v5245_v54, %v5282_v6  ;;  %v4740_v54 = vld [vmem:[#allocation4 + $0x3cc] sm:$0xf0] }
 0x189   :  { %v1306_v53 = vadd.f32 %v5259_v13, %v1277_v31  ;;  %v4094_v13 = vld [vmem:[#allocation4 + $0x1f0] sm:$0xf0]  ;;  %v4333_v7 = vor.u32 %v4740_v54, %v4332_v16  ;;  %v4081_v37 = vor.u32 %v4674_v29, %v4078_v34  ;;  %v4670_v31 = vld [vmem:[#allocation4 + $0x1a4] sm:$0xf]  ;;  %v1280_v54 = vadd.f32 %v5265_v40, %v5282_v6 }
 0x18a   :  { %v1613_v52 = vmax.f32 %v1359_v21, 0.0  ;;  %v1609_v1 = vmax.f32 %v1357_v26, 0.0  ;;  %v1304_v62 = vadd.f32 %v5247_v0, %v1275_v23  ;;  %v4097_v22 = vor.u32 %v4678_v14, %v4094_v13  ;;  %v4642_v0 = vld [vmem:[#allocation4 + $0xc4] sm:$0xf]  ;;  %v4062_v23 = vld [vmem:[#allocation4 + $0x1b0] sm:$0xf0] }
 0x18b   :  { %v5304_v47 = vpop.f32.mrf.mxu2  ;;  %v5306_v43 = vpop.f32.mrf.mxu3  ;;  %v1335_v12 = vadd.f32 %v5261_v35, %v1306_v53  ;;  %2522 = vmatpush.bf16.msra.mxu3 %v4333_v7  ;;  %v3953_v49 = vor.u32 %v4642_v0, %v3950_v44  ;;  %v4666_v13 = vld [vmem:[#allocation4 + $0x184] sm:$0xf]  ;;  %v1309_v40 = vadd.f32 %v5267_v46, %v1280_v54  ;;  %v3902_v44 = vld [vmem:[#allocation4 + $0x70] sm:$0xf0] }
 0x18c   :  { %v5308_v8 = vpop.f32.mrf.mxu0  ;;  %v5310_v20 = vpop.f32.mrf.mxu1  ;;  %v5320_v10 = vpack.c.bf16 %v1613_v52, %v1609_v1  ;;  %v1333_v61 = vadd.f32 %v5253_v60, %v1304_v62  ;;  %2579 = vmatpush.bf16.msrb.mxu1 %v4097_v22  ;;  %v4638_v52 = vld [vmem:[#allocation4 + $0xa4] sm:$0xf]  ;;  %v1282_v1 = vadd.f32 %v5277_v38, %v5282_v6  ;;  %v4065_v62 = vor.u32 %v4670_v31, %v4062_v23  ;;  %v4046_v22 = vld [vmem:[#allocation4 + $0x190] sm:$0xf0] }
 0x18d   :  { %v1364_v24 = vadd.f32 %v5263_v36, %v1335_v12  ;;  %v4736_v36 = vld [vmem:[#allocation4 + $0x3ac] sm:$0xf0]  ;;  %2551 = vmatpush.bf16.msrb.mxu0 %v3953_v49  ;;  %v4634_v38 = vld [vmem:[#allocation4 + $0x84] sm:$0xf] }
 0x18e   :  { %v1362_v60 = vadd.f32 %v5255_v11, %v1333_v61  ;;  %v4317_v25 = vor.u32 %v4736_v36, %v4316_v48  ;;  %v1311_v61 = vadd.f32 %v5279_v50, %v1282_v1  ;;  %v3921_v7 = vor.u32 %v4634_v38, %v3918_v57  ;;  %v4630_v0 = vld [vmem:[#allocation4 + $0x64] sm:$0xf]  ;;  %v4732_v49 = vld [vmem:[#allocation4 + $0x38c] sm:$0xf0] }
 0x18f   :  { %v1621_v21 = vmax.f32 %v1364_v24, 0.0  ;;  %v4662_v29 = vld [vmem:[#allocation4 + $0x164] sm:$0xf]  ;;  %v3905_v34 = vor.u32 %v4630_v0, %v3902_v44 }
 0x190   :  { %2580 = vmatpush.bf16.msrb.mxu1 %v4081_v37  ;;  %v1617_v53 = vmax.f32 %v1362_v60, 0.0  ;;  %2523 = vmatpush.bf16.msra.mxu3 %v4317_v25  ;;  %v1340_v24 = vadd.f32 %v5286_v18, %v1311_v61  ;;  %v4030_v60 = vld [vmem:[#allocation4 + $0x170] sm:$0xf0]  ;;  %v1338_v37 = vadd.f32 %v5273_v27, %v1309_v40  ;;  %v4658_v31 = vld [vmem:[#allocation4 + $0x144] sm:$0xf] }
 0x191   :  { %v4033_v48 = vor.u32 %v4662_v29, %v4030_v60  ;;  %v4710_v23 = vld [vmem:[#allocation4 + $0x2e4] sm:$0xf]  ;;  %v3854_v60 = vld [vmem:[#allocation4 + $0x10] sm:$0xf0] }
 0x192   :  { %v5339_v16 = vpack.c.bf16 %v1621_v21, %v1617_v53  ;;  %v1369_v46 = vadd.f32 %v5288_v59, %v1340_v24  ;;  %v4222_v53 = vld [vmem:[#allocation4 + $0x2f0] sm:$0xf0]  ;;  %v4622_v38 = vld [vmem:[#allocation4 + $0x24] sm:$0xf] }
 0x193   :  { %v5316_v2 = vpop.f32.mrf.mxu2  ;;  %v5318_v5 = vpop.f32.mrf.mxu3  ;;  %v4654_v57 = vld [vmem:[#allocation4 + $0x124] sm:$0xf] }
 0x194   :  { %v1385_v55 = vpop.f32.mrf.mxu0  ;;  %v1414_v56 = vpop.f32.mrf.mxu1  ;;  %2581 = vmatpush.bf16.msrb.mxu1 %v4065_v62  ;;  %v1629_v62 = vmax.f32 %v1369_v46, 0.0  ;;  %v4190_v46 = vld [vmem:[#allocation4 + $0x2b0] sm:$0xf0] }
 0x195   :  { %v1386_v63 = vadd.f32 %v1385_v55, %v5326_v3 }
 0x196   :  { %2442 = vmatmul.bf16.vlgmr.msra.gmra.mxu0 %v5204_v32 }
 0x197   :  { %2471 = vmatmul.bf16.vlgmr.msra.gmra.mxu1 %v5320_v10  ;;  %v1415_v45 = vadd.f32 %v1414_v56, %v1386_v63  ;;  %v3937_v56 = vor.u32 %v4638_v52, %v3934_v41  ;;  %v4626_v52 = vld [vmem:[#allocation4 + $0x44] sm:$0xf]  ;;  %v3886_v41 = vld [vmem:[#allocation4 + $0x50] sm:$0xf0] }
 0x198   :  { %v3889_v27 = vor.u32 %v4626_v52, %v3886_v41 }
 0x199   :  { %2552 = vmatpush.bf16.msrb.mxu0 %v3937_v56  ;;  %v4014_v56 = vld [vmem:[#allocation4 + $0x150] sm:$0xf0] }
 0x19a   :  { %v4017_v59 = vor.u32 %v4658_v31, %v4014_v56  ;;  %v4698_v31 = vld [vmem:[#allocation4 + $0x284] sm:$0xf]  ;;  %v4724_v56 = vld [vmem:[#allocation4 + $0x34c] sm:$0xf0] }
 0x19b   :  { %v1443_v39 = vpop.f32.mrf.mxu2  ;;  %v1472_v17 = vpop.f32.mrf.mxu3 }
 0x19c   :  { %v1387_v35 = vpop.f32.mrf.mxu0  ;;  %v1416_v42 = vpop.f32.mrf.mxu1  ;;  %v1444_v26 = vadd.f32 %v1443_v39, %v1415_v45 }
 0x19d   :  { %v1388_v28 = vadd.f32 %v1387_v35, %v5326_v3  ;;  %2553 = vmatpush.bf16.msrb.mxu0 %v3921_v7  ;;  %v4706_v7 = vld [vmem:[#allocation4 + $0x2c4] sm:$0xf] }
 0x19e   :  { %v1473_v4 = vadd.f32 %v1472_v17, %v1444_v26  ;;  %v4049_v17 = vor.u32 %v4666_v13, %v4046_v22  ;;  %v4206_v22 = vld [vmem:[#allocation4 + $0x2d0] sm:$0xf0] }
 0x19f   :  { %v1417_v55 = vadd.f32 %v1416_v42, %v1388_v28  ;;  %v4300_v28 = vld [vmem:[#allocation4 + $0x380] sm:$0xf]  ;;  %v4209_v40 = vor.u32 %v4706_v7, %v4206_v22  ;;  %v4690_v7 = vld [vmem:[#allocation4 + $0x244] sm:$0xf]  ;;  %v4142_v22 = vld [vmem:[#allocation4 + $0x250] sm:$0xf0] }
 0x1a0   :  { %v1610_v35 = vmax.f32 %v1473_v4, 0.0  ;;  %2582 = vmatpush.bf16.msrb.mxu1 %v4049_v17  ;;  %v4301_v26 = vor.u32 %v4732_v49, %v4300_v28  ;;  %v1285_v49 = vadd.f32 %v5290_v15, %v5282_v6 }
 0x1a1   :  { %2554 = vmatpush.bf16.msrb.mxu0 %v3905_v34  ;;  %v4618_v34 = vld [vmem:[#allocation4 + $0x4] sm:$0xf] }
 0x1a2   :  { %2524 = vmatpush.bf16.msra.mxu3 %v4301_v26  ;;  %v3982_v26 = vld [vmem:[#allocation4 + $0x110] sm:$0xf0]  ;;  %v1314_v15 = vadd.f32 %v5292_v30, %v1285_v49 }
 0x1a3   :  { %v1445_v12 = vpop.f32.mrf.mxu2  ;;  %v1474_v11 = vpop.f32.mrf.mxu3 }
 0x1a4   :  { %v1446_v51 = vadd.f32 %v1445_v12, %v1417_v55  ;;  %v1390_v14 = vpop.f32.mrf.mxu0  ;;  %v1419_v63 = vpop.f32.mrf.mxu1  ;;  %2583 = vmatpush.bf16.msrb.mxu1 %v4033_v48  ;;  %v1367_v12 = vadd.f32 %v5275_v9, %v1338_v37  ;;  %v1287_v9 = vadd.f32 %v5308_v8, %v5282_v6  ;;  %v4650_v8 = vld [vmem:[#allocation4 + $0x104] sm:$0xf] }
 0x1a5   :  { %v1391_v45 = vadd.f32 %v1390_v14, %v5326_v3  ;;  %v4728_v14 = vld [vmem:[#allocation4 + $0x36c] sm:$0xf0]  ;;  %2555 = vmatpush.bf16.msrb.mxu0 %v3889_v27  ;;  %v4702_v48 = vld [vmem:[#allocation4 + $0x2a4] sm:$0xf]  ;;  %v4268_v27 = vld [vmem:[#allocation4 + $0x340] sm:$0xf] }
 0x1a6   :  { %v1475_v39 = vadd.f32 %v1474_v11, %v1446_v51  ;;  %2447 = vmatmul.bf16.gmra.mxu0 %v5212_v33  ;;  %v4225_v11 = vor.u32 %v4710_v23, %v4222_v53  ;;  %v4284_v51 = vld [vmem:[#allocation4 + $0x360] sm:$0xf]  ;;  %v1625_v17 = vmax.f32 %v1367_v12, 0.0  ;;  %v1343_v53 = vadd.f32 %v5304_v47, %v1314_v15 }
 0x1a7   :  { %2476 = vmatmul.bf16.gmra.mxu1 %v5339_v16  ;;  %v1420_v1 = vadd.f32 %v1419_v63, %v1391_v45  ;;  %v4285_v54 = vor.u32 %v4728_v14, %v4284_v51  ;;  %v3870_v63 = vld [vmem:[#allocation4 + $0x30] sm:$0xf0] }
 0x1a8   :  { %v1614_v42 = vmax.f32 %v1475_v39, 0.0  ;;  %2584 = vmatpush.bf16.msrb.mxu1 %v4017_v59  ;;  %2608 = vmatpush.bf16.msrb.mxu2 %v4225_v11  ;;  %v3873_v61 = vor.u32 %v4622_v38, %v3870_v63  ;;  %v3998_v39 = vld [vmem:[#allocation4 + $0x130] sm:$0xf0]  ;;  %v5358_v28 = vpack.c.bf16 %v1629_v62, %v1625_v17  ;;  %v4269_v11 = vor.u32 %v4724_v56, %v4268_v27  ;;  %v4742_v27 = vld [vmem:[#allocation4 + $0x3e4] sm:$0xf] }
 0x1a9   :  { %2525 = vmatpush.bf16.msra.mxu3 %v4285_v54  ;;  %v4158_v51 = vld [vmem:[#allocation4 + $0x270] sm:$0xf0]  ;;  %v1372_v63 = vadd.f32 %v5306_v43, %v1343_v53  ;;  %v4686_v43 = vld [vmem:[#allocation4 + $0x224] sm:$0xf] }
 0x1aa   :  { %v5348_v50 = vpack.c.bf16 %v1614_v42, %v1610_v35  ;;  %v4001_v42 = vor.u32 %v4654_v57, %v3998_v39  ;;  %2556 = vmatpush.bf16.msrb.mxu0 %v3873_v61  ;;  %v4252_v57 = vld [vmem:[#allocation4 + $0x320] sm:$0xf]  ;;  %v4350_v56 = vld [vmem:[#allocation4 + $0x3f0] sm:$0xf0] }
 0x1ab   :  { %v1448_v18 = vpop.f32.mrf.mxu2  ;;  %v1477_v21 = vpop.f32.mrf.mxu3 }
 0x1ac   :  { %2500 = vmatmul.bf16.vlgmr.msra.gmra.mxu2 %v5348_v50  ;;  %v1392_v36 = vpop.f32.mrf.mxu0  ;;  %v1421_v25 = vpop.f32.mrf.mxu1  ;;  %v1449_v4 = vadd.f32 %v1448_v18, %v1420_v1  ;;  %2585 = vmatpush.bf16.msrb.mxu1 %v4001_v42  ;;  %v3857_v18 = vor.u32 %v4618_v34, %v3854_v60  ;;  %v4174_v1 = vld [vmem:[#allocation4 + $0x290] sm:$0xf0] }
 0x1ad   :  { %v1393_v55 = vadd.f32 %v1392_v36, %v5326_v3  ;;  %2609 = vmatpush.bf16.msrb.mxu2 %v4209_v40  ;;  %v3985_v36 = vor.u32 %v4650_v8, %v3982_v26  ;;  %v4177_v23 = vor.u32 %v4698_v31, %v4174_v1  ;;  %2526 = vmatpush.bf16.msra.mxu3 %v4269_v11  ;;  %v4682_v26 = vld [vmem:[#allocation4 + $0x204] sm:$0xf] }
 0x1ae   :  { %v1478_v0 = vadd.f32 %v1477_v21, %v1449_v4  ;;  %v1316_v21 = vadd.f32 %v5310_v20, %v1287_v9  ;;  %2557 = vmatpush.bf16.msrb.mxu0 %v3857_v18  ;;  %v4694_v4 = vld [vmem:[#allocation4 + $0x264] sm:$0xf]  ;;  %v1633_v9 = vmax.f32 %v1372_v63, 0.0  ;;  %v4716_v18 = vld [vmem:[#allocation4 + $0x30c] sm:$0xf0] }
 0x1af   :  { %v1422_v13 = vadd.f32 %v1421_v25, %v1393_v55  ;;  %v4193_v25 = vor.u32 %v4702_v48, %v4190_v46  ;;  %v4161_v38 = vor.u32 %v4694_v4, %v4158_v51  ;;  %v4796_v51 = vld [vmem:[%s5692_s4] sm:$0xf]  ;;  %v4649_v63 = vld [vmem:[#allocation4 + $0xf4] sm:$0xf0] }
 0x1b0   :  { %v1618_v52 = vmax.f32 %v1478_v0, 0.0  ;;  %v1345_v41 = vadd.f32 %v5316_v2, %v1316_v21  ;;  %2586 = vmatpush.bf16.msrb.mxu1 %v3985_v36  ;;  %v4110_v36 = vld [vmem:[#allocation4 + $0x210] sm:$0xf0] }
 0x1b1   :  { %2610 = vmatpush.bf16.msrb.mxu2 %v4193_v25 }
 0x1b2   :  { %v1374_v62 = vadd.f32 %v5318_v5, %v1345_v41  ;;  %v4145_v5 = vor.u32 %v4690_v7, %v4142_v22  ;;  %v4681_v22 = vld [vmem:[#allocation4 + $0x1f4] sm:$0xf0] }
 0x1b3   :  { %v1450_v24 = vpop.f32.mrf.mxu2  ;;  %v1479_v35 = vpop.f32.mrf.mxu3 }
 0x1b4   :  { %v1451_v44 = vadd.f32 %v1450_v24, %v1422_v13  ;;  %v1395_v29 = vpop.f32.mrf.mxu0  ;;  %v1424_v45 = vpop.f32.mrf.mxu1  ;;  %v4720_v13 = vld [vmem:[#allocation4 + $0x32c] sm:$0xf0]  ;;  %v1637_v61 = vmax.f32 %v1374_v62, 0.0 }
 0x1b5   :  { %v1396_v20 = vadd.f32 %v1395_v29, %v5326_v3  ;;  %2611 = vmatpush.bf16.msrb.mxu2 %v4177_v23  ;;  %v4253_v39 = vor.u32 %v4720_v13, %v4252_v57  ;;  %v4353_v23 = vor.u32 %v4742_v27, %v4350_v56 }
 0x1b6   :  { %v1480_v37 = vadd.f32 %v1479_v35, %v1451_v44  ;;  %2452 = vmatmul.bf16.gmra.mxu0 %v5220_v58  ;;  %v5375_v29 = vpack.c.bf16 %v1637_v61, %v1633_v9  ;;  %v4738_v61 = vld [vmem:[#allocation4 + $0x3c4] sm:$0xf] }
 0x1b7   :  { %2481 = vmatmul.bf16.gmra.mxu1 %v5358_v28  ;;  %v1425_v14 = vadd.f32 %v1424_v45, %v1396_v20  ;;  %2527 = vmatpush.bf16.msra.mxu3 %v4253_v39  ;;  %v4126_v45 = vld [vmem:[#allocation4 + $0x230] sm:$0xf0] }
 0x1b8   :  { %v1622_v6 = vmax.f32 %v1480_v37, 0.0  ;;  %v4129_v34 = vor.u32 %v4686_v43, %v4126_v45  ;;  %v4236_v37 = vld [vmem:[#allocation4 + $0x300] sm:$0xf]  ;;  %v4334_v39 = vld [vmem:[#allocation4 + $0x3d0] sm:$0xf0] }
 0x1b9   :  { %2612 = vmatpush.bf16.msrb.mxu2 %v4161_v38  ;;  %v4237_v21 = vor.u32 %v4716_v18, %v4236_v37  ;;  %v3972_v38 = vld [vmem:[#allocation4 + $0xe8] sm:$0xf]  ;;  %v4337_v9 = vor.u32 %v4738_v61, %v4334_v39  ;;  %v4734_v37 = vld [vmem:[#allocation4 + $0x3a4] sm:$0xf]  ;;  %v4318_v18 = vld [vmem:[#allocation4 + $0x3b0] sm:$0xf0] }
 0x1ba   :  { %v5367_v55 = vpack.c.bf16 %v1622_v6, %v1618_v52  ;;  %v4113_v6 = vor.u32 %v4682_v26, %v4110_v36  ;;  %v3973_v7 = vor.u32 %v4649_v63, %v3972_v38  ;;  %v4321_v26 = vor.u32 %v4734_v37, %v4318_v18  ;;  %v4068_v36 = vld [vmem:[#allocation4 + $0x1a8] sm:$0xf]  ;;  %v4665_v39 = vld [vmem:[#allocation4 + $0x174] sm:$0xf0]  ;;  %v4726_v18 = vld [vmem:[#allocation4 + $0x364] sm:$0xf] }
 0x1bb   :  { %v1453_v12 = vpop.f32.mrf.mxu2  ;;  %v1482_v59 = vpop.f32.mrf.mxu3  ;;  %2528 = vmatpush.bf16.msra.mxu3 %v4237_v21  ;;  %v4641_v21 = vld [vmem:[#allocation4 + $0xb4] sm:$0xf0] }
 0x1bc   :  { %2505 = vmatmul.bf16.gmra.mxu2 %v5367_v55  ;;  %v1397_v30 = vpop.f32.mrf.mxu0  ;;  %v1426_v2 = vpop.f32.mrf.mxu1  ;;  %v1454_v47 = vadd.f32 %v1453_v12, %v1425_v14  ;;  %v5387_v14 = vperm.slane %v4796_v51, 3  ;;  %2666 = vmatpush.bf16.msra.mxu0 %v3973_v7  ;;  %v3908_v51 = vld [vmem:[#allocation4 + $0x68] sm:$0xf] }
 0x1bd   :  { %v1398_v54 = vadd.f32 %v1397_v30, %v5326_v3  ;;  %2613 = vmatpush.bf16.msrb.mxu2 %v4145_v5 }
 0x1be   :  { %v1483_v42 = vadd.f32 %v1482_v59, %v1454_v47  ;;  %v4100_v47 = vld [vmem:[#allocation4 + $0x1e8] sm:$0xf] }
 0x1bf   :  { %v1427_v17 = vadd.f32 %v1426_v2, %v1398_v54  ;;  %2637 = vmatpush.bf16.msrb.mxu3 %v4353_v23  ;;  %v3924_v23 = vld [vmem:[#allocation4 + $0x88] sm:$0xf] }
 0x1c0   :  { %v1626_v60 = vmax.f32 %v1483_v42, 0.0 }
 0x1c1   :  { %2614 = vmatpush.bf16.msrb.mxu2 %v4129_v34  ;;  %v4677_v34 = vld [vmem:[#allocation4 + $0x1d4] sm:$0xf0] }
 0x1c3   :  { %v1455_v24 = vpop.f32.mrf.mxu2  ;;  %v1484_v35 = vpop.f32.mrf.mxu3  ;;  %2638 = vmatpush.bf16.msrb.mxu3 %v4337_v9 }
 0x1c4   :  { %v1456_v40 = vadd.f32 %v1455_v24, %v1427_v17  ;;  %v1400_v0 = vpop.f32.mrf.mxu0  ;;  %v1429_v44 = vpop.f32.mrf.mxu1  ;;  %v4101_v24 = vor.u32 %v4681_v22, %v4100_v47  ;;  %v4730_v47 = vld [vmem:[#allocation4 + $0x384] sm:$0xf] }
 0x1c5   :  { %v1401_v46 = vadd.f32 %v1400_v0, %v5326_v3  ;;  %2615 = vmatpush.bf16.msrb.mxu2 %v4113_v6  ;;  %v4645_v0 = vld [vmem:[#allocation4 + $0xd4] sm:$0xf0] }
 0x1c6   :  { %v1485_v49 = vadd.f32 %v1484_v35, %v1456_v40  ;;  %2457 = vmatmul.bf16.gmra.mxu0 %v5231_v19  ;;  %2695 = vmatpush.bf16.msra.mxu1 %v4101_v24  ;;  %v3956_v40 = vld [vmem:[#allocation4 + $0xc8] sm:$0xf]  ;;  %v4673_v6 = vld [vmem:[#allocation4 + $0x1b4] sm:$0xf0] }
 0x1c7   :  { %2486 = vmatmul.bf16.gmra.mxu1 %v5375_v29  ;;  %v1430_v31 = vadd.f32 %v1429_v44, %v1401_v46  ;;  %v4084_v44 = vld [vmem:[#allocation4 + $0x1c8] sm:$0xf]  ;;  %2639 = vmatpush.bf16.msrb.mxu3 %v4321_v26  ;;  %v4286_v26 = vld [vmem:[#allocation4 + $0x370] sm:$0xf0] }
 0x1c8   :  { %v1630_v8 = vmax.f32 %v1485_v49, 0.0  ;;  %v3957_v49 = vor.u32 %v4645_v0, %v3956_v40  ;;  %v3940_v46 = vld [vmem:[#allocation4 + $0xa8] sm:$0xf] }
 0x1c9   :  { %v4020_v40 = vld [vmem:[#allocation4 + $0x148] sm:$0xf] }
 0x1ca   :  { %v5379_v48 = vpack.c.bf16 %v1630_v8, %v1626_v60  ;;  %v4085_v60 = vor.u32 %v4677_v34, %v4084_v44  ;;  %2667 = vmatpush.bf16.msra.mxu0 %v3957_v49  ;;  %v4228_v49 = vld [vmem:[#allocation4 + $0x2e8] sm:$0xf]  ;;  %v4713_v34 = vld [vmem:[#allocation4 + $0x2f4] sm:$0xf0] }
 0x1cb   :  { %v1458_v25 = vpop.f32.mrf.mxu2  ;;  %v1487_v52 = vpop.f32.mrf.mxu3 }
 0x1cc   :  { %2510 = vmatmul.bf16.gmra.mxu2 %v5379_v48  ;;  %v1402_v15 = vpop.f32.mrf.mxu0  ;;  %v1431_v41 = vpop.f32.mrf.mxu1  ;;  %v1459_v20 = vadd.f32 %v1458_v25, %v1430_v31  ;;  %2696 = vmatpush.bf16.msra.mxu1 %v4085_v60  ;;  %v4069_v31 = vor.u32 %v4673_v6, %v4068_v36  ;;  %v4625_v36 = vld [vmem:[#allocation4 + $0x34] sm:$0xf0] }
 0x1cd   :  { %v1403_v1 = vadd.f32 %v1402_v15, %v5326_v3 }
 0x1ce   :  { %v1488_v11 = vadd.f32 %v1487_v52, %v1459_v20  ;;  %v3941_v52 = vor.u32 %v4641_v21, %v3940_v46  ;;  %v4289_v46 = vor.u32 %v4726_v18, %v4286_v26  ;;  %v3876_v21 = vld [vmem:[#allocation4 + $0x28] sm:$0xf] }
 0x1cf   :  { %v1432_v53 = vadd.f32 %v1431_v41, %v1403_v1  ;;  %v3877_v6 = vor.u32 %v4625_v36, %v3876_v21  ;;  %v4148_v26 = vld [vmem:[#allocation4 + $0x248] sm:$0xf]  ;;  %v4714_v21 = vld [vmem:[#allocation4 + $0x304] sm:$0xf] }
 0x1d0   :  { %v1634_v3 = vmax.f32 %v1488_v11, 0.0  ;;  %2668 = vmatpush.bf16.msra.mxu0 %v3941_v52  ;;  %2697 = vmatpush.bf16.msra.mxu1 %v4069_v31  ;;  %v4709_v31 = vld [vmem:[#allocation4 + $0x2d4] sm:$0xf0] }
 0x1d3   :  { %v1460_v12 = vpop.f32.mrf.mxu2  ;;  %v1489_v59 = vpop.f32.mrf.mxu3 }
 0x1d4   :  { %v1461_v30 = vadd.f32 %v1460_v12, %v1432_v53  ;;  %v1501_v2 = vpop.f32.mrf.mxu0  ;;  %v1530_v62 = vpop.f32.mrf.mxu1  ;;  %v4637_v53 = vld [vmem:[#allocation4 + $0x94] sm:$0xf0]  ;;  %v4052_v12 = vld [vmem:[#allocation4 + $0x188] sm:$0xf] }
 0x1d5   :  { %v1502_v13 = vadd.f32 %v1501_v2, %v5387_v14  ;;  %v3925_v11 = vor.u32 %v4637_v53, %v3924_v23 }
 0x1d6   :  { %v1490_v4 = vadd.f32 %v1489_v59, %v1461_v30  ;;  %2558 = vmatmul.bf16.vlgmr.msrb.gmra.mxu0 %v5204_v32  ;;  %v4669_v30 = vld [vmem:[#allocation4 + $0x194] sm:$0xf0] }
 0x1d7   :  { %2587 = vmatmul.bf16.vlgmr.msrb.gmra.mxu1 %v5320_v10  ;;  %v1531_v43 = vadd.f32 %v1530_v62, %v1502_v13  ;;  %v4053_v2 = vor.u32 %v4669_v30, %v4052_v12  ;;  %2669 = vmatpush.bf16.msra.mxu0 %v3925_v11  ;;  %v4302_v13 = vld [vmem:[#allocation4 + $0x390] sm:$0xf0]  ;;  %v3860_v11 = vld [vmem:[#allocation4 + $0x8] sm:$0xf]  ;;  %v4621_v30 = vld [vmem:[#allocation4 + $0x14] sm:$0xf0] }
 0x1d8   :  { %v1638_v54 = vmax.f32 %v1490_v4, 0.0 }
 0x1d9   :  { %2698 = vmatpush.bf16.msra.mxu1 %v4053_v2  ;;  %v3988_v2 = vld [vmem:[#allocation4 + $0x108] sm:$0xf] }
 0x1da   :  { %v5391_v57 = vpack.c.bf16 %v1638_v54, %v1634_v3  ;;  %v4633_v3 = vld [vmem:[#allocation4 + $0x74] sm:$0xf0]  ;;  %v4036_v54 = vld [vmem:[#allocation4 + $0x168] sm:$0xf] }
 0x1db   :  { %v1559_v17 = vpop.f32.mrf.mxu2  ;;  %v1588_v5 = vpop.f32.mrf.mxu3  ;;  %v3909_v61 = vor.u32 %v4633_v3, %v3908_v51  ;;  %v4653_v51 = vld [vmem:[#allocation4 + $0x114] sm:$0xf0]  ;;  %v4196_v3 = vld [vmem:[#allocation4 + $0x2a8] sm:$0xf] }
 0x1dc   :  { %2515 = vmatmul.bf16.gmra.mxu2 %v5391_v57  ;;  %v1503_v35 = vpop.f32.mrf.mxu0  ;;  %v1532_v42 = vpop.f32.mrf.mxu1  ;;  %v1560_v8 = vadd.f32 %v1559_v17, %v1531_v43  ;;  %v4305_v17 = vor.u32 %v4730_v47, %v4302_v13 }
 0x1dd   :  { %v1504_v45 = vadd.f32 %v1503_v35, %v5387_v14  ;;  %2670 = vmatpush.bf16.msra.mxu0 %v3909_v61  ;;  %v3892_v35 = vld [vmem:[#allocation4 + $0x48] sm:$0xf] }
 0x1de   :  { %v1589_v1 = vadd.f32 %v1588_v5, %v1560_v8  ;;  %v4037_v5 = vor.u32 %v4665_v39, %v4036_v54  ;;  %2640 = vmatpush.bf16.msrb.mxu3 %v4305_v17  ;;  %v4229_v8 = vor.u32 %v4713_v34, %v4228_v49  ;;  %v3989_v54 = vor.u32 %v4653_v51, %v3988_v2  ;;  %v4180_v39 = vld [vmem:[#allocation4 + $0x288] sm:$0xf] }
 0x1df   :  { %v1533_v25 = vadd.f32 %v1532_v42, %v1504_v45  ;;  %v4629_v42 = vld [vmem:[#allocation4 + $0x54] sm:$0xf0]  ;;  %v4164_v34 = vld [vmem:[#allocation4 + $0x268] sm:$0xf] }
 0x1e0   :  { %v1611_v62 = vmax.f32 %v1589_v1, 0.0  ;;  %2699 = vmatpush.bf16.msra.mxu1 %v4037_v5  ;;  %v3893_v43 = vor.u32 %v4629_v42, %v3892_v35  ;;  %v4661_v45 = vld [vmem:[#allocation4 + $0x154] sm:$0xf0]  ;;  %2724 = vmatpush.bf16.msra.mxu2 %v4229_v8  ;;  %v4722_v5 = vld [vmem:[#allocation4 + $0x344] sm:$0xf] }
 0x1e1   :  { %v4021_v60 = vor.u32 %v4661_v45, %v4020_v40 }
 0x1e2   :  { %2671 = vmatpush.bf16.msra.mxu0 %v3893_v43  ;;  %2641 = vmatpush.bf16.msrb.mxu3 %v4289_v46  ;;  %v4254_v43 = vld [vmem:[#allocation4 + $0x330] sm:$0xf0]  ;;  %v4693_v46 = vld [vmem:[#allocation4 + $0x254] sm:$0xf0] }
 0x1e3   :  { %v1561_v15 = vpop.f32.mrf.mxu2  ;;  %v1590_v41 = vpop.f32.mrf.mxu3 }
 0x1e4   :  { %v1562_v20 = vadd.f32 %v1561_v15, %v1533_v25  ;;  %v1506_v27 = vpop.f32.mrf.mxu0  ;;  %v1535_v56 = vpop.f32.mrf.mxu1  ;;  %v4004_v25 = vld [vmem:[#allocation4 + $0x128] sm:$0xf]  ;;  %2700 = vmatpush.bf16.msra.mxu1 %v4021_v60  ;;  %v4657_v15 = vld [vmem:[#allocation4 + $0x134] sm:$0xf0] }
 0x1e5   :  { %v1507_v63 = vadd.f32 %v1506_v27, %v5387_v14  ;;  %v4005_v27 = vor.u32 %v4657_v15, %v4004_v25  ;;  %v4697_v60 = vld [vmem:[#allocation4 + $0x274] sm:$0xf0]  ;;  %v4238_v25 = vld [vmem:[#allocation4 + $0x310] sm:$0xf0]  ;;  %v4149_v15 = vor.u32 %v4693_v46, %v4148_v26  ;;  %v4102_v26 = vld [vmem:[#allocation4 + $0x1f8] sm:$0xf0] }
 0x1e6   :  { %v1591_v59 = vadd.f32 %v1590_v41, %v1562_v20  ;;  %2563 = vmatmul.bf16.gmra.mxu0 %v5212_v33  ;;  %v4212_v41 = vld [vmem:[#allocation4 + $0x2c8] sm:$0xf]  ;;  %v4165_v18 = vor.u32 %v4697_v60, %v4164_v34  ;;  %v4647_v60 = vld [vmem:[#allocation4 + $0xec] sm:$0xf] }
 0x1e7   :  { %2592 = vmatmul.bf16.gmra.mxu1 %v5339_v16  ;;  %v1536_v0 = vadd.f32 %v1535_v56, %v1507_v63  ;;  %v4213_v56 = vor.u32 %v4709_v31, %v4212_v41  ;;  %2672 = vmatpush.bf16.msra.mxu0 %v3877_v6  ;;  %v4705_v63 = vld [vmem:[#allocation4 + $0x2b4] sm:$0xf0] }
 0x1e8   :  { %v1615_v4 = vmax.f32 %v1591_v59, 0.0  ;;  %2701 = vmatpush.bf16.msra.mxu1 %v4005_v27  ;;  %v4197_v61 = vor.u32 %v4705_v63, %v4196_v3 }
 0x1e9   :  { %2725 = vmatpush.bf16.msra.mxu2 %v4213_v56  ;;  %v4132_v56 = vld [vmem:[#allocation4 + $0x228] sm:$0xf] }
 0x1ea   :  { %v5398_v38 = vpack.c.bf16 %v1615_v4, %v1611_v62  ;;  %v3861_v4 = vor.u32 %v4621_v30, %v3860_v11  ;;  %v4116_v11 = vld [vmem:[#allocation4 + $0x208] sm:$0xf]  ;;  %v4685_v30 = vld [vmem:[#allocation4 + $0x214] sm:$0xf0] }
 0x1eb   :  { %v1564_v7 = vpop.f32.mrf.mxu2  ;;  %v1593_v22 = vpop.f32.mrf.mxu3  ;;  %v4117_v3 = vor.u32 %v4685_v30, %v4116_v11  ;;  %v4733_v11 = vld [vmem:[#allocation4 + $0x394] sm:$0xf0] }
 0x1ec   :  { %2529 = vmatmul.bf16.vlgmr.msra.gmra.mxu3 %v5398_v38  ;;  %2616 = vmatmul.bf16.vlgmr.msrb.gmra.mxu2 %v5348_v50  ;;  %v1508_v9 = vpop.f32.mrf.mxu0  ;;  %v1537_v24 = vpop.f32.mrf.mxu1  ;;  %v1565_v37 = vadd.f32 %v1564_v7, %v1536_v0  ;;  %v4701_v7 = vld [vmem:[#allocation4 + $0x294] sm:$0xf0] }
 0x1ed   :  { %v1509_v44 = vadd.f32 %v1508_v9, %v5387_v14  ;;  %2673 = vmatpush.bf16.msra.mxu0 %v3861_v4  ;;  %v4270_v9 = vld [vmem:[#allocation4 + $0x350] sm:$0xf0]  ;;  %2702 = vmatpush.bf16.msra.mxu1 %v3989_v54 }
 0x1ee   :  { %v1594_v23 = vadd.f32 %v1593_v22, %v1565_v37  ;;  %2726 = vmatpush.bf16.msra.mxu2 %v4197_v61  ;;  %v4273_v40 = vor.u32 %v4722_v5, %v4270_v9  ;;  %v4745_v61 = vld [vmem:[#allocation4 + $0x3f4] sm:$0xf0]  ;;  %v4340_v9 = vld [vmem:[#allocation4 + $0x3c8] sm:$0xf] }
 0x1ef   :  { %v1538_v52 = vadd.f32 %v1537_v24, %v1509_v44  ;;  %v4181_v24 = vor.u32 %v4701_v7, %v4180_v39  ;;  %v4718_v44 = vld [vmem:[#allocation4 + $0x324] sm:$0xf] }
 0x1f0   :  { %v1619_v47 = vmax.f32 %v1594_v23, 0.0  ;;  %2642 = vmatpush.bf16.msrb.mxu3 %v4273_v40  ;;  %v4257_v49 = vor.u32 %v4718_v44, %v4254_v43  ;;  %v4689_v23 = vld [vmem:[#allocation4 + $0x234] sm:$0xf0] }
 0x1f2   :  { %2727 = vmatpush.bf16.msra.mxu2 %v4181_v24  ;;  %v4741_v24 = vld [vmem:[#allocation4 + $0x3d4] sm:$0xf0] }
 0x1f3   :  { %v1566_v1 = vpop.f32.mrf.mxu2  ;;  %v1595_v20 = vpop.f32.mrf.mxu3 }
 0x1f4   :  { %v1567_v53 = vadd.f32 %v1566_v1, %v1538_v52  ;;  %v1511_v12 = vpop.f32.mrf.mxu0  ;;  %v1540_v59 = vpop.f32.mrf.mxu1  ;;  %2643 = vmatpush.bf16.msrb.mxu3 %v4257_v49  ;;  %v4241_v52 = vor.u32 %v4714_v21, %v4238_v25  ;;  %v4737_v25 = vld [vmem:[#allocation4 + $0x3b4] sm:$0xf0] }
 0x1f5   :  { %v1512_v17 = vadd.f32 %v1511_v12, %v5387_v14  ;;  %v4133_v12 = vor.u32 %v4689_v23, %v4132_v56  ;;  %v3942_v56 = vld [vmem:[#allocation4 + $0xb8] sm:$0xf0]  ;;  %v4671_v23 = vld [vmem:[#allocation4 + $0x1ac] sm:$0xf] }
 0x1f6   :  { %v1596_v62 = vadd.f32 %v1595_v20, %v1567_v53  ;;  %2568 = vmatmul.bf16.gmra.mxu0 %v5220_v58  ;;  %2728 = vmatpush.bf16.msra.mxu2 %v4165_v18  ;;  %v4679_v18 = vld [vmem:[#allocation4 + $0x1ec] sm:$0xf] }
 0x1f7   :  { %2597 = vmatmul.bf16.gmra.mxu1 %v5358_v28  ;;  %v1541_v8 = vadd.f32 %v1540_v59, %v1512_v17  ;;  %v4105_v21 = vor.u32 %v4679_v18, %v4102_v26  ;;  %v4623_v18 = vld [vmem:[#allocation4 + $0x2c] sm:$0xf]  ;;  %v3878_v26 = vld [vmem:[#allocation4 + $0x38] sm:$0xf0] }
 0x1f8   :  { %v1623_v13 = vmax.f32 %v1596_v62, 0.0  ;;  %2644 = vmatpush.bf16.msrb.mxu3 %v4241_v52 }
 0x1f9   :  { %2811 = vmatpush.bf16.msrb.mxu1 %v4105_v21  ;;  %v4655_v21 = vld [vmem:[#allocation4 + $0x12c] sm:$0xf] }
 0x1fa   :  { %v5406_v22 = vpack.c.bf16 %v1623_v13, %v1619_v47  ;;  %2729 = vmatpush.bf16.msra.mxu2 %v4149_v15  ;;  %v4356_v13 = vld [vmem:[#allocation4 + $0x3e8] sm:$0xf]  ;;  %v3958_v15 = vld [vmem:[#allocation4 + $0xd8] sm:$0xf0] }
 0x1fb   :  { %v1569_v35 = vpop.f32.mrf.mxu2  ;;  %v1598_v42 = vpop.f32.mrf.mxu3  ;;  %v4357_v39 = vor.u32 %v4745_v61, %v4356_v13  ;;  %v4631_v61 = vld [vmem:[#allocation4 + $0x6c] sm:$0xf] }
 0x1fc   :  { %2534 = vmatmul.bf16.gmra.mxu3 %v5406_v22  ;;  %2621 = vmatmul.bf16.gmra.mxu2 %v5367_v55  ;;  %v1513_v0 = vpop.f32.mrf.mxu0  ;;  %v1542_v45 = vpop.f32.mrf.mxu1  ;;  %v1570_v36 = vadd.f32 %v1569_v35, %v1541_v8  ;;  %v3974_v8 = vld [vmem:[#allocation4 + $0xf8] sm:$0xf0] }
 0x1fd   :  { %v1514_v37 = vadd.f32 %v1513_v0, %v5387_v14  ;;  %2753 = vmatpush.bf16.msra.mxu3 %v4357_v39  ;;  %v3910_v39 = vld [vmem:[#allocation4 + $0x78] sm:$0xf0] }
 0x1fe   :  { %v1599_v1 = vadd.f32 %v1598_v42, %v1570_v36  ;;  %2730 = vmatpush.bf16.msra.mxu2 %v4133_v12  ;;  %v4341_v42 = vor.u32 %v4741_v24, %v4340_v9  ;;  %v4324_v36 = vld [vmem:[#allocation4 + $0x3a8] sm:$0xf]  ;;  %v4070_v12 = vld [vmem:[#allocation4 + $0x1b8] sm:$0xf0] }
 0x1ff   :  { %v1543_v6 = vadd.f32 %v1542_v45, %v1514_v37  ;;  %v3977_v37 = vor.u32 %v4647_v60, %v3974_v8  ;;  %v4325_v52 = vor.u32 %v4737_v25, %v4324_v36  ;;  %v4073_v30 = vor.u32 %v4671_v23, %v4070_v12  ;;  %v3862_v23 = vld [vmem:[#allocation4 + $0x18] sm:$0xf0] }
 0x200   :  { %v1627_v2 = vmax.f32 %v1599_v1, 0.0  ;;  %v4086_v1 = vld [vmem:[#allocation4 + $0x1d8] sm:$0xf0]  ;;  %v3881_v25 = vor.u32 %v4623_v18, %v3878_v26  ;;  %v4683_v26 = vld [vmem:[#allocation4 + $0x20c] sm:$0xf] }
 0x201   :  { %2754 = vmatpush.bf16.msra.mxu3 %v4341_v42  ;;  %2782 = vmatpush.bf16.msrb.mxu0 %v3977_v37  ;;  %v4729_v42 = vld [vmem:[#allocation4 + $0x374] sm:$0xf0] }
 0x202   :  { %2731 = vmatpush.bf16.msra.mxu2 %v4117_v3  ;;  %v4667_v3 = vld [vmem:[#allocation4 + $0x18c] sm:$0xf] }
 0x203   :  { %v1571_v41 = vpop.f32.mrf.mxu2  ;;  %v1600_v31 = vpop.f32.mrf.mxu3 }
 0x204   :  { %v1572_v20 = vadd.f32 %v1571_v41, %v1543_v6  ;;  %v1516_v27 = vpop.f32.mrf.mxu0  ;;  %v1545_v59 = vpop.f32.mrf.mxu1  ;;  %v4643_v6 = vld [vmem:[#allocation4 + $0xcc] sm:$0xf] }
 0x205   :  { %v1517_v51 = vadd.f32 %v1516_v27, %v5387_v14  ;;  %v4675_v41 = vld [vmem:[#allocation4 + $0x1cc] sm:$0xf]  ;;  %2755 = vmatpush.bf16.msra.mxu3 %v4325_v52  ;;  %v4006_v52 = vld [vmem:[#allocation4 + $0x138] sm:$0xf0] }
 0x206   :  { %v1601_v53 = vadd.f32 %v1600_v31, %v1572_v20  ;;  %2573 = vmatmul.bf16.gmra.mxu0 %v5231_v19  ;;  %v3961_v31 = vor.u32 %v4643_v6, %v3958_v15  ;;  %v4089_v20 = vor.u32 %v4675_v41, %v4086_v1  ;;  %v4639_v27 = vld [vmem:[#allocation4 + $0xac] sm:$0xf]  ;;  %v4214_v15 = vld [vmem:[#allocation4 + $0x2d8] sm:$0xf0]  ;;  %v4009_v41 = vor.u32 %v4655_v21, %v4006_v52  ;;  %v4276_v1 = vld [vmem:[#allocation4 + $0x348] sm:$0xf] }
 0x207   :  { %2602 = vmatmul.bf16.gmra.mxu1 %v5375_v29  ;;  %v1546_v7 = vadd.f32 %v1545_v59, %v1517_v51  ;;  %v4308_v59 = vld [vmem:[#allocation4 + $0x388] sm:$0xf]  ;;  %v3926_v51 = vld [vmem:[#allocation4 + $0x98] sm:$0xf0]  ;;  %v4707_v6 = vld [vmem:[#allocation4 + $0x2cc] sm:$0xf] }
 0x208   :  { %v1631_v62 = vmax.f32 %v1601_v53, 0.0  ;;  %2783 = vmatpush.bf16.msrb.mxu0 %v3961_v31  ;;  %2812 = vmatpush.bf16.msrb.mxu1 %v4089_v20  ;;  %v3945_v53 = vor.u32 %v4639_v27, %v3942_v56  ;;  %v4217_v31 = vor.u32 %v4707_v6, %v4214_v15  ;;  %v4725_v20 = vld [vmem:[#allocation4 + $0x354] sm:$0xf0]  ;;  %v4619_v56 = vld [vmem:[#allocation4 + $0xc] sm:$0xf] }
 0x209   :  { %v4277_v27 = vor.u32 %v4725_v20, %v4276_v1  ;;  %v4118_v21 = vld [vmem:[#allocation4 + $0x218] sm:$0xf0]  ;;  %v4743_v15 = vld [vmem:[#allocation4 + $0x3ec] sm:$0xf] }
 0x20a   :  { %v5414_v4 = vpack.c.bf16 %v1631_v62, %v1627_v2  ;;  %v4309_v2 = vor.u32 %v4733_v11, %v4308_v59  ;;  %v4635_v62 = vld [vmem:[#allocation4 + $0x8c] sm:$0xf]  ;;  %v3865_v59 = vor.u32 %v4619_v56, %v3862_v23  ;;  %v3990_v11 = vld [vmem:[#allocation4 + $0x118] sm:$0xf0]  ;;  %v4121_v52 = vor.u32 %v4683_v26, %v4118_v21 }
 0x20b   :  { %v1574_v54 = vpop.f32.mrf.mxu2  ;;  %v1603_v63 = vpop.f32.mrf.mxu3  ;;  %v4739_v20 = vld [vmem:[#allocation4 + $0x3cc] sm:$0xf] }
 0x20c   :  { %2539 = vmatmul.bf16.gmra.mxu3 %v5414_v4  ;;  %2626 = vmatmul.bf16.gmra.mxu2 %v5379_v48  ;;  %v1518_v47 = vpop.f32.mrf.mxu0  ;;  %v1575_v5 = vadd.f32 %v1574_v54, %v1546_v7  ;;  %v1547_v35 = vpop.f32.mrf.mxu1  ;;  %v3929_v54 = vor.u32 %v4635_v62, %v3926_v51  ;;  %v4663_v7 = vld [vmem:[#allocation4 + $0x16c] sm:$0xf] }
 0x20d   :  { %v1519_v17 = vadd.f32 %v1518_v47, %v5387_v14  ;;  %2784 = vmatpush.bf16.msrb.mxu0 %v3945_v53  ;;  %2756 = vmatpush.bf16.msra.mxu3 %v4309_v2  ;;  %v4651_v53 = vld [vmem:[#allocation4 + $0x10c] sm:$0xf]  ;;  %v4198_v2 = vld [vmem:[#allocation4 + $0x2b8] sm:$0xf0] }
 0x20e   :  { %v1604_v44 = vadd.f32 %v1603_v63, %v1575_v5  ;;  %2813 = vmatpush.bf16.msrb.mxu1 %v4073_v30  ;;  %v4054_v63 = vld [vmem:[#allocation4 + $0x198] sm:$0xf0]  ;;  %v4703_v30 = vld [vmem:[#allocation4 + $0x2ac] sm:$0xf]  ;;  %v3993_v51 = vor.u32 %v4651_v53, %v3990_v11 }
 0x20f   :  { %v1548_v40 = vadd.f32 %v1547_v35, %v1519_v17  ;;  %v4057_v13 = vor.u32 %v4667_v3, %v4054_v63  ;;  %v3913_v17 = vor.u32 %v4631_v61, %v3910_v39  ;;  %v4038_v5 = vld [vmem:[#allocation4 + $0x178] sm:$0xf0]  ;;  %v4292_v35 = vld [vmem:[#allocation4 + $0x368] sm:$0xf]  ;;  %v4201_v3 = vor.u32 %v4703_v30, %v4198_v2  ;;  %v4735_v30 = vld [vmem:[#allocation4 + $0x3ac] sm:$0xf] }
 0x210   :  { %v1635_v34 = vmax.f32 %v1604_v44, 0.0  ;;  %v4041_v9 = vor.u32 %v4663_v7, %v4038_v5  ;;  %v3894_v44 = vld [vmem:[#allocation4 + $0x58] sm:$0xf0]  ;;  %v4260_v39 = vld [vmem:[#allocation4 + $0x328] sm:$0xf] }
 0x211   :  { %2785 = vmatpush.bf16.msrb.mxu0 %v3929_v54  ;;  %v4699_v54 = vld [vmem:[#allocation4 + $0x28c] sm:$0xf]  ;;  %v4182_v63 = vld [vmem:[#allocation4 + $0x298] sm:$0xf0]  ;;  %v4721_v7 = vld [vmem:[#allocation4 + $0x334] sm:$0xf0] }
 0x212   :  { %2814 = vmatpush.bf16.msrb.mxu1 %v4057_v13  ;;  %v4185_v13 = vor.u32 %v4699_v54, %v4182_v63  ;;  %v4695_v5 = vld [vmem:[#allocation4 + $0x26c] sm:$0xf]  ;;  %v4753_v11 = vld [vmem:[#allocation6 + $0x38] sm:$0xff]  ;;  %v4752_v54 = vld [vmem:[#allocation6 + $0x30] sm:$0xff] }
 0x213   :  { %v1576_v0 = vpop.f32.mrf.mxu2  ;;  %v1605_v45 = vpop.f32.mrf.mxu3  ;;  %v4326_v2 = vld [vmem:[#allocation4 + $0x3b8] sm:$0xf0] }
 0x214   :  { %v1577_v43 = vadd.f32 %v1576_v0, %v1548_v40  ;;  %v5426_v47 = vpop.f32.mrf.mxu0  ;;  %v5430_v24 = vpop.f32.mrf.mxu1  ;;  %v4293_v40 = vor.u32 %v4729_v42, %v4292_v35  ;;  %v4627_v0 = vld [vmem:[#allocation4 + $0x4c] sm:$0xf] }
 0x215   :  { %2786 = vmatpush.bf16.msrb.mxu0 %v3913_v17  ;;  %v4261_v17 = vor.u32 %v4721_v7, %v4260_v39 }
 0x216   :  { %v1606_v49 = vadd.f32 %v1605_v45, %v1577_v43  ;;  %2674 = vmatmul.bf16.vlgmr.msra.gmra.mxu0 %v5204_v32  ;;  %2815 = vmatpush.bf16.msrb.mxu1 %v4041_v9  ;;  %v4659_v43 = vld [vmem:[#allocation4 + $0x14c] sm:$0xf]  ;;  %v3897_v45 = vor.u32 %v4627_v0, %v3894_v44  ;;  %v4166_v9 = vld [vmem:[#allocation4 + $0x278] sm:$0xf0]  ;;  %v4244_v44 = vld [vmem:[#allocation4 + $0x308] sm:$0xf] }
 0x217   :  { %2703 = vmatmul.bf16.vlgmr.msra.gmra.mxu1 %v5320_v10  ;;  %2757 = vmatpush.bf16.msra.mxu3 %v4293_v40  ;;  %v4169_v35 = vor.u32 %v4695_v5, %v4166_v9  ;;  %v4691_v40 = vld [vmem:[#allocation4 + $0x24c] sm:$0xf]  ;;  %v4150_v0 = vld [vmem:[#allocation4 + $0x258] sm:$0xf0] }
 0x218   :  { %v1639_v14 = vmax.f32 %v1606_v49, 0.0  ;;  %v4022_v49 = vld [vmem:[#allocation4 + $0x158] sm:$0xf0] }
 0x219   :  { %v4025_v8 = vor.u32 %v4659_v43, %v4022_v49  ;;  %2787 = vmatpush.bf16.msrb.mxu0 %v3897_v45  ;;  %v4717_v45 = vld [vmem:[#allocation4 + $0x314] sm:$0xf0]  ;;  %v4153_v49 = vor.u32 %v4691_v40, %v4150_v0  ;;  %v4727_v40 = vld [vmem:[#allocation4 + $0x36c] sm:$0xf]  ;;  %v4294_v0 = vld [vmem:[#allocation4 + $0x378] sm:$0xf0] }
 0x21a   :  { %v5422_v46 = vpack.c.bf16 %v1639_v14, %v1635_v34  ;;  %v4711_v34 = vld [vmem:[#allocation4 + $0x2ec] sm:$0xf]  ;;  %v4230_v14 = vld [vmem:[#allocation4 + $0x2f8] sm:$0xf0] }
 0x21b   :  { %v4233_v37 = vor.u32 %v4711_v34, %v4230_v14  ;;  %2816 = vmatpush.bf16.msrb.mxu1 %v4025_v8  ;;  %2758 = vmatpush.bf16.msra.mxu3 %v4277_v27  ;;  %v4245_v34 = vor.u32 %v4717_v45, %v4244_v44  ;;  %v4687_v8 = vld [vmem:[#allocation4 + $0x22c] sm:$0xf]  ;;  %v4342_v27 = vld [vmem:[#allocation4 + $0x3d8] sm:$0xf0]  ;;  %v4297_v45 = vor.u32 %v4727_v40, %v4294_v0  ;;  %v4758_v0 = vld [vmem:[#allocation6 + $0x60] sm:$0xff] }
 0x21c   :  { %2544 = vmatmul.bf16.gmra.mxu3 %v5422_v46  ;;  %2631 = vmatmul.bf16.gmra.mxu2 %v5391_v57  ;;  %v5436_v36 = vpop.f32.mrf.mxu0  ;;  %v5438_v12 = vpop.f32.mrf.mxu1  ;;  %v4345_v56 = vor.u32 %v4739_v20, %v4342_v27 }
 0x21d   :  { %2840 = vmatpush.bf16.msrb.mxu2 %v4233_v37  ;;  %2788 = vmatpush.bf16.msrb.mxu0 %v3881_v25  ;;  %v4134_v37 = vld [vmem:[#allocation4 + $0x238] sm:$0xf0] }
 0x21e   :  { %v4137_v18 = vor.u32 %v4687_v8, %v4134_v37  ;;  %v4723_v8 = vld [vmem:[#allocation4 + $0x34c] sm:$0xf]  ;;  %v4278_v37 = vld [vmem:[#allocation4 + $0x358] sm:$0xf0] }
 0x21f   :  { %2817 = vmatpush.bf16.msrb.mxu1 %v4009_v41  ;;  %2759 = vmatpush.bf16.msra.mxu3 %v4261_v17  ;;  %v4358_v41 = vld [vmem:[#allocation4 + $0x3f8] sm:$0xf0]  ;;  %v4750_v17 = vld [vmem:[#allocation6 + $0x20] sm:$0xff]  ;;  %v4281_v26 = vor.u32 %v4723_v8, %v4278_v37 }
 0x221   :  { %2841 = vmatpush.bf16.msrb.mxu2 %v4217_v31  ;;  %2789 = vmatpush.bf16.msrb.mxu0 %v3865_v59  ;;  %v4361_v31 = vor.u32 %v4743_v15, %v4358_v41  ;;  %v4719_v41 = vld [vmem:[#allocation4 + $0x32c] sm:$0xf] }
 0x223   :  { %2818 = vmatpush.bf16.msrb.mxu1 %v3993_v51  ;;  %2760 = vmatpush.bf16.msra.mxu3 %v4245_v34  ;;  %v4329_v51 = vor.u32 %v4735_v30, %v4326_v2  ;;  %v4747_v34 = vld [vmem:[#allocation6 + $0x8] sm:$0xff]  ;;  %v4760_v30 = vld [vmem:[#allocation6 + $0x70] sm:$0xff] }
 0x224   :  { %v5444_v61 = vpop.f32.mrf.mxu0  ;;  %v5448_v42 = vpop.f32.mrf.mxu1  ;;  %v4715_v2 = vld [vmem:[#allocation4 + $0x30c] sm:$0xf] }
 0x225   :  { %2842 = vmatpush.bf16.msrb.mxu2 %v4201_v3  ;;  %3206 = vmatpush.bf16.msra.mxu0 %v4753_v11 }
 0x226   :  { %2679 = vmatmul.bf16.gmra.mxu0 %v5212_v33 }
 0x227   :  { %2708 = vmatmul.bf16.gmra.mxu1 %v5339_v16 }
 0x229   :  { %2843 = vmatpush.bf16.msrb.mxu2 %v4185_v13  ;;  %3207 = vmatpush.bf16.msra.mxu0 %v4752_v54  ;;  %v4310_v13 = vld [vmem:[#allocation4 + $0x398] sm:$0xf0] }
 0x22c   :  { %2645 = vmatmul.bf16.vlgmr.msrb.gmra.mxu3 %v5398_v38  ;;  %2732 = vmatmul.bf16.vlgmr.msra.gmra.mxu2 %v5348_v50  ;;  %v5452_v14 = vpop.f32.mrf.mxu0  ;;  %v5456_v25 = vpop.f32.mrf.mxu1 }
 0x22d   :  { %2844 = vmatpush.bf16.msrb.mxu2 %v4169_v35  ;;  %2869 = vmatpush.bf16.msrb.mxu3 %v4361_v31  ;;  %v4749_v35 = vld [vmem:[#allocation6 + $0x18] sm:$0xff] }
 0x22e   :  { %v4262_v31 = vld [vmem:[#allocation4 + $0x338] sm:$0xf0] }
 0x22f   :  { %v5434_v60 = vpop.f32.mrf.mxu2  ;;  %v4265_v27 = vor.u32 %v4719_v41, %v4262_v31 }
 0x231   :  { %2845 = vmatpush.bf16.msrb.mxu2 %v4153_v49  ;;  %2870 = vmatpush.bf16.msrb.mxu3 %v4345_v56  ;;  %v4748_v49 = vld [vmem:[#allocation6 + $0x10] sm:$0xff] }
 0x234   :  { %v5462_v1 = vpop.f32.mrf.mxu0  ;;  %v5464_v23 = vpop.f32.mrf.mxu1 }
 0x235   :  { %2846 = vmatpush.bf16.msrb.mxu2 %v4137_v18  ;;  %2871 = vmatpush.bf16.msrb.mxu3 %v4329_v51  ;;  %v4246_v51 = vld [vmem:[#allocation4 + $0x318] sm:$0xf0] }
 0x236   :  { %2684 = vmatmul.bf16.gmra.mxu0 %v5220_v58  ;;  %v4249_v54 = vor.u32 %v4715_v2, %v4246_v51  ;;  %v4754_v2 = vld [vmem:[#allocation6 + $0x40] sm:$0xff] }
 0x237   :  { %v5440_v62 = vpop.f32.mrf.mxu2  ;;  %2713 = vmatmul.bf16.gmra.mxu1 %v5358_v28 }
 0x239   :  { %2847 = vmatpush.bf16.msrb.mxu2 %v4121_v52 }
 0x23c   :  { %2650 = vmatmul.bf16.gmra.mxu3 %v5406_v22  ;;  %2737 = vmatmul.bf16.gmra.mxu2 %v5367_v55  ;;  %v5470_v59 = vpop.f32.mrf.mxu0  ;;  %v5474_v3 = vpop.f32.mrf.mxu1 }
 0x23f   :  { %v5450_v43 = vpop.f32.mrf.mxu2 }
 0x244   :  { %v5478_v39 = vpop.f32.mrf.mxu0  ;;  %v5482_v5 = vpop.f32.mrf.mxu1 }
 0x246   :  { %2689 = vmatmul.bf16.gmra.mxu0 %v5231_v19 }
 0x247   :  { %2718 = vmatmul.bf16.gmra.mxu1 %v5375_v29  ;;  %v5458_v6 = vpop.f32.mrf.mxu2 }
 0x24c   :  { %2655 = vmatmul.bf16.gmra.mxu3 %v5414_v4  ;;  %2742 = vmatmul.bf16.gmra.mxu2 %v5379_v48  ;;  %v5488_v44 = vpop.f32.mrf.mxu0 }
 0x24f   :  { %v5466_v53 = vpop.f32.mrf.mxu2 }
 0x254   :  { %v5494_v21 = vpop.f32.mrf.mxu0 }
 0x256   :  { %2790 = vmatmul.bf16.vlgmr.msrb.gmra.mxu0 %v5204_v32  ;;  %v4751_v32 = vld [vmem:[#allocation6 + $0x28] sm:$0xff] }
 0x257   :  { %2819 = vmatmul.bf16.vlgmr.msrb.gmra.mxu1 %v5320_v10  ;;  %v5476_v63 = vpop.f32.mrf.mxu2  ;;  %v4731_v10 = vld [vmem:[#allocation4 + $0x38c] sm:$0xf]  ;;  %3208 = vmatpush.bf16.msra.mxu0 %v4751_v32 }
 0x258   :  { %v4313_v7 = vor.u32 %v4731_v10, %v4310_v13 }
 0x25a   :  { %2872 = vmatpush.bf16.msrb.mxu3 %v4313_v7 }
 0x25b   :  { %3209 = vmatpush.bf16.msra.mxu0 %v4750_v17 }
 0x25c   :  { %2660 = vmatmul.bf16.gmra.mxu3 %v5422_v46  ;;  %2747 = vmatmul.bf16.gmra.mxu2 %v5391_v57  ;;  %v5509_v11 = vpop.f32.mrf.mxu0 }
 0x25e   :  { %2873 = vmatpush.bf16.msrb.mxu3 %v4297_v45 }
 0x25f   :  { %v5484_v9 = vpop.f32.mrf.mxu2  ;;  %3210 = vmatpush.bf16.msra.mxu0 %v4749_v35  ;;  %v4759_v35 = vld [vmem:[#allocation6 + $0x68] sm:$0xff] }
 0x262   :  { %2874 = vmatpush.bf16.msrb.mxu3 %v4281_v26 }
 0x263   :  { %3211 = vmatpush.bf16.msra.mxu0 %v4748_v49 }
 0x264   :  { %v5527_v49 = vpop.f32.mrf.mxu0 }
 0x266   :  { %2795 = vmatmul.bf16.gmra.mxu0 %v5212_v33  ;;  %2875 = vmatpush.bf16.msrb.mxu3 %v4265_v27 }
 0x267   :  { %2824 = vmatmul.bf16.gmra.mxu1 %v5339_v16  ;;  %v5490_v16 = vpop.f32.mrf.mxu1  ;;  %v5492_v18 = vpop.f32.mrf.mxu2  ;;  %3212 = vmatpush.bf16.msra.mxu0 %v4747_v34 }
 0x26a   :  { %2876 = vmatpush.bf16.msrb.mxu3 %v4249_v54 }
 0x26c   :  { %2761 = vmatmul.bf16.vlgmr.msra.gmra.mxu3 %v5398_v38  ;;  %2848 = vmatmul.bf16.vlgmr.msrb.gmra.mxu2 %v5348_v50  ;;  %v4746_v50 = vld [vmem:[#allocation6] sm:$0xff]  ;;  %v5538_v41 = vpop.f32.mrf.mxu0 }
 0x26d   :  { %3213 = vmatpush.bf16.msra.mxu0 %v4746_v50 }
 0x26f   :  { %v2530_v33 = vpop.f32.mrf.mxu3  ;;  %v5498_v15 = vpop.f32.mrf.mxu1 }
 0x270   :  { %v5502_v20 = vpop.f32.mrf.mxu2 }
 0x274   :  { %v5552_v54 = vpop.f32.mrf.mxu0 }
 0x276   :  { %2800 = vmatmul.bf16.gmra.mxu0 %v5220_v58  ;;  %v5507_v58 = vld [vmem:[%s5694_s6] sm:$0xf] }
 0x277   :  { %v2532_v52 = vpop.f32.mrf.mxu3  ;;  %2829 = vmatmul.bf16.gmra.mxu1 %v5358_v28  ;;  %v4761_v28 = vld [vmem:[#allocation6 + $0x78] sm:$0xff]  ;;  %v5516_v10 = vpop.f32.mrf.mxu1 }
 0x278   :  { %3235 = vmatpush.bf16.msra.mxu1 %v4761_v28  ;;  %v5520_v7 = vpop.f32.mrf.mxu2 }
 0x27c   :  { %2766 = vmatmul.bf16.gmra.mxu3 %v5406_v22  ;;  %2853 = vmatmul.bf16.gmra.mxu2 %v5367_v55  ;;  %v5512_v55 = vperm.slane %v5507_v58, 0 }
 0x27d   :  { %3236 = vmatpush.bf16.msra.mxu1 %v4760_v30 }
 0x27e   :  { %v2446_v32 = vadd.f32 %v5436_v36, %v5512_v55  ;;  %v2444_v13 = vadd.f32 %v5426_v47, %v5512_v55  ;;  %v2451_v50 = vadd.f32 %v5452_v14, %v5512_v55 }
 0x27f   :  { %v2535_v56 = vpop.f32.mrf.mxu3  ;;  %v5532_v8 = vpop.f32.mrf.mxu1 }
 0x280   :  { %v2475_v40 = vadd.f32 %v5438_v12, %v2446_v32  ;;  %v2473_v36 = vadd.f32 %v5430_v24, %v2444_v13  ;;  %v4757_v12 = vld [vmem:[#allocation6 + $0x58] sm:$0xff]  ;;  %v5534_v26 = vpop.f32.mrf.mxu2  ;;  %v4756_v24 = vld [vmem:[#allocation6 + $0x50] sm:$0xff]  ;;  %v2480_v31 = vadd.f32 %v5456_v25, %v2451_v50 }
 0x281   :  { %3237 = vmatpush.bf16.msra.mxu1 %v4759_v35 }
 0x282   :  { %v2504_v45 = vadd.f32 %v5440_v62, %v2475_v40  ;;  %v2502_v47 = vadd.f32 %v5434_v60, %v2473_v36  ;;  %v2449_v60 = vadd.f32 %v5444_v61, %v5512_v55  ;;  %v2509_v30 = vadd.f32 %v5458_v6, %v2480_v31  ;;  %v5563_v36 = vpop.f32.mrf.mxu0 }
 0x283   :  { %v2456_v6 = vadd.f32 %v5470_v59, %v5512_v55 }
 0x284   :  { %v2478_v28 = vadd.f32 %v5448_v42, %v2449_v60 }
 0x285   :  { %3238 = vmatpush.bf16.msra.mxu1 %v4758_v0 }
 0x286   :  { %2805 = vmatmul.bf16.gmra.mxu0 %v5231_v19  ;;  %v2533_v19 = vadd.f32 %v2532_v52, %v2504_v45  ;;  %v4755_v52 = vld [vmem:[#allocation6 + $0x48] sm:$0xff]  ;;  %v2507_v61 = vadd.f32 %v5450_v43, %v2478_v28 }
 0x287   :  { %v2537_v17 = vpop.f32.mrf.mxu3  ;;  %2834 = vmatmul.bf16.gmra.mxu1 %v5375_v29  ;;  %v2531_v29 = vadd.f32 %v2530_v33, %v2502_v47  ;;  %v5543_v27 = vpop.f32.mrf.mxu1 }
 0x288   :  { %v2902_v37 = vmax.f32 %v2533_v19, 0.0  ;;  %v5547_v14 = vpop.f32.mrf.mxu2  ;;  %v2538_v51 = vadd.f32 %v2537_v17, %v2509_v30  ;;  %v2536_v25 = vadd.f32 %v2535_v56, %v2507_v61  ;;  %v2485_v17 = vadd.f32 %v5474_v3, %v2456_v6 }
 0x289   :  { %3239 = vmatpush.bf16.msra.mxu1 %v4757_v12  ;;  %v2898_v62 = vmax.f32 %v2531_v29, 0.0  ;;  %v5566_v56 = vperm.slane %v5507_v58, 1 }
 0x28a   :  { %v2910_v13 = vmax.f32 %v2538_v51, 0.0  ;;  %v2906_v35 = vmax.f32 %v2536_v25, 0.0  ;;  %v2514_v47 = vadd.f32 %v5476_v63, %v2485_v17 }
 0x28b   :  { %v2565_v61 = vadd.f32 %v5527_v49, %v5566_v56  ;;  %v2567_v25 = vadd.f32 %v5538_v41, %v5566_v56 }
 0x28c   :  { %2771 = vmatmul.bf16.gmra.mxu3 %v5414_v4  ;;  %2858 = vmatmul.bf16.gmra.mxu2 %v5379_v48  ;;  %v2930_v48 = vpack.c.bf16 %v2902_v37, %v2898_v62  ;;  %v2934_v0 = vpack.c.bf16 %v2910_v13, %v2906_v35  ;;  %v5581_v62 = vpop.f32.mrf.mxu0 }
 0x28d   :  { %3240 = vmatpush.bf16.msra.mxu1 %v4756_v24  ;;  %v2562_v24 = vadd.f32 %v5509_v11, %v5566_v56  ;;  %v2459_v11 = vadd.f32 %v5478_v39, %v5512_v55 }
 0x28f   :  { %v2540_v34 = vpop.f32.mrf.mxu3  ;;  %v5554_v42 = vpop.f32.mrf.mxu1 }
 0x290   :  { %v5558_v40 = vpop.f32.mrf.mxu2 }
 0x291   :  { %3241 = vmatpush.bf16.msra.mxu1 %v4755_v52 }
 0x295   :  { %3242 = vmatpush.bf16.msra.mxu1 %v4754_v2 }
 0x296   :  { %3214 = vmatmul.bf16.vlgmr.msra.gmra.mxu0 %v2930_v48 }
 0x297   :  { %v2542_v33 = vpop.f32.mrf.mxu3  ;;  %v5574_v29 = vpop.f32.mrf.mxu1 }
 0x298   :  { %v2543_v19 = vadd.f32 %v2542_v33, %v2514_v47  ;;  %v5576_v12 = vpop.f32.mrf.mxu2 }
 0x29c   :  { %2776 = vmatmul.bf16.gmra.mxu3 %v5422_v46  ;;  %2863 = vmatmul.bf16.gmra.mxu2 %v5391_v57  ;;  %v2454_v57 = vadd.f32 %v5462_v1, %v5512_v55  ;;  %v2560_v1 = vadd.f32 %v5494_v21, %v5566_v56  ;;  %v2461_v21 = vadd.f32 %v5488_v44, %v5512_v55  ;;  %v5599_v55 = vpop.f32.mrf.mxu0 }
 0x29d   :  { %v2488_v44 = vadd.f32 %v5482_v5, %v2459_v11  ;;  %v4769_v5 = vld [vmem:[#allocation6 + $0xb8] sm:$0xff]  ;;  %v4763_v11 = vld [vmem:[#allocation6 + $0x88] sm:$0xff] }
 0x29e   :  { %v2483_v45 = vadd.f32 %v5464_v23, %v2454_v57  ;;  %v2918_v23 = vmax.f32 %v2543_v19, 0.0  ;;  %v2589_v63 = vadd.f32 %v5498_v15, %v2560_v1  ;;  %v2490_v31 = vadd.f32 %v5490_v16, %v2461_v21  ;;  %3264 = vmatpush.bf16.msra.mxu2 %v4769_v5  ;;  %v4766_v19 = vld [vmem:[#allocation6 + $0xa0] sm:$0xff] }
 0x29f   :  { %v2545_v32 = vpop.f32.mrf.mxu3  ;;  %v5590_v15 = vpop.f32.mrf.mxu1  ;;  %v2517_v39 = vadd.f32 %v5484_v9, %v2488_v44 }
 0x2a0   :  { %v2512_v59 = vadd.f32 %v5466_v53, %v2483_v45  ;;  %v2591_v53 = vadd.f32 %v5516_v10, %v2562_v24  ;;  %v2618_v50 = vadd.f32 %v5502_v20, %v2589_v63  ;;  %v5593_v10 = vpop.f32.mrf.mxu2  ;;  %v2519_v30 = vadd.f32 %v5492_v18, %v2490_v31  ;;  %v4765_v24 = vld [vmem:[#allocation6 + $0x98] sm:$0xff]  ;;  %v4762_v31 = vld [vmem:[#allocation6 + $0x80] sm:$0xff] }
 0x2a1   :  { %v2546_v16 = vadd.f32 %v2545_v32, %v2517_v39  ;;  %v2594_v18 = vadd.f32 %v5532_v8, %v2565_v61  ;;  %v4767_v8 = vld [vmem:[#allocation6 + $0xa8] sm:$0xff] }
 0x2a2   :  { %v2541_v3 = vadd.f32 %v2540_v34, %v2512_v59  ;;  %v2620_v48 = vadd.f32 %v5520_v7, %v2591_v53 }
 0x2a3   :  { %v2922_v9 = vmax.f32 %v2546_v16, 0.0  ;;  %v2623_v57 = vadd.f32 %v5534_v26, %v2594_v18 }
 0x2a4   :  { %v5609_v17 = vpop.f32.mrf.mxu0 }
 0x2a6   :  { %3219 = vmatmul.bf16.gmra.mxu0 %v2934_v0  ;;  %v2596_v0 = vadd.f32 %v5543_v27, %v2567_v25  ;;  %v5630_v25 = vperm.slane %v5507_v58, 2 }
 0x2a7   :  { %v2547_v43 = vpop.f32.mrf.mxu3  ;;  %v2605_v35 = vpop.f32.mrf.mxu1 }
 0x2a8   :  { %v2548_v2 = vadd.f32 %v2547_v43, %v2519_v30  ;;  %v2634_v6 = vpop.f32.mrf.mxu2  ;;  %v2625_v32 = vadd.f32 %v5547_v14, %v2596_v0  ;;  %v2570_v14 = vadd.f32 %v5552_v54, %v5566_v56 }
 0x2aa   :  { %v2926_v13 = vmax.f32 %v2548_v2, 0.0  ;;  %v2599_v63 = vadd.f32 %v5554_v42, %v2570_v14 }
 0x2ac   :  { %2877 = vmatmul.bf16.vlgmr.msrb.gmra.mxu3 %v5398_v38  ;;  %v2914_v38 = vmax.f32 %v2541_v3, 0.0  ;;  %v2942_v49 = vpack.c.bf16 %v2926_v13, %v2922_v9 }
 0x2ae   :  { %v2938_v34 = vpack.c.bf16 %v2918_v23, %v2914_v38  ;;  %v2677_v23 = vpop.f32.mrf.mxu0  ;;  %v4764_v38 = vld [vmem:[#allocation6 + $0x90] sm:$0xff] }
 0x2af   :  { %v2646_v37 = vpop.f32.mrf.mxu3  ;;  %v5611_v1 = vpop.f32.mrf.mxu1  ;;  %v2678_v9 = vadd.f32 %v2677_v23, %v5630_v25 }
 0x2b0   :  { %v2647_v60 = vadd.f32 %v2646_v37, %v2618_v50  ;;  %v2733_v27 = vpop.f32.mrf.mxu2  ;;  %v2572_v37 = vadd.f32 %v5563_v36, %v5566_v56 }
 0x2b2   :  { %v2899_v20 = vmax.f32 %v2647_v60, 0.0  ;;  %v2601_v53 = vadd.f32 %v5574_v29, %v2572_v37  ;;  %v4773_v37 = vld [vmem:[#allocation6 + $0xd8] sm:$0xff] }
 0x2b4   :  { %v2630_v50 = vadd.f32 %v5576_v12, %v2601_v53  ;;  %v4777_v12 = vld [vmem:[#allocation6 + $0xf8] sm:$0xff] }
 0x2b5   :  { %3293 = vmatpush.bf16.msra.mxu3 %v4777_v12 }
 0x2b6   :  { %3224 = vmatmul.bf16.gmra.mxu0 %v2938_v34 }
 0x2b7   :  { %v2648_v33 = vpop.f32.mrf.mxu3  ;;  %v2706_v21 = vpop.f32.mrf.mxu1 }
 0x2b8   :  { %v2649_v52 = vadd.f32 %v2648_v33, %v2620_v48  ;;  %v2735_v34 = vpop.f32.mrf.mxu2  ;;  %v2707_v0 = vadd.f32 %v2706_v21, %v2678_v9 }
 0x2ba   :  { %v2903_v28 = vmax.f32 %v2649_v52, 0.0  ;;  %v2680_v52 = vpop.f32.mrf.mxu0 }
 0x2bb   :  { %v2681_v14 = vadd.f32 %v2680_v52, %v5630_v25 }
 0x2bc   :  { %v2931_v7 = vpack.c.bf16 %v2903_v28, %v2899_v20  ;;  %2882 = vmatmul.bf16.gmra.mxu3 %v5406_v22  ;;  %v4768_v22 = vld [vmem:[#allocation6 + $0xb0] sm:$0xff]  ;;  %v2577_v20 = vadd.f32 %v5599_v55, %v5566_v56 }
 0x2bd   :  { %3265 = vmatpush.bf16.msra.mxu2 %v4768_v22  ;;  %v4775_v22 = vld [vmem:[#allocation6 + $0xe8] sm:$0xff] }
 0x2be   :  { %3243 = vmatmul.bf16.vlgmr.msra.gmra.mxu1 %v2931_v7  ;;  %v2606_v7 = vadd.f32 %v2605_v35, %v2577_v20 }
 0x2bf   :  { %v2651_v51 = vpop.f32.mrf.mxu3  ;;  %v2709_v28 = vpop.f32.mrf.mxu1 }
 0x2c0   :  { %v2652_v43 = vadd.f32 %v2651_v51, %v2623_v57  ;;  %v2738_v44 = vpop.f32.mrf.mxu2  ;;  %v2635_v2 = vadd.f32 %v2634_v6, %v2606_v7  ;;  %v2710_v23 = vadd.f32 %v2709_v28, %v2681_v14  ;;  %v4770_v7 = vld [vmem:[#allocation6 + $0xc0] sm:$0xff] }
 0x2c1   :  { %3266 = vmatpush.bf16.msra.mxu2 %v4767_v8 }
 0x2c2   :  { %v2907_v47 = vmax.f32 %v2652_v43, 0.0  ;;  %v2682_v39 = vpop.f32.mrf.mxu0  ;;  %v4774_v43 = vld [vmem:[#allocation6 + $0xe0] sm:$0xff]  ;;  %v2739_v53 = vadd.f32 %v2738_v44, %v2710_v23 }
 0x2c5   :  { %3267 = vmatpush.bf16.msra.mxu2 %v4766_v19 }
 0x2c6   :  { %3229 = vmatmul.bf16.gmra.mxu0 %v2942_v49 }
 0x2c7   :  { %v2653_v41 = vpop.f32.mrf.mxu3  ;;  %v2711_v5 = vpop.f32.mrf.mxu1 }
 0x2c8   :  { %v2654_v45 = vadd.f32 %v2653_v41, %v2625_v32  ;;  %v2740_v13 = vpop.f32.mrf.mxu2  ;;  %v2736_v41 = vadd.f32 %v2735_v34, %v2707_v0 }
 0x2c9   :  { %3268 = vmatpush.bf16.msra.mxu2 %v4765_v24 }
 0x2ca   :  { %v2911_v59 = vmax.f32 %v2654_v45, 0.0 }
 0x2cc   :  { %2887 = vmatmul.bf16.gmra.mxu3 %v5414_v4  ;;  %v2935_v26 = vpack.c.bf16 %v2911_v59, %v2907_v47  ;;  %v2628_v4 = vadd.f32 %v5558_v40, %v2599_v63  ;;  %v2575_v40 = vadd.f32 %v5581_v62, %v5566_v56  ;;  %v4776_v62 = vld [vmem:[#allocation6 + $0xf0] sm:$0xff] }
 0x2cd   :  { %3269 = vmatpush.bf16.msra.mxu2 %v4764_v38  ;;  %3294 = vmatpush.bf16.msra.mxu3 %v4776_v62 }
 0x2ce   :  { %3248 = vmatmul.bf16.gmra.mxu1 %v2935_v26  ;;  %v2604_v30 = vadd.f32 %v5590_v15, %v2575_v40  ;;  %v2676_v15 = vadd.f32 %v5609_v17, %v5630_v25 }
 0x2cf   :  { %v2656_v3 = vpop.f32.mrf.mxu3  ;;  %v2714_v49 = vpop.f32.mrf.mxu1 }
 0x2d0   :  { %v2657_v54 = vadd.f32 %v2656_v3, %v2628_v4  ;;  %v2705_v6 = vadd.f32 %v5611_v1, %v2676_v15  ;;  %v2743_v32 = vpop.f32.mrf.mxu2  ;;  %v4772_v4 = vld [vmem:[#allocation6 + $0xd0] sm:$0xff] }
 0x2d1   :  { %3270 = vmatpush.bf16.msra.mxu2 %v4763_v11  ;;  %3295 = vmatpush.bf16.msra.mxu3 %v4775_v22 }
 0x2d2   :  { %v2915_v36 = vmax.f32 %v2657_v54, 0.0  ;;  %v2734_v57 = vadd.f32 %v2733_v27, %v2705_v6  ;;  %v2683_v27 = vadd.f32 %v2682_v39, %v5630_v25 }
 0x2d4   :  { %v2712_v38 = vadd.f32 %v2711_v5, %v2683_v27 }
 0x2d5   :  { %3271 = vmatpush.bf16.msra.mxu2 %v4762_v31  ;;  %3296 = vmatpush.bf16.msra.mxu3 %v4774_v43  ;;  %v4771_v31 = vld [vmem:[#allocation6 + $0xc8] sm:$0xff] }
 0x2d7   :  { %v2658_v48 = vpop.f32.mrf.mxu3  ;;  %v2716_v3 = vpop.f32.mrf.mxu1 }
 0x2d8   :  { %v2659_v60 = vadd.f32 %v2658_v48, %v2630_v50  ;;  %v2745_v1 = vpop.f32.mrf.mxu2  ;;  %v2741_v50 = vadd.f32 %v2740_v13, %v2712_v38 }
 0x2d9   :  { %3297 = vmatpush.bf16.msra.mxu3 %v4773_v37 }
 0x2da   :  { %v2919_v33 = vmax.f32 %v2659_v60, 0.0 }
 0x2dc   :  { %2892 = vmatmul.bf16.gmra.mxu3 %v5422_v46  ;;  %v2939_v42 = vpack.c.bf16 %v2919_v33, %v2915_v36  ;;  %v2633_v46 = vadd.f32 %v5593_v10, %v2604_v30  ;;  %v2685_v10 = vpop.f32.mrf.mxu0 }
 0x2dd   :  { %3298 = vmatpush.bf16.msra.mxu3 %v4772_v4 }
 0x2de   :  { %3253 = vmatmul.bf16.gmra.mxu1 %v2939_v42  ;;  %v2686_v42 = vadd.f32 %v2685_v10, %v5630_v25 }
 0x2df   :  { %v2661_v29 = vpop.f32.mrf.mxu3  ;;  %v2719_v34 = vpop.f32.mrf.mxu1 }
 0x2e0   :  { %v2662_v61 = vadd.f32 %v2661_v29, %v2633_v46  ;;  %v2748_v60 = vpop.f32.mrf.mxu2  ;;  %v2715_v12 = vadd.f32 %v2714_v49, %v2686_v42 }
 0x2e1   :  { %3299 = vmatpush.bf16.msra.mxu3 %v4771_v31 }
 0x2e2   :  { %v2923_v56 = vmax.f32 %v2662_v61, 0.0  ;;  %v2744_v30 = vadd.f32 %v2743_v32, %v2715_v12 }
 0x2e4   :  { %v2687_v17 = vpop.f32.mrf.mxu0 }
 0x2e5   :  { %v2688_v29 = vadd.f32 %v2687_v17, %v5630_v25  ;;  %3300 = vmatpush.bf16.msra.mxu3 %v4770_v7 }
 0x2e7   :  { %v2663_v16 = vpop.f32.mrf.mxu3  ;;  %v2721_v20 = vpop.f32.mrf.mxu1  ;;  %v2717_v44 = vadd.f32 %v2716_v3, %v2688_v29 }
 0x2e8   :  { %v2664_v51 = vadd.f32 %v2663_v16, %v2635_v2  ;;  %v2750_v28 = vpop.f32.mrf.mxu2 }
 0x2e9   :  { %v2746_v46 = vadd.f32 %v2745_v1, %v2717_v44 }
 0x2ea   :  { %v2927_v55 = vmax.f32 %v2664_v51, 0.0 }
 0x2ec   :  { %v2943_v18 = vpack.c.bf16 %v2927_v55, %v2923_v56  ;;  %v2690_v63 = vpop.f32.mrf.mxu0 }
 0x2ed   :  { %v2691_v13 = vadd.f32 %v2690_v63, %v5630_v25 }
 0x2ee   :  { %3258 = vmatmul.bf16.gmra.mxu1 %v2943_v18 }
 0x2ef   :  { %v2762_v35 = vpop.f32.mrf.mxu3  ;;  %v2820_v5 = vpop.f32.mrf.mxu1 }
 0x2f0   :  { %v2763_v45 = vadd.f32 %v2762_v35, %v2734_v57  ;;  %v2849_v55 = vpop.f32.mrf.mxu2  ;;  %v2720_v35 = vadd.f32 %v2719_v34, %v2691_v13 }
 0x2f2   :  { %v2900_v59 = vmax.f32 %v2763_v45, 0.0  ;;  %v2749_v9 = vadd.f32 %v2748_v60, %v2720_v35 }
 0x2f4   :  { %v2692_v52 = vpop.f32.mrf.mxu0 }
 0x2f5   :  { %v2693_v15 = vadd.f32 %v2692_v52, %v5630_v25 }
 0x2f7   :  { %v2764_v8 = vpop.f32.mrf.mxu3  ;;  %v2722_v22 = vadd.f32 %v2721_v20, %v2693_v15  ;;  %v2822_v6 = vpop.f32.mrf.mxu1 }
 0x2f8   :  { %v2765_v47 = vadd.f32 %v2764_v8, %v2736_v41  ;;  %v2851_v49 = vpop.f32.mrf.mxu2  ;;  %v5643_v41 = vperm.slane %v5507_v58, 3 }
 0x2f9   :  { %v2751_v0 = vadd.f32 %v2750_v28, %v2722_v22 }
 0x2fa   :  { %v2904_v19 = vmax.f32 %v2765_v47, 0.0 }
 0x2fc   :  { %v2932_v26 = vpack.c.bf16 %v2904_v19, %v2900_v59  ;;  %v2791_v2 = vpop.f32.mrf.mxu0 }
 0x2fd   :  { %v2792_v59 = vadd.f32 %v2791_v2, %v5643_v41 }
 0x2fe   :  { %3272 = vmatmul.bf16.vlgmr.msra.gmra.mxu2 %v2932_v26 }
 0x2ff   :  { %v2767_v24 = vpop.f32.mrf.mxu3  ;;  %v2825_v26 = vpop.f32.mrf.mxu1  ;;  %v2821_v3 = vadd.f32 %v2820_v5, %v2792_v59 }
 0x300   :  { %v2768_v21 = vadd.f32 %v2767_v24, %v2739_v53  ;;  %v2854_v14 = vpop.f32.mrf.mxu2 }
 0x301   :  { %v2850_v1 = vadd.f32 %v2849_v55, %v2821_v3 }
 0x302   :  { %v2908_v11 = vmax.f32 %v2768_v21, 0.0 }
 0x304   :  { %v2793_v10 = vpop.f32.mrf.mxu0 }
 0x305   :  { %v2794_v19 = vadd.f32 %v2793_v10, %v5643_v41 }
 0x307   :  { %v2769_v54 = vpop.f32.mrf.mxu3  ;;  %v2823_v37 = vadd.f32 %v2822_v6, %v2794_v19  ;;  %v2827_v38 = vpop.f32.mrf.mxu1 }
 0x308   :  { %v2770_v48 = vadd.f32 %v2769_v54, %v2741_v50  ;;  %v2856_v50 = vpop.f32.mrf.mxu2 }
 0x309   :  { %v2852_v27 = vadd.f32 %v2851_v49, %v2823_v37 }
 0x30a   :  { %v2912_v36 = vmax.f32 %v2770_v48, 0.0 }
 0x30c   :  { %v2936_v33 = vpack.c.bf16 %v2912_v36, %v2908_v11  ;;  %v2796_v47 = vpop.f32.mrf.mxu0 }
 0x30d   :  { %v2797_v54 = vadd.f32 %v2796_v47, %v5643_v41 }
 0x30e   :  { %3277 = vmatmul.bf16.gmra.mxu2 %v2936_v33 }
 0x30f   :  { %v2772_v40 = vpop.f32.mrf.mxu3  ;;  %v2826_v11 = vadd.f32 %v2825_v26, %v2797_v54  ;;  %v2830_v33 = vpop.f32.mrf.mxu1 }
 0x310   :  { %v2773_v39 = vadd.f32 %v2772_v40, %v2744_v30  ;;  %v2859_v42 = vpop.f32.mrf.mxu2 }
 0x311   :  { %v2855_v52 = vadd.f32 %v2854_v14, %v2826_v11 }
 0x312   :  { %v2916_v62 = vmax.f32 %v2773_v39, 0.0 }
 0x314   :  { %v2798_v24 = vpop.f32.mrf.mxu0 }
 0x315   :  { %v2799_v60 = vadd.f32 %v2798_v24, %v5643_v41 }
 0x317   :  { %v2774_v61 = vpop.f32.mrf.mxu3  ;;  %v2828_v36 = vadd.f32 %v2827_v38, %v2799_v60 }
 0x318   :  { %v2775_v16 = vadd.f32 %v2774_v61, %v2746_v46  ;;  %v2832_v46 = vpop.f32.mrf.mxu1  ;;  %v2861_v39 = vpop.f32.mrf.mxu2 }
 0x319   :  { %v2857_v31 = vadd.f32 %v2856_v50, %v2828_v36 }
 0x31a   :  { %v2920_v51 = vmax.f32 %v2775_v16, 0.0 }
 0x31c   :  { %v2940_v56 = vpack.c.bf16 %v2920_v51, %v2916_v62  ;;  %v2801_v34 = vpop.f32.mrf.mxu0 }
 0x31d   :  { %v2802_v7 = vadd.f32 %v2801_v34, %v5643_v41 }
 0x31e   :  { %3282 = vmatmul.bf16.gmra.mxu2 %v2940_v56 }
 0x31f   :  { %v2777_v18 = vpop.f32.mrf.mxu3  ;;  %v2831_v16 = vadd.f32 %v2830_v33, %v2802_v7 }
 0x320   :  { %v2778_v57 = vadd.f32 %v2777_v18, %v2749_v9  ;;  %v2835_v15 = vpop.f32.mrf.mxu1  ;;  %v2864_v10 = vpop.f32.mrf.mxu2 }
 0x321   :  { %v2860_v5 = vadd.f32 %v2859_v42, %v2831_v16 }
 0x322   :  { %v2924_v45 = vmax.f32 %v2778_v57, 0.0 }
 0x324   :  { %v2803_v20 = vpop.f32.mrf.mxu0 }
 0x325   :  { %v2804_v61 = vadd.f32 %v2803_v20, %v5643_v41 }
 0x327   :  { %v2779_v32 = vpop.f32.mrf.mxu3  ;;  %v2833_v51 = vadd.f32 %v2832_v46, %v2804_v61 }
 0x328   :  { %v2780_v43 = vadd.f32 %v2779_v32, %v2751_v0 }
 0x329   :  { %v2862_v56 = vadd.f32 %v2861_v39, %v2833_v51 }
 0x32a   :  { %v2928_v8 = vmax.f32 %v2780_v43, 0.0  ;;  %v2837_v43 = vpop.f32.mrf.mxu1 }
 0x32c   :  { %v2944_v17 = vpack.c.bf16 %v2928_v8, %v2924_v45  ;;  %v2806_v62 = vpop.f32.mrf.mxu0  ;;  %v2866_v45 = vpop.f32.mrf.mxu2 }
 0x32d   :  { %v2807_v0 = vadd.f32 %v2806_v62, %v5643_v41 }
 0x32e   :  { %3287 = vmatmul.bf16.gmra.mxu2 %v2944_v17 }
 0x32f   :  { %v2878_v25 = vpop.f32.mrf.mxu3  ;;  %v2836_v32 = vadd.f32 %v2835_v15, %v2807_v0 }
 0x330   :  { %v2879_v23 = vadd.f32 %v2878_v25, %v2850_v1 }
 0x331   :  { %v2865_v47 = vadd.f32 %v2864_v10, %v2836_v32 }
 0x332   :  { %v2901_v53 = vmax.f32 %v2879_v23, 0.0 }
 0x334   :  { %v2808_v6 = vpop.f32.mrf.mxu0 }
 0x335   :  { %v2809_v49 = vadd.f32 %v2808_v6, %v5643_v41  ;;  %v4795_v41 = vld [vmem:[%s5696_s8] ss:$0 sm:$0xff] }
 0x337   :  { %v2880_v58 = vpop.f32.mrf.mxu3  ;;  %v2838_v8 = vadd.f32 %v2837_v43, %v2809_v49 }
 0x338   :  { %v2881_v63 = vadd.f32 %v2880_v58, %v2852_v27 }
 0x339   :  { %v2867_v17 = vadd.f32 %v2866_v45, %v2838_v8 }
 0x33a   :  { %v2905_v4 = vmax.f32 %v2881_v63, 0.0 }
 0x33b   :  { %v3244_v1 = vpop.f32.mrf.mxu1 }
 0x33c   :  { %v2933_v21 = vpack.c.bf16 %v2905_v4, %v2901_v53  ;;  %v3215_v37 = vpop.f32.mrf.mxu0 }
 0x33d   :  { %v3216_v63 = vadd.f32 %v4795_v41, %v3215_v37 }
 0x33e   :  { %3301 = vmatmul.bf16.vlgmr.msra.gmra.mxu3 %v2933_v21 }
 0x33f   :  { %v2883_v48 = vpop.f32.mrf.mxu3  ;;  %v3245_v38 = vadd.f32 %v3244_v1, %v3216_v63 }
 0x340   :  { %v2884_v40 = vadd.f32 %v2883_v48, %v2855_v52 }
 0x342   :  { %v2909_v28 = vmax.f32 %v2884_v40, 0.0 }
 0x343   :  { %v3246_v23 = vpop.f32.mrf.mxu1 }
 0x344   :  { %v3217_v27 = vpop.f32.mrf.mxu0 }
 0x345   :  { %v3218_v48 = vadd.f32 %v4795_v41, %v3217_v27 }
 0x347   :  { %v2885_v29 = vpop.f32.mrf.mxu3  ;;  %v3247_v60 = vadd.f32 %v3246_v23, %v3218_v48 }
 0x348   :  { %v2886_v12 = vadd.f32 %v2885_v29, %v2857_v31 }
 0x34a   :  { %v2913_v44 = vmax.f32 %v2886_v12, 0.0 }
 0x34b   :  { %v3249_v50 = vpop.f32.mrf.mxu1 }
 0x34c   :  { %v2937_v30 = vpack.c.bf16 %v2913_v44, %v2909_v28  ;;  %v3220_v53 = vpop.f32.mrf.mxu0 }
 0x34d   :  { %v3221_v31 = vadd.f32 %v4795_v41, %v3220_v53 }
 0x34e   :  { %3306 = vmatmul.bf16.gmra.mxu3 %v2937_v30 }
 0x34f   :  { %v2888_v2 = vpop.f32.mrf.mxu3  ;;  %v3250_v29 = vadd.f32 %v3249_v50, %v3221_v31 }
 0x350   :  { %v2889_v55 = vadd.f32 %v2888_v2, %v2860_v5 }
 0x352   :  { %v2917_v35 = vmax.f32 %v2889_v55, 0.0 }
 0x353   :  { %v3251_v42 = vpop.f32.mrf.mxu1 }
 0x354   :  { %v3222_v36 = vpop.f32.mrf.mxu0 }
 0x355   :  { %v3223_v30 = vadd.f32 %v4795_v41, %v3222_v36 }
 0x357   :  { %v2890_v13 = vpop.f32.mrf.mxu3  ;;  %v3252_v46 = vadd.f32 %v3251_v42, %v3223_v30 }
 0x358   :  { %v2891_v18 = vadd.f32 %v2890_v13, %v2862_v56 }
 0x35a   :  { %v2921_v22 = vmax.f32 %v2891_v18, 0.0 }
 0x35b   :  { %v3254_v7 = vpop.f32.mrf.mxu1 }
 0x35c   :  { %v2941_v9 = vpack.c.bf16 %v2921_v22, %v2917_v35  ;;  %v3225_v44 = vpop.f32.mrf.mxu0 }
 0x35d   :  { %v3226_v62 = vadd.f32 %v4795_v41, %v3225_v44 }
 0x35e   :  { %3311 = vmatmul.bf16.gmra.mxu3 %v2941_v9 }
 0x35f   :  { %v2893_v57 = vpop.f32.mrf.mxu3  ;;  %v3255_v5 = vadd.f32 %v3254_v7, %v3226_v62 }
 0x360   :  { %v2894_v59 = vadd.f32 %v2893_v57, %v2865_v47 }
 0x362   :  { %v2925_v26 = vmax.f32 %v2894_v59, 0.0 }
 0x363   :  { %v3256_v56 = vpop.f32.mrf.mxu1 }
 0x364   :  { %v3227_v51 = vpop.f32.mrf.mxu0 }
 0x365   :  { %v3228_v10 = vadd.f32 %v4795_v41, %v3227_v51 }
 0x367   :  { %v2895_v25 = vpop.f32.mrf.mxu3  ;;  %v3257_v35 = vadd.f32 %v3256_v56, %v3228_v10 }
 0x368   :  { %v2896_v19 = vadd.f32 %v2895_v25, %v2867_v17 }
 0x36a   :  { %v2929_v14 = vmax.f32 %v2896_v19, 0.0 }
 0x36b   :  { %v3259_v6 = vpop.f32.mrf.mxu1 }
 0x36c   :  { %v2945_v3 = vpack.c.bf16 %v2929_v14, %v2925_v26  ;;  %v3230_v22 = vpop.f32.mrf.mxu0 }
 0x36d   :  { %v3231_v32 = vadd.f32 %v4795_v41, %v3230_v22 }
 0x36e   :  { %3316 = vmatmul.bf16.gmra.mxu3 %v2945_v3 }
 0x36f   :  { %v3260_v43 = vadd.f32 %v3259_v6, %v3231_v32 }
 0x373   :  { %v3261_v59 = vpop.f32.mrf.mxu1 }
 0x374   :  { %v3232_v8 = vpop.f32.mrf.mxu0 }
 0x375   :  { %v3233_v25 = vadd.f32 %v4795_v41, %v3232_v8 }
 0x377   :  { %v3262_v26 = vadd.f32 %v3261_v59, %v3233_v25 }
 0x381   :  { %v3273_v24 = vpop.f32.mrf.mxu2 }
 0x382   :  { %v3274_v4 = vadd.f32 %v3273_v24, %v3245_v38 }
 0x389   :  { %v3275_v58 = vpop.f32.mrf.mxu2 }
 0x38a   :  { %v3276_v11 = vadd.f32 %v3275_v58, %v3247_v60 }
 0x391   :  { %v3278_v34 = vpop.f32.mrf.mxu2 }
 0x392   :  { %v3279_v12 = vadd.f32 %v3278_v34, %v3250_v29 }
 0x399   :  { %v3280_v40 = vpop.f32.mrf.mxu2 }
 0x39a   :  { %v3281_v2 = vadd.f32 %v3280_v40, %v3252_v46 }
 0x3a1   :  { %v3283_v39 = vpop.f32.mrf.mxu2 }
 0x3a2   :  { %v3284_v55 = vadd.f32 %v3283_v39, %v3255_v5 }
 0x3a9   :  { %v3285_v13 = vpop.f32.mrf.mxu2 }
 0x3aa   :  { %v3286_v9 = vadd.f32 %v3285_v13, %v3257_v35 }
 0x3b1   :  { %v3288_v49 = vpop.f32.mrf.mxu2 }
 0x3b2   :  { %v3289_v45 = vadd.f32 %v3288_v49, %v3260_v43 }
 0x3b9   :  { %v3290_v19 = vpop.f32.mrf.mxu2 }
 0x3ba   :  { %v3291_v14 = vadd.f32 %v3290_v19, %v3262_v26 }
 0x3c1   :  { %v3302_v21 = vpop.f32.mrf.mxu3 }
 0x3c2   :  { %v3303_v54 = vadd.f32 %v3302_v21, %v3274_v4 }
 0x3c4   :  { %3323 = vst.msk [vmem:[%s5697_s9] sm:$0xff] %vm3322_vm0, %v3303_v54 }
 0x3c9   :  { %v3304_v33 = vpop.f32.mrf.mxu3 }
 0x3ca   :  { %v3305_v52 = vadd.f32 %v3304_v33, %v3276_v11 }
 0x3cc   :  { %3324 = vst.msk [vmem:[%s5697_s9 + $0x8] sm:$0xff] %vm3322_vm0, %v3305_v52 }
 0x3d1   :  { %v3307_v20 = vpop.f32.mrf.mxu3 }
 0x3d2   :  { %v3308_v28 = vadd.f32 %v3307_v20, %v3279_v12 }
 0x3d4   :  { %3325 = vst.msk [vmem:[%s5697_s9 + $0x10] sm:$0xff] %vm3322_vm0, %v3308_v28 }
 0x3d9   :  { %v3309_v61 = vpop.f32.mrf.mxu3 }
 0x3da   :  { %v3310_v16 = vadd.f32 %v3309_v61, %v3281_v2 }
 0x3dc   :  { %3326 = vst.msk [vmem:[%s5697_s9 + $0x18] sm:$0xff] %vm3322_vm0, %v3310_v16 }
 0x3e1   :  { %v3312_v18 = vpop.f32.mrf.mxu3 }
 0x3e2   :  { %v3313_v15 = vadd.f32 %v3312_v18, %v3284_v55 }
 0x3e4   :  { %3327 = vst.msk [vmem:[%s5697_s9 + $0x20] sm:$0xff] %vm3322_vm0, %v3313_v15 }
 0x3e9   :  { %v3314_v0 = vpop.f32.mrf.mxu3 }
 0x3ea   :  { %v3315_v57 = vadd.f32 %v3314_v0, %v3286_v9 }
 0x3ec   :  { %3328 = vst.msk [vmem:[%s5697_s9 + $0x28] sm:$0xff] %vm3322_vm0, %v3315_v57 }
 0x3f1   :  { %v3317_v47 = vpop.f32.mrf.mxu3 }
 0x3f2   :  { %v3318_v17 = vadd.f32 %v3317_v47, %v3289_v45 }
 0x3f4   :  { %3329 = vst.msk [vmem:[%s5697_s9 + $0x30] sm:$0xff] %vm3322_vm0, %v3318_v17 }
 0x3f9   :  { %v3319_v3 = vpop.f32.mrf.mxu3 }
 0x3fa   :  { %v3320_v37 = vadd.f32 %v3319_v3, %v3291_v14 }
 0x3fc   :  { %3330 = vst.msk [vmem:[%s5697_s9 + $0x38] sm:$0xff] %vm3322_vm0, %v3320_v37 }
 0x3fd   :  { %3335 = vsyncpa [#allocation3], 1 }
 0x3fe   :  { %3336 = vsyncpa [#allocation5], 1 }

</bundles_post_ra>
